<compile_context>
chip_gen: v7x
topology: tpu7x:2x2x1
jax: 0.10.0
libtpu: 0.0.40
codegen_flags: <defaults>
</compile_context>

<pallas_src>
import math
import functools

import jax
import jax.numpy as jnp
from jax import lax
from jax.experimental import pallas as pl
from jax.experimental.pallas import tpu as pltpu

# ----------------------------- configuration ------------------------------
LIFTING_DIM   = 32          # D
NUM_HEADS     = 4
DH            = LIFTING_DIM // NUM_HEADS
NUM_LAYERS    = 2
NUM_TIMESTEPS = 4           # T (> 1)
B             = 2
N             = 8           # nodes per graph
LN_EPS        = 1e-5        # torch.nn.LayerNorm default
ATTN_SCALE    = 1.0 / math.sqrt(DH)


# --------------------------- in-kernel helpers -----------------------------
def _sigmoid(z):
    # 1 / (1 + exp(-z)); reciprocal goes to the EUP slot.
    return pl.reciprocal(1.0 + jnp.exp(-z), approx=True)


def _silu(z):
    return z * _sigmoid(z)


def _layernorm(x, g, b):
    mu = jnp.mean(x, axis=-1, keepdims=True)
    xc = x - mu
    var = jnp.mean(xc * xc, axis=-1, keepdims=True)
    return xc * lax.rsqrt(var + LN_EPS) * g + b


# ------------------------------ fused kernel -------------------------------
def _gtno_fused_kernel(*refs):
    """refs = (x_in, v_in, cf_in, <flattened params...>, out_ref, attn_scratch)."""
    D = LIFTING_DIM
    attn_ref = refs[-1]               # VMEM scratch (M, D)
    out_ref = refs[-2]                # (M, 3)
    it = iter(refs[:-2])

    def ld():
        return next(it)[...]

    x_in = ld().astype(jnp.float32)   # (M, 4)
    v_in = ld().astype(jnp.float32)   # (M, 4)
    cf_in = ld().astype(jnp.float32)  # (M, 9)

    # ---- lifting layers (nn.Linear path) ----
    wlx, blx = ld(), ld()
    wlv, blv = ld(), ld()
    wlc, blc = ld(), ld()
    x0 = jnp.dot(x_in, wlx, preferred_element_type=jnp.float32) + blx   # (M, D)
    v0 = jnp.dot(v_in, wlv, preferred_element_type=jnp.float32) + blv
    cf = jnp.dot(cf_in, wlc, preferred_element_type=jnp.float32) + blc
    q_data = cf                        # GTNO passes the lifted (un-normalised) cf

    M = x0.shape[0]
    n_graphs = M // N

    initial_v = None
    for layer in range(NUM_LAYERS):
        ln_g, ln_b = ld(), ld()
        wq, bq = ld(), ld()
        wkv = [(ld(), ld()) for _ in range(3)]      # each (D, 2D), (1, 2D)
        wo, bo = ld(), ld()
        w1, b1 = ld(), ld()
        w2, b2 = ld(), ld()
        w3, b3 = ld(), ld()
        lam_p = ld()                                # (1, 1)

        # pre-norm (one LayerNorm per block, shared across the 3 streams)
        cfn = _layernorm(cf, ln_g, ln_b)
        xn = _layernorm(x0, ln_g, ln_b)
        vn = _layernorm(v0, ln_g, ln_b)

        # ---- QuadraticHeterogenousCrossAttention (GHCA) ----
        q = jnp.dot(q_data, wq, preferred_element_type=jnp.float32) + bq   # (M, D)
        ks, vs = [], []
        for (wkv_i, bkv_i), f in zip(wkv, (xn, vn, cfn)):
            kv = jnp.dot(f, wkv_i, preferred_element_type=jnp.float32) + bkv_i  # (M, 2D)
            ks.append(kv[:, :D])
            vs.append(kv[:, D:])

        # per-graph, per-head attention; softmax runs over the 3 stacked
        # heterogeneous key chunks (chunked online formulation == softmax
        # over the concatenated 3N keys).
        for g in range(n_graphs):
            r0 = g * N
            qb = q[r0:r0 + N]                       # (N, D)
            kbs = [k[r0:r0 + N] for k in ks]        # 3 x (N, D)
            vbs = [v[r0:r0 + N] for v in vs]
            acc = jnp.zeros((N, D), jnp.float32)    # attn @ Wo accumulator
            for h in range(NUM_HEADS):
                lo = h * DH
                qh = qb[:, lo:lo + DH]              # (N, DH)
                s = [lax.dot_general(qh, kb[:, lo:lo + DH],
                                     (((1,), (1,)), ((), ())),
                                     preferred_element_type=jnp.float32) * ATTN_SCALE
                     for kb in kbs]                 # 3 x (N, N)
                m = jnp.maximum(
                    jnp.maximum(jnp.max(s[0], axis=-1, keepdims=True),
                                jnp.max(s[1], axis=-1, keepdims=True)),
                    jnp.max(s[2], axis=-1, keepdims=True))
                p = [jnp.exp(si - m) for si in s]
                denom = (jnp.sum(p[0], axis=-1, keepdims=True)
                         + jnp.sum(p[1], axis=-1, keepdims=True)
                         + jnp.sum(p[2], axis=-1, keepdims=True))
                oh = (jnp.dot(p[0], vbs[0][:, lo:lo + DH], preferred_element_type=jnp.float32)
                      + jnp.dot(p[1], vbs[1][:, lo:lo + DH], preferred_element_type=jnp.float32)
                      + jnp.dot(p[2], vbs[2][:, lo:lo + DH], preferred_element_type=jnp.float32))
                oh = oh * pl.reciprocal(denom, approx=True)     # (N, DH)
                # concat-over-heads @ Wo  ==  sum_h  o_h @ Wo[h*DH:(h+1)*DH, :]
                acc = acc + jnp.dot(oh, wo[lo:lo + DH, :],
                                    preferred_element_type=jnp.float32)
            attn_ref[r0:r0 + N, :] = acc + bo

        attn = attn_ref[...]                        # (M, D)
        hres = xn + attn                            # residual with normalised x_0

        # ---- FFN: Linear -> SiLU -> Linear -> SiLU -> Linear ----
        h1 = _silu(jnp.dot(hres, w1, preferred_element_type=jnp.float32) + b1)
        h2 = _silu(jnp.dot(h1, w2, preferred_element_type=jnp.float32) + b2)
        x_out = jnp.dot(h2, w3, preferred_element_type=jnp.float32) + b3

        # ---- value residual (LEARNABLE) ----
        if initial_v is None:
            initial_v = x_out
        else:
            lam = _sigmoid(lam_p)                   # (1, 1) broadcast
            x_out = lam * x_out + (1.0 - lam) * initial_v
        x0 = x_out

    # ---- projection (D -> 3) ----
    wp, bp = ld(), ld()
    out_ref[...] = (jnp.dot(x0, wp, preferred_element_type=jnp.float32)
                    + bp).astype(out_ref.dtype)


# ------------------------------ parameter init ----------------------------
def _kaiming_linear(key, fan_in, fan_out):
    # torch.nn.init.kaiming_normal_(weight, nonlinearity='leaky_relu'), a=0
    # gain = sqrt(2), std = gain / sqrt(fan_in); bias zeroed.
    std = math.sqrt(2.0 / fan_in)
    w = jax.random.normal(key, (fan_in, fan_out), jnp.float32) * std
    b = jnp.zeros((1, fan_out), jnp.float32)
    return w, b


def init_params(key):
    D = LIFTING_DIM
    keys = jax.random.split(key, 4 + NUM_LAYERS)
    params = {
        "lift_x":  _kaiming_linear(keys[0], 4, D),
        "lift_v":  _kaiming_linear(keys[1], 4, D),
        "lift_cf": _kaiming_linear(keys[2], 9, D),
        "proj":    _kaiming_linear(keys[3], D, 3),
        "blocks":  [],
    }
    for l in range(NUM_LAYERS):
        bk = jax.random.split(keys[4 + l], 16)
        wk = [_kaiming_linear(bk[1 + i], D, D) for i in range(3)]
        wv = [_kaiming_linear(bk[4 + i], D, D) for i in range(3)]
        blk = {
            "ln_g": jnp.ones((1, D), jnp.float32),
            "ln_b": jnp.zeros((1, D), jnp.float32),
            "Wq":   _kaiming_linear(bk[0], D, D),
            # K/V weights concatenated per feature -> wider MXU output (2D lanes)
            "Wkv":  [(jnp.concatenate([wk[i][0], wv[i][0]], axis=1),
                      jnp.concatenate([wk[i][1], wv[i][1]], axis=1))
                     for i in range(3)],
            "Wo":   _kaiming_linear(bk[7], D, D),
            "ffn":  (_kaiming_linear(bk[8], D, D),
                     _kaiming_linear(bk[9], D, D),
                     _kaiming_linear(bk[10], D, D)),
            "lambda_v": jnp.full((1, 1), 0.5, jnp.float32),
        }
        params["blocks"].append(blk)
    return params


def _flatten_params(params):
    flat = []
    for name in ("lift_x", "lift_v", "lift_cf"):
        w, b = params[name]
        flat += [w, b]
    for blk in params["blocks"]:
        flat += [blk["ln_g"], blk["ln_b"], blk["Wq"][0], blk["Wq"][1]]
        for i in range(3):
            flat += [blk["Wkv"][i][0], blk["Wkv"][i][1]]
        flat += [blk["Wo"][0], blk["Wo"][1]]
        for (w, b) in blk["ffn"]:
            flat += [w, b]
        flat += [blk["lambda_v"]]
    w, b = params["proj"]
    flat += [w, b]
    return flat


# ------------------------------ model forward -----------------------------
def gtno_forward(params, x_0, v_0, concatenated_features):
    Bb, Nn, _ = x_0.shape
    M = Bb * Nn
    flat = _flatten_params(params)

    out2 = pl.pallas_call(
        _gtno_fused_kernel,
        out_shape=jax.ShapeDtypeStruct((M, 3), jnp.float32),
        scratch_shapes=[pltpu.VMEM((M, LIFTING_DIM), jnp.float32)],
    )(
        x_0.reshape(M, 4).astype(jnp.float32),
        v_0.reshape(M, 4).astype(jnp.float32),
        concatenated_features.reshape(M, 9).astype(jnp.float32),
        *flat,
    )

    # The reference module replicates the batch T times before lifting; with
    # this configuration (no RoPE / no time conditioning) the T replicas are
    # numerically identical, so compute once and broadcast over T.
    out = jnp.broadcast_to(out2.reshape(Bb, Nn, 1, 3),
                           (Bb, Nn, NUM_TIMESTEPS, 3))
    return out


# ----------------------------------- main ---------------------------------
if __name__ == "__main__":
    key = jax.random.PRNGKey(0)
    k_par, k_x, k_v, k_c = jax.random.split(key, 4)

    params = init_params(k_par)

    x_0 = jax.random.normal(k_x, (B, N, 4), jnp.float32)
    v_0 = jax.random.normal(k_v, (B, N, 4), jnp.float32)
    concatenated_features = jax.random.normal(k_c, (B, N, 9), jnp.float32)

    fwd = jax.jit(functools.partial(gtno_forward, params))
    out = fwd(x_0, v_0, concatenated_features)
    out = jax.block_until_ready(out)

    assert out.shape == (B, N, NUM_TIMESTEPS, 3), out.shape
    assert jnp.all(jnp.isfinite(out))
    print("KERNEL_OK")
</pallas_src>

<mosaic_0001>
module attributes {stable_mosaic.version = 11 : i64} {
  func.func @_gtno_fused_kernel(%arg0: memref<16x4xf32, #tpu.memory_space<vmem>>, %arg1: memref<16x4xf32, #tpu.memory_space<vmem>>, %arg2: memref<16x9xf32, #tpu.memory_space<vmem>>, %arg3: memref<4x32xf32, #tpu.memory_space<vmem>>, %arg4: memref<1x32xf32, #tpu.memory_space<vmem>>, %arg5: memref<4x32xf32, #tpu.memory_space<vmem>>, %arg6: memref<1x32xf32, #tpu.memory_space<vmem>>, %arg7: memref<9x32xf32, #tpu.memory_space<vmem>>, %arg8: memref<1x32xf32, #tpu.memory_space<vmem>>, %arg9: memref<1x32xf32, #tpu.memory_space<vmem>>, %arg10: memref<1x32xf32, #tpu.memory_space<vmem>>, %arg11: memref<32x32xf32, #tpu.memory_space<vmem>>, %arg12: memref<1x32xf32, #tpu.memory_space<vmem>>, %arg13: memref<32x64xf32, #tpu.memory_space<vmem>>, %arg14: memref<1x64xf32, #tpu.memory_space<vmem>>, %arg15: memref<32x64xf32, #tpu.memory_space<vmem>>, %arg16: memref<1x64xf32, #tpu.memory_space<vmem>>, %arg17: memref<32x64xf32, #tpu.memory_space<vmem>>, %arg18: memref<1x64xf32, #tpu.memory_space<vmem>>, %arg19: memref<32x32xf32, #tpu.memory_space<vmem>>, %arg20: memref<1x32xf32, #tpu.memory_space<vmem>>, %arg21: memref<32x32xf32, #tpu.memory_space<vmem>>, %arg22: memref<1x32xf32, #tpu.memory_space<vmem>>, %arg23: memref<32x32xf32, #tpu.memory_space<vmem>>, %arg24: memref<1x32xf32, #tpu.memory_space<vmem>>, %arg25: memref<32x32xf32, #tpu.memory_space<vmem>>, %arg26: memref<1x32xf32, #tpu.memory_space<vmem>>, %arg27: memref<1x1xf32, #tpu.memory_space<vmem>>, %arg28: memref<1x32xf32, #tpu.memory_space<vmem>>, %arg29: memref<1x32xf32, #tpu.memory_space<vmem>>, %arg30: memref<32x32xf32, #tpu.memory_space<vmem>>, %arg31: memref<1x32xf32, #tpu.memory_space<vmem>>, %arg32: memref<32x64xf32, #tpu.memory_space<vmem>>, %arg33: memref<1x64xf32, #tpu.memory_space<vmem>>, %arg34: memref<32x64xf32, #tpu.memory_space<vmem>>, %arg35: memref<1x64xf32, #tpu.memory_space<vmem>>, %arg36: memref<32x64xf32, #tpu.memory_space<vmem>>, %arg37: memref<1x64xf32, #tpu.memory_space<vmem>>, %arg38: memref<32x32xf32, #tpu.memory_space<vmem>>, %arg39: memref<1x32xf32, #tpu.memory_space<vmem>>, %arg40: memref<32x32xf32, #tpu.memory_space<vmem>>, %arg41: memref<1x32xf32, #tpu.memory_space<vmem>>, %arg42: memref<32x32xf32, #tpu.memory_space<vmem>>, %arg43: memref<1x32xf32, #tpu.memory_space<vmem>>, %arg44: memref<32x32xf32, #tpu.memory_space<vmem>>, %arg45: memref<1x32xf32, #tpu.memory_space<vmem>>, %arg46: memref<1x1xf32, #tpu.memory_space<vmem>>, %arg47: memref<32x3xf32, #tpu.memory_space<vmem>>, %arg48: memref<1x3xf32, #tpu.memory_space<vmem>>, %arg49: memref<16x3xf32, #tpu.memory_space<vmem>>, %arg50: memref<16x32xf32, #tpu.memory_space<vmem>>) attributes {dimension_semantics = [], scalar_prefetch = 0 : i64, scratch_operands = 1 : i64, tpu.core_type = #tpu.core_type<tc>} {
    %c0 = arith.constant 0 : index
    %c0_0 = arith.constant 0 : index
    %0 = vector.load %arg0[%c0, %c0_0] : memref<16x4xf32, #tpu.memory_space<vmem>>, vector<16x4xf32>
    %c0_1 = arith.constant 0 : index
    %c0_2 = arith.constant 0 : index
    %1 = vector.load %arg1[%c0_1, %c0_2] : memref<16x4xf32, #tpu.memory_space<vmem>>, vector<16x4xf32>
    %c0_3 = arith.constant 0 : index
    %c0_4 = arith.constant 0 : index
    %2 = vector.load %arg2[%c0_3, %c0_4] : memref<16x9xf32, #tpu.memory_space<vmem>>, vector<16x9xf32>
    %c0_5 = arith.constant 0 : index
    %c0_6 = arith.constant 0 : index
    %3 = vector.load %arg3[%c0_5, %c0_6] : memref<4x32xf32, #tpu.memory_space<vmem>>, vector<4x32xf32>
    %c0_7 = arith.constant 0 : index
    %c0_8 = arith.constant 0 : index
    %4 = vector.load %arg4[%c0_7, %c0_8] : memref<1x32xf32, #tpu.memory_space<vmem>>, vector<1x32xf32>
    %c0_9 = arith.constant 0 : index
    %c0_10 = arith.constant 0 : index
    %5 = vector.load %arg5[%c0_9, %c0_10] : memref<4x32xf32, #tpu.memory_space<vmem>>, vector<4x32xf32>
    %c0_11 = arith.constant 0 : index
    %c0_12 = arith.constant 0 : index
    %6 = vector.load %arg6[%c0_11, %c0_12] : memref<1x32xf32, #tpu.memory_space<vmem>>, vector<1x32xf32>
    %c0_13 = arith.constant 0 : index
    %c0_14 = arith.constant 0 : index
    %7 = vector.load %arg7[%c0_13, %c0_14] : memref<9x32xf32, #tpu.memory_space<vmem>>, vector<9x32xf32>
    %c0_15 = arith.constant 0 : index
    %c0_16 = arith.constant 0 : index
    %8 = vector.load %arg8[%c0_15, %c0_16] : memref<1x32xf32, #tpu.memory_space<vmem>>, vector<1x32xf32>
    %cst = arith.constant dense<0.000000e+00> : vector<16x32xf32>
    %9 = tpu.matmul %0, %3, %cst {dimension_numbers = #tpu.dot_dimension_numbers<[1], [0], [0], [1], [0, 0, 1, 1], [], []>} : vector<16x4xf32>, vector<4x32xf32>, vector<16x32xf32> -> vector<16x32xf32>
    %10 = vector.broadcast %4 : vector<1x32xf32> to vector<16x32xf32>
    %11 = arith.addf %9, %10 : vector<16x32xf32>
    %cst_17 = arith.constant dense<0.000000e+00> : vector<16x32xf32>
    %12 = tpu.matmul %1, %5, %cst_17 {dimension_numbers = #tpu.dot_dimension_numbers<[1], [0], [0], [1], [0, 0, 1, 1], [], []>} : vector<16x4xf32>, vector<4x32xf32>, vector<16x32xf32> -> vector<16x32xf32>
    %13 = vector.broadcast %6 : vector<1x32xf32> to vector<16x32xf32>
    %14 = arith.addf %12, %13 : vector<16x32xf32>
    %cst_18 = arith.constant dense<0.000000e+00> : vector<16x32xf32>
    %15 = tpu.matmul %2, %7, %cst_18 {dimension_numbers = #tpu.dot_dimension_numbers<[1], [0], [0], [1], [0, 0, 1, 1], [], []>} : vector<16x9xf32>, vector<9x32xf32>, vector<16x32xf32> -> vector<16x32xf32>
    %16 = vector.broadcast %8 : vector<1x32xf32> to vector<16x32xf32>
    %17 = arith.addf %15, %16 : vector<16x32xf32>
    %c0_19 = arith.constant 0 : index
    %c0_20 = arith.constant 0 : index
    %18 = vector.load %arg9[%c0_19, %c0_20] : memref<1x32xf32, #tpu.memory_space<vmem>>, vector<1x32xf32>
    %c0_21 = arith.constant 0 : index
    %c0_22 = arith.constant 0 : index
    %19 = vector.load %arg10[%c0_21, %c0_22] : memref<1x32xf32, #tpu.memory_space<vmem>>, vector<1x32xf32>
    %c0_23 = arith.constant 0 : index
    %c0_24 = arith.constant 0 : index
    %20 = vector.load %arg11[%c0_23, %c0_24] : memref<32x32xf32, #tpu.memory_space<vmem>>, vector<32x32xf32>
    %c0_25 = arith.constant 0 : index
    %c0_26 = arith.constant 0 : index
    %21 = vector.load %arg12[%c0_25, %c0_26] : memref<1x32xf32, #tpu.memory_space<vmem>>, vector<1x32xf32>
    %c0_27 = arith.constant 0 : index
    %c0_28 = arith.constant 0 : index
    %22 = vector.load %arg13[%c0_27, %c0_28] : memref<32x64xf32, #tpu.memory_space<vmem>>, vector<32x64xf32>
    %c0_29 = arith.constant 0 : index
    %c0_30 = arith.constant 0 : index
    %23 = vector.load %arg14[%c0_29, %c0_30] : memref<1x64xf32, #tpu.memory_space<vmem>>, vector<1x64xf32>
    %c0_31 = arith.constant 0 : index
    %c0_32 = arith.constant 0 : index
    %24 = vector.load %arg15[%c0_31, %c0_32] : memref<32x64xf32, #tpu.memory_space<vmem>>, vector<32x64xf32>
    %c0_33 = arith.constant 0 : index
    %c0_34 = arith.constant 0 : index
    %25 = vector.load %arg16[%c0_33, %c0_34] : memref<1x64xf32, #tpu.memory_space<vmem>>, vector<1x64xf32>
    %c0_35 = arith.constant 0 : index
    %c0_36 = arith.constant 0 : index
    %26 = vector.load %arg17[%c0_35, %c0_36] : memref<32x64xf32, #tpu.memory_space<vmem>>, vector<32x64xf32>
    %c0_37 = arith.constant 0 : index
    %c0_38 = arith.constant 0 : index
    %27 = vector.load %arg18[%c0_37, %c0_38] : memref<1x64xf32, #tpu.memory_space<vmem>>, vector<1x64xf32>
    %c0_39 = arith.constant 0 : index
    %c0_40 = arith.constant 0 : index
    %28 = vector.load %arg19[%c0_39, %c0_40] : memref<32x32xf32, #tpu.memory_space<vmem>>, vector<32x32xf32>
    %c0_41 = arith.constant 0 : index
    %c0_42 = arith.constant 0 : index
    %29 = vector.load %arg20[%c0_41, %c0_42] : memref<1x32xf32, #tpu.memory_space<vmem>>, vector<1x32xf32>
    %c0_43 = arith.constant 0 : index
    %c0_44 = arith.constant 0 : index
    %30 = vector.load %arg21[%c0_43, %c0_44] : memref<32x32xf32, #tpu.memory_space<vmem>>, vector<32x32xf32>
    %c0_45 = arith.constant 0 : index
    %c0_46 = arith.constant 0 : index
    %31 = vector.load %arg22[%c0_45, %c0_46] : memref<1x32xf32, #tpu.memory_space<vmem>>, vector<1x32xf32>
    %c0_47 = arith.constant 0 : index
    %c0_48 = arith.constant 0 : index
    %32 = vector.load %arg23[%c0_47, %c0_48] : memref<32x32xf32, #tpu.memory_space<vmem>>, vector<32x32xf32>
    %c0_49 = arith.constant 0 : index
    %c0_50 = arith.constant 0 : index
    %33 = vector.load %arg24[%c0_49, %c0_50] : memref<1x32xf32, #tpu.memory_space<vmem>>, vector<1x32xf32>
    %c0_51 = arith.constant 0 : index
    %c0_52 = arith.constant 0 : index
    %34 = vector.load %arg25[%c0_51, %c0_52] : memref<32x32xf32, #tpu.memory_space<vmem>>, vector<32x32xf32>
    %c0_53 = arith.constant 0 : index
    %c0_54 = arith.constant 0 : index
    %35 = vector.load %arg26[%c0_53, %c0_54] : memref<1x32xf32, #tpu.memory_space<vmem>>, vector<1x32xf32>
    %cst_55 = arith.constant dense<0.000000e+00> : vector<16xf32>
    %36 = vector.multi_reduction <add>, %17, %cst_55 [1] : vector<16x32xf32> to vector<16xf32>
    %37 = vector.shape_cast %36 : vector<16xf32> to vector<16x1xf32>
    %cst_56 = arith.constant 3.200000e+01 : f32
    %38 = vector.broadcast %cst_56 : f32 to vector<16x1xf32>
    %39 = arith.divf %37, %38 : vector<16x1xf32>
    %40 = vector.broadcast %39 : vector<16x1xf32> to vector<16x32xf32>
    %41 = arith.subf %17, %40 : vector<16x32xf32>
    %42 = arith.mulf %41, %41 : vector<16x32xf32>
    %cst_57 = arith.constant dense<0.000000e+00> : vector<16xf32>
    %43 = vector.multi_reduction <add>, %42, %cst_57 [1] : vector<16x32xf32> to vector<16xf32>
    %44 = vector.shape_cast %43 : vector<16xf32> to vector<16x1xf32>
    %cst_58 = arith.constant 3.200000e+01 : f32
    %45 = vector.broadcast %cst_58 : f32 to vector<16x1xf32>
    %46 = arith.divf %44, %45 : vector<16x1xf32>
    %cst_59 = arith.constant 9.99999974E-6 : f32
    %47 = vector.broadcast %cst_59 : f32 to vector<16x1xf32>
    %48 = arith.addf %46, %47 : vector<16x1xf32>
    %49 = math.rsqrt %48 : vector<16x1xf32>
    %50 = vector.broadcast %49 : vector<16x1xf32> to vector<16x32xf32>
    %51 = arith.mulf %41, %50 : vector<16x32xf32>
    %52 = vector.broadcast %18 : vector<1x32xf32> to vector<16x32xf32>
    %53 = arith.mulf %51, %52 : vector<16x32xf32>
    %54 = vector.broadcast %19 : vector<1x32xf32> to vector<16x32xf32>
    %55 = arith.addf %53, %54 : vector<16x32xf32>
    %cst_60 = arith.constant dense<0.000000e+00> : vector<16xf32>
    %56 = vector.multi_reduction <add>, %11, %cst_60 [1] : vector<16x32xf32> to vector<16xf32>
    %57 = vector.shape_cast %56 : vector<16xf32> to vector<16x1xf32>
    %cst_61 = arith.constant 3.200000e+01 : f32
    %58 = vector.broadcast %cst_61 : f32 to vector<16x1xf32>
    %59 = arith.divf %57, %58 : vector<16x1xf32>
    %60 = vector.broadcast %59 : vector<16x1xf32> to vector<16x32xf32>
    %61 = arith.subf %11, %60 : vector<16x32xf32>
    %62 = arith.mulf %61, %61 : vector<16x32xf32>
    %cst_62 = arith.constant dense<0.000000e+00> : vector<16xf32>
    %63 = vector.multi_reduction <add>, %62, %cst_62 [1] : vector<16x32xf32> to vector<16xf32>
    %64 = vector.shape_cast %63 : vector<16xf32> to vector<16x1xf32>
    %cst_63 = arith.constant 3.200000e+01 : f32
    %65 = vector.broadcast %cst_63 : f32 to vector<16x1xf32>
    %66 = arith.divf %64, %65 : vector<16x1xf32>
    %cst_64 = arith.constant 9.99999974E-6 : f32
    %67 = vector.broadcast %cst_64 : f32 to vector<16x1xf32>
    %68 = arith.addf %66, %67 : vector<16x1xf32>
    %69 = math.rsqrt %68 : vector<16x1xf32>
    %70 = vector.broadcast %69 : vector<16x1xf32> to vector<16x32xf32>
    %71 = arith.mulf %61, %70 : vector<16x32xf32>
    %72 = vector.broadcast %18 : vector<1x32xf32> to vector<16x32xf32>
    %73 = arith.mulf %71, %72 : vector<16x32xf32>
    %74 = vector.broadcast %19 : vector<1x32xf32> to vector<16x32xf32>
    %75 = arith.addf %73, %74 : vector<16x32xf32>
    %cst_65 = arith.constant dense<0.000000e+00> : vector<16xf32>
    %76 = vector.multi_reduction <add>, %14, %cst_65 [1] : vector<16x32xf32> to vector<16xf32>
    %77 = vector.shape_cast %76 : vector<16xf32> to vector<16x1xf32>
    %cst_66 = arith.constant 3.200000e+01 : f32
    %78 = vector.broadcast %cst_66 : f32 to vector<16x1xf32>
    %79 = arith.divf %77, %78 : vector<16x1xf32>
    %80 = vector.broadcast %79 : vector<16x1xf32> to vector<16x32xf32>
    %81 = arith.subf %14, %80 : vector<16x32xf32>
    %82 = arith.mulf %81, %81 : vector<16x32xf32>
    %cst_67 = arith.constant dense<0.000000e+00> : vector<16xf32>
    %83 = vector.multi_reduction <add>, %82, %cst_67 [1] : vector<16x32xf32> to vector<16xf32>
    %84 = vector.shape_cast %83 : vector<16xf32> to vector<16x1xf32>
    %cst_68 = arith.constant 3.200000e+01 : f32
    %85 = vector.broadcast %cst_68 : f32 to vector<16x1xf32>
    %86 = arith.divf %84, %85 : vector<16x1xf32>
    %cst_69 = arith.constant 9.99999974E-6 : f32
    %87 = vector.broadcast %cst_69 : f32 to vector<16x1xf32>
    %88 = arith.addf %86, %87 : vector<16x1xf32>
    %89 = math.rsqrt %88 : vector<16x1xf32>
    %90 = vector.broadcast %89 : vector<16x1xf32> to vector<16x32xf32>
    %91 = arith.mulf %81, %90 : vector<16x32xf32>
    %92 = vector.broadcast %18 : vector<1x32xf32> to vector<16x32xf32>
    %93 = arith.mulf %91, %92 : vector<16x32xf32>
    %94 = vector.broadcast %19 : vector<1x32xf32> to vector<16x32xf32>
    %95 = arith.addf %93, %94 : vector<16x32xf32>
    %cst_70 = arith.constant dense<0.000000e+00> : vector<16x32xf32>
    %96 = tpu.matmul %17, %20, %cst_70 {dimension_numbers = #tpu.dot_dimension_numbers<[1], [0], [0], [1], [0, 0, 1, 1], [], []>} : vector<16x32xf32>, vector<32x32xf32>, vector<16x32xf32> -> vector<16x32xf32>
    %97 = vector.broadcast %21 : vector<1x32xf32> to vector<16x32xf32>
    %98 = arith.addf %96, %97 : vector<16x32xf32>
    %cst_71 = arith.constant dense<0.000000e+00> : vector<16x64xf32>
    %99 = tpu.matmul %75, %22, %cst_71 {dimension_numbers = #tpu.dot_dimension_numbers<[1], [0], [0], [1], [0, 0, 1, 1], [], []>} : vector<16x32xf32>, vector<32x64xf32>, vector<16x64xf32> -> vector<16x64xf32>
    %100 = vector.broadcast %23 : vector<1x64xf32> to vector<16x64xf32>
    %101 = arith.addf %99, %100 : vector<16x64xf32>
    %102 = vector.extract_strided_slice %101 {offsets = [0, 0], sizes = [16, 32], strides = [1, 1]} : vector<16x64xf32> to vector<16x32xf32>
    %103 = vector.extract_strided_slice %101 {offsets = [0, 32], sizes = [16, 32], strides = [1, 1]} : vector<16x64xf32> to vector<16x32xf32>
    %cst_72 = arith.constant dense<0.000000e+00> : vector<16x64xf32>
    %104 = tpu.matmul %95, %24, %cst_72 {dimension_numbers = #tpu.dot_dimension_numbers<[1], [0], [0], [1], [0, 0, 1, 1], [], []>} : vector<16x32xf32>, vector<32x64xf32>, vector<16x64xf32> -> vector<16x64xf32>
    %105 = vector.broadcast %25 : vector<1x64xf32> to vector<16x64xf32>
    %106 = arith.addf %104, %105 : vector<16x64xf32>
    %107 = vector.extract_strided_slice %106 {offsets = [0, 0], sizes = [16, 32], strides = [1, 1]} : vector<16x64xf32> to vector<16x32xf32>
    %108 = vector.extract_strided_slice %106 {offsets = [0, 32], sizes = [16, 32], strides = [1, 1]} : vector<16x64xf32> to vector<16x32xf32>
    %cst_73 = arith.constant dense<0.000000e+00> : vector<16x64xf32>
    %109 = tpu.matmul %55, %26, %cst_73 {dimension_numbers = #tpu.dot_dimension_numbers<[1], [0], [0], [1], [0, 0, 1, 1], [], []>} : vector<16x32xf32>, vector<32x64xf32>, vector<16x64xf32> -> vector<16x64xf32>
    %110 = vector.broadcast %27 : vector<1x64xf32> to vector<16x64xf32>
    %111 = arith.addf %109, %110 : vector<16x64xf32>
    %112 = vector.extract_strided_slice %111 {offsets = [0, 0], sizes = [16, 32], strides = [1, 1]} : vector<16x64xf32> to vector<16x32xf32>
    %113 = vector.extract_strided_slice %111 {offsets = [0, 32], sizes = [16, 32], strides = [1, 1]} : vector<16x64xf32> to vector<16x32xf32>
    %114 = vector.extract_strided_slice %98 {offsets = [0, 0], sizes = [8, 32], strides = [1, 1]} : vector<16x32xf32> to vector<8x32xf32>
    %115 = vector.extract_strided_slice %102 {offsets = [0, 0], sizes = [8, 32], strides = [1, 1]} : vector<16x32xf32> to vector<8x32xf32>
    %116 = vector.extract_strided_slice %107 {offsets = [0, 0], sizes = [8, 32], strides = [1, 1]} : vector<16x32xf32> to vector<8x32xf32>
    %117 = vector.extract_strided_slice %112 {offsets = [0, 0], sizes = [8, 32], strides = [1, 1]} : vector<16x32xf32> to vector<8x32xf32>
    %118 = vector.extract_strided_slice %103 {offsets = [0, 0], sizes = [8, 32], strides = [1, 1]} : vector<16x32xf32> to vector<8x32xf32>
    %119 = vector.extract_strided_slice %108 {offsets = [0, 0], sizes = [8, 32], strides = [1, 1]} : vector<16x32xf32> to vector<8x32xf32>
    %120 = vector.extract_strided_slice %113 {offsets = [0, 0], sizes = [8, 32], strides = [1, 1]} : vector<16x32xf32> to vector<8x32xf32>
    %cst_74 = arith.constant 0.000000e+00 : f32
    %121 = vector.broadcast %cst_74 : f32 to vector<8x32xf32>
    %122 = vector.extract_strided_slice %114 {offsets = [0, 0], sizes = [8, 8], strides = [1, 1]} : vector<8x32xf32> to vector<8x8xf32>
    %123 = vector.extract_strided_slice %115 {offsets = [0, 0], sizes = [8, 8], strides = [1, 1]} : vector<8x32xf32> to vector<8x8xf32>
    %cst_75 = arith.constant dense<0.000000e+00> : vector<8x8xf32>
    %124 = tpu.matmul %122, %123, %cst_75 {dimension_numbers = #tpu.dot_dimension_numbers<[1], [1], [0], [0], [0, 0, 1, 0], [], []>} : vector<8x8xf32>, vector<8x8xf32>, vector<8x8xf32> -> vector<8x8xf32>
    %cst_76 = arith.constant 0.353553385 : f32
    %125 = vector.broadcast %cst_76 : f32 to vector<8x8xf32>
    %126 = arith.mulf %124, %125 : vector<8x8xf32>
    %127 = vector.extract_strided_slice %116 {offsets = [0, 0], sizes = [8, 8], strides = [1, 1]} : vector<8x32xf32> to vector<8x8xf32>
    %cst_77 = arith.constant dense<0.000000e+00> : vector<8x8xf32>
    %128 = tpu.matmul %122, %127, %cst_77 {dimension_numbers = #tpu.dot_dimension_numbers<[1], [1], [0], [0], [0, 0, 1, 0], [], []>} : vector<8x8xf32>, vector<8x8xf32>, vector<8x8xf32> -> vector<8x8xf32>
    %cst_78 = arith.constant 0.353553385 : f32
    %129 = vector.broadcast %cst_78 : f32 to vector<8x8xf32>
    %130 = arith.mulf %128, %129 : vector<8x8xf32>
    %131 = vector.extract_strided_slice %117 {offsets = [0, 0], sizes = [8, 8], strides = [1, 1]} : vector<8x32xf32> to vector<8x8xf32>
    %cst_79 = arith.constant dense<0.000000e+00> : vector<8x8xf32>
    %132 = tpu.matmul %122, %131, %cst_79 {dimension_numbers = #tpu.dot_dimension_numbers<[1], [1], [0], [0], [0, 0, 1, 0], [], []>} : vector<8x8xf32>, vector<8x8xf32>, vector<8x8xf32> -> vector<8x8xf32>
    %cst_80 = arith.constant 0.353553385 : f32
    %133 = vector.broadcast %cst_80 : f32 to vector<8x8xf32>
    %134 = arith.mulf %132, %133 : vector<8x8xf32>
    %cst_81 = arith.constant dense<0xFF800000> : vector<8xf32>
    %135 = vector.multi_reduction <maximumf>, %126, %cst_81 [1] : vector<8x8xf32> to vector<8xf32>
    %136 = vector.shape_cast %135 : vector<8xf32> to vector<8x1xf32>
    %cst_82 = arith.constant dense<0xFF800000> : vector<8xf32>
    %137 = vector.multi_reduction <maximumf>, %130, %cst_82 [1] : vector<8x8xf32> to vector<8xf32>
    %138 = vector.shape_cast %137 : vector<8xf32> to vector<8x1xf32>
    %139 = arith.maximumf %136, %138 : vector<8x1xf32>
    %cst_83 = arith.constant dense<0xFF800000> : vector<8xf32>
    %140 = vector.multi_reduction <maximumf>, %134, %cst_83 [1] : vector<8x8xf32> to vector<8xf32>
    %141 = vector.shape_cast %140 : vector<8xf32> to vector<8x1xf32>
    %142 = arith.maximumf %139, %141 : vector<8x1xf32>
    %143 = vector.broadcast %142 : vector<8x1xf32> to vector<8x8xf32>
    %144 = arith.subf %126, %143 : vector<8x8xf32>
    %145 = math.exp %144 : vector<8x8xf32>
    %146 = vector.broadcast %142 : vector<8x1xf32> to vector<8x8xf32>
    %147 = arith.subf %130, %146 : vector<8x8xf32>
    %148 = math.exp %147 : vector<8x8xf32>
    %149 = vector.broadcast %142 : vector<8x1xf32> to vector<8x8xf32>
    %150 = arith.subf %134, %149 : vector<8x8xf32>
    %151 = math.exp %150 : vector<8x8xf32>
    %cst_84 = arith.constant dense<0.000000e+00> : vector<8xf32>
    %152 = vector.multi_reduction <add>, %145, %cst_84 [1] : vector<8x8xf32> to vector<8xf32>
    %153 = vector.shape_cast %152 : vector<8xf32> to vector<8x1xf32>
    %cst_85 = arith.constant dense<0.000000e+00> : vector<8xf32>
    %154 = vector.multi_reduction <add>, %148, %cst_85 [1] : vector<8x8xf32> to vector<8xf32>
    %155 = vector.shape_cast %154 : vector<8xf32> to vector<8x1xf32>
    %156 = arith.addf %153, %155 : vector<8x1xf32>
    %cst_86 = arith.constant dense<0.000000e+00> : vector<8xf32>
    %157 = vector.multi_reduction <add>, %151, %cst_86 [1] : vector<8x8xf32> to vector<8xf32>
    %158 = vector.shape_cast %157 : vector<8xf32> to vector<8x1xf32>
    %159 = arith.addf %156, %158 : vector<8x1xf32>
    %160 = vector.extract_strided_slice %118 {offsets = [0, 0], sizes = [8, 8], strides = [1, 1]} : vector<8x32xf32> to vector<8x8xf32>
    %cst_87 = arith.constant dense<0.000000e+00> : vector<8x8xf32>
    %161 = tpu.matmul %145, %160, %cst_87 {dimension_numbers = #tpu.dot_dimension_numbers<[1], [0], [0], [1], [0, 0, 1, 1], [], []>} : vector<8x8xf32>, vector<8x8xf32>, vector<8x8xf32> -> vector<8x8xf32>
    %162 = vector.extract_strided_slice %119 {offsets = [0, 0], sizes = [8, 8], strides = [1, 1]} : vector<8x32xf32> to vector<8x8xf32>
    %cst_88 = arith.constant dense<0.000000e+00> : vector<8x8xf32>
    %163 = tpu.matmul %148, %162, %cst_88 {dimension_numbers = #tpu.dot_dimension_numbers<[1], [0], [0], [1], [0, 0, 1, 1], [], []>} : vector<8x8xf32>, vector<8x8xf32>, vector<8x8xf32> -> vector<8x8xf32>
    %164 = arith.addf %161, %163 : vector<8x8xf32>
    %165 = vector.extract_strided_slice %120 {offsets = [0, 0], sizes = [8, 8], strides = [1, 1]} : vector<8x32xf32> to vector<8x8xf32>
    %cst_89 = arith.constant dense<0.000000e+00> : vector<8x8xf32>
    %166 = tpu.matmul %151, %165, %cst_89 {dimension_numbers = #tpu.dot_dimension_numbers<[1], [0], [0], [1], [0, 0, 1, 1], [], []>} : vector<8x8xf32>, vector<8x8xf32>, vector<8x8xf32> -> vector<8x8xf32>
    %167 = arith.addf %164, %166 : vector<8x8xf32>
    %168 = tpu.reciprocal %159 {approx = true} : vector<8x1xf32> -> vector<8x1xf32>
    %169 = vector.broadcast %168 : vector<8x1xf32> to vector<8x8xf32>
    %170 = arith.mulf %167, %169 : vector<8x8xf32>
    %171 = vector.extract_strided_slice %28 {offsets = [0, 0], sizes = [8, 32], strides = [1, 1]} : vector<32x32xf32> to vector<8x32xf32>
    %cst_90 = arith.constant dense<0.000000e+00> : vector<8x32xf32>
    %172 = tpu.matmul %170, %171, %cst_90 {dimension_numbers = #tpu.dot_dimension_numbers<[1], [0], [0], [1], [0, 0, 1, 1], [], []>} : vector<8x8xf32>, vector<8x32xf32>, vector<8x32xf32> -> vector<8x32xf32>
    %173 = arith.addf %121, %172 : vector<8x32xf32>
    %174 = vector.extract_strided_slice %114 {offsets = [0, 8], sizes = [8, 8], strides = [1, 1]} : vector<8x32xf32> to vector<8x8xf32>
    %175 = vector.extract_strided_slice %115 {offsets = [0, 8], sizes = [8, 8], strides = [1, 1]} : vector<8x32xf32> to vector<8x8xf32>
    %cst_91 = arith.constant dense<0.000000e+00> : vector<8x8xf32>
    %176 = tpu.matmul %174, %175, %cst_91 {dimension_numbers = #tpu.dot_dimension_numbers<[1], [1], [0], [0], [0, 0, 1, 0], [], []>} : vector<8x8xf32>, vector<8x8xf32>, vector<8x8xf32> -> vector<8x8xf32>
    %cst_92 = arith.constant 0.353553385 : f32
    %177 = vector.broadcast %cst_92 : f32 to vector<8x8xf32>
    %178 = arith.mulf %176, %177 : vector<8x8xf32>
    %179 = vector.extract_strided_slice %116 {offsets = [0, 8], sizes = [8, 8], strides = [1, 1]} : vector<8x32xf32> to vector<8x8xf32>
    %cst_93 = arith.constant dense<0.000000e+00> : vector<8x8xf32>
    %180 = tpu.matmul %174, %179, %cst_93 {dimension_numbers = #tpu.dot_dimension_numbers<[1], [1], [0], [0], [0, 0, 1, 0], [], []>} : vector<8x8xf32>, vector<8x8xf32>, vector<8x8xf32> -> vector<8x8xf32>
    %cst_94 = arith.constant 0.353553385 : f32
    %181 = vector.broadcast %cst_94 : f32 to vector<8x8xf32>
    %182 = arith.mulf %180, %181 : vector<8x8xf32>
    %183 = vector.extract_strided_slice %117 {offsets = [0, 8], sizes = [8, 8], strides = [1, 1]} : vector<8x32xf32> to vector<8x8xf32>
    %cst_95 = arith.constant dense<0.000000e+00> : vector<8x8xf32>
    %184 = tpu.matmul %174, %183, %cst_95 {dimension_numbers = #tpu.dot_dimension_numbers<[1], [1], [0], [0], [0, 0, 1, 0], [], []>} : vector<8x8xf32>, vector<8x8xf32>, vector<8x8xf32> -> vector<8x8xf32>
    %cst_96 = arith.constant 0.353553385 : f32
    %185 = vector.broadcast %cst_96 : f32 to vector<8x8xf32>
    %186 = arith.mulf %184, %185 : vector<8x8xf32>
    %cst_97 = arith.constant dense<0xFF800000> : vector<8xf32>
    %187 = vector.multi_reduction <maximumf>, %178, %cst_97 [1] : vector<8x8xf32> to vector<8xf32>
    %188 = vector.shape_cast %187 : vector<8xf32> to vector<8x1xf32>
    %cst_98 = arith.constant dense<0xFF800000> : vector<8xf32>
    %189 = vector.multi_reduction <maximumf>, %182, %cst_98 [1] : vector<8x8xf32> to vector<8xf32>
    %190 = vector.shape_cast %189 : vector<8xf32> to vector<8x1xf32>
    %191 = arith.maximumf %188, %190 : vector<8x1xf32>
    %cst_99 = arith.constant dense<0xFF800000> : vector<8xf32>
    %192 = vector.multi_reduction <maximumf>, %186, %cst_99 [1] : vector<8x8xf32> to vector<8xf32>
    %193 = vector.shape_cast %192 : vector<8xf32> to vector<8x1xf32>
    %194 = arith.maximumf %191, %193 : vector<8x1xf32>
    %195 = vector.broadcast %194 : vector<8x1xf32> to vector<8x8xf32>
    %196 = arith.subf %178, %195 : vector<8x8xf32>
    %197 = math.exp %196 : vector<8x8xf32>
    %198 = vector.broadcast %194 : vector<8x1xf32> to vector<8x8xf32>
    %199 = arith.subf %182, %198 : vector<8x8xf32>
    %200 = math.exp %199 : vector<8x8xf32>
    %201 = vector.broadcast %194 : vector<8x1xf32> to vector<8x8xf32>
    %202 = arith.subf %186, %201 : vector<8x8xf32>
    %203 = math.exp %202 : vector<8x8xf32>
    %cst_100 = arith.constant dense<0.000000e+00> : vector<8xf32>
    %204 = vector.multi_reduction <add>, %197, %cst_100 [1] : vector<8x8xf32> to vector<8xf32>
    %205 = vector.shape_cast %204 : vector<8xf32> to vector<8x1xf32>
    %cst_101 = arith.constant dense<0.000000e+00> : vector<8xf32>
    %206 = vector.multi_reduction <add>, %200, %cst_101 [1] : vector<8x8xf32> to vector<8xf32>
    %207 = vector.shape_cast %206 : vector<8xf32> to vector<8x1xf32>
    %208 = arith.addf %205, %207 : vector<8x1xf32>
    %cst_102 = arith.constant dense<0.000000e+00> : vector<8xf32>
    %209 = vector.multi_reduction <add>, %203, %cst_102 [1] : vector<8x8xf32> to vector<8xf32>
    %210 = vector.shape_cast %209 : vector<8xf32> to vector<8x1xf32>
    %211 = arith.addf %208, %210 : vector<8x1xf32>
    %212 = vector.extract_strided_slice %118 {offsets = [0, 8], sizes = [8, 8], strides = [1, 1]} : vector<8x32xf32> to vector<8x8xf32>
    %cst_103 = arith.constant dense<0.000000e+00> : vector<8x8xf32>
    %213 = tpu.matmul %197, %212, %cst_103 {dimension_numbers = #tpu.dot_dimension_numbers<[1], [0], [0], [1], [0, 0, 1, 1], [], []>} : vector<8x8xf32>, vector<8x8xf32>, vector<8x8xf32> -> vector<8x8xf32>
    %214 = vector.extract_strided_slice %119 {offsets = [0, 8], sizes = [8, 8], strides = [1, 1]} : vector<8x32xf32> to vector<8x8xf32>
    %cst_104 = arith.constant dense<0.000000e+00> : vector<8x8xf32>
    %215 = tpu.matmul %200, %214, %cst_104 {dimension_numbers = #tpu.dot_dimension_numbers<[1], [0], [0], [1], [0, 0, 1, 1], [], []>} : vector<8x8xf32>, vector<8x8xf32>, vector<8x8xf32> -> vector<8x8xf32>
    %216 = arith.addf %213, %215 : vector<8x8xf32>
    %217 = vector.extract_strided_slice %120 {offsets = [0, 8], sizes = [8, 8], strides = [1, 1]} : vector<8x32xf32> to vector<8x8xf32>
    %cst_105 = arith.constant dense<0.000000e+00> : vector<8x8xf32>
    %218 = tpu.matmul %203, %217, %cst_105 {dimension_numbers = #tpu.dot_dimension_numbers<[1], [0], [0], [1], [0, 0, 1, 1], [], []>} : vector<8x8xf32>, vector<8x8xf32>, vector<8x8xf32> -> vector<8x8xf32>
    %219 = arith.addf %216, %218 : vector<8x8xf32>
    %220 = tpu.reciprocal %211 {approx = true} : vector<8x1xf32> -> vector<8x1xf32>
    %221 = vector.broadcast %220 : vector<8x1xf32> to vector<8x8xf32>
    %222 = arith.mulf %219, %221 : vector<8x8xf32>
    %223 = vector.extract_strided_slice %28 {offsets = [8, 0], sizes = [8, 32], strides = [1, 1]} : vector<32x32xf32> to vector<8x32xf32>
    %cst_106 = arith.constant dense<0.000000e+00> : vector<8x32xf32>
    %224 = tpu.matmul %222, %223, %cst_106 {dimension_numbers = #tpu.dot_dimension_numbers<[1], [0], [0], [1], [0, 0, 1, 1], [], []>} : vector<8x8xf32>, vector<8x32xf32>, vector<8x32xf32> -> vector<8x32xf32>
    %225 = arith.addf %173, %224 : vector<8x32xf32>
    %226 = vector.extract_strided_slice %114 {offsets = [0, 16], sizes = [8, 8], strides = [1, 1]} : vector<8x32xf32> to vector<8x8xf32>
    %227 = vector.extract_strided_slice %115 {offsets = [0, 16], sizes = [8, 8], strides = [1, 1]} : vector<8x32xf32> to vector<8x8xf32>
    %cst_107 = arith.constant dense<0.000000e+00> : vector<8x8xf32>
    %228 = tpu.matmul %226, %227, %cst_107 {dimension_numbers = #tpu.dot_dimension_numbers<[1], [1], [0], [0], [0, 0, 1, 0], [], []>} : vector<8x8xf32>, vector<8x8xf32>, vector<8x8xf32> -> vector<8x8xf32>
    %cst_108 = arith.constant 0.353553385 : f32
    %229 = vector.broadcast %cst_108 : f32 to vector<8x8xf32>
    %230 = arith.mulf %228, %229 : vector<8x8xf32>
    %231 = vector.extract_strided_slice %116 {offsets = [0, 16], sizes = [8, 8], strides = [1, 1]} : vector<8x32xf32> to vector<8x8xf32>
    %cst_109 = arith.constant dense<0.000000e+00> : vector<8x8xf32>
    %232 = tpu.matmul %226, %231, %cst_109 {dimension_numbers = #tpu.dot_dimension_numbers<[1], [1], [0], [0], [0, 0, 1, 0], [], []>} : vector<8x8xf32>, vector<8x8xf32>, vector<8x8xf32> -> vector<8x8xf32>
    %cst_110 = arith.constant 0.353553385 : f32
    %233 = vector.broadcast %cst_110 : f32 to vector<8x8xf32>
    %234 = arith.mulf %232, %233 : vector<8x8xf32>
    %235 = vector.extract_strided_slice %117 {offsets = [0, 16], sizes = [8, 8], strides = [1, 1]} : vector<8x32xf32> to vector<8x8xf32>
    %cst_111 = arith.constant dense<0.000000e+00> : vector<8x8xf32>
    %236 = tpu.matmul %226, %235, %cst_111 {dimension_numbers = #tpu.dot_dimension_numbers<[1], [1], [0], [0], [0, 0, 1, 0], [], []>} : vector<8x8xf32>, vector<8x8xf32>, vector<8x8xf32> -> vector<8x8xf32>
    %cst_112 = arith.constant 0.353553385 : f32
    %237 = vector.broadcast %cst_112 : f32 to vector<8x8xf32>
    %238 = arith.mulf %236, %237 : vector<8x8xf32>
    %cst_113 = arith.constant dense<0xFF800000> : vector<8xf32>
    %239 = vector.multi_reduction <maximumf>, %230, %cst_113 [1] : vector<8x8xf32> to vector<8xf32>
    %240 = vector.shape_cast %239 : vector<8xf32> to vector<8x1xf32>
    %cst_114 = arith.constant dense<0xFF800000> : vector<8xf32>
    %241 = vector.multi_reduction <maximumf>, %234, %cst_114 [1] : vector<8x8xf32> to vector<8xf32>
    %242 = vector.shape_cast %241 : vector<8xf32> to vector<8x1xf32>
    %243 = arith.maximumf %240, %242 : vector<8x1xf32>
    %cst_115 = arith.constant dense<0xFF800000> : vector<8xf32>
    %244 = vector.multi_reduction <maximumf>, %238, %cst_115 [1] : vector<8x8xf32> to vector<8xf32>
    %245 = vector.shape_cast %244 : vector<8xf32> to vector<8x1xf32>
    %246 = arith.maximumf %243, %245 : vector<8x1xf32>
    %247 = vector.broadcast %246 : vector<8x1xf32> to vector<8x8xf32>
    %248 = arith.subf %230, %247 : vector<8x8xf32>
    %249 = math.exp %248 : vector<8x8xf32>
    %250 = vector.broadcast %246 : vector<8x1xf32> to vector<8x8xf32>
    %251 = arith.subf %234, %250 : vector<8x8xf32>
    %252 = math.exp %251 : vector<8x8xf32>
    %253 = vector.broadcast %246 : vector<8x1xf32> to vector<8x8xf32>
    %254 = arith.subf %238, %253 : vector<8x8xf32>
    %255 = math.exp %254 : vector<8x8xf32>
    %cst_116 = arith.constant dense<0.000000e+00> : vector<8xf32>
    %256 = vector.multi_reduction <add>, %249, %cst_116 [1] : vector<8x8xf32> to vector<8xf32>
    %257 = vector.shape_cast %256 : vector<8xf32> to vector<8x1xf32>
    %cst_117 = arith.constant dense<0.000000e+00> : vector<8xf32>
    %258 = vector.multi_reduction <add>, %252, %cst_117 [1] : vector<8x8xf32> to vector<8xf32>
    %259 = vector.shape_cast %258 : vector<8xf32> to vector<8x1xf32>
    %260 = arith.addf %257, %259 : vector<8x1xf32>
    %cst_118 = arith.constant dense<0.000000e+00> : vector<8xf32>
    %261 = vector.multi_reduction <add>, %255, %cst_118 [1] : vector<8x8xf32> to vector<8xf32>
    %262 = vector.shape_cast %261 : vector<8xf32> to vector<8x1xf32>
    %263 = arith.addf %260, %262 : vector<8x1xf32>
    %264 = vector.extract_strided_slice %118 {offsets = [0, 16], sizes = [8, 8], strides = [1, 1]} : vector<8x32xf32> to vector<8x8xf32>
    %cst_119 = arith.constant dense<0.000000e+00> : vector<8x8xf32>
    %265 = tpu.matmul %249, %264, %cst_119 {dimension_numbers = #tpu.dot_dimension_numbers<[1], [0], [0], [1], [0, 0, 1, 1], [], []>} : vector<8x8xf32>, vector<8x8xf32>, vector<8x8xf32> -> vector<8x8xf32>
    %266 = vector.extract_strided_slice %119 {offsets = [0, 16], sizes = [8, 8], strides = [1, 1]} : vector<8x32xf32> to vector<8x8xf32>
    %cst_120 = arith.constant dense<0.000000e+00> : vector<8x8xf32>
    %267 = tpu.matmul %252, %266, %cst_120 {dimension_numbers = #tpu.dot_dimension_numbers<[1], [0], [0], [1], [0, 0, 1, 1], [], []>} : vector<8x8xf32>, vector<8x8xf32>, vector<8x8xf32> -> vector<8x8xf32>
    %268 = arith.addf %265, %267 : vector<8x8xf32>
    %269 = vector.extract_strided_slice %120 {offsets = [0, 16], sizes = [8, 8], strides = [1, 1]} : vector<8x32xf32> to vector<8x8xf32>
    %cst_121 = arith.constant dense<0.000000e+00> : vector<8x8xf32>
    %270 = tpu.matmul %255, %269, %cst_121 {dimension_numbers = #tpu.dot_dimension_numbers<[1], [0], [0], [1], [0, 0, 1, 1], [], []>} : vector<8x8xf32>, vector<8x8xf32>, vector<8x8xf32> -> vector<8x8xf32>
    %271 = arith.addf %268, %270 : vector<8x8xf32>
    %272 = tpu.reciprocal %263 {approx = true} : vector<8x1xf32> -> vector<8x1xf32>
    %273 = vector.broadcast %272 : vector<8x1xf32> to vector<8x8xf32>
    %274 = arith.mulf %271, %273 : vector<8x8xf32>
    %275 = vector.extract_strided_slice %28 {offsets = [16, 0], sizes = [8, 32], strides = [1, 1]} : vector<32x32xf32> to vector<8x32xf32>
    %cst_122 = arith.constant dense<0.000000e+00> : vector<8x32xf32>
    %276 = tpu.matmul %274, %275, %cst_122 {dimension_numbers = #tpu.dot_dimension_numbers<[1], [0], [0], [1], [0, 0, 1, 1], [], []>} : vector<8x8xf32>, vector<8x32xf32>, vector<8x32xf32> -> vector<8x32xf32>
    %277 = arith.addf %225, %276 : vector<8x32xf32>
    %278 = vector.extract_strided_slice %114 {offsets = [0, 24], sizes = [8, 8], strides = [1, 1]} : vector<8x32xf32> to vector<8x8xf32>
    %279 = vector.extract_strided_slice %115 {offsets = [0, 24], sizes = [8, 8], strides = [1, 1]} : vector<8x32xf32> to vector<8x8xf32>
    %cst_123 = arith.constant dense<0.000000e+00> : vector<8x8xf32>
    %280 = tpu.matmul %278, %279, %cst_123 {dimension_numbers = #tpu.dot_dimension_numbers<[1], [1], [0], [0], [0, 0, 1, 0], [], []>} : vector<8x8xf32>, vector<8x8xf32>, vector<8x8xf32> -> vector<8x8xf32>
    %cst_124 = arith.constant 0.353553385 : f32
    %281 = vector.broadcast %cst_124 : f32 to vector<8x8xf32>
    %282 = arith.mulf %280, %281 : vector<8x8xf32>
    %283 = vector.extract_strided_slice %116 {offsets = [0, 24], sizes = [8, 8], strides = [1, 1]} : vector<8x32xf32> to vector<8x8xf32>
    %cst_125 = arith.constant dense<0.000000e+00> : vector<8x8xf32>
    %284 = tpu.matmul %278, %283, %cst_125 {dimension_numbers = #tpu.dot_dimension_numbers<[1], [1], [0], [0], [0, 0, 1, 0], [], []>} : vector<8x8xf32>, vector<8x8xf32>, vector<8x8xf32> -> vector<8x8xf32>
    %cst_126 = arith.constant 0.353553385 : f32
    %285 = vector.broadcast %cst_126 : f32 to vector<8x8xf32>
    %286 = arith.mulf %284, %285 : vector<8x8xf32>
    %287 = vector.extract_strided_slice %117 {offsets = [0, 24], sizes = [8, 8], strides = [1, 1]} : vector<8x32xf32> to vector<8x8xf32>
    %cst_127 = arith.constant dense<0.000000e+00> : vector<8x8xf32>
    %288 = tpu.matmul %278, %287, %cst_127 {dimension_numbers = #tpu.dot_dimension_numbers<[1], [1], [0], [0], [0, 0, 1, 0], [], []>} : vector<8x8xf32>, vector<8x8xf32>, vector<8x8xf32> -> vector<8x8xf32>
    %cst_128 = arith.constant 0.353553385 : f32
    %289 = vector.broadcast %cst_128 : f32 to vector<8x8xf32>
    %290 = arith.mulf %288, %289 : vector<8x8xf32>
    %cst_129 = arith.constant dense<0xFF800000> : vector<8xf32>
    %291 = vector.multi_reduction <maximumf>, %282, %cst_129 [1] : vector<8x8xf32> to vector<8xf32>
    %292 = vector.shape_cast %291 : vector<8xf32> to vector<8x1xf32>
    %cst_130 = arith.constant dense<0xFF800000> : vector<8xf32>
    %293 = vector.multi_reduction <maximumf>, %286, %cst_130 [1] : vector<8x8xf32> to vector<8xf32>
    %294 = vector.shape_cast %293 : vector<8xf32> to vector<8x1xf32>
    %295 = arith.maximumf %292, %294 : vector<8x1xf32>
    %cst_131 = arith.constant dense<0xFF800000> : vector<8xf32>
    %296 = vector.multi_reduction <maximumf>, %290, %cst_131 [1] : vector<8x8xf32> to vector<8xf32>
    %297 = vector.shape_cast %296 : vector<8xf32> to vector<8x1xf32>
    %298 = arith.maximumf %295, %297 : vector<8x1xf32>
    %299 = vector.broadcast %298 : vector<8x1xf32> to vector<8x8xf32>
    %300 = arith.subf %282, %299 : vector<8x8xf32>
    %301 = math.exp %300 : vector<8x8xf32>
    %302 = vector.broadcast %298 : vector<8x1xf32> to vector<8x8xf32>
    %303 = arith.subf %286, %302 : vector<8x8xf32>
    %304 = math.exp %303 : vector<8x8xf32>
    %305 = vector.broadcast %298 : vector<8x1xf32> to vector<8x8xf32>
    %306 = arith.subf %290, %305 : vector<8x8xf32>
    %307 = math.exp %306 : vector<8x8xf32>
    %cst_132 = arith.constant dense<0.000000e+00> : vector<8xf32>
    %308 = vector.multi_reduction <add>, %301, %cst_132 [1] : vector<8x8xf32> to vector<8xf32>
    %309 = vector.shape_cast %308 : vector<8xf32> to vector<8x1xf32>
    %cst_133 = arith.constant dense<0.000000e+00> : vector<8xf32>
    %310 = vector.multi_reduction <add>, %304, %cst_133 [1] : vector<8x8xf32> to vector<8xf32>
    %311 = vector.shape_cast %310 : vector<8xf32> to vector<8x1xf32>
    %312 = arith.addf %309, %311 : vector<8x1xf32>
    %cst_134 = arith.constant dense<0.000000e+00> : vector<8xf32>
    %313 = vector.multi_reduction <add>, %307, %cst_134 [1] : vector<8x8xf32> to vector<8xf32>
    %314 = vector.shape_cast %313 : vector<8xf32> to vector<8x1xf32>
    %315 = arith.addf %312, %314 : vector<8x1xf32>
    %316 = vector.extract_strided_slice %118 {offsets = [0, 24], sizes = [8, 8], strides = [1, 1]} : vector<8x32xf32> to vector<8x8xf32>
    %cst_135 = arith.constant dense<0.000000e+00> : vector<8x8xf32>
    %317 = tpu.matmul %301, %316, %cst_135 {dimension_numbers = #tpu.dot_dimension_numbers<[1], [0], [0], [1], [0, 0, 1, 1], [], []>} : vector<8x8xf32>, vector<8x8xf32>, vector<8x8xf32> -> vector<8x8xf32>
    %318 = vector.extract_strided_slice %119 {offsets = [0, 24], sizes = [8, 8], strides = [1, 1]} : vector<8x32xf32> to vector<8x8xf32>
    %cst_136 = arith.constant dense<0.000000e+00> : vector<8x8xf32>
    %319 = tpu.matmul %304, %318, %cst_136 {dimension_numbers = #tpu.dot_dimension_numbers<[1], [0], [0], [1], [0, 0, 1, 1], [], []>} : vector<8x8xf32>, vector<8x8xf32>, vector<8x8xf32> -> vector<8x8xf32>
    %320 = arith.addf %317, %319 : vector<8x8xf32>
    %321 = vector.extract_strided_slice %120 {offsets = [0, 24], sizes = [8, 8], strides = [1, 1]} : vector<8x32xf32> to vector<8x8xf32>
    %cst_137 = arith.constant dense<0.000000e+00> : vector<8x8xf32>
    %322 = tpu.matmul %307, %321, %cst_137 {dimension_numbers = #tpu.dot_dimension_numbers<[1], [0], [0], [1], [0, 0, 1, 1], [], []>} : vector<8x8xf32>, vector<8x8xf32>, vector<8x8xf32> -> vector<8x8xf32>
    %323 = arith.addf %320, %322 : vector<8x8xf32>
    %324 = tpu.reciprocal %315 {approx = true} : vector<8x1xf32> -> vector<8x1xf32>
    %325 = vector.broadcast %324 : vector<8x1xf32> to vector<8x8xf32>
    %326 = arith.mulf %323, %325 : vector<8x8xf32>
    %327 = vector.extract_strided_slice %28 {offsets = [24, 0], sizes = [8, 32], strides = [1, 1]} : vector<32x32xf32> to vector<8x32xf32>
    %cst_138 = arith.constant dense<0.000000e+00> : vector<8x32xf32>
    %328 = tpu.matmul %326, %327, %cst_138 {dimension_numbers = #tpu.dot_dimension_numbers<[1], [0], [0], [1], [0, 0, 1, 1], [], []>} : vector<8x8xf32>, vector<8x32xf32>, vector<8x32xf32> -> vector<8x32xf32>
    %329 = arith.addf %277, %328 : vector<8x32xf32>
    %330 = vector.broadcast %29 : vector<1x32xf32> to vector<8x32xf32>
    %331 = arith.addf %329, %330 : vector<8x32xf32>
    %c0_139 = arith.constant 0 : index
    %c0_140 = arith.constant 0 : index
    %332 = vector.load %arg50[%c0_139, %c0_140] : memref<16x32xf32, #tpu.memory_space<vmem>>, vector<8x32xf32>
    tpu.vector_store %arg50[%c0_139, %c0_140], %331 {strides = array<i32>} : memref<16x32xf32, #tpu.memory_space<vmem>>, vector<8x32xf32>,
    %333 = vector.extract_strided_slice %98 {offsets = [8, 0], sizes = [8, 32], strides = [1, 1]} : vector<16x32xf32> to vector<8x32xf32>
    %334 = vector.extract_strided_slice %102 {offsets = [8, 0], sizes = [8, 32], strides = [1, 1]} : vector<16x32xf32> to vector<8x32xf32>
    %335 = vector.extract_strided_slice %107 {offsets = [8, 0], sizes = [8, 32], strides = [1, 1]} : vector<16x32xf32> to vector<8x32xf32>
    %336 = vector.extract_strided_slice %112 {offsets = [8, 0], sizes = [8, 32], strides = [1, 1]} : vector<16x32xf32> to vector<8x32xf32>
    %337 = vector.extract_strided_slice %103 {offsets = [8, 0], sizes = [8, 32], strides = [1, 1]} : vector<16x32xf32> to vector<8x32xf32>
    %338 = vector.extract_strided_slice %108 {offsets = [8, 0], sizes = [8, 32], strides = [1, 1]} : vector<16x32xf32> to vector<8x32xf32>
    %339 = vector.extract_strided_slice %113 {offsets = [8, 0], sizes = [8, 32], strides = [1, 1]} : vector<16x32xf32> to vector<8x32xf32>
    %cst_141 = arith.constant 0.000000e+00 : f32
    %340 = vector.broadcast %cst_141 : f32 to vector<8x32xf32>
    %341 = vector.extract_strided_slice %333 {offsets = [0, 0], sizes = [8, 8], strides = [1, 1]} : vector<8x32xf32> to vector<8x8xf32>
    %342 = vector.extract_strided_slice %334 {offsets = [0, 0], sizes = [8, 8], strides = [1, 1]} : vector<8x32xf32> to vector<8x8xf32>
    %cst_142 = arith.constant dense<0.000000e+00> : vector<8x8xf32>
    %343 = tpu.matmul %341, %342, %cst_142 {dimension_numbers = #tpu.dot_dimension_numbers<[1], [1], [0], [0], [0, 0, 1, 0], [], []>} : vector<8x8xf32>, vector<8x8xf32>, vector<8x8xf32> -> vector<8x8xf32>
    %cst_143 = arith.constant 0.353553385 : f32
    %344 = vector.broadcast %cst_143 : f32 to vector<8x8xf32>
    %345 = arith.mulf %343, %344 : vector<8x8xf32>
    %346 = vector.extract_strided_slice %335 {offsets = [0, 0], sizes = [8, 8], strides = [1, 1]} : vector<8x32xf32> to vector<8x8xf32>
    %cst_144 = arith.constant dense<0.000000e+00> : vector<8x8xf32>
    %347 = tpu.matmul %341, %346, %cst_144 {dimension_numbers = #tpu.dot_dimension_numbers<[1], [1], [0], [0], [0, 0, 1, 0], [], []>} : vector<8x8xf32>, vector<8x8xf32>, vector<8x8xf32> -> vector<8x8xf32>
    %cst_145 = arith.constant 0.353553385 : f32
    %348 = vector.broadcast %cst_145 : f32 to vector<8x8xf32>
    %349 = arith.mulf %347, %348 : vector<8x8xf32>
    %350 = vector.extract_strided_slice %336 {offsets = [0, 0], sizes = [8, 8], strides = [1, 1]} : vector<8x32xf32> to vector<8x8xf32>
    %cst_146 = arith.constant dense<0.000000e+00> : vector<8x8xf32>
    %351 = tpu.matmul %341, %350, %cst_146 {dimension_numbers = #tpu.dot_dimension_numbers<[1], [1], [0], [0], [0, 0, 1, 0], [], []>} : vector<8x8xf32>, vector<8x8xf32>, vector<8x8xf32> -> vector<8x8xf32>
    %cst_147 = arith.constant 0.353553385 : f32
    %352 = vector.broadcast %cst_147 : f32 to vector<8x8xf32>
    %353 = arith.mulf %351, %352 : vector<8x8xf32>
    %cst_148 = arith.constant dense<0xFF800000> : vector<8xf32>
    %354 = vector.multi_reduction <maximumf>, %345, %cst_148 [1] : vector<8x8xf32> to vector<8xf32>
    %355 = vector.shape_cast %354 : vector<8xf32> to vector<8x1xf32>
    %cst_149 = arith.constant dense<0xFF800000> : vector<8xf32>
    %356 = vector.multi_reduction <maximumf>, %349, %cst_149 [1] : vector<8x8xf32> to vector<8xf32>
    %357 = vector.shape_cast %356 : vector<8xf32> to vector<8x1xf32>
    %358 = arith.maximumf %355, %357 : vector<8x1xf32>
    %cst_150 = arith.constant dense<0xFF800000> : vector<8xf32>
    %359 = vector.multi_reduction <maximumf>, %353, %cst_150 [1] : vector<8x8xf32> to vector<8xf32>
    %360 = vector.shape_cast %359 : vector<8xf32> to vector<8x1xf32>
    %361 = arith.maximumf %358, %360 : vector<8x1xf32>
    %362 = vector.broadcast %361 : vector<8x1xf32> to vector<8x8xf32>
    %363 = arith.subf %345, %362 : vector<8x8xf32>
    %364 = math.exp %363 : vector<8x8xf32>
    %365 = vector.broadcast %361 : vector<8x1xf32> to vector<8x8xf32>
    %366 = arith.subf %349, %365 : vector<8x8xf32>
    %367 = math.exp %366 : vector<8x8xf32>
    %368 = vector.broadcast %361 : vector<8x1xf32> to vector<8x8xf32>
    %369 = arith.subf %353, %368 : vector<8x8xf32>
    %370 = math.exp %369 : vector<8x8xf32>
    %cst_151 = arith.constant dense<0.000000e+00> : vector<8xf32>
    %371 = vector.multi_reduction <add>, %364, %cst_151 [1] : vector<8x8xf32> to vector<8xf32>
    %372 = vector.shape_cast %371 : vector<8xf32> to vector<8x1xf32>
    %cst_152 = arith.constant dense<0.000000e+00> : vector<8xf32>
    %373 = vector.multi_reduction <add>, %367, %cst_152 [1] : vector<8x8xf32> to vector<8xf32>
    %374 = vector.shape_cast %373 : vector<8xf32> to vector<8x1xf32>
    %375 = arith.addf %372, %374 : vector<8x1xf32>
    %cst_153 = arith.constant dense<0.000000e+00> : vector<8xf32>
    %376 = vector.multi_reduction <add>, %370, %cst_153 [1] : vector<8x8xf32> to vector<8xf32>
    %377 = vector.shape_cast %376 : vector<8xf32> to vector<8x1xf32>
    %378 = arith.addf %375, %377 : vector<8x1xf32>
    %379 = vector.extract_strided_slice %337 {offsets = [0, 0], sizes = [8, 8], strides = [1, 1]} : vector<8x32xf32> to vector<8x8xf32>
    %cst_154 = arith.constant dense<0.000000e+00> : vector<8x8xf32>
    %380 = tpu.matmul %364, %379, %cst_154 {dimension_numbers = #tpu.dot_dimension_numbers<[1], [0], [0], [1], [0, 0, 1, 1], [], []>} : vector<8x8xf32>, vector<8x8xf32>, vector<8x8xf32> -> vector<8x8xf32>
    %381 = vector.extract_strided_slice %338 {offsets = [0, 0], sizes = [8, 8], strides = [1, 1]} : vector<8x32xf32> to vector<8x8xf32>
    %cst_155 = arith.constant dense<0.000000e+00> : vector<8x8xf32>
    %382 = tpu.matmul %367, %381, %cst_155 {dimension_numbers = #tpu.dot_dimension_numbers<[1], [0], [0], [1], [0, 0, 1, 1], [], []>} : vector<8x8xf32>, vector<8x8xf32>, vector<8x8xf32> -> vector<8x8xf32>
    %383 = arith.addf %380, %382 : vector<8x8xf32>
    %384 = vector.extract_strided_slice %339 {offsets = [0, 0], sizes = [8, 8], strides = [1, 1]} : vector<8x32xf32> to vector<8x8xf32>
    %cst_156 = arith.constant dense<0.000000e+00> : vector<8x8xf32>
    %385 = tpu.matmul %370, %384, %cst_156 {dimension_numbers = #tpu.dot_dimension_numbers<[1], [0], [0], [1], [0, 0, 1, 1], [], []>} : vector<8x8xf32>, vector<8x8xf32>, vector<8x8xf32> -> vector<8x8xf32>
    %386 = arith.addf %383, %385 : vector<8x8xf32>
    %387 = tpu.reciprocal %378 {approx = true} : vector<8x1xf32> -> vector<8x1xf32>
    %388 = vector.broadcast %387 : vector<8x1xf32> to vector<8x8xf32>
    %389 = arith.mulf %386, %388 : vector<8x8xf32>
    %390 = vector.extract_strided_slice %28 {offsets = [0, 0], sizes = [8, 32], strides = [1, 1]} : vector<32x32xf32> to vector<8x32xf32>
    %cst_157 = arith.constant dense<0.000000e+00> : vector<8x32xf32>
    %391 = tpu.matmul %389, %390, %cst_157 {dimension_numbers = #tpu.dot_dimension_numbers<[1], [0], [0], [1], [0, 0, 1, 1], [], []>} : vector<8x8xf32>, vector<8x32xf32>, vector<8x32xf32> -> vector<8x32xf32>
    %392 = arith.addf %340, %391 : vector<8x32xf32>
    %393 = vector.extract_strided_slice %333 {offsets = [0, 8], sizes = [8, 8], strides = [1, 1]} : vector<8x32xf32> to vector<8x8xf32>
    %394 = vector.extract_strided_slice %334 {offsets = [0, 8], sizes = [8, 8], strides = [1, 1]} : vector<8x32xf32> to vector<8x8xf32>
    %cst_158 = arith.constant dense<0.000000e+00> : vector<8x8xf32>
    %395 = tpu.matmul %393, %394, %cst_158 {dimension_numbers = #tpu.dot_dimension_numbers<[1], [1], [0], [0], [0, 0, 1, 0], [], []>} : vector<8x8xf32>, vector<8x8xf32>, vector<8x8xf32> -> vector<8x8xf32>
    %cst_159 = arith.constant 0.353553385 : f32
    %396 = vector.broadcast %cst_159 : f32 to vector<8x8xf32>
    %397 = arith.mulf %395, %396 : vector<8x8xf32>
    %398 = vector.extract_strided_slice %335 {offsets = [0, 8], sizes = [8, 8], strides = [1, 1]} : vector<8x32xf32> to vector<8x8xf32>
    %cst_160 = arith.constant dense<0.000000e+00> : vector<8x8xf32>
    %399 = tpu.matmul %393, %398, %cst_160 {dimension_numbers = #tpu.dot_dimension_numbers<[1], [1], [0], [0], [0, 0, 1, 0], [], []>} : vector<8x8xf32>, vector<8x8xf32>, vector<8x8xf32> -> vector<8x8xf32>
    %cst_161 = arith.constant 0.353553385 : f32
    %400 = vector.broadcast %cst_161 : f32 to vector<8x8xf32>
    %401 = arith.mulf %399, %400 : vector<8x8xf32>
    %402 = vector.extract_strided_slice %336 {offsets = [0, 8], sizes = [8, 8], strides = [1, 1]} : vector<8x32xf32> to vector<8x8xf32>
    %cst_162 = arith.constant dense<0.000000e+00> : vector<8x8xf32>
    %403 = tpu.matmul %393, %402, %cst_162 {dimension_numbers = #tpu.dot_dimension_numbers<[1], [1], [0], [0], [0, 0, 1, 0], [], []>} : vector<8x8xf32>, vector<8x8xf32>, vector<8x8xf32> -> vector<8x8xf32>
    %cst_163 = arith.constant 0.353553385 : f32
    %404 = vector.broadcast %cst_163 : f32 to vector<8x8xf32>
    %405 = arith.mulf %403, %404 : vector<8x8xf32>
    %cst_164 = arith.constant dense<0xFF800000> : vector<8xf32>
    %406 = vector.multi_reduction <maximumf>, %397, %cst_164 [1] : vector<8x8xf32> to vector<8xf32>
    %407 = vector.shape_cast %406 : vector<8xf32> to vector<8x1xf32>
    %cst_165 = arith.constant dense<0xFF800000> : vector<8xf32>
    %408 = vector.multi_reduction <maximumf>, %401, %cst_165 [1] : vector<8x8xf32> to vector<8xf32>
    %409 = vector.shape_cast %408 : vector<8xf32> to vector<8x1xf32>
    %410 = arith.maximumf %407, %409 : vector<8x1xf32>
    %cst_166 = arith.constant dense<0xFF800000> : vector<8xf32>
    %411 = vector.multi_reduction <maximumf>, %405, %cst_166 [1] : vector<8x8xf32> to vector<8xf32>
    %412 = vector.shape_cast %411 : vector<8xf32> to vector<8x1xf32>
    %413 = arith.maximumf %410, %412 : vector<8x1xf32>
    %414 = vector.broadcast %413 : vector<8x1xf32> to vector<8x8xf32>
    %415 = arith.subf %397, %414 : vector<8x8xf32>
    %416 = math.exp %415 : vector<8x8xf32>
    %417 = vector.broadcast %413 : vector<8x1xf32> to vector<8x8xf32>
    %418 = arith.subf %401, %417 : vector<8x8xf32>
    %419 = math.exp %418 : vector<8x8xf32>
    %420 = vector.broadcast %413 : vector<8x1xf32> to vector<8x8xf32>
    %421 = arith.subf %405, %420 : vector<8x8xf32>
    %422 = math.exp %421 : vector<8x8xf32>
    %cst_167 = arith.constant dense<0.000000e+00> : vector<8xf32>
    %423 = vector.multi_reduction <add>, %416, %cst_167 [1] : vector<8x8xf32> to vector<8xf32>
    %424 = vector.shape_cast %423 : vector<8xf32> to vector<8x1xf32>
    %cst_168 = arith.constant dense<0.000000e+00> : vector<8xf32>
    %425 = vector.multi_reduction <add>, %419, %cst_168 [1] : vector<8x8xf32> to vector<8xf32>
    %426 = vector.shape_cast %425 : vector<8xf32> to vector<8x1xf32>
    %427 = arith.addf %424, %426 : vector<8x1xf32>
    %cst_169 = arith.constant dense<0.000000e+00> : vector<8xf32>
    %428 = vector.multi_reduction <add>, %422, %cst_169 [1] : vector<8x8xf32> to vector<8xf32>
    %429 = vector.shape_cast %428 : vector<8xf32> to vector<8x1xf32>
    %430 = arith.addf %427, %429 : vector<8x1xf32>
    %431 = vector.extract_strided_slice %337 {offsets = [0, 8], sizes = [8, 8], strides = [1, 1]} : vector<8x32xf32> to vector<8x8xf32>
    %cst_170 = arith.constant dense<0.000000e+00> : vector<8x8xf32>
    %432 = tpu.matmul %416, %431, %cst_170 {dimension_numbers = #tpu.dot_dimension_numbers<[1], [0], [0], [1], [0, 0, 1, 1], [], []>} : vector<8x8xf32>, vector<8x8xf32>, vector<8x8xf32> -> vector<8x8xf32>
    %433 = vector.extract_strided_slice %338 {offsets = [0, 8], sizes = [8, 8], strides = [1, 1]} : vector<8x32xf32> to vector<8x8xf32>
    %cst_171 = arith.constant dense<0.000000e+00> : vector<8x8xf32>
    %434 = tpu.matmul %419, %433, %cst_171 {dimension_numbers = #tpu.dot_dimension_numbers<[1], [0], [0], [1], [0, 0, 1, 1], [], []>} : vector<8x8xf32>, vector<8x8xf32>, vector<8x8xf32> -> vector<8x8xf32>
    %435 = arith.addf %432, %434 : vector<8x8xf32>
    %436 = vector.extract_strided_slice %339 {offsets = [0, 8], sizes = [8, 8], strides = [1, 1]} : vector<8x32xf32> to vector<8x8xf32>
    %cst_172 = arith.constant dense<0.000000e+00> : vector<8x8xf32>
    %437 = tpu.matmul %422, %436, %cst_172 {dimension_numbers = #tpu.dot_dimension_numbers<[1], [0], [0], [1], [0, 0, 1, 1], [], []>} : vector<8x8xf32>, vector<8x8xf32>, vector<8x8xf32> -> vector<8x8xf32>
    %438 = arith.addf %435, %437 : vector<8x8xf32>
    %439 = tpu.reciprocal %430 {approx = true} : vector<8x1xf32> -> vector<8x1xf32>
    %440 = vector.broadcast %439 : vector<8x1xf32> to vector<8x8xf32>
    %441 = arith.mulf %438, %440 : vector<8x8xf32>
    %442 = vector.extract_strided_slice %28 {offsets = [8, 0], sizes = [8, 32], strides = [1, 1]} : vector<32x32xf32> to vector<8x32xf32>
    %cst_173 = arith.constant dense<0.000000e+00> : vector<8x32xf32>
    %443 = tpu.matmul %441, %442, %cst_173 {dimension_numbers = #tpu.dot_dimension_numbers<[1], [0], [0], [1], [0, 0, 1, 1], [], []>} : vector<8x8xf32>, vector<8x32xf32>, vector<8x32xf32> -> vector<8x32xf32>
    %444 = arith.addf %392, %443 : vector<8x32xf32>
    %445 = vector.extract_strided_slice %333 {offsets = [0, 16], sizes = [8, 8], strides = [1, 1]} : vector<8x32xf32> to vector<8x8xf32>
    %446 = vector.extract_strided_slice %334 {offsets = [0, 16], sizes = [8, 8], strides = [1, 1]} : vector<8x32xf32> to vector<8x8xf32>
    %cst_174 = arith.constant dense<0.000000e+00> : vector<8x8xf32>
    %447 = tpu.matmul %445, %446, %cst_174 {dimension_numbers = #tpu.dot_dimension_numbers<[1], [1], [0], [0], [0, 0, 1, 0], [], []>} : vector<8x8xf32>, vector<8x8xf32>, vector<8x8xf32> -> vector<8x8xf32>
    %cst_175 = arith.constant 0.353553385 : f32
    %448 = vector.broadcast %cst_175 : f32 to vector<8x8xf32>
    %449 = arith.mulf %447, %448 : vector<8x8xf32>
    %450 = vector.extract_strided_slice %335 {offsets = [0, 16], sizes = [8, 8], strides = [1, 1]} : vector<8x32xf32> to vector<8x8xf32>
    %cst_176 = arith.constant dense<0.000000e+00> : vector<8x8xf32>
    %451 = tpu.matmul %445, %450, %cst_176 {dimension_numbers = #tpu.dot_dimension_numbers<[1], [1], [0], [0], [0, 0, 1, 0], [], []>} : vector<8x8xf32>, vector<8x8xf32>, vector<8x8xf32> -> vector<8x8xf32>
    %cst_177 = arith.constant 0.353553385 : f32
    %452 = vector.broadcast %cst_177 : f32 to vector<8x8xf32>
    %453 = arith.mulf %451, %452 : vector<8x8xf32>
    %454 = vector.extract_strided_slice %336 {offsets = [0, 16], sizes = [8, 8], strides = [1, 1]} : vector<8x32xf32> to vector<8x8xf32>
    %cst_178 = arith.constant dense<0.000000e+00> : vector<8x8xf32>
    %455 = tpu.matmul %445, %454, %cst_178 {dimension_numbers = #tpu.dot_dimension_numbers<[1], [1], [0], [0], [0, 0, 1, 0], [], []>} : vector<8x8xf32>, vector<8x8xf32>, vector<8x8xf32> -> vector<8x8xf32>
    %cst_179 = arith.constant 0.353553385 : f32
    %456 = vector.broadcast %cst_179 : f32 to vector<8x8xf32>
    %457 = arith.mulf %455, %456 : vector<8x8xf32>
    %cst_180 = arith.constant dense<0xFF800000> : vector<8xf32>
    %458 = vector.multi_reduction <maximumf>, %449, %cst_180 [1] : vector<8x8xf32> to vector<8xf32>
    %459 = vector.shape_cast %458 : vector<8xf32> to vector<8x1xf32>
    %cst_181 = arith.constant dense<0xFF800000> : vector<8xf32>
    %460 = vector.multi_reduction <maximumf>, %453, %cst_181 [1] : vector<8x8xf32> to vector<8xf32>
    %461 = vector.shape_cast %460 : vector<8xf32> to vector<8x1xf32>
    %462 = arith.maximumf %459, %461 : vector<8x1xf32>
    %cst_182 = arith.constant dense<0xFF800000> : vector<8xf32>
    %463 = vector.multi_reduction <maximumf>, %457, %cst_182 [1] : vector<8x8xf32> to vector<8xf32>
    %464 = vector.shape_cast %463 : vector<8xf32> to vector<8x1xf32>
    %465 = arith.maximumf %462, %464 : vector<8x1xf32>
    %466 = vector.broadcast %465 : vector<8x1xf32> to vector<8x8xf32>
    %467 = arith.subf %449, %466 : vector<8x8xf32>
    %468 = math.exp %467 : vector<8x8xf32>
    %469 = vector.broadcast %465 : vector<8x1xf32> to vector<8x8xf32>
    %470 = arith.subf %453, %469 : vector<8x8xf32>
    %471 = math.exp %470 : vector<8x8xf32>
    %472 = vector.broadcast %465 : vector<8x1xf32> to vector<8x8xf32>
    %473 = arith.subf %457, %472 : vector<8x8xf32>
    %474 = math.exp %473 : vector<8x8xf32>
    %cst_183 = arith.constant dense<0.000000e+00> : vector<8xf32>
    %475 = vector.multi_reduction <add>, %468, %cst_183 [1] : vector<8x8xf32> to vector<8xf32>
    %476 = vector.shape_cast %475 : vector<8xf32> to vector<8x1xf32>
    %cst_184 = arith.constant dense<0.000000e+00> : vector<8xf32>
    %477 = vector.multi_reduction <add>, %471, %cst_184 [1] : vector<8x8xf32> to vector<8xf32>
    %478 = vector.shape_cast %477 : vector<8xf32> to vector<8x1xf32>
    %479 = arith.addf %476, %478 : vector<8x1xf32>
    %cst_185 = arith.constant dense<0.000000e+00> : vector<8xf32>
    %480 = vector.multi_reduction <add>, %474, %cst_185 [1] : vector<8x8xf32> to vector<8xf32>
    %481 = vector.shape_cast %480 : vector<8xf32> to vector<8x1xf32>
    %482 = arith.addf %479, %481 : vector<8x1xf32>
    %483 = vector.extract_strided_slice %337 {offsets = [0, 16], sizes = [8, 8], strides = [1, 1]} : vector<8x32xf32> to vector<8x8xf32>
    %cst_186 = arith.constant dense<0.000000e+00> : vector<8x8xf32>
    %484 = tpu.matmul %468, %483, %cst_186 {dimension_numbers = #tpu.dot_dimension_numbers<[1], [0], [0], [1], [0, 0, 1, 1], [], []>} : vector<8x8xf32>, vector<8x8xf32>, vector<8x8xf32> -> vector<8x8xf32>
    %485 = vector.extract_strided_slice %338 {offsets = [0, 16], sizes = [8, 8], strides = [1, 1]} : vector<8x32xf32> to vector<8x8xf32>
    %cst_187 = arith.constant dense<0.000000e+00> : vector<8x8xf32>
    %486 = tpu.matmul %471, %485, %cst_187 {dimension_numbers = #tpu.dot_dimension_numbers<[1], [0], [0], [1], [0, 0, 1, 1], [], []>} : vector<8x8xf32>, vector<8x8xf32>, vector<8x8xf32> -> vector<8x8xf32>
    %487 = arith.addf %484, %486 : vector<8x8xf32>
    %488 = vector.extract_strided_slice %339 {offsets = [0, 16], sizes = [8, 8], strides = [1, 1]} : vector<8x32xf32> to vector<8x8xf32>
    %cst_188 = arith.constant dense<0.000000e+00> : vector<8x8xf32>
    %489 = tpu.matmul %474, %488, %cst_188 {dimension_numbers = #tpu.dot_dimension_numbers<[1], [0], [0], [1], [0, 0, 1, 1], [], []>} : vector<8x8xf32>, vector<8x8xf32>, vector<8x8xf32> -> vector<8x8xf32>
    %490 = arith.addf %487, %489 : vector<8x8xf32>
    %491 = tpu.reciprocal %482 {approx = true} : vector<8x1xf32> -> vector<8x1xf32>
    %492 = vector.broadcast %491 : vector<8x1xf32> to vector<8x8xf32>
    %493 = arith.mulf %490, %492 : vector<8x8xf32>
    %494 = vector.extract_strided_slice %28 {offsets = [16, 0], sizes = [8, 32], strides = [1, 1]} : vector<32x32xf32> to vector<8x32xf32>
    %cst_189 = arith.constant dense<0.000000e+00> : vector<8x32xf32>
    %495 = tpu.matmul %493, %494, %cst_189 {dimension_numbers = #tpu.dot_dimension_numbers<[1], [0], [0], [1], [0, 0, 1, 1], [], []>} : vector<8x8xf32>, vector<8x32xf32>, vector<8x32xf32> -> vector<8x32xf32>
    %496 = arith.addf %444, %495 : vector<8x32xf32>
    %497 = vector.extract_strided_slice %333 {offsets = [0, 24], sizes = [8, 8], strides = [1, 1]} : vector<8x32xf32> to vector<8x8xf32>
    %498 = vector.extract_strided_slice %334 {offsets = [0, 24], sizes = [8, 8], strides = [1, 1]} : vector<8x32xf32> to vector<8x8xf32>
    %cst_190 = arith.constant dense<0.000000e+00> : vector<8x8xf32>
    %499 = tpu.matmul %497, %498, %cst_190 {dimension_numbers = #tpu.dot_dimension_numbers<[1], [1], [0], [0], [0, 0, 1, 0], [], []>} : vector<8x8xf32>, vector<8x8xf32>, vector<8x8xf32> -> vector<8x8xf32>
    %cst_191 = arith.constant 0.353553385 : f32
    %500 = vector.broadcast %cst_191 : f32 to vector<8x8xf32>
    %501 = arith.mulf %499, %500 : vector<8x8xf32>
    %502 = vector.extract_strided_slice %335 {offsets = [0, 24], sizes = [8, 8], strides = [1, 1]} : vector<8x32xf32> to vector<8x8xf32>
    %cst_192 = arith.constant dense<0.000000e+00> : vector<8x8xf32>
    %503 = tpu.matmul %497, %502, %cst_192 {dimension_numbers = #tpu.dot_dimension_numbers<[1], [1], [0], [0], [0, 0, 1, 0], [], []>} : vector<8x8xf32>, vector<8x8xf32>, vector<8x8xf32> -> vector<8x8xf32>
    %cst_193 = arith.constant 0.353553385 : f32
    %504 = vector.broadcast %cst_193 : f32 to vector<8x8xf32>
    %505 = arith.mulf %503, %504 : vector<8x8xf32>
    %506 = vector.extract_strided_slice %336 {offsets = [0, 24], sizes = [8, 8], strides = [1, 1]} : vector<8x32xf32> to vector<8x8xf32>
    %cst_194 = arith.constant dense<0.000000e+00> : vector<8x8xf32>
    %507 = tpu.matmul %497, %506, %cst_194 {dimension_numbers = #tpu.dot_dimension_numbers<[1], [1], [0], [0], [0, 0, 1, 0], [], []>} : vector<8x8xf32>, vector<8x8xf32>, vector<8x8xf32> -> vector<8x8xf32>
    %cst_195 = arith.constant 0.353553385 : f32
    %508 = vector.broadcast %cst_195 : f32 to vector<8x8xf32>
    %509 = arith.mulf %507, %508 : vector<8x8xf32>
    %cst_196 = arith.constant dense<0xFF800000> : vector<8xf32>
    %510 = vector.multi_reduction <maximumf>, %501, %cst_196 [1] : vector<8x8xf32> to vector<8xf32>
    %511 = vector.shape_cast %510 : vector<8xf32> to vector<8x1xf32>
    %cst_197 = arith.constant dense<0xFF800000> : vector<8xf32>
    %512 = vector.multi_reduction <maximumf>, %505, %cst_197 [1] : vector<8x8xf32> to vector<8xf32>
    %513 = vector.shape_cast %512 : vector<8xf32> to vector<8x1xf32>
    %514 = arith.maximumf %511, %513 : vector<8x1xf32>
    %cst_198 = arith.constant dense<0xFF800000> : vector<8xf32>
    %515 = vector.multi_reduction <maximumf>, %509, %cst_198 [1] : vector<8x8xf32> to vector<8xf32>
    %516 = vector.shape_cast %515 : vector<8xf32> to vector<8x1xf32>
    %517 = arith.maximumf %514, %516 : vector<8x1xf32>
    %518 = vector.broadcast %517 : vector<8x1xf32> to vector<8x8xf32>
    %519 = arith.subf %501, %518 : vector<8x8xf32>
    %520 = math.exp %519 : vector<8x8xf32>
    %521 = vector.broadcast %517 : vector<8x1xf32> to vector<8x8xf32>
    %522 = arith.subf %505, %521 : vector<8x8xf32>
    %523 = math.exp %522 : vector<8x8xf32>
    %524 = vector.broadcast %517 : vector<8x1xf32> to vector<8x8xf32>
    %525 = arith.subf %509, %524 : vector<8x8xf32>
    %526 = math.exp %525 : vector<8x8xf32>
    %cst_199 = arith.constant dense<0.000000e+00> : vector<8xf32>
    %527 = vector.multi_reduction <add>, %520, %cst_199 [1] : vector<8x8xf32> to vector<8xf32>
    %528 = vector.shape_cast %527 : vector<8xf32> to vector<8x1xf32>
    %cst_200 = arith.constant dense<0.000000e+00> : vector<8xf32>
    %529 = vector.multi_reduction <add>, %523, %cst_200 [1] : vector<8x8xf32> to vector<8xf32>
    %530 = vector.shape_cast %529 : vector<8xf32> to vector<8x1xf32>
    %531 = arith.addf %528, %530 : vector<8x1xf32>
    %cst_201 = arith.constant dense<0.000000e+00> : vector<8xf32>
    %532 = vector.multi_reduction <add>, %526, %cst_201 [1] : vector<8x8xf32> to vector<8xf32>
    %533 = vector.shape_cast %532 : vector<8xf32> to vector<8x1xf32>
    %534 = arith.addf %531, %533 : vector<8x1xf32>
    %535 = vector.extract_strided_slice %337 {offsets = [0, 24], sizes = [8, 8], strides = [1, 1]} : vector<8x32xf32> to vector<8x8xf32>
    %cst_202 = arith.constant dense<0.000000e+00> : vector<8x8xf32>
    %536 = tpu.matmul %520, %535, %cst_202 {dimension_numbers = #tpu.dot_dimension_numbers<[1], [0], [0], [1], [0, 0, 1, 1], [], []>} : vector<8x8xf32>, vector<8x8xf32>, vector<8x8xf32> -> vector<8x8xf32>
    %537 = vector.extract_strided_slice %338 {offsets = [0, 24], sizes = [8, 8], strides = [1, 1]} : vector<8x32xf32> to vector<8x8xf32>
    %cst_203 = arith.constant dense<0.000000e+00> : vector<8x8xf32>
    %538 = tpu.matmul %523, %537, %cst_203 {dimension_numbers = #tpu.dot_dimension_numbers<[1], [0], [0], [1], [0, 0, 1, 1], [], []>} : vector<8x8xf32>, vector<8x8xf32>, vector<8x8xf32> -> vector<8x8xf32>
    %539 = arith.addf %536, %538 : vector<8x8xf32>
    %540 = vector.extract_strided_slice %339 {offsets = [0, 24], sizes = [8, 8], strides = [1, 1]} : vector<8x32xf32> to vector<8x8xf32>
    %cst_204 = arith.constant dense<0.000000e+00> : vector<8x8xf32>
    %541 = tpu.matmul %526, %540, %cst_204 {dimension_numbers = #tpu.dot_dimension_numbers<[1], [0], [0], [1], [0, 0, 1, 1], [], []>} : vector<8x8xf32>, vector<8x8xf32>, vector<8x8xf32> -> vector<8x8xf32>
    %542 = arith.addf %539, %541 : vector<8x8xf32>
    %543 = tpu.reciprocal %534 {approx = true} : vector<8x1xf32> -> vector<8x1xf32>
    %544 = vector.broadcast %543 : vector<8x1xf32> to vector<8x8xf32>
    %545 = arith.mulf %542, %544 : vector<8x8xf32>
    %546 = vector.extract_strided_slice %28 {offsets = [24, 0], sizes = [8, 32], strides = [1, 1]} : vector<32x32xf32> to vector<8x32xf32>
    %cst_205 = arith.constant dense<0.000000e+00> : vector<8x32xf32>
    %547 = tpu.matmul %545, %546, %cst_205 {dimension_numbers = #tpu.dot_dimension_numbers<[1], [0], [0], [1], [0, 0, 1, 1], [], []>} : vector<8x8xf32>, vector<8x32xf32>, vector<8x32xf32> -> vector<8x32xf32>
    %548 = arith.addf %496, %547 : vector<8x32xf32>
    %549 = vector.broadcast %29 : vector<1x32xf32> to vector<8x32xf32>
    %550 = arith.addf %548, %549 : vector<8x32xf32>
    %c8 = arith.constant 8 : index
    %c0_206 = arith.constant 0 : index
    %551 = vector.load %arg50[%c8, %c0_206] : memref<16x32xf32, #tpu.memory_space<vmem>>, vector<8x32xf32>
    tpu.vector_store %arg50[%c8, %c0_206], %550 {strides = array<i32>} : memref<16x32xf32, #tpu.memory_space<vmem>>, vector<8x32xf32>,
    %c0_207 = arith.constant 0 : index
    %c0_208 = arith.constant 0 : index
    %552 = vector.load %arg50[%c0_207, %c0_208] : memref<16x32xf32, #tpu.memory_space<vmem>>, vector<16x32xf32>
    %553 = arith.addf %75, %552 : vector<16x32xf32>
    %cst_209 = arith.constant dense<0.000000e+00> : vector<16x32xf32>
    %554 = tpu.matmul %553, %30, %cst_209 {dimension_numbers = #tpu.dot_dimension_numbers<[1], [0], [0], [1], [0, 0, 1, 1], [], []>} : vector<16x32xf32>, vector<32x32xf32>, vector<16x32xf32> -> vector<16x32xf32>
    %555 = vector.broadcast %31 : vector<1x32xf32> to vector<16x32xf32>
    %556 = arith.addf %554, %555 : vector<16x32xf32>
    %cst_210 = arith.constant 0.000000e+00 : f32
    %557 = vector.broadcast %cst_210 : f32 to vector<16x32xf32>
    %558 = arith.subf %557, %556 : vector<16x32xf32>
    %559 = math.exp %558 : vector<16x32xf32>
    %cst_211 = arith.constant 1.000000e+00 : f32
    %560 = vector.broadcast %cst_211 : f32 to vector<16x32xf32>
    %561 = arith.addf %560, %559 : vector<16x32xf32>
    %562 = tpu.reciprocal %561 {approx = true} : vector<16x32xf32> -> vector<16x32xf32>
    %563 = arith.mulf %556, %562 : vector<16x32xf32>
    %cst_212 = arith.constant dense<0.000000e+00> : vector<16x32xf32>
    %564 = tpu.matmul %563, %32, %cst_212 {dimension_numbers = #tpu.dot_dimension_numbers<[1], [0], [0], [1], [0, 0, 1, 1], [], []>} : vector<16x32xf32>, vector<32x32xf32>, vector<16x32xf32> -> vector<16x32xf32>
    %565 = vector.broadcast %33 : vector<1x32xf32> to vector<16x32xf32>
    %566 = arith.addf %564, %565 : vector<16x32xf32>
    %cst_213 = arith.constant 0.000000e+00 : f32
    %567 = vector.broadcast %cst_213 : f32 to vector<16x32xf32>
    %568 = arith.subf %567, %566 : vector<16x32xf32>
    %569 = math.exp %568 : vector<16x32xf32>
    %cst_214 = arith.constant 1.000000e+00 : f32
    %570 = vector.broadcast %cst_214 : f32 to vector<16x32xf32>
    %571 = arith.addf %570, %569 : vector<16x32xf32>
    %572 = tpu.reciprocal %571 {approx = true} : vector<16x32xf32> -> vector<16x32xf32>
    %573 = arith.mulf %566, %572 : vector<16x32xf32>
    %cst_215 = arith.constant dense<0.000000e+00> : vector<16x32xf32>
    %574 = tpu.matmul %573, %34, %cst_215 {dimension_numbers = #tpu.dot_dimension_numbers<[1], [0], [0], [1], [0, 0, 1, 1], [], []>} : vector<16x32xf32>, vector<32x32xf32>, vector<16x32xf32> -> vector<16x32xf32>
    %575 = vector.broadcast %35 : vector<1x32xf32> to vector<16x32xf32>
    %576 = arith.addf %574, %575 : vector<16x32xf32>
    %c0_216 = arith.constant 0 : index
    %c0_217 = arith.constant 0 : index
    %577 = vector.load %arg28[%c0_216, %c0_217] : memref<1x32xf32, #tpu.memory_space<vmem>>, vector<1x32xf32>
    %c0_218 = arith.constant 0 : index
    %c0_219 = arith.constant 0 : index
    %578 = vector.load %arg29[%c0_218, %c0_219] : memref<1x32xf32, #tpu.memory_space<vmem>>, vector<1x32xf32>
    %c0_220 = arith.constant 0 : index
    %c0_221 = arith.constant 0 : index
    %579 = vector.load %arg30[%c0_220, %c0_221] : memref<32x32xf32, #tpu.memory_space<vmem>>, vector<32x32xf32>
    %c0_222 = arith.constant 0 : index
    %c0_223 = arith.constant 0 : index
    %580 = vector.load %arg31[%c0_222, %c0_223] : memref<1x32xf32, #tpu.memory_space<vmem>>, vector<1x32xf32>
    %c0_224 = arith.constant 0 : index
    %c0_225 = arith.constant 0 : index
    %581 = vector.load %arg32[%c0_224, %c0_225] : memref<32x64xf32, #tpu.memory_space<vmem>>, vector<32x64xf32>
    %c0_226 = arith.constant 0 : index
    %c0_227 = arith.constant 0 : index
    %582 = vector.load %arg33[%c0_226, %c0_227] : memref<1x64xf32, #tpu.memory_space<vmem>>, vector<1x64xf32>
    %c0_228 = arith.constant 0 : index
    %c0_229 = arith.constant 0 : index
    %583 = vector.load %arg34[%c0_228, %c0_229] : memref<32x64xf32, #tpu.memory_space<vmem>>, vector<32x64xf32>
    %c0_230 = arith.constant 0 : index
    %c0_231 = arith.constant 0 : index
    %584 = vector.load %arg35[%c0_230, %c0_231] : memref<1x64xf32, #tpu.memory_space<vmem>>, vector<1x64xf32>
    %c0_232 = arith.constant 0 : index
    %c0_233 = arith.constant 0 : index
    %585 = vector.load %arg36[%c0_232, %c0_233] : memref<32x64xf32, #tpu.memory_space<vmem>>, vector<32x64xf32>
    %c0_234 = arith.constant 0 : index
    %c0_235 = arith.constant 0 : index
    %586 = vector.load %arg37[%c0_234, %c0_235] : memref<1x64xf32, #tpu.memory_space<vmem>>, vector<1x64xf32>
    %c0_236 = arith.constant 0 : index
    %c0_237 = arith.constant 0 : index
    %587 = vector.load %arg38[%c0_236, %c0_237] : memref<32x32xf32, #tpu.memory_space<vmem>>, vector<32x32xf32>
    %c0_238 = arith.constant 0 : index
    %c0_239 = arith.constant 0 : index
    %588 = vector.load %arg39[%c0_238, %c0_239] : memref<1x32xf32, #tpu.memory_space<vmem>>, vector<1x32xf32>
    %c0_240 = arith.constant 0 : index
    %c0_241 = arith.constant 0 : index
    %589 = vector.load %arg40[%c0_240, %c0_241] : memref<32x32xf32, #tpu.memory_space<vmem>>, vector<32x32xf32>
    %c0_242 = arith.constant 0 : index
    %c0_243 = arith.constant 0 : index
    %590 = vector.load %arg41[%c0_242, %c0_243] : memref<1x32xf32, #tpu.memory_space<vmem>>, vector<1x32xf32>
    %c0_244 = arith.constant 0 : index
    %c0_245 = arith.constant 0 : index
    %591 = vector.load %arg42[%c0_244, %c0_245] : memref<32x32xf32, #tpu.memory_space<vmem>>, vector<32x32xf32>
    %c0_246 = arith.constant 0 : index
    %c0_247 = arith.constant 0 : index
    %592 = vector.load %arg43[%c0_246, %c0_247] : memref<1x32xf32, #tpu.memory_space<vmem>>, vector<1x32xf32>
    %c0_248 = arith.constant 0 : index
    %c0_249 = arith.constant 0 : index
    %593 = vector.load %arg44[%c0_248, %c0_249] : memref<32x32xf32, #tpu.memory_space<vmem>>, vector<32x32xf32>
    %c0_250 = arith.constant 0 : index
    %c0_251 = arith.constant 0 : index
    %594 = vector.load %arg45[%c0_250, %c0_251] : memref<1x32xf32, #tpu.memory_space<vmem>>, vector<1x32xf32>
    %c0_252 = arith.constant 0 : index
    %c0_253 = arith.constant 0 : index
    %595 = vector.load %arg46[%c0_252, %c0_253] : memref<1x1xf32, #tpu.memory_space<vmem>>, vector<1x1xf32>
    %cst_254 = arith.constant dense<0.000000e+00> : vector<16xf32>
    %596 = vector.multi_reduction <add>, %17, %cst_254 [1] : vector<16x32xf32> to vector<16xf32>
    %597 = vector.shape_cast %596 : vector<16xf32> to vector<16x1xf32>
    %cst_255 = arith.constant 3.200000e+01 : f32
    %598 = vector.broadcast %cst_255 : f32 to vector<16x1xf32>
    %599 = arith.divf %597, %598 : vector<16x1xf32>
    %600 = vector.broadcast %599 : vector<16x1xf32> to vector<16x32xf32>
    %601 = arith.subf %17, %600 : vector<16x32xf32>
    %602 = arith.mulf %601, %601 : vector<16x32xf32>
    %cst_256 = arith.constant dense<0.000000e+00> : vector<16xf32>
    %603 = vector.multi_reduction <add>, %602, %cst_256 [1] : vector<16x32xf32> to vector<16xf32>
    %604 = vector.shape_cast %603 : vector<16xf32> to vector<16x1xf32>
    %cst_257 = arith.constant 3.200000e+01 : f32
    %605 = vector.broadcast %cst_257 : f32 to vector<16x1xf32>
    %606 = arith.divf %604, %605 : vector<16x1xf32>
    %cst_258 = arith.constant 9.99999974E-6 : f32
    %607 = vector.broadcast %cst_258 : f32 to vector<16x1xf32>
    %608 = arith.addf %606, %607 : vector<16x1xf32>
    %609 = math.rsqrt %608 : vector<16x1xf32>
    %610 = vector.broadcast %609 : vector<16x1xf32> to vector<16x32xf32>
    %611 = arith.mulf %601, %610 : vector<16x32xf32>
    %612 = vector.broadcast %577 : vector<1x32xf32> to vector<16x32xf32>
    %613 = arith.mulf %611, %612 : vector<16x32xf32>
    %614 = vector.broadcast %578 : vector<1x32xf32> to vector<16x32xf32>
    %615 = arith.addf %613, %614 : vector<16x32xf32>
    %cst_259 = arith.constant dense<0.000000e+00> : vector<16xf32>
    %616 = vector.multi_reduction <add>, %576, %cst_259 [1] : vector<16x32xf32> to vector<16xf32>
    %617 = vector.shape_cast %616 : vector<16xf32> to vector<16x1xf32>
    %cst_260 = arith.constant 3.200000e+01 : f32
    %618 = vector.broadcast %cst_260 : f32 to vector<16x1xf32>
    %619 = arith.divf %617, %618 : vector<16x1xf32>
    %620 = vector.broadcast %619 : vector<16x1xf32> to vector<16x32xf32>
    %621 = arith.subf %576, %620 : vector<16x32xf32>
    %622 = arith.mulf %621, %621 : vector<16x32xf32>
    %cst_261 = arith.constant dense<0.000000e+00> : vector<16xf32>
    %623 = vector.multi_reduction <add>, %622, %cst_261 [1] : vector<16x32xf32> to vector<16xf32>
    %624 = vector.shape_cast %623 : vector<16xf32> to vector<16x1xf32>
    %cst_262 = arith.constant 3.200000e+01 : f32
    %625 = vector.broadcast %cst_262 : f32 to vector<16x1xf32>
    %626 = arith.divf %624, %625 : vector<16x1xf32>
    %cst_263 = arith.constant 9.99999974E-6 : f32
    %627 = vector.broadcast %cst_263 : f32 to vector<16x1xf32>
    %628 = arith.addf %626, %627 : vector<16x1xf32>
    %629 = math.rsqrt %628 : vector<16x1xf32>
    %630 = vector.broadcast %629 : vector<16x1xf32> to vector<16x32xf32>
    %631 = arith.mulf %621, %630 : vector<16x32xf32>
    %632 = vector.broadcast %577 : vector<1x32xf32> to vector<16x32xf32>
    %633 = arith.mulf %631, %632 : vector<16x32xf32>
    %634 = vector.broadcast %578 : vector<1x32xf32> to vector<16x32xf32>
    %635 = arith.addf %633, %634 : vector<16x32xf32>
    %cst_264 = arith.constant dense<0.000000e+00> : vector<16xf32>
    %636 = vector.multi_reduction <add>, %14, %cst_264 [1] : vector<16x32xf32> to vector<16xf32>
    %637 = vector.shape_cast %636 : vector<16xf32> to vector<16x1xf32>
    %cst_265 = arith.constant 3.200000e+01 : f32
    %638 = vector.broadcast %cst_265 : f32 to vector<16x1xf32>
    %639 = arith.divf %637, %638 : vector<16x1xf32>
    %640 = vector.broadcast %639 : vector<16x1xf32> to vector<16x32xf32>
    %641 = arith.subf %14, %640 : vector<16x32xf32>
    %642 = arith.mulf %641, %641 : vector<16x32xf32>
    %cst_266 = arith.constant dense<0.000000e+00> : vector<16xf32>
    %643 = vector.multi_reduction <add>, %642, %cst_266 [1] : vector<16x32xf32> to vector<16xf32>
    %644 = vector.shape_cast %643 : vector<16xf32> to vector<16x1xf32>
    %cst_267 = arith.constant 3.200000e+01 : f32
    %645 = vector.broadcast %cst_267 : f32 to vector<16x1xf32>
    %646 = arith.divf %644, %645 : vector<16x1xf32>
    %cst_268 = arith.constant 9.99999974E-6 : f32
    %647 = vector.broadcast %cst_268 : f32 to vector<16x1xf32>
    %648 = arith.addf %646, %647 : vector<16x1xf32>
    %649 = math.rsqrt %648 : vector<16x1xf32>
    %650 = vector.broadcast %649 : vector<16x1xf32> to vector<16x32xf32>
    %651 = arith.mulf %641, %650 : vector<16x32xf32>
    %652 = vector.broadcast %577 : vector<1x32xf32> to vector<16x32xf32>
    %653 = arith.mulf %651, %652 : vector<16x32xf32>
    %654 = vector.broadcast %578 : vector<1x32xf32> to vector<16x32xf32>
    %655 = arith.addf %653, %654 : vector<16x32xf32>
    %cst_269 = arith.constant dense<0.000000e+00> : vector<16x32xf32>
    %656 = tpu.matmul %17, %579, %cst_269 {dimension_numbers = #tpu.dot_dimension_numbers<[1], [0], [0], [1], [0, 0, 1, 1], [], []>} : vector<16x32xf32>, vector<32x32xf32>, vector<16x32xf32> -> vector<16x32xf32>
    %657 = vector.broadcast %580 : vector<1x32xf32> to vector<16x32xf32>
    %658 = arith.addf %656, %657 : vector<16x32xf32>
    %cst_270 = arith.constant dense<0.000000e+00> : vector<16x64xf32>
    %659 = tpu.matmul %635, %581, %cst_270 {dimension_numbers = #tpu.dot_dimension_numbers<[1], [0], [0], [1], [0, 0, 1, 1], [], []>} : vector<16x32xf32>, vector<32x64xf32>, vector<16x64xf32> -> vector<16x64xf32>
    %660 = vector.broadcast %582 : vector<1x64xf32> to vector<16x64xf32>
    %661 = arith.addf %659, %660 : vector<16x64xf32>
    %662 = vector.extract_strided_slice %661 {offsets = [0, 0], sizes = [16, 32], strides = [1, 1]} : vector<16x64xf32> to vector<16x32xf32>
    %663 = vector.extract_strided_slice %661 {offsets = [0, 32], sizes = [16, 32], strides = [1, 1]} : vector<16x64xf32> to vector<16x32xf32>
    %cst_271 = arith.constant dense<0.000000e+00> : vector<16x64xf32>
    %664 = tpu.matmul %655, %583, %cst_271 {dimension_numbers = #tpu.dot_dimension_numbers<[1], [0], [0], [1], [0, 0, 1, 1], [], []>} : vector<16x32xf32>, vector<32x64xf32>, vector<16x64xf32> -> vector<16x64xf32>
    %665 = vector.broadcast %584 : vector<1x64xf32> to vector<16x64xf32>
    %666 = arith.addf %664, %665 : vector<16x64xf32>
    %667 = vector.extract_strided_slice %666 {offsets = [0, 0], sizes = [16, 32], strides = [1, 1]} : vector<16x64xf32> to vector<16x32xf32>
    %668 = vector.extract_strided_slice %666 {offsets = [0, 32], sizes = [16, 32], strides = [1, 1]} : vector<16x64xf32> to vector<16x32xf32>
    %cst_272 = arith.constant dense<0.000000e+00> : vector<16x64xf32>
    %669 = tpu.matmul %615, %585, %cst_272 {dimension_numbers = #tpu.dot_dimension_numbers<[1], [0], [0], [1], [0, 0, 1, 1], [], []>} : vector<16x32xf32>, vector<32x64xf32>, vector<16x64xf32> -> vector<16x64xf32>
    %670 = vector.broadcast %586 : vector<1x64xf32> to vector<16x64xf32>
    %671 = arith.addf %669, %670 : vector<16x64xf32>
    %672 = vector.extract_strided_slice %671 {offsets = [0, 0], sizes = [16, 32], strides = [1, 1]} : vector<16x64xf32> to vector<16x32xf32>
    %673 = vector.extract_strided_slice %671 {offsets = [0, 32], sizes = [16, 32], strides = [1, 1]} : vector<16x64xf32> to vector<16x32xf32>
    %674 = vector.extract_strided_slice %658 {offsets = [0, 0], sizes = [8, 32], strides = [1, 1]} : vector<16x32xf32> to vector<8x32xf32>
    %675 = vector.extract_strided_slice %662 {offsets = [0, 0], sizes = [8, 32], strides = [1, 1]} : vector<16x32xf32> to vector<8x32xf32>
    %676 = vector.extract_strided_slice %667 {offsets = [0, 0], sizes = [8, 32], strides = [1, 1]} : vector<16x32xf32> to vector<8x32xf32>
    %677 = vector.extract_strided_slice %672 {offsets = [0, 0], sizes = [8, 32], strides = [1, 1]} : vector<16x32xf32> to vector<8x32xf32>
    %678 = vector.extract_strided_slice %663 {offsets = [0, 0], sizes = [8, 32], strides = [1, 1]} : vector<16x32xf32> to vector<8x32xf32>
    %679 = vector.extract_strided_slice %668 {offsets = [0, 0], sizes = [8, 32], strides = [1, 1]} : vector<16x32xf32> to vector<8x32xf32>
    %680 = vector.extract_strided_slice %673 {offsets = [0, 0], sizes = [8, 32], strides = [1, 1]} : vector<16x32xf32> to vector<8x32xf32>
    %cst_273 = arith.constant 0.000000e+00 : f32
    %681 = vector.broadcast %cst_273 : f32 to vector<8x32xf32>
    %682 = vector.extract_strided_slice %674 {offsets = [0, 0], sizes = [8, 8], strides = [1, 1]} : vector<8x32xf32> to vector<8x8xf32>
    %683 = vector.extract_strided_slice %675 {offsets = [0, 0], sizes = [8, 8], strides = [1, 1]} : vector<8x32xf32> to vector<8x8xf32>
    %cst_274 = arith.constant dense<0.000000e+00> : vector<8x8xf32>
    %684 = tpu.matmul %682, %683, %cst_274 {dimension_numbers = #tpu.dot_dimension_numbers<[1], [1], [0], [0], [0, 0, 1, 0], [], []>} : vector<8x8xf32>, vector<8x8xf32>, vector<8x8xf32> -> vector<8x8xf32>
    %cst_275 = arith.constant 0.353553385 : f32
    %685 = vector.broadcast %cst_275 : f32 to vector<8x8xf32>
    %686 = arith.mulf %684, %685 : vector<8x8xf32>
    %687 = vector.extract_strided_slice %676 {offsets = [0, 0], sizes = [8, 8], strides = [1, 1]} : vector<8x32xf32> to vector<8x8xf32>
    %cst_276 = arith.constant dense<0.000000e+00> : vector<8x8xf32>
    %688 = tpu.matmul %682, %687, %cst_276 {dimension_numbers = #tpu.dot_dimension_numbers<[1], [1], [0], [0], [0, 0, 1, 0], [], []>} : vector<8x8xf32>, vector<8x8xf32>, vector<8x8xf32> -> vector<8x8xf32>
    %cst_277 = arith.constant 0.353553385 : f32
    %689 = vector.broadcast %cst_277 : f32 to vector<8x8xf32>
    %690 = arith.mulf %688, %689 : vector<8x8xf32>
    %691 = vector.extract_strided_slice %677 {offsets = [0, 0], sizes = [8, 8], strides = [1, 1]} : vector<8x32xf32> to vector<8x8xf32>
    %cst_278 = arith.constant dense<0.000000e+00> : vector<8x8xf32>
    %692 = tpu.matmul %682, %691, %cst_278 {dimension_numbers = #tpu.dot_dimension_numbers<[1], [1], [0], [0], [0, 0, 1, 0], [], []>} : vector<8x8xf32>, vector<8x8xf32>, vector<8x8xf32> -> vector<8x8xf32>
    %cst_279 = arith.constant 0.353553385 : f32
    %693 = vector.broadcast %cst_279 : f32 to vector<8x8xf32>
    %694 = arith.mulf %692, %693 : vector<8x8xf32>
    %cst_280 = arith.constant dense<0xFF800000> : vector<8xf32>
    %695 = vector.multi_reduction <maximumf>, %686, %cst_280 [1] : vector<8x8xf32> to vector<8xf32>
    %696 = vector.shape_cast %695 : vector<8xf32> to vector<8x1xf32>
    %cst_281 = arith.constant dense<0xFF800000> : vector<8xf32>
    %697 = vector.multi_reduction <maximumf>, %690, %cst_281 [1] : vector<8x8xf32> to vector<8xf32>
    %698 = vector.shape_cast %697 : vector<8xf32> to vector<8x1xf32>
    %699 = arith.maximumf %696, %698 : vector<8x1xf32>
    %cst_282 = arith.constant dense<0xFF800000> : vector<8xf32>
    %700 = vector.multi_reduction <maximumf>, %694, %cst_282 [1] : vector<8x8xf32> to vector<8xf32>
    %701 = vector.shape_cast %700 : vector<8xf32> to vector<8x1xf32>
    %702 = arith.maximumf %699, %701 : vector<8x1xf32>
    %703 = vector.broadcast %702 : vector<8x1xf32> to vector<8x8xf32>
    %704 = arith.subf %686, %703 : vector<8x8xf32>
    %705 = math.exp %704 : vector<8x8xf32>
    %706 = vector.broadcast %702 : vector<8x1xf32> to vector<8x8xf32>
    %707 = arith.subf %690, %706 : vector<8x8xf32>
    %708 = math.exp %707 : vector<8x8xf32>
    %709 = vector.broadcast %702 : vector<8x1xf32> to vector<8x8xf32>
    %710 = arith.subf %694, %709 : vector<8x8xf32>
    %711 = math.exp %710 : vector<8x8xf32>
    %cst_283 = arith.constant dense<0.000000e+00> : vector<8xf32>
    %712 = vector.multi_reduction <add>, %705, %cst_283 [1] : vector<8x8xf32> to vector<8xf32>
    %713 = vector.shape_cast %712 : vector<8xf32> to vector<8x1xf32>
    %cst_284 = arith.constant dense<0.000000e+00> : vector<8xf32>
    %714 = vector.multi_reduction <add>, %708, %cst_284 [1] : vector<8x8xf32> to vector<8xf32>
    %715 = vector.shape_cast %714 : vector<8xf32> to vector<8x1xf32>
    %716 = arith.addf %713, %715 : vector<8x1xf32>
    %cst_285 = arith.constant dense<0.000000e+00> : vector<8xf32>
    %717 = vector.multi_reduction <add>, %711, %cst_285 [1] : vector<8x8xf32> to vector<8xf32>
    %718 = vector.shape_cast %717 : vector<8xf32> to vector<8x1xf32>
    %719 = arith.addf %716, %718 : vector<8x1xf32>
    %720 = vector.extract_strided_slice %678 {offsets = [0, 0], sizes = [8, 8], strides = [1, 1]} : vector<8x32xf32> to vector<8x8xf32>
    %cst_286 = arith.constant dense<0.000000e+00> : vector<8x8xf32>
    %721 = tpu.matmul %705, %720, %cst_286 {dimension_numbers = #tpu.dot_dimension_numbers<[1], [0], [0], [1], [0, 0, 1, 1], [], []>} : vector<8x8xf32>, vector<8x8xf32>, vector<8x8xf32> -> vector<8x8xf32>
    %722 = vector.extract_strided_slice %679 {offsets = [0, 0], sizes = [8, 8], strides = [1, 1]} : vector<8x32xf32> to vector<8x8xf32>
    %cst_287 = arith.constant dense<0.000000e+00> : vector<8x8xf32>
    %723 = tpu.matmul %708, %722, %cst_287 {dimension_numbers = #tpu.dot_dimension_numbers<[1], [0], [0], [1], [0, 0, 1, 1], [], []>} : vector<8x8xf32>, vector<8x8xf32>, vector<8x8xf32> -> vector<8x8xf32>
    %724 = arith.addf %721, %723 : vector<8x8xf32>
    %725 = vector.extract_strided_slice %680 {offsets = [0, 0], sizes = [8, 8], strides = [1, 1]} : vector<8x32xf32> to vector<8x8xf32>
    %cst_288 = arith.constant dense<0.000000e+00> : vector<8x8xf32>
    %726 = tpu.matmul %711, %725, %cst_288 {dimension_numbers = #tpu.dot_dimension_numbers<[1], [0], [0], [1], [0, 0, 1, 1], [], []>} : vector<8x8xf32>, vector<8x8xf32>, vector<8x8xf32> -> vector<8x8xf32>
    %727 = arith.addf %724, %726 : vector<8x8xf32>
    %728 = tpu.reciprocal %719 {approx = true} : vector<8x1xf32> -> vector<8x1xf32>
    %729 = vector.broadcast %728 : vector<8x1xf32> to vector<8x8xf32>
    %730 = arith.mulf %727, %729 : vector<8x8xf32>
    %731 = vector.extract_strided_slice %587 {offsets = [0, 0], sizes = [8, 32], strides = [1, 1]} : vector<32x32xf32> to vector<8x32xf32>
    %cst_289 = arith.constant dense<0.000000e+00> : vector<8x32xf32>
    %732 = tpu.matmul %730, %731, %cst_289 {dimension_numbers = #tpu.dot_dimension_numbers<[1], [0], [0], [1], [0, 0, 1, 1], [], []>} : vector<8x8xf32>, vector<8x32xf32>, vector<8x32xf32> -> vector<8x32xf32>
    %733 = arith.addf %681, %732 : vector<8x32xf32>
    %734 = vector.extract_strided_slice %674 {offsets = [0, 8], sizes = [8, 8], strides = [1, 1]} : vector<8x32xf32> to vector<8x8xf32>
    %735 = vector.extract_strided_slice %675 {offsets = [0, 8], sizes = [8, 8], strides = [1, 1]} : vector<8x32xf32> to vector<8x8xf32>
    %cst_290 = arith.constant dense<0.000000e+00> : vector<8x8xf32>
    %736 = tpu.matmul %734, %735, %cst_290 {dimension_numbers = #tpu.dot_dimension_numbers<[1], [1], [0], [0], [0, 0, 1, 0], [], []>} : vector<8x8xf32>, vector<8x8xf32>, vector<8x8xf32> -> vector<8x8xf32>
    %cst_291 = arith.constant 0.353553385 : f32
    %737 = vector.broadcast %cst_291 : f32 to vector<8x8xf32>
    %738 = arith.mulf %736, %737 : vector<8x8xf32>
    %739 = vector.extract_strided_slice %676 {offsets = [0, 8], sizes = [8, 8], strides = [1, 1]} : vector<8x32xf32> to vector<8x8xf32>
    %cst_292 = arith.constant dense<0.000000e+00> : vector<8x8xf32>
    %740 = tpu.matmul %734, %739, %cst_292 {dimension_numbers = #tpu.dot_dimension_numbers<[1], [1], [0], [0], [0, 0, 1, 0], [], []>} : vector<8x8xf32>, vector<8x8xf32>, vector<8x8xf32> -> vector<8x8xf32>
    %cst_293 = arith.constant 0.353553385 : f32
    %741 = vector.broadcast %cst_293 : f32 to vector<8x8xf32>
    %742 = arith.mulf %740, %741 : vector<8x8xf32>
    %743 = vector.extract_strided_slice %677 {offsets = [0, 8], sizes = [8, 8], strides = [1, 1]} : vector<8x32xf32> to vector<8x8xf32>
    %cst_294 = arith.constant dense<0.000000e+00> : vector<8x8xf32>
    %744 = tpu.matmul %734, %743, %cst_294 {dimension_numbers = #tpu.dot_dimension_numbers<[1], [1], [0], [0], [0, 0, 1, 0], [], []>} : vector<8x8xf32>, vector<8x8xf32>, vector<8x8xf32> -> vector<8x8xf32>
    %cst_295 = arith.constant 0.353553385 : f32
    %745 = vector.broadcast %cst_295 : f32 to vector<8x8xf32>
    %746 = arith.mulf %744, %745 : vector<8x8xf32>
    %cst_296 = arith.constant dense<0xFF800000> : vector<8xf32>
    %747 = vector.multi_reduction <maximumf>, %738, %cst_296 [1] : vector<8x8xf32> to vector<8xf32>
    %748 = vector.shape_cast %747 : vector<8xf32> to vector<8x1xf32>
    %cst_297 = arith.constant dense<0xFF800000> : vector<8xf32>
    %749 = vector.multi_reduction <maximumf>, %742, %cst_297 [1] : vector<8x8xf32> to vector<8xf32>
    %750 = vector.shape_cast %749 : vector<8xf32> to vector<8x1xf32>
    %751 = arith.maximumf %748, %750 : vector<8x1xf32>
    %cst_298 = arith.constant dense<0xFF800000> : vector<8xf32>
    %752 = vector.multi_reduction <maximumf>, %746, %cst_298 [1] : vector<8x8xf32> to vector<8xf32>
    %753 = vector.shape_cast %752 : vector<8xf32> to vector<8x1xf32>
    %754 = arith.maximumf %751, %753 : vector<8x1xf32>
    %755 = vector.broadcast %754 : vector<8x1xf32> to vector<8x8xf32>
    %756 = arith.subf %738, %755 : vector<8x8xf32>
    %757 = math.exp %756 : vector<8x8xf32>
    %758 = vector.broadcast %754 : vector<8x1xf32> to vector<8x8xf32>
    %759 = arith.subf %742, %758 : vector<8x8xf32>
    %760 = math.exp %759 : vector<8x8xf32>
    %761 = vector.broadcast %754 : vector<8x1xf32> to vector<8x8xf32>
    %762 = arith.subf %746, %761 : vector<8x8xf32>
    %763 = math.exp %762 : vector<8x8xf32>
    %cst_299 = arith.constant dense<0.000000e+00> : vector<8xf32>
    %764 = vector.multi_reduction <add>, %757, %cst_299 [1] : vector<8x8xf32> to vector<8xf32>
    %765 = vector.shape_cast %764 : vector<8xf32> to vector<8x1xf32>
    %cst_300 = arith.constant dense<0.000000e+00> : vector<8xf32>
    %766 = vector.multi_reduction <add>, %760, %cst_300 [1] : vector<8x8xf32> to vector<8xf32>
    %767 = vector.shape_cast %766 : vector<8xf32> to vector<8x1xf32>
    %768 = arith.addf %765, %767 : vector<8x1xf32>
    %cst_301 = arith.constant dense<0.000000e+00> : vector<8xf32>
    %769 = vector.multi_reduction <add>, %763, %cst_301 [1] : vector<8x8xf32> to vector<8xf32>
    %770 = vector.shape_cast %769 : vector<8xf32> to vector<8x1xf32>
    %771 = arith.addf %768, %770 : vector<8x1xf32>
    %772 = vector.extract_strided_slice %678 {offsets = [0, 8], sizes = [8, 8], strides = [1, 1]} : vector<8x32xf32> to vector<8x8xf32>
    %cst_302 = arith.constant dense<0.000000e+00> : vector<8x8xf32>
    %773 = tpu.matmul %757, %772, %cst_302 {dimension_numbers = #tpu.dot_dimension_numbers<[1], [0], [0], [1], [0, 0, 1, 1], [], []>} : vector<8x8xf32>, vector<8x8xf32>, vector<8x8xf32> -> vector<8x8xf32>
    %774 = vector.extract_strided_slice %679 {offsets = [0, 8], sizes = [8, 8], strides = [1, 1]} : vector<8x32xf32> to vector<8x8xf32>
    %cst_303 = arith.constant dense<0.000000e+00> : vector<8x8xf32>
    %775 = tpu.matmul %760, %774, %cst_303 {dimension_numbers = #tpu.dot_dimension_numbers<[1], [0], [0], [1], [0, 0, 1, 1], [], []>} : vector<8x8xf32>, vector<8x8xf32>, vector<8x8xf32> -> vector<8x8xf32>
    %776 = arith.addf %773, %775 : vector<8x8xf32>
    %777 = vector.extract_strided_slice %680 {offsets = [0, 8], sizes = [8, 8], strides = [1, 1]} : vector<8x32xf32> to vector<8x8xf32>
    %cst_304 = arith.constant dense<0.000000e+00> : vector<8x8xf32>
    %778 = tpu.matmul %763, %777, %cst_304 {dimension_numbers = #tpu.dot_dimension_numbers<[1], [0], [0], [1], [0, 0, 1, 1], [], []>} : vector<8x8xf32>, vector<8x8xf32>, vector<8x8xf32> -> vector<8x8xf32>
    %779 = arith.addf %776, %778 : vector<8x8xf32>
    %780 = tpu.reciprocal %771 {approx = true} : vector<8x1xf32> -> vector<8x1xf32>
    %781 = vector.broadcast %780 : vector<8x1xf32> to vector<8x8xf32>
    %782 = arith.mulf %779, %781 : vector<8x8xf32>
    %783 = vector.extract_strided_slice %587 {offsets = [8, 0], sizes = [8, 32], strides = [1, 1]} : vector<32x32xf32> to vector<8x32xf32>
    %cst_305 = arith.constant dense<0.000000e+00> : vector<8x32xf32>
    %784 = tpu.matmul %782, %783, %cst_305 {dimension_numbers = #tpu.dot_dimension_numbers<[1], [0], [0], [1], [0, 0, 1, 1], [], []>} : vector<8x8xf32>, vector<8x32xf32>, vector<8x32xf32> -> vector<8x32xf32>
    %785 = arith.addf %733, %784 : vector<8x32xf32>
    %786 = vector.extract_strided_slice %674 {offsets = [0, 16], sizes = [8, 8], strides = [1, 1]} : vector<8x32xf32> to vector<8x8xf32>
    %787 = vector.extract_strided_slice %675 {offsets = [0, 16], sizes = [8, 8], strides = [1, 1]} : vector<8x32xf32> to vector<8x8xf32>
    %cst_306 = arith.constant dense<0.000000e+00> : vector<8x8xf32>
    %788 = tpu.matmul %786, %787, %cst_306 {dimension_numbers = #tpu.dot_dimension_numbers<[1], [1], [0], [0], [0, 0, 1, 0], [], []>} : vector<8x8xf32>, vector<8x8xf32>, vector<8x8xf32> -> vector<8x8xf32>
    %cst_307 = arith.constant 0.353553385 : f32
    %789 = vector.broadcast %cst_307 : f32 to vector<8x8xf32>
    %790 = arith.mulf %788, %789 : vector<8x8xf32>
    %791 = vector.extract_strided_slice %676 {offsets = [0, 16], sizes = [8, 8], strides = [1, 1]} : vector<8x32xf32> to vector<8x8xf32>
    %cst_308 = arith.constant dense<0.000000e+00> : vector<8x8xf32>
    %792 = tpu.matmul %786, %791, %cst_308 {dimension_numbers = #tpu.dot_dimension_numbers<[1], [1], [0], [0], [0, 0, 1, 0], [], []>} : vector<8x8xf32>, vector<8x8xf32>, vector<8x8xf32> -> vector<8x8xf32>
    %cst_309 = arith.constant 0.353553385 : f32
    %793 = vector.broadcast %cst_309 : f32 to vector<8x8xf32>
    %794 = arith.mulf %792, %793 : vector<8x8xf32>
    %795 = vector.extract_strided_slice %677 {offsets = [0, 16], sizes = [8, 8], strides = [1, 1]} : vector<8x32xf32> to vector<8x8xf32>
    %cst_310 = arith.constant dense<0.000000e+00> : vector<8x8xf32>
    %796 = tpu.matmul %786, %795, %cst_310 {dimension_numbers = #tpu.dot_dimension_numbers<[1], [1], [0], [0], [0, 0, 1, 0], [], []>} : vector<8x8xf32>, vector<8x8xf32>, vector<8x8xf32> -> vector<8x8xf32>
    %cst_311 = arith.constant 0.353553385 : f32
    %797 = vector.broadcast %cst_311 : f32 to vector<8x8xf32>
    %798 = arith.mulf %796, %797 : vector<8x8xf32>
    %cst_312 = arith.constant dense<0xFF800000> : vector<8xf32>
    %799 = vector.multi_reduction <maximumf>, %790, %cst_312 [1] : vector<8x8xf32> to vector<8xf32>
    %800 = vector.shape_cast %799 : vector<8xf32> to vector<8x1xf32>
    %cst_313 = arith.constant dense<0xFF800000> : vector<8xf32>
    %801 = vector.multi_reduction <maximumf>, %794, %cst_313 [1] : vector<8x8xf32> to vector<8xf32>
    %802 = vector.shape_cast %801 : vector<8xf32> to vector<8x1xf32>
    %803 = arith.maximumf %800, %802 : vector<8x1xf32>
    %cst_314 = arith.constant dense<0xFF800000> : vector<8xf32>
    %804 = vector.multi_reduction <maximumf>, %798, %cst_314 [1] : vector<8x8xf32> to vector<8xf32>
    %805 = vector.shape_cast %804 : vector<8xf32> to vector<8x1xf32>
    %806 = arith.maximumf %803, %805 : vector<8x1xf32>
    %807 = vector.broadcast %806 : vector<8x1xf32> to vector<8x8xf32>
    %808 = arith.subf %790, %807 : vector<8x8xf32>
    %809 = math.exp %808 : vector<8x8xf32>
    %810 = vector.broadcast %806 : vector<8x1xf32> to vector<8x8xf32>
    %811 = arith.subf %794, %810 : vector<8x8xf32>
    %812 = math.exp %811 : vector<8x8xf32>
    %813 = vector.broadcast %806 : vector<8x1xf32> to vector<8x8xf32>
    %814 = arith.subf %798, %813 : vector<8x8xf32>
    %815 = math.exp %814 : vector<8x8xf32>
    %cst_315 = arith.constant dense<0.000000e+00> : vector<8xf32>
    %816 = vector.multi_reduction <add>, %809, %cst_315 [1] : vector<8x8xf32> to vector<8xf32>
    %817 = vector.shape_cast %816 : vector<8xf32> to vector<8x1xf32>
    %cst_316 = arith.constant dense<0.000000e+00> : vector<8xf32>
    %818 = vector.multi_reduction <add>, %812, %cst_316 [1] : vector<8x8xf32> to vector<8xf32>
    %819 = vector.shape_cast %818 : vector<8xf32> to vector<8x1xf32>
    %820 = arith.addf %817, %819 : vector<8x1xf32>
    %cst_317 = arith.constant dense<0.000000e+00> : vector<8xf32>
    %821 = vector.multi_reduction <add>, %815, %cst_317 [1] : vector<8x8xf32> to vector<8xf32>
    %822 = vector.shape_cast %821 : vector<8xf32> to vector<8x1xf32>
    %823 = arith.addf %820, %822 : vector<8x1xf32>
    %824 = vector.extract_strided_slice %678 {offsets = [0, 16], sizes = [8, 8], strides = [1, 1]} : vector<8x32xf32> to vector<8x8xf32>
    %cst_318 = arith.constant dense<0.000000e+00> : vector<8x8xf32>
    %825 = tpu.matmul %809, %824, %cst_318 {dimension_numbers = #tpu.dot_dimension_numbers<[1], [0], [0], [1], [0, 0, 1, 1], [], []>} : vector<8x8xf32>, vector<8x8xf32>, vector<8x8xf32> -> vector<8x8xf32>
    %826 = vector.extract_strided_slice %679 {offsets = [0, 16], sizes = [8, 8], strides = [1, 1]} : vector<8x32xf32> to vector<8x8xf32>
    %cst_319 = arith.constant dense<0.000000e+00> : vector<8x8xf32>
    %827 = tpu.matmul %812, %826, %cst_319 {dimension_numbers = #tpu.dot_dimension_numbers<[1], [0], [0], [1], [0, 0, 1, 1], [], []>} : vector<8x8xf32>, vector<8x8xf32>, vector<8x8xf32> -> vector<8x8xf32>
    %828 = arith.addf %825, %827 : vector<8x8xf32>
    %829 = vector.extract_strided_slice %680 {offsets = [0, 16], sizes = [8, 8], strides = [1, 1]} : vector<8x32xf32> to vector<8x8xf32>
    %cst_320 = arith.constant dense<0.000000e+00> : vector<8x8xf32>
    %830 = tpu.matmul %815, %829, %cst_320 {dimension_numbers = #tpu.dot_dimension_numbers<[1], [0], [0], [1], [0, 0, 1, 1], [], []>} : vector<8x8xf32>, vector<8x8xf32>, vector<8x8xf32> -> vector<8x8xf32>
    %831 = arith.addf %828, %830 : vector<8x8xf32>
    %832 = tpu.reciprocal %823 {approx = true} : vector<8x1xf32> -> vector<8x1xf32>
    %833 = vector.broadcast %832 : vector<8x1xf32> to vector<8x8xf32>
    %834 = arith.mulf %831, %833 : vector<8x8xf32>
    %835 = vector.extract_strided_slice %587 {offsets = [16, 0], sizes = [8, 32], strides = [1, 1]} : vector<32x32xf32> to vector<8x32xf32>
    %cst_321 = arith.constant dense<0.000000e+00> : vector<8x32xf32>
    %836 = tpu.matmul %834, %835, %cst_321 {dimension_numbers = #tpu.dot_dimension_numbers<[1], [0], [0], [1], [0, 0, 1, 1], [], []>} : vector<8x8xf32>, vector<8x32xf32>, vector<8x32xf32> -> vector<8x32xf32>
    %837 = arith.addf %785, %836 : vector<8x32xf32>
    %838 = vector.extract_strided_slice %674 {offsets = [0, 24], sizes = [8, 8], strides = [1, 1]} : vector<8x32xf32> to vector<8x8xf32>
    %839 = vector.extract_strided_slice %675 {offsets = [0, 24], sizes = [8, 8], strides = [1, 1]} : vector<8x32xf32> to vector<8x8xf32>
    %cst_322 = arith.constant dense<0.000000e+00> : vector<8x8xf32>
    %840 = tpu.matmul %838, %839, %cst_322 {dimension_numbers = #tpu.dot_dimension_numbers<[1], [1], [0], [0], [0, 0, 1, 0], [], []>} : vector<8x8xf32>, vector<8x8xf32>, vector<8x8xf32> -> vector<8x8xf32>
    %cst_323 = arith.constant 0.353553385 : f32
    %841 = vector.broadcast %cst_323 : f32 to vector<8x8xf32>
    %842 = arith.mulf %840, %841 : vector<8x8xf32>
    %843 = vector.extract_strided_slice %676 {offsets = [0, 24], sizes = [8, 8], strides = [1, 1]} : vector<8x32xf32> to vector<8x8xf32>
    %cst_324 = arith.constant dense<0.000000e+00> : vector<8x8xf32>
    %844 = tpu.matmul %838, %843, %cst_324 {dimension_numbers = #tpu.dot_dimension_numbers<[1], [1], [0], [0], [0, 0, 1, 0], [], []>} : vector<8x8xf32>, vector<8x8xf32>, vector<8x8xf32> -> vector<8x8xf32>
    %cst_325 = arith.constant 0.353553385 : f32
    %845 = vector.broadcast %cst_325 : f32 to vector<8x8xf32>
    %846 = arith.mulf %844, %845 : vector<8x8xf32>
    %847 = vector.extract_strided_slice %677 {offsets = [0, 24], sizes = [8, 8], strides = [1, 1]} : vector<8x32xf32> to vector<8x8xf32>
    %cst_326 = arith.constant dense<0.000000e+00> : vector<8x8xf32>
    %848 = tpu.matmul %838, %847, %cst_326 {dimension_numbers = #tpu.dot_dimension_numbers<[1], [1], [0], [0], [0, 0, 1, 0], [], []>} : vector<8x8xf32>, vector<8x8xf32>, vector<8x8xf32> -> vector<8x8xf32>
    %cst_327 = arith.constant 0.353553385 : f32
    %849 = vector.broadcast %cst_327 : f32 to vector<8x8xf32>
    %850 = arith.mulf %848, %849 : vector<8x8xf32>
    %cst_328 = arith.constant dense<0xFF800000> : vector<8xf32>
    %851 = vector.multi_reduction <maximumf>, %842, %cst_328 [1] : vector<8x8xf32> to vector<8xf32>
    %852 = vector.shape_cast %851 : vector<8xf32> to vector<8x1xf32>
    %cst_329 = arith.constant dense<0xFF800000> : vector<8xf32>
    %853 = vector.multi_reduction <maximumf>, %846, %cst_329 [1] : vector<8x8xf32> to vector<8xf32>
    %854 = vector.shape_cast %853 : vector<8xf32> to vector<8x1xf32>
    %855 = arith.maximumf %852, %854 : vector<8x1xf32>
    %cst_330 = arith.constant dense<0xFF800000> : vector<8xf32>
    %856 = vector.multi_reduction <maximumf>, %850, %cst_330 [1] : vector<8x8xf32> to vector<8xf32>
    %857 = vector.shape_cast %856 : vector<8xf32> to vector<8x1xf32>
    %858 = arith.maximumf %855, %857 : vector<8x1xf32>
    %859 = vector.broadcast %858 : vector<8x1xf32> to vector<8x8xf32>
    %860 = arith.subf %842, %859 : vector<8x8xf32>
    %861 = math.exp %860 : vector<8x8xf32>
    %862 = vector.broadcast %858 : vector<8x1xf32> to vector<8x8xf32>
    %863 = arith.subf %846, %862 : vector<8x8xf32>
    %864 = math.exp %863 : vector<8x8xf32>
    %865 = vector.broadcast %858 : vector<8x1xf32> to vector<8x8xf32>
    %866 = arith.subf %850, %865 : vector<8x8xf32>
    %867 = math.exp %866 : vector<8x8xf32>
    %cst_331 = arith.constant dense<0.000000e+00> : vector<8xf32>
    %868 = vector.multi_reduction <add>, %861, %cst_331 [1] : vector<8x8xf32> to vector<8xf32>
    %869 = vector.shape_cast %868 : vector<8xf32> to vector<8x1xf32>
    %cst_332 = arith.constant dense<0.000000e+00> : vector<8xf32>
    %870 = vector.multi_reduction <add>, %864, %cst_332 [1] : vector<8x8xf32> to vector<8xf32>
    %871 = vector.shape_cast %870 : vector<8xf32> to vector<8x1xf32>
    %872 = arith.addf %869, %871 : vector<8x1xf32>
    %cst_333 = arith.constant dense<0.000000e+00> : vector<8xf32>
    %873 = vector.multi_reduction <add>, %867, %cst_333 [1] : vector<8x8xf32> to vector<8xf32>
    %874 = vector.shape_cast %873 : vector<8xf32> to vector<8x1xf32>
    %875 = arith.addf %872, %874 : vector<8x1xf32>
    %876 = vector.extract_strided_slice %678 {offsets = [0, 24], sizes = [8, 8], strides = [1, 1]} : vector<8x32xf32> to vector<8x8xf32>
    %cst_334 = arith.constant dense<0.000000e+00> : vector<8x8xf32>
    %877 = tpu.matmul %861, %876, %cst_334 {dimension_numbers = #tpu.dot_dimension_numbers<[1], [0], [0], [1], [0, 0, 1, 1], [], []>} : vector<8x8xf32>, vector<8x8xf32>, vector<8x8xf32> -> vector<8x8xf32>
    %878 = vector.extract_strided_slice %679 {offsets = [0, 24], sizes = [8, 8], strides = [1, 1]} : vector<8x32xf32> to vector<8x8xf32>
    %cst_335 = arith.constant dense<0.000000e+00> : vector<8x8xf32>
    %879 = tpu.matmul %864, %878, %cst_335 {dimension_numbers = #tpu.dot_dimension_numbers<[1], [0], [0], [1], [0, 0, 1, 1], [], []>} : vector<8x8xf32>, vector<8x8xf32>, vector<8x8xf32> -> vector<8x8xf32>
    %880 = arith.addf %877, %879 : vector<8x8xf32>
    %881 = vector.extract_strided_slice %680 {offsets = [0, 24], sizes = [8, 8], strides = [1, 1]} : vector<8x32xf32> to vector<8x8xf32>
    %cst_336 = arith.constant dense<0.000000e+00> : vector<8x8xf32>
    %882 = tpu.matmul %867, %881, %cst_336 {dimension_numbers = #tpu.dot_dimension_numbers<[1], [0], [0], [1], [0, 0, 1, 1], [], []>} : vector<8x8xf32>, vector<8x8xf32>, vector<8x8xf32> -> vector<8x8xf32>
    %883 = arith.addf %880, %882 : vector<8x8xf32>
    %884 = tpu.reciprocal %875 {approx = true} : vector<8x1xf32> -> vector<8x1xf32>
    %885 = vector.broadcast %884 : vector<8x1xf32> to vector<8x8xf32>
    %886 = arith.mulf %883, %885 : vector<8x8xf32>
    %887 = vector.extract_strided_slice %587 {offsets = [24, 0], sizes = [8, 32], strides = [1, 1]} : vector<32x32xf32> to vector<8x32xf32>
    %cst_337 = arith.constant dense<0.000000e+00> : vector<8x32xf32>
    %888 = tpu.matmul %886, %887, %cst_337 {dimension_numbers = #tpu.dot_dimension_numbers<[1], [0], [0], [1], [0, 0, 1, 1], [], []>} : vector<8x8xf32>, vector<8x32xf32>, vector<8x32xf32> -> vector<8x32xf32>
    %889 = arith.addf %837, %888 : vector<8x32xf32>
    %890 = vector.broadcast %588 : vector<1x32xf32> to vector<8x32xf32>
    %891 = arith.addf %889, %890 : vector<8x32xf32>
    %c0_338 = arith.constant 0 : index
    %c0_339 = arith.constant 0 : index
    %892 = vector.load %arg50[%c0_338, %c0_339] : memref<16x32xf32, #tpu.memory_space<vmem>>, vector<8x32xf32>
    tpu.vector_store %arg50[%c0_338, %c0_339], %891 {strides = array<i32>} : memref<16x32xf32, #tpu.memory_space<vmem>>, vector<8x32xf32>,
    %893 = vector.extract_strided_slice %658 {offsets = [8, 0], sizes = [8, 32], strides = [1, 1]} : vector<16x32xf32> to vector<8x32xf32>
    %894 = vector.extract_strided_slice %662 {offsets = [8, 0], sizes = [8, 32], strides = [1, 1]} : vector<16x32xf32> to vector<8x32xf32>
    %895 = vector.extract_strided_slice %667 {offsets = [8, 0], sizes = [8, 32], strides = [1, 1]} : vector<16x32xf32> to vector<8x32xf32>
    %896 = vector.extract_strided_slice %672 {offsets = [8, 0], sizes = [8, 32], strides = [1, 1]} : vector<16x32xf32> to vector<8x32xf32>
    %897 = vector.extract_strided_slice %663 {offsets = [8, 0], sizes = [8, 32], strides = [1, 1]} : vector<16x32xf32> to vector<8x32xf32>
    %898 = vector.extract_strided_slice %668 {offsets = [8, 0], sizes = [8, 32], strides = [1, 1]} : vector<16x32xf32> to vector<8x32xf32>
    %899 = vector.extract_strided_slice %673 {offsets = [8, 0], sizes = [8, 32], strides = [1, 1]} : vector<16x32xf32> to vector<8x32xf32>
    %cst_340 = arith.constant 0.000000e+00 : f32
    %900 = vector.broadcast %cst_340 : f32 to vector<8x32xf32>
    %901 = vector.extract_strided_slice %893 {offsets = [0, 0], sizes = [8, 8], strides = [1, 1]} : vector<8x32xf32> to vector<8x8xf32>
    %902 = vector.extract_strided_slice %894 {offsets = [0, 0], sizes = [8, 8], strides = [1, 1]} : vector<8x32xf32> to vector<8x8xf32>
    %cst_341 = arith.constant dense<0.000000e+00> : vector<8x8xf32>
    %903 = tpu.matmul %901, %902, %cst_341 {dimension_numbers = #tpu.dot_dimension_numbers<[1], [1], [0], [0], [0, 0, 1, 0], [], []>} : vector<8x8xf32>, vector<8x8xf32>, vector<8x8xf32> -> vector<8x8xf32>
    %cst_342 = arith.constant 0.353553385 : f32
    %904 = vector.broadcast %cst_342 : f32 to vector<8x8xf32>
    %905 = arith.mulf %903, %904 : vector<8x8xf32>
    %906 = vector.extract_strided_slice %895 {offsets = [0, 0], sizes = [8, 8], strides = [1, 1]} : vector<8x32xf32> to vector<8x8xf32>
    %cst_343 = arith.constant dense<0.000000e+00> : vector<8x8xf32>
    %907 = tpu.matmul %901, %906, %cst_343 {dimension_numbers = #tpu.dot_dimension_numbers<[1], [1], [0], [0], [0, 0, 1, 0], [], []>} : vector<8x8xf32>, vector<8x8xf32>, vector<8x8xf32> -> vector<8x8xf32>
    %cst_344 = arith.constant 0.353553385 : f32
    %908 = vector.broadcast %cst_344 : f32 to vector<8x8xf32>
    %909 = arith.mulf %907, %908 : vector<8x8xf32>
    %910 = vector.extract_strided_slice %896 {offsets = [0, 0], sizes = [8, 8], strides = [1, 1]} : vector<8x32xf32> to vector<8x8xf32>
    %cst_345 = arith.constant dense<0.000000e+00> : vector<8x8xf32>
    %911 = tpu.matmul %901, %910, %cst_345 {dimension_numbers = #tpu.dot_dimension_numbers<[1], [1], [0], [0], [0, 0, 1, 0], [], []>} : vector<8x8xf32>, vector<8x8xf32>, vector<8x8xf32> -> vector<8x8xf32>
    %cst_346 = arith.constant 0.353553385 : f32
    %912 = vector.broadcast %cst_346 : f32 to vector<8x8xf32>
    %913 = arith.mulf %911, %912 : vector<8x8xf32>
    %cst_347 = arith.constant dense<0xFF800000> : vector<8xf32>
    %914 = vector.multi_reduction <maximumf>, %905, %cst_347 [1] : vector<8x8xf32> to vector<8xf32>
    %915 = vector.shape_cast %914 : vector<8xf32> to vector<8x1xf32>
    %cst_348 = arith.constant dense<0xFF800000> : vector<8xf32>
    %916 = vector.multi_reduction <maximumf>, %909, %cst_348 [1] : vector<8x8xf32> to vector<8xf32>
    %917 = vector.shape_cast %916 : vector<8xf32> to vector<8x1xf32>
    %918 = arith.maximumf %915, %917 : vector<8x1xf32>
    %cst_349 = arith.constant dense<0xFF800000> : vector<8xf32>
    %919 = vector.multi_reduction <maximumf>, %913, %cst_349 [1] : vector<8x8xf32> to vector<8xf32>
    %920 = vector.shape_cast %919 : vector<8xf32> to vector<8x1xf32>
    %921 = arith.maximumf %918, %920 : vector<8x1xf32>
    %922 = vector.broadcast %921 : vector<8x1xf32> to vector<8x8xf32>
    %923 = arith.subf %905, %922 : vector<8x8xf32>
    %924 = math.exp %923 : vector<8x8xf32>
    %925 = vector.broadcast %921 : vector<8x1xf32> to vector<8x8xf32>
    %926 = arith.subf %909, %925 : vector<8x8xf32>
    %927 = math.exp %926 : vector<8x8xf32>
    %928 = vector.broadcast %921 : vector<8x1xf32> to vector<8x8xf32>
    %929 = arith.subf %913, %928 : vector<8x8xf32>
    %930 = math.exp %929 : vector<8x8xf32>
    %cst_350 = arith.constant dense<0.000000e+00> : vector<8xf32>
    %931 = vector.multi_reduction <add>, %924, %cst_350 [1] : vector<8x8xf32> to vector<8xf32>
    %932 = vector.shape_cast %931 : vector<8xf32> to vector<8x1xf32>
    %cst_351 = arith.constant dense<0.000000e+00> : vector<8xf32>
    %933 = vector.multi_reduction <add>, %927, %cst_351 [1] : vector<8x8xf32> to vector<8xf32>
    %934 = vector.shape_cast %933 : vector<8xf32> to vector<8x1xf32>
    %935 = arith.addf %932, %934 : vector<8x1xf32>
    %cst_352 = arith.constant dense<0.000000e+00> : vector<8xf32>
    %936 = vector.multi_reduction <add>, %930, %cst_352 [1] : vector<8x8xf32> to vector<8xf32>
    %937 = vector.shape_cast %936 : vector<8xf32> to vector<8x1xf32>
    %938 = arith.addf %935, %937 : vector<8x1xf32>
    %939 = vector.extract_strided_slice %897 {offsets = [0, 0], sizes = [8, 8], strides = [1, 1]} : vector<8x32xf32> to vector<8x8xf32>
    %cst_353 = arith.constant dense<0.000000e+00> : vector<8x8xf32>
    %940 = tpu.matmul %924, %939, %cst_353 {dimension_numbers = #tpu.dot_dimension_numbers<[1], [0], [0], [1], [0, 0, 1, 1], [], []>} : vector<8x8xf32>, vector<8x8xf32>, vector<8x8xf32> -> vector<8x8xf32>
    %941 = vector.extract_strided_slice %898 {offsets = [0, 0], sizes = [8, 8], strides = [1, 1]} : vector<8x32xf32> to vector<8x8xf32>
    %cst_354 = arith.constant dense<0.000000e+00> : vector<8x8xf32>
    %942 = tpu.matmul %927, %941, %cst_354 {dimension_numbers = #tpu.dot_dimension_numbers<[1], [0], [0], [1], [0, 0, 1, 1], [], []>} : vector<8x8xf32>, vector<8x8xf32>, vector<8x8xf32> -> vector<8x8xf32>
    %943 = arith.addf %940, %942 : vector<8x8xf32>
    %944 = vector.extract_strided_slice %899 {offsets = [0, 0], sizes = [8, 8], strides = [1, 1]} : vector<8x32xf32> to vector<8x8xf32>
    %cst_355 = arith.constant dense<0.000000e+00> : vector<8x8xf32>
    %945 = tpu.matmul %930, %944, %cst_355 {dimension_numbers = #tpu.dot_dimension_numbers<[1], [0], [0], [1], [0, 0, 1, 1], [], []>} : vector<8x8xf32>, vector<8x8xf32>, vector<8x8xf32> -> vector<8x8xf32>
    %946 = arith.addf %943, %945 : vector<8x8xf32>
    %947 = tpu.reciprocal %938 {approx = true} : vector<8x1xf32> -> vector<8x1xf32>
    %948 = vector.broadcast %947 : vector<8x1xf32> to vector<8x8xf32>
    %949 = arith.mulf %946, %948 : vector<8x8xf32>
    %950 = vector.extract_strided_slice %587 {offsets = [0, 0], sizes = [8, 32], strides = [1, 1]} : vector<32x32xf32> to vector<8x32xf32>
    %cst_356 = arith.constant dense<0.000000e+00> : vector<8x32xf32>
    %951 = tpu.matmul %949, %950, %cst_356 {dimension_numbers = #tpu.dot_dimension_numbers<[1], [0], [0], [1], [0, 0, 1, 1], [], []>} : vector<8x8xf32>, vector<8x32xf32>, vector<8x32xf32> -> vector<8x32xf32>
    %952 = arith.addf %900, %951 : vector<8x32xf32>
    %953 = vector.extract_strided_slice %893 {offsets = [0, 8], sizes = [8, 8], strides = [1, 1]} : vector<8x32xf32> to vector<8x8xf32>
    %954 = vector.extract_strided_slice %894 {offsets = [0, 8], sizes = [8, 8], strides = [1, 1]} : vector<8x32xf32> to vector<8x8xf32>
    %cst_357 = arith.constant dense<0.000000e+00> : vector<8x8xf32>
    %955 = tpu.matmul %953, %954, %cst_357 {dimension_numbers = #tpu.dot_dimension_numbers<[1], [1], [0], [0], [0, 0, 1, 0], [], []>} : vector<8x8xf32>, vector<8x8xf32>, vector<8x8xf32> -> vector<8x8xf32>
    %cst_358 = arith.constant 0.353553385 : f32
    %956 = vector.broadcast %cst_358 : f32 to vector<8x8xf32>
    %957 = arith.mulf %955, %956 : vector<8x8xf32>
    %958 = vector.extract_strided_slice %895 {offsets = [0, 8], sizes = [8, 8], strides = [1, 1]} : vector<8x32xf32> to vector<8x8xf32>
    %cst_359 = arith.constant dense<0.000000e+00> : vector<8x8xf32>
    %959 = tpu.matmul %953, %958, %cst_359 {dimension_numbers = #tpu.dot_dimension_numbers<[1], [1], [0], [0], [0, 0, 1, 0], [], []>} : vector<8x8xf32>, vector<8x8xf32>, vector<8x8xf32> -> vector<8x8xf32>
    %cst_360 = arith.constant 0.353553385 : f32
    %960 = vector.broadcast %cst_360 : f32 to vector<8x8xf32>
    %961 = arith.mulf %959, %960 : vector<8x8xf32>
    %962 = vector.extract_strided_slice %896 {offsets = [0, 8], sizes = [8, 8], strides = [1, 1]} : vector<8x32xf32> to vector<8x8xf32>
    %cst_361 = arith.constant dense<0.000000e+00> : vector<8x8xf32>
    %963 = tpu.matmul %953, %962, %cst_361 {dimension_numbers = #tpu.dot_dimension_numbers<[1], [1], [0], [0], [0, 0, 1, 0], [], []>} : vector<8x8xf32>, vector<8x8xf32>, vector<8x8xf32> -> vector<8x8xf32>
    %cst_362 = arith.constant 0.353553385 : f32
    %964 = vector.broadcast %cst_362 : f32 to vector<8x8xf32>
    %965 = arith.mulf %963, %964 : vector<8x8xf32>
    %cst_363 = arith.constant dense<0xFF800000> : vector<8xf32>
    %966 = vector.multi_reduction <maximumf>, %957, %cst_363 [1] : vector<8x8xf32> to vector<8xf32>
    %967 = vector.shape_cast %966 : vector<8xf32> to vector<8x1xf32>
    %cst_364 = arith.constant dense<0xFF800000> : vector<8xf32>
    %968 = vector.multi_reduction <maximumf>, %961, %cst_364 [1] : vector<8x8xf32> to vector<8xf32>
    %969 = vector.shape_cast %968 : vector<8xf32> to vector<8x1xf32>
    %970 = arith.maximumf %967, %969 : vector<8x1xf32>
    %cst_365 = arith.constant dense<0xFF800000> : vector<8xf32>
    %971 = vector.multi_reduction <maximumf>, %965, %cst_365 [1] : vector<8x8xf32> to vector<8xf32>
    %972 = vector.shape_cast %971 : vector<8xf32> to vector<8x1xf32>
    %973 = arith.maximumf %970, %972 : vector<8x1xf32>
    %974 = vector.broadcast %973 : vector<8x1xf32> to vector<8x8xf32>
    %975 = arith.subf %957, %974 : vector<8x8xf32>
    %976 = math.exp %975 : vector<8x8xf32>
    %977 = vector.broadcast %973 : vector<8x1xf32> to vector<8x8xf32>
    %978 = arith.subf %961, %977 : vector<8x8xf32>
    %979 = math.exp %978 : vector<8x8xf32>
    %980 = vector.broadcast %973 : vector<8x1xf32> to vector<8x8xf32>
    %981 = arith.subf %965, %980 : vector<8x8xf32>
    %982 = math.exp %981 : vector<8x8xf32>
    %cst_366 = arith.constant dense<0.000000e+00> : vector<8xf32>
    %983 = vector.multi_reduction <add>, %976, %cst_366 [1] : vector<8x8xf32> to vector<8xf32>
    %984 = vector.shape_cast %983 : vector<8xf32> to vector<8x1xf32>
    %cst_367 = arith.constant dense<0.000000e+00> : vector<8xf32>
    %985 = vector.multi_reduction <add>, %979, %cst_367 [1] : vector<8x8xf32> to vector<8xf32>
    %986 = vector.shape_cast %985 : vector<8xf32> to vector<8x1xf32>
    %987 = arith.addf %984, %986 : vector<8x1xf32>
    %cst_368 = arith.constant dense<0.000000e+00> : vector<8xf32>
    %988 = vector.multi_reduction <add>, %982, %cst_368 [1] : vector<8x8xf32> to vector<8xf32>
    %989 = vector.shape_cast %988 : vector<8xf32> to vector<8x1xf32>
    %990 = arith.addf %987, %989 : vector<8x1xf32>
    %991 = vector.extract_strided_slice %897 {offsets = [0, 8], sizes = [8, 8], strides = [1, 1]} : vector<8x32xf32> to vector<8x8xf32>
    %cst_369 = arith.constant dense<0.000000e+00> : vector<8x8xf32>
    %992 = tpu.matmul %976, %991, %cst_369 {dimension_numbers = #tpu.dot_dimension_numbers<[1], [0], [0], [1], [0, 0, 1, 1], [], []>} : vector<8x8xf32>, vector<8x8xf32>, vector<8x8xf32> -> vector<8x8xf32>
    %993 = vector.extract_strided_slice %898 {offsets = [0, 8], sizes = [8, 8], strides = [1, 1]} : vector<8x32xf32> to vector<8x8xf32>
    %cst_370 = arith.constant dense<0.000000e+00> : vector<8x8xf32>
    %994 = tpu.matmul %979, %993, %cst_370 {dimension_numbers = #tpu.dot_dimension_numbers<[1], [0], [0], [1], [0, 0, 1, 1], [], []>} : vector<8x8xf32>, vector<8x8xf32>, vector<8x8xf32> -> vector<8x8xf32>
    %995 = arith.addf %992, %994 : vector<8x8xf32>
    %996 = vector.extract_strided_slice %899 {offsets = [0, 8], sizes = [8, 8], strides = [1, 1]} : vector<8x32xf32> to vector<8x8xf32>
    %cst_371 = arith.constant dense<0.000000e+00> : vector<8x8xf32>
    %997 = tpu.matmul %982, %996, %cst_371 {dimension_numbers = #tpu.dot_dimension_numbers<[1], [0], [0], [1], [0, 0, 1, 1], [], []>} : vector<8x8xf32>, vector<8x8xf32>, vector<8x8xf32> -> vector<8x8xf32>
    %998 = arith.addf %995, %997 : vector<8x8xf32>
    %999 = tpu.reciprocal %990 {approx = true} : vector<8x1xf32> -> vector<8x1xf32>
    %1000 = vector.broadcast %999 : vector<8x1xf32> to vector<8x8xf32>
    %1001 = arith.mulf %998, %1000 : vector<8x8xf32>
    %1002 = vector.extract_strided_slice %587 {offsets = [8, 0], sizes = [8, 32], strides = [1, 1]} : vector<32x32xf32> to vector<8x32xf32>
    %cst_372 = arith.constant dense<0.000000e+00> : vector<8x32xf32>
    %1003 = tpu.matmul %1001, %1002, %cst_372 {dimension_numbers = #tpu.dot_dimension_numbers<[1], [0], [0], [1], [0, 0, 1, 1], [], []>} : vector<8x8xf32>, vector<8x32xf32>, vector<8x32xf32> -> vector<8x32xf32>
    %1004 = arith.addf %952, %1003 : vector<8x32xf32>
    %1005 = vector.extract_strided_slice %893 {offsets = [0, 16], sizes = [8, 8], strides = [1, 1]} : vector<8x32xf32> to vector<8x8xf32>
    %1006 = vector.extract_strided_slice %894 {offsets = [0, 16], sizes = [8, 8], strides = [1, 1]} : vector<8x32xf32> to vector<8x8xf32>
    %cst_373 = arith.constant dense<0.000000e+00> : vector<8x8xf32>
    %1007 = tpu.matmul %1005, %1006, %cst_373 {dimension_numbers = #tpu.dot_dimension_numbers<[1], [1], [0], [0], [0, 0, 1, 0], [], []>} : vector<8x8xf32>, vector<8x8xf32>, vector<8x8xf32> -> vector<8x8xf32>
    %cst_374 = arith.constant 0.353553385 : f32
    %1008 = vector.broadcast %cst_374 : f32 to vector<8x8xf32>
    %1009 = arith.mulf %1007, %1008 : vector<8x8xf32>
    %1010 = vector.extract_strided_slice %895 {offsets = [0, 16], sizes = [8, 8], strides = [1, 1]} : vector<8x32xf32> to vector<8x8xf32>
    %cst_375 = arith.constant dense<0.000000e+00> : vector<8x8xf32>
    %1011 = tpu.matmul %1005, %1010, %cst_375 {dimension_numbers = #tpu.dot_dimension_numbers<[1], [1], [0], [0], [0, 0, 1, 0], [], []>} : vector<8x8xf32>, vector<8x8xf32>, vector<8x8xf32> -> vector<8x8xf32>
    %cst_376 = arith.constant 0.353553385 : f32
    %1012 = vector.broadcast %cst_376 : f32 to vector<8x8xf32>
    %1013 = arith.mulf %1011, %1012 : vector<8x8xf32>
    %1014 = vector.extract_strided_slice %896 {offsets = [0, 16], sizes = [8, 8], strides = [1, 1]} : vector<8x32xf32> to vector<8x8xf32>
    %cst_377 = arith.constant dense<0.000000e+00> : vector<8x8xf32>
    %1015 = tpu.matmul %1005, %1014, %cst_377 {dimension_numbers = #tpu.dot_dimension_numbers<[1], [1], [0], [0], [0, 0, 1, 0], [], []>} : vector<8x8xf32>, vector<8x8xf32>, vector<8x8xf32> -> vector<8x8xf32>
    %cst_378 = arith.constant 0.353553385 : f32
    %1016 = vector.broadcast %cst_378 : f32 to vector<8x8xf32>
    %1017 = arith.mulf %1015, %1016 : vector<8x8xf32>
    %cst_379 = arith.constant dense<0xFF800000> : vector<8xf32>
    %1018 = vector.multi_reduction <maximumf>, %1009, %cst_379 [1] : vector<8x8xf32> to vector<8xf32>
    %1019 = vector.shape_cast %1018 : vector<8xf32> to vector<8x1xf32>
    %cst_380 = arith.constant dense<0xFF800000> : vector<8xf32>
    %1020 = vector.multi_reduction <maximumf>, %1013, %cst_380 [1] : vector<8x8xf32> to vector<8xf32>
    %1021 = vector.shape_cast %1020 : vector<8xf32> to vector<8x1xf32>
    %1022 = arith.maximumf %1019, %1021 : vector<8x1xf32>
    %cst_381 = arith.constant dense<0xFF800000> : vector<8xf32>
    %1023 = vector.multi_reduction <maximumf>, %1017, %cst_381 [1] : vector<8x8xf32> to vector<8xf32>
    %1024 = vector.shape_cast %1023 : vector<8xf32> to vector<8x1xf32>
    %1025 = arith.maximumf %1022, %1024 : vector<8x1xf32>
    %1026 = vector.broadcast %1025 : vector<8x1xf32> to vector<8x8xf32>
    %1027 = arith.subf %1009, %1026 : vector<8x8xf32>
    %1028 = math.exp %1027 : vector<8x8xf32>
    %1029 = vector.broadcast %1025 : vector<8x1xf32> to vector<8x8xf32>
    %1030 = arith.subf %1013, %1029 : vector<8x8xf32>
    %1031 = math.exp %1030 : vector<8x8xf32>
    %1032 = vector.broadcast %1025 : vector<8x1xf32> to vector<8x8xf32>
    %1033 = arith.subf %1017, %1032 : vector<8x8xf32>
    %1034 = math.exp %1033 : vector<8x8xf32>
    %cst_382 = arith.constant dense<0.000000e+00> : vector<8xf32>
    %1035 = vector.multi_reduction <add>, %1028, %cst_382 [1] : vector<8x8xf32> to vector<8xf32>
    %1036 = vector.shape_cast %1035 : vector<8xf32> to vector<8x1xf32>
    %cst_383 = arith.constant dense<0.000000e+00> : vector<8xf32>
    %1037 = vector.multi_reduction <add>, %1031, %cst_383 [1] : vector<8x8xf32> to vector<8xf32>
    %1038 = vector.shape_cast %1037 : vector<8xf32> to vector<8x1xf32>
    %1039 = arith.addf %1036, %1038 : vector<8x1xf32>
    %cst_384 = arith.constant dense<0.000000e+00> : vector<8xf32>
    %1040 = vector.multi_reduction <add>, %1034, %cst_384 [1] : vector<8x8xf32> to vector<8xf32>
    %1041 = vector.shape_cast %1040 : vector<8xf32> to vector<8x1xf32>
    %1042 = arith.addf %1039, %1041 : vector<8x1xf32>
    %1043 = vector.extract_strided_slice %897 {offsets = [0, 16], sizes = [8, 8], strides = [1, 1]} : vector<8x32xf32> to vector<8x8xf32>
    %cst_385 = arith.constant dense<0.000000e+00> : vector<8x8xf32>
    %1044 = tpu.matmul %1028, %1043, %cst_385 {dimension_numbers = #tpu.dot_dimension_numbers<[1], [0], [0], [1], [0, 0, 1, 1], [], []>} : vector<8x8xf32>, vector<8x8xf32>, vector<8x8xf32> -> vector<8x8xf32>
    %1045 = vector.extract_strided_slice %898 {offsets = [0, 16], sizes = [8, 8], strides = [1, 1]} : vector<8x32xf32> to vector<8x8xf32>
    %cst_386 = arith.constant dense<0.000000e+00> : vector<8x8xf32>
    %1046 = tpu.matmul %1031, %1045, %cst_386 {dimension_numbers = #tpu.dot_dimension_numbers<[1], [0], [0], [1], [0, 0, 1, 1], [], []>} : vector<8x8xf32>, vector<8x8xf32>, vector<8x8xf32> -> vector<8x8xf32>
    %1047 = arith.addf %1044, %1046 : vector<8x8xf32>
    %1048 = vector.extract_strided_slice %899 {offsets = [0, 16], sizes = [8, 8], strides = [1, 1]} : vector<8x32xf32> to vector<8x8xf32>
    %cst_387 = arith.constant dense<0.000000e+00> : vector<8x8xf32>
    %1049 = tpu.matmul %1034, %1048, %cst_387 {dimension_numbers = #tpu.dot_dimension_numbers<[1], [0], [0], [1], [0, 0, 1, 1], [], []>} : vector<8x8xf32>, vector<8x8xf32>, vector<8x8xf32> -> vector<8x8xf32>
    %1050 = arith.addf %1047, %1049 : vector<8x8xf32>
    %1051 = tpu.reciprocal %1042 {approx = true} : vector<8x1xf32> -> vector<8x1xf32>
    %1052 = vector.broadcast %1051 : vector<8x1xf32> to vector<8x8xf32>
    %1053 = arith.mulf %1050, %1052 : vector<8x8xf32>
    %1054 = vector.extract_strided_slice %587 {offsets = [16, 0], sizes = [8, 32], strides = [1, 1]} : vector<32x32xf32> to vector<8x32xf32>
    %cst_388 = arith.constant dense<0.000000e+00> : vector<8x32xf32>
    %1055 = tpu.matmul %1053, %1054, %cst_388 {dimension_numbers = #tpu.dot_dimension_numbers<[1], [0], [0], [1], [0, 0, 1, 1], [], []>} : vector<8x8xf32>, vector<8x32xf32>, vector<8x32xf32> -> vector<8x32xf32>
    %1056 = arith.addf %1004, %1055 : vector<8x32xf32>
    %1057 = vector.extract_strided_slice %893 {offsets = [0, 24], sizes = [8, 8], strides = [1, 1]} : vector<8x32xf32> to vector<8x8xf32>
    %1058 = vector.extract_strided_slice %894 {offsets = [0, 24], sizes = [8, 8], strides = [1, 1]} : vector<8x32xf32> to vector<8x8xf32>
    %cst_389 = arith.constant dense<0.000000e+00> : vector<8x8xf32>
    %1059 = tpu.matmul %1057, %1058, %cst_389 {dimension_numbers = #tpu.dot_dimension_numbers<[1], [1], [0], [0], [0, 0, 1, 0], [], []>} : vector<8x8xf32>, vector<8x8xf32>, vector<8x8xf32> -> vector<8x8xf32>
    %cst_390 = arith.constant 0.353553385 : f32
    %1060 = vector.broadcast %cst_390 : f32 to vector<8x8xf32>
    %1061 = arith.mulf %1059, %1060 : vector<8x8xf32>
    %1062 = vector.extract_strided_slice %895 {offsets = [0, 24], sizes = [8, 8], strides = [1, 1]} : vector<8x32xf32> to vector<8x8xf32>
    %cst_391 = arith.constant dense<0.000000e+00> : vector<8x8xf32>
    %1063 = tpu.matmul %1057, %1062, %cst_391 {dimension_numbers = #tpu.dot_dimension_numbers<[1], [1], [0], [0], [0, 0, 1, 0], [], []>} : vector<8x8xf32>, vector<8x8xf32>, vector<8x8xf32> -> vector<8x8xf32>
    %cst_392 = arith.constant 0.353553385 : f32
    %1064 = vector.broadcast %cst_392 : f32 to vector<8x8xf32>
    %1065 = arith.mulf %1063, %1064 : vector<8x8xf32>
    %1066 = vector.extract_strided_slice %896 {offsets = [0, 24], sizes = [8, 8], strides = [1, 1]} : vector<8x32xf32> to vector<8x8xf32>
    %cst_393 = arith.constant dense<0.000000e+00> : vector<8x8xf32>
    %1067 = tpu.matmul %1057, %1066, %cst_393 {dimension_numbers = #tpu.dot_dimension_numbers<[1], [1], [0], [0], [0, 0, 1, 0], [], []>} : vector<8x8xf32>, vector<8x8xf32>, vector<8x8xf32> -> vector<8x8xf32>
    %cst_394 = arith.constant 0.353553385 : f32
    %1068 = vector.broadcast %cst_394 : f32 to vector<8x8xf32>
    %1069 = arith.mulf %1067, %1068 : vector<8x8xf32>
    %cst_395 = arith.constant dense<0xFF800000> : vector<8xf32>
    %1070 = vector.multi_reduction <maximumf>, %1061, %cst_395 [1] : vector<8x8xf32> to vector<8xf32>
    %1071 = vector.shape_cast %1070 : vector<8xf32> to vector<8x1xf32>
    %cst_396 = arith.constant dense<0xFF800000> : vector<8xf32>
    %1072 = vector.multi_reduction <maximumf>, %1065, %cst_396 [1] : vector<8x8xf32> to vector<8xf32>
    %1073 = vector.shape_cast %1072 : vector<8xf32> to vector<8x1xf32>
    %1074 = arith.maximumf %1071, %1073 : vector<8x1xf32>
    %cst_397 = arith.constant dense<0xFF800000> : vector<8xf32>
    %1075 = vector.multi_reduction <maximumf>, %1069, %cst_397 [1] : vector<8x8xf32> to vector<8xf32>
    %1076 = vector.shape_cast %1075 : vector<8xf32> to vector<8x1xf32>
    %1077 = arith.maximumf %1074, %1076 : vector<8x1xf32>
    %1078 = vector.broadcast %1077 : vector<8x1xf32> to vector<8x8xf32>
    %1079 = arith.subf %1061, %1078 : vector<8x8xf32>
    %1080 = math.exp %1079 : vector<8x8xf32>
    %1081 = vector.broadcast %1077 : vector<8x1xf32> to vector<8x8xf32>
    %1082 = arith.subf %1065, %1081 : vector<8x8xf32>
    %1083 = math.exp %1082 : vector<8x8xf32>
    %1084 = vector.broadcast %1077 : vector<8x1xf32> to vector<8x8xf32>
    %1085 = arith.subf %1069, %1084 : vector<8x8xf32>
    %1086 = math.exp %1085 : vector<8x8xf32>
    %cst_398 = arith.constant dense<0.000000e+00> : vector<8xf32>
    %1087 = vector.multi_reduction <add>, %1080, %cst_398 [1] : vector<8x8xf32> to vector<8xf32>
    %1088 = vector.shape_cast %1087 : vector<8xf32> to vector<8x1xf32>
    %cst_399 = arith.constant dense<0.000000e+00> : vector<8xf32>
    %1089 = vector.multi_reduction <add>, %1083, %cst_399 [1] : vector<8x8xf32> to vector<8xf32>
    %1090 = vector.shape_cast %1089 : vector<8xf32> to vector<8x1xf32>
    %1091 = arith.addf %1088, %1090 : vector<8x1xf32>
    %cst_400 = arith.constant dense<0.000000e+00> : vector<8xf32>
    %1092 = vector.multi_reduction <add>, %1086, %cst_400 [1] : vector<8x8xf32> to vector<8xf32>
    %1093 = vector.shape_cast %1092 : vector<8xf32> to vector<8x1xf32>
    %1094 = arith.addf %1091, %1093 : vector<8x1xf32>
    %1095 = vector.extract_strided_slice %897 {offsets = [0, 24], sizes = [8, 8], strides = [1, 1]} : vector<8x32xf32> to vector<8x8xf32>
    %cst_401 = arith.constant dense<0.000000e+00> : vector<8x8xf32>
    %1096 = tpu.matmul %1080, %1095, %cst_401 {dimension_numbers = #tpu.dot_dimension_numbers<[1], [0], [0], [1], [0, 0, 1, 1], [], []>} : vector<8x8xf32>, vector<8x8xf32>, vector<8x8xf32> -> vector<8x8xf32>
    %1097 = vector.extract_strided_slice %898 {offsets = [0, 24], sizes = [8, 8], strides = [1, 1]} : vector<8x32xf32> to vector<8x8xf32>
    %cst_402 = arith.constant dense<0.000000e+00> : vector<8x8xf32>
    %1098 = tpu.matmul %1083, %1097, %cst_402 {dimension_numbers = #tpu.dot_dimension_numbers<[1], [0], [0], [1], [0, 0, 1, 1], [], []>} : vector<8x8xf32>, vector<8x8xf32>, vector<8x8xf32> -> vector<8x8xf32>
    %1099 = arith.addf %1096, %1098 : vector<8x8xf32>
    %1100 = vector.extract_strided_slice %899 {offsets = [0, 24], sizes = [8, 8], strides = [1, 1]} : vector<8x32xf32> to vector<8x8xf32>
    %cst_403 = arith.constant dense<0.000000e+00> : vector<8x8xf32>
    %1101 = tpu.matmul %1086, %1100, %cst_403 {dimension_numbers = #tpu.dot_dimension_numbers<[1], [0], [0], [1], [0, 0, 1, 1], [], []>} : vector<8x8xf32>, vector<8x8xf32>, vector<8x8xf32> -> vector<8x8xf32>
    %1102 = arith.addf %1099, %1101 : vector<8x8xf32>
    %1103 = tpu.reciprocal %1094 {approx = true} : vector<8x1xf32> -> vector<8x1xf32>
    %1104 = vector.broadcast %1103 : vector<8x1xf32> to vector<8x8xf32>
    %1105 = arith.mulf %1102, %1104 : vector<8x8xf32>
    %1106 = vector.extract_strided_slice %587 {offsets = [24, 0], sizes = [8, 32], strides = [1, 1]} : vector<32x32xf32> to vector<8x32xf32>
    %cst_404 = arith.constant dense<0.000000e+00> : vector<8x32xf32>
    %1107 = tpu.matmul %1105, %1106, %cst_404 {dimension_numbers = #tpu.dot_dimension_numbers<[1], [0], [0], [1], [0, 0, 1, 1], [], []>} : vector<8x8xf32>, vector<8x32xf32>, vector<8x32xf32> -> vector<8x32xf32>
    %1108 = arith.addf %1056, %1107 : vector<8x32xf32>
    %1109 = vector.broadcast %588 : vector<1x32xf32> to vector<8x32xf32>
    %1110 = arith.addf %1108, %1109 : vector<8x32xf32>
    %c8_405 = arith.constant 8 : index
    %c0_406 = arith.constant 0 : index
    %1111 = vector.load %arg50[%c8_405, %c0_406] : memref<16x32xf32, #tpu.memory_space<vmem>>, vector<8x32xf32>
    tpu.vector_store %arg50[%c8_405, %c0_406], %1110 {strides = array<i32>} : memref<16x32xf32, #tpu.memory_space<vmem>>, vector<8x32xf32>,
    %c0_407 = arith.constant 0 : index
    %c0_408 = arith.constant 0 : index
    %1112 = vector.load %arg50[%c0_407, %c0_408] : memref<16x32xf32, #tpu.memory_space<vmem>>, vector<16x32xf32>
    %1113 = arith.addf %635, %1112 : vector<16x32xf32>
    %cst_409 = arith.constant dense<0.000000e+00> : vector<16x32xf32>
    %1114 = tpu.matmul %1113, %589, %cst_409 {dimension_numbers = #tpu.dot_dimension_numbers<[1], [0], [0], [1], [0, 0, 1, 1], [], []>} : vector<16x32xf32>, vector<32x32xf32>, vector<16x32xf32> -> vector<16x32xf32>
    %1115 = vector.broadcast %590 : vector<1x32xf32> to vector<16x32xf32>
    %1116 = arith.addf %1114, %1115 : vector<16x32xf32>
    %cst_410 = arith.constant 0.000000e+00 : f32
    %1117 = vector.broadcast %cst_410 : f32 to vector<16x32xf32>
    %1118 = arith.subf %1117, %1116 : vector<16x32xf32>
    %1119 = math.exp %1118 : vector<16x32xf32>
    %cst_411 = arith.constant 1.000000e+00 : f32
    %1120 = vector.broadcast %cst_411 : f32 to vector<16x32xf32>
    %1121 = arith.addf %1120, %1119 : vector<16x32xf32>
    %1122 = tpu.reciprocal %1121 {approx = true} : vector<16x32xf32> -> vector<16x32xf32>
    %1123 = arith.mulf %1116, %1122 : vector<16x32xf32>
    %cst_412 = arith.constant dense<0.000000e+00> : vector<16x32xf32>
    %1124 = tpu.matmul %1123, %591, %cst_412 {dimension_numbers = #tpu.dot_dimension_numbers<[1], [0], [0], [1], [0, 0, 1, 1], [], []>} : vector<16x32xf32>, vector<32x32xf32>, vector<16x32xf32> -> vector<16x32xf32>
    %1125 = vector.broadcast %592 : vector<1x32xf32> to vector<16x32xf32>
    %1126 = arith.addf %1124, %1125 : vector<16x32xf32>
    %cst_413 = arith.constant 0.000000e+00 : f32
    %1127 = vector.broadcast %cst_413 : f32 to vector<16x32xf32>
    %1128 = arith.subf %1127, %1126 : vector<16x32xf32>
    %1129 = math.exp %1128 : vector<16x32xf32>
    %cst_414 = arith.constant 1.000000e+00 : f32
    %1130 = vector.broadcast %cst_414 : f32 to vector<16x32xf32>
    %1131 = arith.addf %1130, %1129 : vector<16x32xf32>
    %1132 = tpu.reciprocal %1131 {approx = true} : vector<16x32xf32> -> vector<16x32xf32>
    %1133 = arith.mulf %1126, %1132 : vector<16x32xf32>
    %cst_415 = arith.constant dense<0.000000e+00> : vector<16x32xf32>
    %1134 = tpu.matmul %1133, %593, %cst_415 {dimension_numbers = #tpu.dot_dimension_numbers<[1], [0], [0], [1], [0, 0, 1, 1], [], []>} : vector<16x32xf32>, vector<32x32xf32>, vector<16x32xf32> -> vector<16x32xf32>
    %1135 = vector.broadcast %594 : vector<1x32xf32> to vector<16x32xf32>
    %1136 = arith.addf %1134, %1135 : vector<16x32xf32>
    %cst_416 = arith.constant 0.000000e+00 : f32
    %1137 = vector.broadcast %cst_416 : f32 to vector<1x1xf32>
    %1138 = arith.subf %1137, %595 : vector<1x1xf32>
    %1139 = math.exp %1138 : vector<1x1xf32>
    %cst_417 = arith.constant 1.000000e+00 : f32
    %1140 = vector.broadcast %cst_417 : f32 to vector<1x1xf32>
    %1141 = arith.addf %1140, %1139 : vector<1x1xf32>
    %1142 = tpu.reciprocal %1141 {approx = true} : vector<1x1xf32> -> vector<1x1xf32>
    %1143 = vector.broadcast %1142 : vector<1x1xf32> to vector<16x32xf32>
    %1144 = arith.mulf %1143, %1136 : vector<16x32xf32>
    %cst_418 = arith.constant 1.000000e+00 : f32
    %1145 = vector.broadcast %cst_418 : f32 to vector<1x1xf32>
    %1146 = arith.subf %1145, %1142 : vector<1x1xf32>
    %1147 = vector.broadcast %1146 : vector<1x1xf32> to vector<16x32xf32>
    %1148 = arith.mulf %1147, %576 : vector<16x32xf32>
    %1149 = arith.addf %1144, %1148 : vector<16x32xf32>
    %c0_419 = arith.constant 0 : index
    %c0_420 = arith.constant 0 : index
    %1150 = vector.load %arg47[%c0_419, %c0_420] : memref<32x3xf32, #tpu.memory_space<vmem>>, vector<32x3xf32>
    %c0_421 = arith.constant 0 : index
    %c0_422 = arith.constant 0 : index
    %1151 = vector.load %arg48[%c0_421, %c0_422] : memref<1x3xf32, #tpu.memory_space<vmem>>, vector<1x3xf32>
    %cst_423 = arith.constant dense<0.000000e+00> : vector<16x3xf32>
    %1152 = tpu.matmul %1149, %1150, %cst_423 {dimension_numbers = #tpu.dot_dimension_numbers<[1], [0], [0], [1], [0, 0, 1, 1], [], []>} : vector<16x32xf32>, vector<32x3xf32>, vector<16x3xf32> -> vector<16x3xf32>
    %1153 = vector.broadcast %1151 : vector<1x3xf32> to vector<16x3xf32>
    %1154 = arith.addf %1152, %1153 : vector<16x3xf32>
    %c0_424 = arith.constant 0 : index
    %c0_425 = arith.constant 0 : index
    %1155 = vector.load %arg49[%c0_424, %c0_425] : memref<16x3xf32, #tpu.memory_space<vmem>>, vector<16x3xf32>
    tpu.vector_store %arg49[%c0_424, %c0_425], %1154 {strides = array<i32>} : memref<16x3xf32, #tpu.memory_space<vmem>>, vector<16x3xf32>,
    return
  }
}

</mosaic_0001>

<bundles_post_ra>
// kernel: gtno_forward.1
= control target key start
LH: loop header
LB: loop body
LE: loop exit
PB: predicated region body
PF: predicated region fallthrough
CT: control target
= control target key end

     0   :  { %s13582_s6 = smov 1   ;;  %s13583_s10 = smov 2   ;;  %s15156_s0 = inlined_call_operand.smem [shape: u32[50], index: -1, kind: input, shape index: {}] }
   0x1   :  { %s13668_s5 = sld [smem:[%s15156_s0]]   ;;  %s13584_s14 = smov 3  }
   0x2   :  { %s13673_s9 = sld [smem:[%s15156_s0 + %s13582_s6]]   ;;  %s13585_s18 = smov 4  }
   0x3   :  { %s13678_s13 = sld [smem:[%s15156_s0 + %s13583_s10]]   ;;  %s13586_s22 = smov 5  }
   0x4   :  { %s13683_s17 = sld [smem:[%s15156_s0 + %s13584_s14]]   ;;  %s13587_s26 = smov 6  }
   0x5   :  { %s13688_s21 = sld [smem:[%s15156_s0 + %s13585_s18]]   ;;  %s13588_s30 = smov 7  }
   0x6   :  { %s13693_s25 = sld [smem:[%s15156_s0 + %s13586_s22]]   ;;  %s13589_s4 = smov 8  }
   0x7   :  { %15165 = sst [smem:[#allocation40_spill]] %s13668_s5  ;;  %s13590_s10 = smov 9  }
   0x8   :  { %15166 = sst [smem:[#allocation41_spill]] %s13673_s9  ;;  %s13591_s15 = smov 10  }
   0x9   :  { %s13698_s29 = sld [smem:[%s15156_s0 + %s13587_s26]]   ;;  %s13592_s20 = smov 11  }
   0xa   :  { %s13703_s3 = sld [smem:[%s15156_s0 + %s13588_s30]]   ;;  %s13593_s26 = smov 12  }
   0xb   :  { %15167 = sst [smem:[#allocation42_spill]] %s13688_s21  ;;  %s13594_s1 = smov 13  }
   0xc   :  { %s13708_s8 = sld [smem:[%s15156_s0 + %s13589_s4]]   ;;  %s13595_s7 = smov 14  }
   0xd   :  { %s13713_s14 = sld [smem:[%s15156_s0 + %s13590_s10]]   ;;  %s13597_s22 = smov 16  }
   0xe   :  { %s13718_s19 = sld [smem:[%s15156_s0 + %s13591_s15]]   ;;  %s13596_s15 = smov 15  }
   0xf   :  { %15168 = sst [smem:[#allocation43_spill]] %s13698_s29  ;;  %s13598_s28 = smov 17  }
  0x10   :  { %s13723_s24 = sld [smem:[%s15156_s0 + %s13592_s20]]  }
  0x11   :  { %s13728_s30 = sld [smem:[%s15156_s0 + %s13593_s26]]  }
  0x12   :  { %15169 = sst [smem:[#allocation44_spill]] %s13708_s8 }
  0x13   :  { %15170 = sst [smem:[#allocation45_spill]] %s13713_s14 }
  0x14   :  { %15171 = sst [smem:[#allocation46_spill]] %s13718_s19 }
  0x15   :  { %s13733_s6 = sld [smem:[%s15156_s0 + %s13594_s1]]  }
  0x16   :  { %s13738_s12 = sld [smem:[%s15156_s0 + %s13595_s7]]   ;;  %s13599_s7 = smov 18  }
  0x17   :  { %15172 = sst [smem:[#allocation47_spill]] %s13728_s30 }
  0x18   :  { %s13743_s20 = sld [smem:[%s15156_s0 + %s13596_s15]]   ;;  %s13600_s15 = smov 19  }
  0x19   :  { %s13748_s27 = sld [smem:[%s15156_s0 + %s13597_s22]]   ;;  %s13601_s22 = smov 20  }
  0x1a   :  { %s13753_s4 = sld [smem:[%s15156_s0 + %s13598_s28]]   ;;  %s13602_s28 = smov 21  }
  0x1b   :  { %s13763_s19 = sld [smem:[%s15156_s0 + %s13600_s15]]   ;;  %s13604_s15 = smov 23  }
  0x1c   :  { %15173 = sst [smem:[#allocation48_spill]] %s13738_s12 }
  0x1d   :  { %s13758_s12 = sld [smem:[%s15156_s0 + %s13599_s7]]   ;;  %s13603_s7 = smov 22  }
  0x1e   :  { %s13773_s14 = sld [smem:[%s15156_s0 + %s13602_s28]]   ;;  %s13606_s28 = smov 25  }
  0x1f   :  { %15174 = sst [smem:[#allocation49_spill]] %s13748_s27 }
  0x20   :  { %s13768_s27 = sld [smem:[%s15156_s0 + %s13601_s22]]   ;;  %s13605_s22 = smov 24  }
  0x21   :  { %s13783_s30 = sld [smem:[%s15156_s0 + %s13604_s15]]   ;;  %s13608_s15 = smov 28  }
  0x22   :  { %s13793_s8 = sld [smem:[%s15156_s0 + %s13606_s28]]   ;;  %s13610_s28 = smov 30  }
  0x23   :  { %15175 = sst [smem:[#allocation50_spill]] %s13758_s12 }
  0x24   :  { %s13778_s12 = sld [smem:[%s15156_s0 + %s13603_s7]]   ;;  %s13607_s7 = smov 26  }
  0x25   :  { %s13803_s29 = sld [smem:[%s15156_s0 + %s13608_s15]]   ;;  %s13612_s15 = smov 32  }
  0x26   :  { %15176 = sst [smem:[#allocation51_spill]] %s13768_s27 }
  0x27   :  { %s13788_s27 = sld [smem:[%s15156_s0 + %s13605_s22]]   ;;  %s13609_s22 = smov 29  }
  0x28   :  { %s13813_s21 = sld [smem:[%s15156_s0 + %s13610_s28]]   ;;  %s13614_s28 = smov 34  }
  0x29   :  { %s13833_s9 = sld [smem:[%s15156_s0 + %s13614_s28]]   ;;  %s13618_s28 = smov 38  }
  0x2a   :  { %15177 = sst [smem:[#allocation52_spill]] %s13778_s12 }
  0x2b   :  { %s13798_s12 = sld [smem:[%s15156_s0 + %s13607_s7]]   ;;  %s13611_s7 = smov 31  }
  0x2c   :  { %15180 = sst [smem:[#allocation55_spill]] %s13803_s29 }
  0x2d   :  { %15178 = sst [smem:[#allocation53_spill]] %s13788_s27 }
  0x2e   :  { %s13808_s27 = sld [smem:[%s15156_s0 + %s13609_s22]]   ;;  %s13613_s22 = smov 33  }
  0x2f   :  { %15182 = sst [smem:[#allocation57_spill]] %s13813_s21 }
  0x30   :  { %s13823_s29 = sld [smem:[%s15156_s0 + %s13612_s15]]   ;;  %s13616_s15 = smov 36  }
  0x31   :  { %15179 = sst [smem:[#allocation54_spill]] %s13798_s12 }
  0x32   :  { %s13818_s12 = sld [smem:[%s15156_s0 + %s13611_s7]]   ;;  %s13615_s7 = smov 35  }
  0x33   :  { %15185 = sst [smem:[#allocation60_spill]] %s13833_s9 }
  0x34   :  { %15181 = sst [smem:[#allocation56_spill]] %s13808_s27 }
  0x35   :  { %s13828_s27 = sld [smem:[%s15156_s0 + %s13613_s22]]   ;;  %s13617_s22 = smov 37  }
  0x36   :  { %s13843_s5 = sld [smem:[%s15156_s0 + %s13616_s15]]   ;;  %s13620_s15 = smov 40  }
  0x37   :  { %s13853_s9 = sld [smem:[%s15156_s0 + %s13618_s28]]   ;;  %s13622_s28 = smov 42  }
  0x38   :  { %15183 = sst [smem:[#allocation58_spill]] %s13818_s12 }
  0x39   :  { %s13838_s12 = sld [smem:[%s15156_s0 + %s13615_s7]]   ;;  %s13619_s7 = smov 39  }
  0x3a   :  { %s13863_s21 = sld [smem:[%s15156_s0 + %s13620_s15]]   ;;  %s13624_s15 = smov 44  }
  0x3b   :  { %15184 = sst [smem:[#allocation59_spill]] %s13828_s27 }
  0x3c   :  { %s13848_s27 = sld [smem:[%s15156_s0 + %s13617_s22]]   ;;  %s13621_s22 = smov 41  }
  0x3d   :  { %15188 = sst [smem:[#allocation63_spill]] %s13853_s9 }
  0x3e   :  { %s13873_s9 = sld [smem:[%s15156_s0 + %s13622_s28]]   ;;  %s13626_s28 = smov 47  }
  0x3f   :  { %15186 = sst [smem:[#allocation61_spill]] %s13838_s12 }
  0x40   :  { %s13858_s12 = sld [smem:[%s15156_s0 + %s13619_s7]]   ;;  %s13623_s7 = smov 43  }
  0x41   :  { %15190 = sst [smem:[#allocation65_spill]] %s13863_s21 }
  0x42   :  { %15187 = sst [smem:[#allocation62_spill]] %s13848_s27 }
  0x43   :  { %s13868_s27 = sld [smem:[%s15156_s0 + %s13621_s22]]   ;;  %s13625_s22 = smov 45  }
  0x44   :  { %15192 = sst [smem:[#allocation67_spill]] %s13873_s9 }
  0x45   :  { %s13883_s21 = sld [smem:[%s15156_s0 + %s13624_s15]]   ;;  %s13628_s15 = smov 49  }
  0x46   :  { %15189 = sst [smem:[#allocation64_spill]] %s13858_s12 }
  0x47   :  { %s13878_s12 = sld [smem:[%s15156_s0 + %s13623_s7]]   ;;  %s13627_s7 = smov 48  }
  0x48   :  { %s13893_s9 = sld [smem:[%s15156_s0 + %s13626_s28]]  }
  0x49   :  { %15191 = sst [smem:[#allocation66_spill]] %s13868_s27 }
  0x4a   :  { %s13888_s27 = sld [smem:[%s15156_s0 + %s13625_s22]]   ;;  %s13629_s22 = smov 46  }
  0x4b   :  { %15194 = sst [smem:[#allocation69_spill]] %s13883_s21 }
  0x4c   :  { %s13903_s21 = sld [smem:[%s15156_s0 + %s13628_s15]]  }
  0x4d   :  { %15193 = sst [smem:[#allocation68_spill]] %s13878_s12 }
  0x4e   :  { %s13898_s12 = sld [smem:[%s15156_s0 + %s13627_s7]]  }
  0x50   :  { %15195 = sst [smem:[#allocation70_spill]] %s13888_s27 }
  0x51   :  { %s11446_s27 = sld [smem:[%s15156_s0 + %s13629_s22]]  }
  0x57   :  { %v106_v0 = vstv %s11446_s27 }
  0x58   :  { %107 = vst [vmem:[#allocation4] sm:$0x1] %v106_v0 }
  0x59   :  { %108 = vsyncpa [#allocation6], 0 }
  0x5a   :  { %109 = vsyncpa [#allocation8], 0 }
  0x5b   :  { %110 = vsyncpa [#allocation11], 0 }
  0x5c   :  { %111 = vsyncpa [#allocation14], 0 }
  0x5d   :  { %112 = vsyncpa [#allocation17], 0 }
  0x5e   :  { %113 = vsyncpa [#allocation20], 0 }
  0x5f   :  { %114 = vsyncpa [#allocation23], 0 }
  0x60   :  { %115 = vsyncpa [#allocation26], 0 }
  0x61   :  { %116 = vsyncpa [#allocation29], 0  ;;  %s13630_s28 = smov [#allocation7]   ;;  %s13190_s2 = scalar_lea.hbm %s13683_s17, 64 }
  0x62   :  { %s139_s1 = sshll.u32 %s13630_s28, 4  ;;  %p13191_p0 = scmp.ne.s32.totalorder %s13683_s17, %s13190_s2  ;;  %s140_s1 = int_to_ptr.vmem [resolvable:$true] %s139_s1 }
  0x63   :  { %p13194_p1 = scmp.lt.u32.totalorder %s13190_s2, %s13683_s17 }
  0x65   :  { %p13196_p2 = pnand %p13194_p1, %p13191_p0 }
  0x67   :  { %13199 = shalt.err (!%p13196_p2)
}
  0x68   :  { %s13200_s0 = scalar_lea.vmem %s140_s1, 64  ;;  %p13205_p4 = scmp.lt.s32.totalorder %s140_s1, %s140_s1 }
  0x69   :  { %p13201_p3 = scmp.ne.s32.totalorder %s140_s1, %s13200_s0  ;;  %p13206_p5 = scmp.lt.s32.totalorder %s13200_s0, %s13200_s0 }
  0x6b   :  { %p13207_p6 = por %p13206_p5, %p13205_p4 }
  0x6d   :  { %p13208_p7 = pnand %p13207_p6, %p13201_p3 }
  0x6f   :  { %13211 = shalt.err (!%p13208_p7)
}
  0x70   :  { %142 = dma.hbm_to_vmem [thread:$0]  %s13683_s17, 64, %s140_s1, [#allocation8]  }
  0x71   :  { %s13631_s27 = smov [#allocation10]   ;;  %s13632_s10 = smov [#allocation13]  }
  0x72   :  { %s162_s7 = sshll.u32 %s13631_s27, 4  ;;  %s194_s11 = sshll.u32 %s13632_s10, 4  ;;  %s163_s7 = int_to_ptr.vmem [resolvable:$true] %s162_s7  ;;  %s195_s11 = int_to_ptr.vmem [resolvable:$true] %s194_s11 }
  0x73   :  { %s13212_s15 = scalar_lea.hbm %s13703_s3, 256 }
  0x74   :  { %p13213_p8 = scmp.ne.s32.totalorder %s13703_s3, %s13212_s15  ;;  %p13216_p9 = scmp.lt.u32.totalorder %s13212_s15, %s13703_s3 }
  0x76   :  { %p13218_p10 = pnand %p13216_p9, %p13213_p8 }
  0x78   :  { %13221 = shalt.err (!%p13218_p10)
}
  0x79   :  { %s13222_s16 = scalar_lea.vmem %s163_s7, 256  ;;  %p13227_p12 = scmp.lt.s32.totalorder %s163_s7, %s163_s7 }
  0x7a   :  { %p13223_p11 = scmp.ne.s32.totalorder %s163_s7, %s13222_s16  ;;  %p13228_p13 = scmp.lt.s32.totalorder %s13222_s16, %s13222_s16 }
  0x7c   :  { %p13229_p0 = por %p13228_p13, %p13227_p12 }
  0x7e   :  { %p13230_p1 = pnand %p13229_p0, %p13223_p11 }
  0x80   :  { %13233 = shalt.err (!%p13230_p1)
}
  0x81   :  { %s13633_s18 = smov 128   ;;  %s13634_s17 = smov 8  }
  0x82   :  { %168 = dma.hbm_to_vmem [thread:$0]  %s13703_s3, 256, %s163_s7, [#allocation11], %s13633_s18, %s13633_s18, %s13634_s17  }
  0x83   :  { %s13234_s22 = scalar_lea.hbm %s13733_s6, 512 }
  0x84   :  { %p13235_p2 = scmp.ne.s32.totalorder %s13733_s6, %s13234_s22  ;;  %p13238_p3 = scmp.lt.u32.totalorder %s13234_s22, %s13733_s6 }
  0x86   :  { %p13240_p4 = pnand %p13238_p3, %p13235_p2 }
  0x88   :  { %13243 = shalt.err (!%p13240_p4)
}
  0x89   :  { %s13244_s23 = scalar_lea.vmem %s195_s11, 512  ;;  %p13249_p6 = scmp.lt.s32.totalorder %s195_s11, %s195_s11 }
  0x8a   :  { %p13245_p5 = scmp.ne.s32.totalorder %s195_s11, %s13244_s23  ;;  %p13250_p7 = scmp.lt.s32.totalorder %s13244_s23, %s13244_s23 }
  0x8c   :  { %p13251_p8 = por %p13250_p7, %p13249_p6 }
  0x8e   :  { %p13252_p9 = pnand %p13251_p8, %p13245_p5 }
  0x90   :  { %13255 = shalt.err (!%p13252_p9)
}
  0x91   :  { %200 = dma.hbm_to_vmem [thread:$0]  %s13733_s6, 512, %s195_s11, [#allocation14], %s13633_s18, %s13633_s18, %s13634_s17  }
  0x92   :  { %s13635_s3 = smov [#allocation16]   ;;  %s13636_s28 = smov [#allocation19]  }
  0x93   :  { %s222_s26 = sshll.u32 %s13635_s3, 4  ;;  %s250_s1 = sshll.u32 %s13636_s28, 4  ;;  %s223_s26 = int_to_ptr.vmem [resolvable:$true] %s222_s26  ;;  %s251_s1 = int_to_ptr.vmem [resolvable:$true] %s250_s1 }
  0x94   :  { %s13256_s2 = scalar_lea.hbm %s13753_s4, 512 }
  0x95   :  { %p13257_p10 = scmp.ne.s32.totalorder %s13753_s4, %s13256_s2  ;;  %p13260_p11 = scmp.lt.u32.totalorder %s13256_s2, %s13753_s4 }
  0x97   :  { %p13262_p12 = pnand %p13260_p11, %p13257_p10 }
  0x99   :  { %13265 = shalt.err (!%p13262_p12)
}
  0x9a   :  { %s13266_s0 = scalar_lea.vmem %s223_s26, 512  ;;  %p13271_p0 = scmp.lt.s32.totalorder %s223_s26, %s223_s26 }
  0x9b   :  { %p13267_p13 = scmp.ne.s32.totalorder %s223_s26, %s13266_s0  ;;  %p13272_p1 = scmp.lt.s32.totalorder %s13266_s0, %s13266_s0 }
  0x9d   :  { %p13273_p2 = por %p13272_p1, %p13271_p0 }
  0x9f   :  { %p13274_p3 = pnand %p13273_p2, %p13267_p13 }
  0xa1   :  { %13277 = shalt.err (!%p13274_p3)
}
  0xa2   :  { %228 = dma.hbm_to_vmem [thread:$0]  %s13753_s4, 512, %s223_s26, [#allocation17], %s13633_s18, %s13633_s18, %s13634_s17  }
  0xa3   :  { %s13278_s6 = scalar_lea.hbm %s13773_s14, 512 }
  0xa4   :  { %p13279_p4 = scmp.ne.s32.totalorder %s13773_s14, %s13278_s6  ;;  %p13282_p5 = scmp.lt.u32.totalorder %s13278_s6, %s13773_s14 }
  0xa6   :  { %p13284_p6 = pnand %p13282_p5, %p13279_p4 }
  0xa8   :  { %13287 = shalt.err (!%p13284_p6)
}
  0xa9   :  { %s13288_s27 = scalar_lea.vmem %s251_s1, 512  ;;  %p13293_p8 = scmp.lt.s32.totalorder %s251_s1, %s251_s1 }
  0xaa   :  { %p13289_p7 = scmp.ne.s32.totalorder %s251_s1, %s13288_s27  ;;  %p13294_p9 = scmp.lt.s32.totalorder %s13288_s27, %s13288_s27 }
  0xac   :  { %p13295_p10 = por %p13294_p9, %p13293_p8 }
  0xae   :  { %p13296_p11 = pnand %p13295_p10, %p13289_p7 }
  0xb0   :  { %13299 = shalt.err (!%p13296_p11)
}
  0xb1   :  { %256 = dma.hbm_to_vmem [thread:$0]  %s13773_s14, 512, %s251_s1, [#allocation20], %s13633_s18, %s13633_s18, %s13634_s17  }
  0xb2   :  { %s13637_s4 = smov [#allocation22]   ;;  %s13638_s10 = smov [#allocation25]  }
  0xb3   :  { %s278_s7 = sshll.u32 %s13637_s4, 4  ;;  %s312_s11 = sshll.u32 %s13638_s10, 4  ;;  %s279_s7 = int_to_ptr.vmem [resolvable:$true] %s278_s7  ;;  %s313_s11 = int_to_ptr.vmem [resolvable:$true] %s312_s11 }
  0xb4   :  { %s13300_s15 = scalar_lea.hbm %s13793_s8, 512 }
  0xb5   :  { %p13301_p12 = scmp.ne.s32.totalorder %s13793_s8, %s13300_s15  ;;  %p13304_p13 = scmp.lt.u32.totalorder %s13300_s15, %s13793_s8 }
  0xb7   :  { %p13306_p0 = pnand %p13304_p13, %p13301_p12 }
  0xb9   :  { %13309 = shalt.err (!%p13306_p0)
}
  0xba   :  { %s13310_s16 = scalar_lea.vmem %s279_s7, 512  ;;  %p13315_p2 = scmp.lt.s32.totalorder %s279_s7, %s279_s7 }
  0xbb   :  { %p13311_p1 = scmp.ne.s32.totalorder %s279_s7, %s13310_s16  ;;  %p13316_p3 = scmp.lt.s32.totalorder %s13310_s16, %s13310_s16 }
  0xbd   :  { %p13317_p4 = por %p13316_p3, %p13315_p2 }
  0xbf   :  { %p13318_p5 = pnand %p13317_p4, %p13311_p1 }
  0xc1   :  { %13321 = shalt.err (!%p13318_p5)
}
  0xc2   :  { %284 = dma.hbm_to_vmem [thread:$0]  %s13793_s8, 512, %s279_s7, [#allocation23], %s13633_s18, %s13633_s18, %s13634_s17  }
  0xc3   :  { %s13322_s14 = scalar_lea.hbm %s13823_s29, 512 }
  0xc4   :  { %p13323_p6 = scmp.ne.s32.totalorder %s13823_s29, %s13322_s14  ;;  %p13326_p7 = scmp.lt.u32.totalorder %s13322_s14, %s13823_s29 }
  0xc6   :  { %p13328_p8 = pnand %p13326_p7, %p13323_p6 }
  0xc8   :  { %13331 = shalt.err (!%p13328_p8)
}
  0xc9   :  { %s13332_s22 = scalar_lea.vmem %s313_s11, 512  ;;  %p13337_p10 = scmp.lt.s32.totalorder %s313_s11, %s313_s11 }
  0xca   :  { %p13333_p9 = scmp.ne.s32.totalorder %s313_s11, %s13332_s22  ;;  %p13338_p11 = scmp.lt.s32.totalorder %s13332_s22, %s13332_s22 }
  0xcc   :  { %p13339_p12 = por %p13338_p11, %p13337_p10 }
  0xce   :  { %p13340_p13 = pnand %p13339_p12, %p13333_p9 }
  0xd0   :  { %13343 = shalt.err (!%p13340_p13)
}
  0xd1   :  { %318 = dma.hbm_to_vmem [thread:$0]  %s13823_s29, 512, %s313_s11, [#allocation26], %s13633_s18, %s13633_s18, %s13634_s17  }
  0xd2   :  { %s13639_s8 = smov [#allocation28]   ;;  %s13640_s3 = smov [#allocation5]  }
  0xd3   :  { %s340_s23 = sshll.u32 %s13639_s8, 4  ;;  %s126_s26 = sshll.u32 %s13640_s3, 4  ;;  %s341_s23 = int_to_ptr.vmem [resolvable:$true] %s340_s23  ;;  %s127_s26 = int_to_ptr.vmem [resolvable:$true] %s126_s26 }
  0xd4   :  { %s13344_s28 = scalar_lea.hbm %s13843_s5, 512 }
  0xd5   :  { %p13345_p0 = scmp.ne.s32.totalorder %s13843_s5, %s13344_s28  ;;  %p13348_p1 = scmp.lt.u32.totalorder %s13344_s28, %s13843_s5 }
  0xd7   :  { %p13350_p2 = pnand %p13348_p1, %p13345_p0 }
  0xd9   :  { %13353 = shalt.err (!%p13350_p2)
}
  0xda   :  { %s13354_s1 = scalar_lea.vmem %s341_s23, 512  ;;  %p13359_p4 = scmp.lt.s32.totalorder %s341_s23, %s341_s23 }
  0xdb   :  { %p13355_p3 = scmp.ne.s32.totalorder %s341_s23, %s13354_s1  ;;  %p13360_p5 = scmp.lt.s32.totalorder %s13354_s1, %s13354_s1 }
  0xdd   :  { %p13361_p6 = por %p13360_p5, %p13359_p4 }
  0xdf   :  { %p13362_p7 = pnand %p13361_p6, %p13355_p3 }
  0xe1   :  { %13365 = shalt.err (!%p13362_p7)
}
  0xe2   :  { %346 = dma.hbm_to_vmem [thread:$0]  %s13843_s5, 512, %s341_s23, [#allocation29], %s13633_s18, %s13633_s18, %s13634_s17  }
  0xe3   :  { %s13366_s29 = scalar_lea.hbm %s13678_s13, 256 }
  0xe4   :  { %p13367_p8 = scmp.ne.s32.totalorder %s13678_s13, %s13366_s29  ;;  %p13370_p9 = scmp.lt.u32.totalorder %s13366_s29, %s13678_s13 }
  0xe6   :  { %p13372_p10 = pnand %p13370_p9, %p13367_p8 }
  0xe8   :  { %13375 = shalt.err (!%p13372_p10)
}
  0xe9   :  { %s13376_s2 = scalar_lea.vmem %s127_s26, 256  ;;  %p13381_p12 = scmp.lt.s32.totalorder %s127_s26, %s127_s26 }
  0xea   :  { %p13377_p11 = scmp.ne.s32.totalorder %s127_s26, %s13376_s2  ;;  %p13382_p13 = scmp.lt.s32.totalorder %s13376_s2, %s13376_s2 }
  0xec   :  { %p13383_p0 = por %p13382_p13, %p13381_p12 }
  0xee   :  { %p13384_p1 = pnand %p13383_p0, %p13377_p11 }
  0xf0   :  { %13387 = shalt.err (!%p13384_p1)
}
  0xf1   :  { %132 = dma.hbm_to_vmem [thread:$0]  %s13678_s13, 256, %s127_s26, [#allocation6], %s13633_s18, %s13633_s18, %s13634_s17  }
  0xf2   :  { %s13641_s5 = smov [#allocation9]   ;;  %s13642_s6 = smov [#allocation12]  }
  0xf3   :  { %s151_s0 = sshll.u32 %s13641_s5, 4  ;;  %s180_s27 = sshll.u32 %s13642_s6, 4  ;;  %s152_s0 = int_to_ptr.vmem [resolvable:$true] %s151_s0  ;;  %s181_s27 = int_to_ptr.vmem [resolvable:$true] %s180_s27 }
  0xf4   :  { %s13388_s4 = scalar_lea.hbm %s13693_s25, 64 }
  0xf5   :  { %p13389_p2 = scmp.ne.s32.totalorder %s13693_s25, %s13388_s4  ;;  %p13392_p3 = scmp.lt.u32.totalorder %s13388_s4, %s13693_s25 }
  0xf7   :  { %p13394_p4 = pnand %p13392_p3, %p13389_p2 }
  0xf9   :  { %13397 = shalt.err (!%p13394_p4)
}
  0xfa   :  { %s13398_s7 = scalar_lea.vmem %s152_s0, 64  ;;  %p13403_p6 = scmp.lt.s32.totalorder %s152_s0, %s152_s0 }
  0xfb   :  { %p13399_p5 = scmp.ne.s32.totalorder %s152_s0, %s13398_s7  ;;  %p13404_p7 = scmp.lt.s32.totalorder %s13398_s7, %s13398_s7 }
  0xfd   :  { %p13405_p8 = por %p13404_p7, %p13403_p6 }
  0xff   :  { %p13406_p9 = pnand %p13405_p8, %p13399_p5 }
 0x101   :  { %13409 = shalt.err (!%p13406_p9)
}
 0x102   :  { %154 = dma.hbm_to_vmem [thread:$0]  %s13693_s25, 64, %s152_s0, [#allocation8]  }
 0x103   :  { %s13410_s13 = scalar_lea.hbm %s13723_s24, 512 }
 0x104   :  { %p13411_p10 = scmp.ne.s32.totalorder %s13723_s24, %s13410_s13  ;;  %p13414_p11 = scmp.lt.u32.totalorder %s13410_s13, %s13723_s24 }
 0x106   :  { %p13416_p12 = pnand %p13414_p11, %p13411_p10 }
 0x108   :  { %13419 = shalt.err (!%p13416_p12)
}
 0x109   :  { %s13420_s10 = scalar_lea.vmem %s181_s27, 512  ;;  %p13425_p0 = scmp.lt.s32.totalorder %s181_s27, %s181_s27 }
 0x10a   :  { %p13421_p13 = scmp.ne.s32.totalorder %s181_s27, %s13420_s10  ;;  %p13426_p1 = scmp.lt.s32.totalorder %s13420_s10, %s13420_s10 }
 0x10c   :  { %p13427_p2 = por %p13426_p1, %p13425_p0 }
 0x10e   :  { %p13428_p3 = pnand %p13427_p2, %p13421_p13 }
 0x110   :  { %13431 = shalt.err (!%p13428_p3)
}
 0x111   :  { %186 = dma.hbm_to_vmem [thread:$0]  %s13723_s24, 512, %s181_s27, [#allocation11], %s13633_s18, %s13633_s18, %s13634_s17  }
 0x112   :  { %s13643_s25 = smov [#allocation15]   ;;  %s13644_s15 = smov [#allocation18]  }
 0x113   :  { %s208_s11 = sshll.u32 %s13643_s25, 4  ;;  %s236_s16 = sshll.u32 %s13644_s15, 4  ;;  %s209_s11 = int_to_ptr.vmem [resolvable:$true] %s208_s11  ;;  %s237_s16 = int_to_ptr.vmem [resolvable:$true] %s236_s16 }
 0x114   :  { %s13432_s14 = scalar_lea.hbm %s13743_s20, 512 }
 0x115   :  { %p13433_p4 = scmp.ne.s32.totalorder %s13743_s20, %s13432_s14  ;;  %p13436_p5 = scmp.lt.u32.totalorder %s13432_s14, %s13743_s20 }
 0x117   :  { %p13438_p6 = pnand %p13436_p5, %p13433_p4 }
 0x119   :  { %13441 = shalt.err (!%p13438_p6)
}
 0x11a   :  { %s13442_s22 = scalar_lea.vmem %s209_s11, 512  ;;  %p13447_p8 = scmp.lt.s32.totalorder %s209_s11, %s209_s11 }
 0x11b   :  { %p13443_p7 = scmp.ne.s32.totalorder %s209_s11, %s13442_s22  ;;  %p13448_p9 = scmp.lt.s32.totalorder %s13442_s22, %s13442_s22 }
 0x11d   :  { %p13449_p10 = por %p13448_p9, %p13447_p8 }
 0x11f   :  { %p13450_p11 = pnand %p13449_p10, %p13443_p7 }
 0x121   :  { %13453 = shalt.err (!%p13450_p11)
}
 0x122   :  { %214 = dma.hbm_to_vmem [thread:$0]  %s13743_s20, 512, %s209_s11, [#allocation14], %s13633_s18, %s13633_s18, %s13634_s17  }
 0x123   :  { %s13454_s24 = scalar_lea.hbm %s13763_s19, 512 }
 0x124   :  { %p13455_p12 = scmp.ne.s32.totalorder %s13763_s19, %s13454_s24  ;;  %p13458_p13 = scmp.lt.u32.totalorder %s13454_s24, %s13763_s19 }
 0x126   :  { %p13460_p0 = pnand %p13458_p13, %p13455_p12 }
 0x128   :  { %13463 = shalt.err (!%p13460_p0)
}
 0x129   :  { %s13464_s8 = scalar_lea.vmem %s237_s16, 512  ;;  %p13469_p2 = scmp.lt.s32.totalorder %s237_s16, %s237_s16 }
 0x12a   :  { %p13465_p1 = scmp.ne.s32.totalorder %s237_s16, %s13464_s8  ;;  %p13470_p3 = scmp.lt.s32.totalorder %s13464_s8, %s13464_s8 }
 0x12c   :  { %p13471_p4 = por %p13470_p3, %p13469_p2 }
 0x12e   :  { %p13472_p5 = pnand %p13471_p4, %p13465_p1 }
 0x130   :  { %13475 = shalt.err (!%p13472_p5)
}
 0x131   :  { %242 = dma.hbm_to_vmem [thread:$0]  %s13763_s19, 512, %s237_s16, [#allocation17], %s13633_s18, %s13633_s18, %s13634_s17  }
 0x132   :  { %s13645_s20 = smov [#allocation21]   ;;  %s13646_s3 = smov [#allocation24]  }
 0x133   :  { %s264_s23 = sshll.u32 %s13645_s20, 4  ;;  %s298_s26 = sshll.u32 %s13646_s3, 4  ;;  %s265_s23 = int_to_ptr.vmem [resolvable:$true] %s264_s23  ;;  %s299_s26 = int_to_ptr.vmem [resolvable:$true] %s298_s26 }
 0x134   :  { %s13476_s28 = scalar_lea.hbm %s13783_s30, 512 }
 0x135   :  { %p13477_p6 = scmp.ne.s32.totalorder %s13783_s30, %s13476_s28  ;;  %p13480_p7 = scmp.lt.u32.totalorder %s13476_s28, %s13783_s30 }
 0x137   :  { %p13482_p8 = pnand %p13480_p7, %p13477_p6 }
 0x139   :  { %13485 = shalt.err (!%p13482_p8)
}
 0x13a   :  { %s13486_s1 = scalar_lea.vmem %s265_s23, 512  ;;  %p13491_p10 = scmp.lt.s32.totalorder %s265_s23, %s265_s23 }
 0x13b   :  { %p13487_p9 = scmp.ne.s32.totalorder %s265_s23, %s13486_s1  ;;  %p13492_p11 = scmp.lt.s32.totalorder %s13486_s1, %s13486_s1 }
 0x13d   :  { %p13493_p12 = por %p13492_p11, %p13491_p10 }
 0x13f   :  { %p13494_p13 = pnand %p13493_p12, %p13487_p9 }
 0x141   :  { %13497 = shalt.err (!%p13494_p13)
}
 0x142   :  { %s15196_s19 = sld [smem:[#allocation57_spill]] }
 0x143   :  { %270 = dma.hbm_to_vmem [thread:$0]  %s13783_s30, 512, %s265_s23, [#allocation20], %s13633_s18, %s13633_s18, %s13634_s17  }
 0x148   :  { %s13498_s29 = scalar_lea.hbm %s15196_s19, 512 }
 0x149   :  { %p13499_p0 = scmp.ne.s32.totalorder %s15196_s19, %s13498_s29  ;;  %p13502_p1 = scmp.lt.u32.totalorder %s13498_s29, %s15196_s19 }
 0x14b   :  { %p13504_p2 = pnand %p13502_p1, %p13499_p0 }
 0x14d   :  { %13507 = shalt.err (!%p13504_p2)
}
 0x14e   :  { %s13508_s2 = scalar_lea.vmem %s299_s26, 512  ;;  %p13513_p4 = scmp.lt.s32.totalorder %s299_s26, %s299_s26 }
 0x14f   :  { %p13509_p3 = scmp.ne.s32.totalorder %s299_s26, %s13508_s2  ;;  %p13514_p5 = scmp.lt.s32.totalorder %s13508_s2, %s13508_s2 }
 0x151   :  { %p13515_p6 = por %p13514_p5, %p13513_p4 }
 0x153   :  { %p13516_p7 = pnand %p13515_p6, %p13509_p3 }
 0x155   :  { %13519 = shalt.err (!%p13516_p7)
}
 0x156   :  { %s15197_s5 = sld [smem:[#allocation60_spill]]  ;;  %s13647_s30 = smov [#allocation27]  }
 0x157   :  { %304 = dma.hbm_to_vmem [thread:$0]  %s15196_s19, 512, %s299_s26, [#allocation23], %s13633_s18, %s13633_s18, %s13634_s17  }
 0x158   :  { %s326_s0 = sshll.u32 %s13647_s30, 4  ;;  %s13648_s6 = smov [#allocation30]   ;;  %s327_s0 = int_to_ptr.vmem [resolvable:$true] %s326_s0 }
 0x159   :  { %s354_s27 = sshll.u32 %s13648_s6, 4  ;;  %s355_s27 = int_to_ptr.vmem [resolvable:$true] %s354_s27 }
 0x15c   :  { %s13520_s4 = scalar_lea.hbm %s15197_s5, 512 }
 0x15d   :  { %p13521_p8 = scmp.ne.s32.totalorder %s15197_s5, %s13520_s4  ;;  %p13524_p9 = scmp.lt.u32.totalorder %s13520_s4, %s15197_s5 }
 0x15f   :  { %p13526_p10 = pnand %p13524_p9, %p13521_p8 }
 0x161   :  { %13529 = shalt.err (!%p13526_p10)
}
 0x162   :  { %s13530_s7 = scalar_lea.vmem %s327_s0, 512  ;;  %p13535_p12 = scmp.lt.s32.totalorder %s327_s0, %s327_s0 }
 0x163   :  { %p13531_p11 = scmp.ne.s32.totalorder %s327_s0, %s13530_s7  ;;  %p13536_p13 = scmp.lt.s32.totalorder %s13530_s7, %s13530_s7 }
 0x165   :  { %p13537_p0 = por %p13536_p13, %p13535_p12 }
 0x167   :  { %p13538_p1 = pnand %p13537_p0, %p13531_p11 }
 0x169   :  { %13541 = shalt.err (!%p13538_p1)
}
 0x16a   :  { %s15198_s13 = sld [smem:[#allocation63_spill]] }
 0x16b   :  { %332 = dma.hbm_to_vmem [thread:$0]  %s15197_s5, 512, %s327_s0, [#allocation26], %s13633_s18, %s13633_s18, %s13634_s17  }
 0x170   :  { %s13542_s10 = scalar_lea.hbm %s15198_s13, 512 }
 0x171   :  { %p13543_p2 = scmp.ne.s32.totalorder %s15198_s13, %s13542_s10  ;;  %p13546_p3 = scmp.lt.u32.totalorder %s13542_s10, %s15198_s13 }
 0x173   :  { %p13548_p4 = pnand %p13546_p3, %p13543_p2 }
 0x175   :  { %13551 = shalt.err (!%p13548_p4)
}
 0x176   :  { %s13552_s25 = scalar_lea.vmem %s355_s27, 512  ;;  %p13557_p6 = scmp.lt.s32.totalorder %s355_s27, %s355_s27 }
 0x177   :  { %p13553_p5 = scmp.ne.s32.totalorder %s355_s27, %s13552_s25  ;;  %p13558_p7 = scmp.lt.s32.totalorder %s13552_s25, %s13552_s25 }
 0x179   :  { %p13559_p8 = por %p13558_p7, %p13557_p6 }
 0x17b   :  { %p13560_p9 = pnand %p13559_p8, %p13553_p5 }
 0x17d   :  { %13563 = shalt.err (!%p13560_p9)
}
 0x17e   :  { %360 = dma.hbm_to_vmem [thread:$0]  %s15198_s13, 512, %s355_s27, [#allocation29], %s13633_s18, %s13633_s18, %s13634_s17  }
 0x17f   :  { %13564 = dma.done.wait [#allocation6], 256  }
 0x180   :  { %13565 = vsyncadd [#allocation6], 4294967040 }
 0x181   :  { %13566 = dma.done.wait [#allocation8], 128  }
 0x182   :  { %13567 = vsyncadd [#allocation8], 4294967168 }
 0x183   :  { %13568 = dma.done.wait [#allocation11], 768  }
 0x184   :  { %13569 = vsyncadd [#allocation11], 4294966528 }
 0x185   :  { %13570 = dma.done.wait [#allocation14], 1024  }
 0x186   :  { %13571 = vsyncadd [#allocation14], 4294966272 }
 0x187   :  { %13572 = dma.done.wait [#allocation17], 1024  }
 0x188   :  { %13573 = vsyncadd [#allocation17], 4294966272 }
 0x189   :  { %13574 = dma.done.wait [#allocation20], 1024  }
 0x18a   :  { %13575 = vsyncadd [#allocation20], 4294966272 }
 0x18b   :  { %13576 = dma.done.wait [#allocation23], 1024  }
 0x18c   :  { %13577 = vsyncadd [#allocation23], 4294966272 }
 0x18d   :  { %13578 = dma.done.wait [#allocation26], 1024  }
 0x18e   :  { %13579 = vsyncadd [#allocation26], 4294966272 }
 0x18f   :  { %13580 = dma.done.wait [#allocation29], 1024  }
 0x190   :  { %13581 = vsyncadd [#allocation29], 4294966272  ;;  %s15199_s11 = sld [smem:[#allocation40_spill]]  ;;  %s15200_s18 = sld [smem:[#allocation41_spill]]  ;;  %vm640_vm0 = vcmask 1040384   ;;  %vm458_vm1 = vcmask 1043456  }
 0x191   :  { %vm451_vm2 = vcmask 31744   ;;  %vm13649_vm3 = vmmov 1   ;;  %v438_v2 = vld [vmem:[#allocation7] sm:$0xf]  ;;  %v440_v3 = vld [vmem:[#allocation9] sm:$0xf] }
 0x192   :  { %vm14021_vm4 = vmpackc.low %vm640_vm0, %vm13649_vm3  ;;  %11997 = vmatprep.subr.msk.mxu0 %vm458_vm1, %v438_v2  ;;  %12002 = vmatprep.subr.msk.mxu1 %vm458_vm1, %v440_v3  ;;  %v442_v8 = vld [vmem:[#allocation10] sm:$0xff]  ;;  %v443_v9 = vld [vmem:[#allocation10 + $0x8] sm:$0x1]  ;;  %vm633_vm5 = vcmask 72704   ;;  %s15203_s17 = sld [smem:[#allocation42_spill]]  ;;  %s15204_s15 = sld [smem:[#allocation43_spill]] }
 0x193   :  { %11998 = vmatpush3.msk.msra.mxu0 %vm458_vm1, %v438_v2  ;;  %v436_v10 = vld [vmem:[#allocation5] sm:$0xff]  ;;  %12003 = vmatpush3.msk.msra.mxu1 %vm458_vm1, %v440_v3  ;;  %v12739_v11 = vpack.c.bf16 %v443_v9, %v442_v8  ;;  %v437_v12 = vld [vmem:[#allocation5 + $0x8] sm:$0xff]  ;;  %v722_v14 = vld [vmem:[#allocation12 + $0x8] sm:$0xff]  ;;  %s15205_s16 = sld [smem:[#allocation44_spill]]  ;;  %vm761_vm6 = vcmask 261120   ;;  %s15206_s14 = sld [smem:[#allocation47_spill]] }
 0x194   :  { %v721_v13 = vld [vmem:[#allocation12] sm:$0xff]  ;;  %v723_v16 = vld [vmem:[#allocation12 + $0x10] sm:$0xff]  ;;  %v724_v17 = vld [vmem:[#allocation12 + $0x18] sm:$0xff]  ;;  %s13650_s22 = smov 120   ;;  %s15207_s24 = sld [smem:[#allocation45_spill]]  ;;  %vm13652_vm7 = vmmov 0  }
 0x195   :  { %12741 = vmatprep.subr.msk.bf16.mxu0 %vm14021_vm4, %v12739_v11  ;;  %v12745_v15 = vpack.c.bf16 %v722_v14, %v721_v13  ;;  %v12749_v18 = vpack.c.bf16 %v724_v17, %v723_v16  ;;  %v728_v9 = vld [vmem:[#allocation13 + $0x10] sm:$0xff]  ;;  %v732_v13 = vld [vmem:[#allocation15 + $0x8] sm:$0xff]  ;;  %v734_v16 = vld [vmem:[#allocation15 + $0x18] sm:$0xff]  ;;  %s15208_s8 = sld [smem:[#allocation46_spill]]  ;;  %s15209_s20 = sld [smem:[#allocation48_spill]]  ;;  %vm1213_vm8 = vcmask 64512  }
 0x196   :  { %v432_v4 = vld [vmem:[%s15199_s11] sm:$0xff]  ;;  %v433_v6 = vld [vmem:[%s15199_s11 + $0x8] sm:$0xff]  ;;  %s15210_s23 = sld [smem:[#allocation49_spill]]  ;;  %s15211_s3 = sld [smem:[#allocation50_spill]]  ;;  %vm11385_vm9 = vcmask 23552  }
 0x197   :  { %v434_v5 = vld [vmem:[%s15200_s18] sm:$0xff]  ;;  %v435_v7 = vld [vmem:[%s15200_s18 + $0x8] sm:$0xff]  ;;  %11999 = vmatprep.mubr.msk.f32.mxu0 %vm451_vm2, %v432_v4  ;;  %12746 = vmatprep.subr.bf16.mxu1 %v12745_v15  ;;  %s13653_s26 = smov 96   ;;  %s13654_s28 = smov 88  }
 0x198   :  { %12004 = vmatprep.mubr.msk.f32.mxu1 %vm451_vm2, %v434_v5  ;;  %12000 = vmatmul.mubr.msk.f32.vlgmr.msra.gmra.mrb[0].mxu0 %vm451_vm2, %v433_v6  ;;  %v11450_v19 = vld [vmem:[%s15203_s17] ss:$0 sm:$0xff]  ;;  %s13655_s1 = smov 112   ;;  %s13656_s19 = smov 80  }
 0x199   :  { %12005 = vmatmul.mubr.msk.f32.vlgmr.msra.gmra.mrb[0].mxu1 %vm451_vm2, %v435_v7  ;;  %12011 = vmatprep.mubr.msk.f32.mxu0 %vm633_vm5, %v436_v10  ;;  %v11454_v20 = vld [vmem:[%s15204_s15] ss:$0 sm:$0xff]  ;;  %v727_v7 = vld [vmem:[#allocation13 + $0x8] sm:$0xff]  ;;  %v729_v10 = vld [vmem:[#allocation13 + $0x18] sm:$0xff]  ;;  %s13657_s29 = smov 104   ;;  %s13658_s2 = smov 72  }
 0x19a   :  { %12744 = vmatpush3.bf16.msk.msra.mxu0 %vm14021_vm4, %v12739_v11  ;;  %12748 = vmatpush3.bf16.msra.mxu1 %v12745_v15  ;;  %v11458_v28 = vld [vmem:[%s15205_s16] ss:$0 sm:$0xff]  ;;  %v12757_v11 = vpack.c.bf16 %v729_v10, %v728_v9  ;;  %v733_v15 = vld [vmem:[#allocation15 + $0x10] sm:$0xff]  ;;  %s15212_s5 = sld [smem:[#allocation51_spill]]  ;;  %s15213_s30 = sld [smem:[#allocation52_spill]] }
 0x19b   :  { %12750 = vmatprep.subr.bf16.mxu1 %v12749_v18  ;;  %v726_v6 = vld [vmem:[#allocation13] sm:$0xff]  ;;  %s15214_s0 = sld [smem:[#allocation55_spill]]  ;;  %s15215_s6 = sld [smem:[#allocation56_spill]] }
 0x19c   :  { %v12753_v8 = vpack.c.bf16 %v727_v7, %v726_v6  ;;  %v736_v17 = vld [vmem:[#allocation16] sm:$0xff]  ;;  %s15216_s27 = sld [smem:[#allocation53_spill]]  ;;  %s15217_s4 = sld [smem:[#allocation58_spill]] }
 0x19d   :  { %12012 = vmatmul.mubr.msk.f32.vlgmr.msra.gmra.mrb[2].mxu0 %vm633_vm5, %v437_v12  ;;  %v731_v12 = vld [vmem:[#allocation15] sm:$0xff]  ;;  %s15218_s7 = sld [smem:[#allocation61_spill]]  ;;  %s15219_s13 = sld [smem:[#allocation54_spill]] }
 0x19e   :  { %12752 = vmatpush3.bf16.msra.mxu1 %v12749_v18  ;;  %12754 = vmatprep.subr.bf16.mxu0 %v12753_v8  ;;  %v12761_v14 = vpack.c.bf16 %v732_v13, %v731_v12  ;;  %v12765_v18 = vpack.c.bf16 %v734_v16, %v733_v15  ;;  %v13651_v12 = vmov 0.0   ;;  %s15220_s10 = sld [smem:[#allocation59_spill]]  ;;  %s15221_s25 = sld [smem:[#allocation62_spill]] }
 0x19f   :  { %12756 = vmatpush3.bf16.msra.mxu0 %v12753_v8  ;;  %s15222_s11 = sld [smem:[#allocation64_spill]]  ;;  %s15223_s18 = sld [smem:[#allocation65_spill]] }
 0x1a0   :  { %12758 = vmatprep.subr.bf16.mxu0 %v12757_v11  ;;  %12762 = vmatprep.subr.bf16.mxu1 %v12761_v14  ;;  %s15224_s17 = sld [smem:[#allocation67_spill]]  ;;  %s15225_s15 = sld [smem:[#allocation66_spill]] }
 0x1a1   :  { %s15226_s16 = sld [smem:[#allocation69_spill]] }
 0x1a3   :  { %12760 = vmatpush3.bf16.msra.mxu0 %v12757_v11 }
 0x26b   :  { %v12001_v21 = vpop.f32.mrb[0].mxu0 }
 0x26c   :  { %v12006_v22 = vpop.f32.mrb[0].mxu1  ;;  %v528_v23 = vpop.f32.mrb[1].mxu0  ;;  %v534_v29 = vadd.f32 %v12001_v21, %v11450_v19  ;;  %v11464_v21 = vld [vmem:[%s15206_s14] ss:$0 sm:$0xff]  ;;  %s15227_s14 = sld [smem:[#allocation68_spill]] }
 0x26d   :  { %v618_v24 = vpop.f32.mrb[1].mxu1  ;;  %v624_v25 = vadd.f32 %v12006_v22, %v11454_v20  ;;  %v529_v26 = vadd.f32 %v11450_v19, %v528_v23  ;;  %v737_v19 = vld [vmem:[#allocation16 + $0x8] sm:$0xff] }
 0x26e   :  { %v619_v27 = vadd.f32 %v11454_v20, %v618_v24  ;;  %v808_v37 = vsel %vm761_vm6, %v534_v29, 0.0  ;;  %v12769_v20 = vpack.c.bf16 %v737_v19, %v736_v17  ;;  %v11470_v17 = vld [vmem:[%s15210_s23] ss:$0 sm:$0xff] }
 0x26f   :  { %v805_v31 = vsel %vm761_vm6, %v529_v26, 0.0  ;;  %v838_v34 = vsel %vm761_vm6, %v624_v25, 0.0 }
 0x270   :  { %v835_v30 = vsel %vm761_vm6, %v619_v27, 0.0  ;;  %806 = vadd.xlane.f32.xlu0 %v805_v31  ;;  %v12013_v32 = vpop.f32.mrb[2].mxu0  ;;  %12770 = vmatprep.subr.bf16.mxu0 %v12769_v20 }
 0x271   :  { %836 = vadd.xlane.f32.xlu1 %v835_v30  ;;  %v14046_v33 = vadd.f32 %v12013_v32, %v11458_v28  ;;  %v710_v35 = vpop.f32.mrb[3].mxu0 }
 0x272   :  { %v14049_v36 = vadd.f32 %v11458_v28, %v710_v35 }
 0x273   :  { %v765_v38 = vsel %vm761_vm6, %v14046_v33, 0.0 }
 0x274   :  { %809 = vadd.xlane.f32.xlu0 %v808_v37  ;;  %v762_v39 = vsel %vm761_vm6, %v14049_v36, 0.0  ;;  %12022 = vmatprep.mubr.msk.f32.mxu1 %vm761_vm6, %v14049_v36 }
 0x275   :  { %839 = vadd.xlane.f32.xlu1 %v838_v34  ;;  %12023 = vmatmul.mubr.msk.f32.vlgmr.msra.gmra.mrb[2].mxu1 %vm761_vm6, %v14046_v33 }
 0x276   :  { %12764 = vmatpush3.bf16.msra.mxu1 %v12761_v14 }
 0x277   :  { %12766 = vmatprep.subr.bf16.mxu1 %v12765_v18 }
 0x278   :  { %763 = vadd.xlane.f32.xlu0 %v762_v39 }
 0x279   :  { %766 = vadd.xlane.f32.xlu1 %v765_v38 }
 0x27a   :  { %12768 = vmatpush3.bf16.msra.mxu1 %v12765_v18 }
 0x27b   :  { %12058 = vmatprep.subr.mxu1 %v13651_v12 }
 0x2fd   :  { %v807_v41 = vpop.xlane.xlu0 %806 }
 0x2fe   :  { %v837_v40 = vpop.xlane.xlu1 %836  ;;  %v811_v43 = vmul.f32 0.03125, %v807_v41 }
 0x2ff   :  { %v841_v42 = vmul.f32 0.03125, %v837_v40 }
 0x300   :  { %v14062_v45 = vsub.f32 %v529_v26, %v811_v43 }
 0x301   :  { %v14060_v44 = vsub.f32 %v619_v27, %v841_v42  ;;  %v810_v47 = vpop.xlane.xlu0 %809 }
 0x302   :  { %v840_v46 = vpop.xlane.xlu1 %839  ;;  %v812_v49 = vmul.f32 0.03125, %v810_v47  ;;  %v815_v50 = vmul.f32 %v14062_v45, %v14062_v45 }
 0x303   :  { %v842_v48 = vmul.f32 0.03125, %v840_v46  ;;  %v845_v51 = vmul.f32 %v14060_v44, %v14060_v44 }
 0x304   :  { %v14070_v53 = vsub.f32 %v534_v29, %v812_v49  ;;  %v817_v54 = vsel %vm761_vm6, %v815_v50, 0.0  ;;  %v11462_v49 = vld [vmem:[%s15207_s24] ss:$0 sm:$0xff] }
 0x305   :  { %v14068_v52 = vsub.f32 %v624_v25, %v842_v48  ;;  %818 = vadd.xlane.f32.xlu0 %v817_v54  ;;  %v764_v56 = vpop.xlane.xlu0 %763  ;;  %v847_v60 = vsel %vm761_vm6, %v845_v51, 0.0  ;;  %v11463_v51 = vld [vmem:[%s15208_s8] ss:$0 sm:$0xff] }
 0x306   :  { %v767_v55 = vpop.xlane.xlu1 %766  ;;  %v769_v58 = vmul.f32 0.03125, %v764_v56  ;;  %v816_v59 = vmul.f32 %v14070_v53, %v14070_v53 }
 0x307   :  { %v770_v57 = vmul.f32 0.03125, %v767_v55  ;;  %v846_v0 = vmul.f32 %v14068_v52, %v14068_v52 }
 0x308   :  { %v14080_v62 = vsub.f32 %v14049_v36, %v769_v58  ;;  %v820_v63 = vsel %vm761_vm6, %v816_v59, 0.0 }
 0x309   :  { %v14077_v61 = vsub.f32 %v14046_v33, %v770_v57  ;;  %848 = vadd.xlane.f32.xlu0 %v847_v60  ;;  %821 = vadd.xlane.f32.xlu1 %v820_v63  ;;  %v850_v2 = vsel %vm761_vm6, %v846_v0, 0.0  ;;  %v738_v60 = vld [vmem:[#allocation16 + $0x10] sm:$0xff]  ;;  %v739_v63 = vld [vmem:[#allocation16 + $0x18] sm:$0xff] }
 0x30a   :  { %v773_v1 = vmul.f32 %v14080_v62, %v14080_v62 }
 0x30b   :  { %v774_v4 = vmul.f32 %v14077_v61, %v14077_v61 }
 0x30c   :  { %v775_v3 = vsel %vm761_vm6, %v773_v1, 0.0 }
 0x30d   :  { %851 = vadd.xlane.f32.xlu1 %v850_v2  ;;  %776 = vadd.xlane.f32.xlu0 %v775_v3  ;;  %v778_v5 = vsel %vm761_vm6, %v774_v4, 0.0 }
 0x311   :  { %779 = vadd.xlane.f32.xlu1 %v778_v5 }
 0x348   :  { %v12024_v22 = vpop.f32.mrb[2].mxu1 }
 0x349   :  { %v14093_v23 = vadd.f32 %v12024_v22, %v11464_v21  ;;  %v943_v24 = vpop.f32.mrb[3].mxu1  ;;  %v11473_v22 = vld [vmem:[%s15211_s3] ss:$0 sm:$0xff] }
 0x34a   :  { %v14095_v25 = vadd.f32 %v11464_v21, %v943_v24 }
 0x34c   :  { %1701 = vrot.lane.b32.xlu1 %v14095_v25, %s13650_s22 }
 0x392   :  { %v819_v26 = vpop.xlane.xlu0 %818 }
 0x393   :  { %v823_v27 = vmul.f32 0.03125, %v819_v26 }
 0x395   :  { %v825_v28 = vadd.f32 1e-05, %v823_v27 }
 0x396   :  { %v822_v29 = vpop.xlane.xlu1 %821  ;;  %v849_v30 = vpop.xlane.xlu0 %848 }
 0x397   :  { %13010 = vrsqrt.f32 %v825_v28  ;;  %v824_v31 = vmul.f32 0.03125, %v822_v29  ;;  %v853_v32 = vmul.f32 0.03125, %v849_v30 }
 0x399   :  { %v826_v34 = vadd.f32 1e-05, %v824_v31  ;;  %v855_v35 = vadd.f32 1e-05, %v853_v32 }
 0x39a   :  { %v852_v37 = vpop.xlane.xlu1 %851  ;;  %v777_v38 = vpop.xlane.xlu0 %776 }
 0x39b   :  { %13012 = vrsqrt.f32 %v826_v34  ;;  %v854_v39 = vmul.f32 0.03125, %v852_v37  ;;  %v781_v40 = vmul.f32 0.03125, %v777_v38 }
 0x39c   :  { %13014 = vrsqrt.f32 %v855_v35 }
 0x39d   :  { %v856_v41 = vadd.f32 1e-05, %v854_v39  ;;  %v783_v42 = vadd.f32 1e-05, %v781_v40 }
 0x39e   :  { %v780_v43 = vpop.xlane.xlu1 %779 }
 0x39f   :  { %13016 = vrsqrt.f32 %v856_v41  ;;  %v782_v46 = vmul.f32 0.03125, %v780_v43 }
 0x3a0   :  { %13018 = vrsqrt.f32 %v783_v42 }
 0x3a1   :  { %v13011_v47 = vpop.eup %13010  ;;  %v784_v48 = vadd.f32 1e-05, %v782_v46 }
 0x3a2   :  { %v829_v50 = vmul.f32 %v13011_v47, %v14062_v45 }
 0x3a3   :  { %13020 = vrsqrt.f32 %v784_v48 }
 0x3a4   :  { %v831_v54 = vmul.f32 %v11462_v49, %v829_v50 }
 0x3a5   :  { %v13013_v55 = vpop.eup %13012 }
 0x3a6   :  { %v13015_v56 = vpop.eup %13014  ;;  %v830_v57 = vmul.f32 %v13013_v55, %v14070_v53  ;;  %v14103_v58 = vadd.f32 %v11463_v51, %v831_v54  ;;  %v12773_v53 = vpack.c.bf16 %v739_v63, %v738_v60 }
 0x3a7   :  { %v14106_v59 = vmul.f32 %v13015_v56, %v14060_v44 }
 0x3a8   :  { %12033 = vmatprep.mubr.msk.f32.mxu0 %vm761_vm6, %v14103_v58  ;;  %v832_v0 = vmul.f32 %v11462_v49, %v830_v57 }
 0x3a9   :  { %v13017_v1 = vpop.eup %13016  ;;  %v861_v45 = vmul.f32 %v11462_v49, %v14106_v59 }
 0x3aa   :  { %v13019_v2 = vpop.eup %13018  ;;  %v14112_v3 = vmul.f32 %v13017_v1, %v14068_v52  ;;  %v14114_v4 = vadd.f32 %v11463_v51, %v832_v0 }
 0x3ab   :  { %v863_v5 = vadd.f32 %v11463_v51, %v861_v45  ;;  %v14117_v44 = vmul.f32 %v13019_v2, %v14080_v62 }
 0x3ac   :  { %12034 = vmatmul.mubr.msk.f32.vlgmr.msra.gmra.mrb[4].mxu0 %vm761_vm6, %v14114_v4  ;;  %v862_v6 = vmul.f32 %v11462_v49, %v14112_v3 }
 0x3ad   :  { %v13021_v7 = vpop.eup %13020  ;;  %12044 = vmatprep.mubr.msk.f32.mxu1 %vm761_vm6, %v863_v5  ;;  %12772 = vmatpush3.bf16.msra.mxu0 %v12769_v20  ;;  %v795_v8 = vmul.f32 %v11462_v49, %v14117_v44 }
 0x3ae   :  { %v14125_v52 = vmul.f32 %v13021_v7, %v14077_v61  ;;  %v864_v9 = vadd.f32 %v11463_v51, %v862_v6  ;;  %12774 = vmatprep.subr.bf16.mxu0 %v12773_v53  ;;  %v11467_v61 = vld [vmem:[%s15209_s20] ss:$0 sm:$0xff] }
 0x3af   :  { %v803_v10 = vadd.f32 %v11463_v51, %v795_v8 }
 0x3b0   :  { %12045 = vmatmul.mubr.msk.f32.vlgmr.msra.gmra.mrb[4].mxu1 %vm761_vm6, %v864_v9  ;;  %v796_v62 = vmul.f32 %v11462_v49, %v14125_v52 }
 0x3b1   :  { %12055 = vmatprep.mubr.msk.f32.mxu0 %vm761_vm6, %v803_v10  ;;  %12776 = vmatpush3.bf16.msra.mxu0 %v12773_v53 }
 0x3b2   :  { %v804_v11 = vadd.f32 %v11463_v51, %v796_v62  ;;  %12063 = vmatprep.subr.mxu0 %v13651_v12  ;;  %12060 = vmatprep.mubr.msk.f32.mxu1 %vm13652_vm7, %v13651_v12 }
 0x3b4   :  { %12056 = vmatmul.mubr.msk.f32.vlgmr.msra.gmra.mrb[6].mxu0 %vm761_vm6, %v804_v11 }
 0x3b5   :  { %12065 = vmatprep.mubr.msk.f32.mxu0 %vm13652_vm7, %v13651_v12 }
 0x3be   :  { %v1702_v29 = vpop.permute.xlu1 %1701 }
 0x47f   :  { %v12035_v13 = vpop.f32.mrb[4].mxu0 }
 0x480   :  { %v14138_v14 = vadd.f32 %v12035_v13, %v11467_v61  ;;  %v1030_v15 = vpop.f32.mrb[5].mxu0 }
 0x481   :  { %v14140_v16 = vadd.f32 %v11467_v61, %v1030_v15 }
 0x483   :  { %1703 = vrot.lane.b32.xlu0 %v14140_v16, %s13650_s22  ;;  %v12046_v18 = vpop.f32.mrb[4].mxu1  ;;  %12059 = vmatpush3.xpose.msk.msra.mxu1 %vm1213_vm8, %v14140_v16 }
 0x484   :  { %v14147_v19 = vadd.f32 %v12046_v18, %v11470_v17  ;;  %v1117_v20 = vpop.f32.mrb[5].mxu1  ;;  %12068 = vmatprep.subr.mxu1 %v13651_v12 }
 0x485   :  { %v14150_v21 = vadd.f32 %v11470_v17, %v1117_v20 }
 0x486   :  { %12061 = vmatmul.mubr.msk.f32.vlgmr.msra.gmra.mrb[6].mxu1 %vm1213_vm8, %v14095_v25 }
 0x487   :  { %1780 = vrot.lane.b32.xlu1 %v14150_v21, %s13650_s22  ;;  %v12057_v24 = vpop.f32.mrb[6].mxu0  ;;  %12064 = vmatpush3.xpose.msk.msra.mxu0 %vm1213_vm8, %v14150_v21 }
 0x488   :  { %v14159_v26 = vadd.f32 %v12057_v24, %v11473_v22  ;;  %v1204_v27 = vpop.f32.mrb[7].mxu0  ;;  %12070 = vmatprep.mubr.msk.f32.mxu1 %vm13652_vm7, %v13651_v12  ;;  %12073 = vmatprep.subr.mxu0 %v13651_v12 }
 0x489   :  { %v14164_v28 = vadd.f32 %v11473_v22, %v1204_v27 }
 0x48a   :  { %12066 = vmatmul.mubr.msk.f32.vlgmr.msra.gmra.mrb[8].mxu0 %vm1213_vm8, %v14095_v25 }
 0x48b   :  { %1855 = vrot.lane.b32.xlu1 %v14164_v28, %s13650_s22  ;;  %12069 = vmatpush3.xpose.msk.msra.mxu1 %vm1213_vm8, %v14164_v28 }
 0x48c   :  { %12088 = vmatprep.subr.mxu1 %v13651_v12  ;;  %12075 = vmatprep.mubr.msk.f32.mxu0 %vm13652_vm7, %v13651_v12 }
 0x48e   :  { %12071 = vmatmul.mubr.msk.f32.vlgmr.msra.gmra.mrb[8].mxu1 %vm1213_vm8, %v14095_v25 }
 0x48f   :  { %12090 = vmatprep.mubr.msk.f32.mxu1 %vm13652_vm7, %v13651_v12 }
 0x4f5   :  { %v1704_v30 = vpop.permute.xlu0 %1703 }
 0x4f6   :  { %12089 = vmatpush3.xpose.msk.msra.mxu1 %vm1213_vm8, %v1704_v30 }
 0x4f7   :  { %12093 = vmatprep.subr.mxu1 %v13651_v12 }
 0x4f9   :  { %v1781_v31 = vpop.permute.xlu1 %1780  ;;  %12091 = vmatmul.mubr.msk.f32.vlgmr.msra.gmra.mrb[10].mxu1 %vm1213_vm8, %v1702_v29 }
 0x4fa   :  { %12094 = vmatpush3.xpose.msk.msra.mxu1 %vm1213_vm8, %v1781_v31  ;;  %12095 = vmatprep.mubr.msk.f32.mxu1 %vm13652_vm7, %v13651_v12 }
 0x4fb   :  { %12098 = vmatprep.subr.mxu1 %v13651_v12 }
 0x4fd   :  { %v1856_v32 = vpop.permute.xlu1 %1855  ;;  %12096 = vmatmul.mubr.msk.f32.vlgmr.msra.gmra.mrb[12].mxu1 %vm1213_vm8, %v1702_v29 }
 0x4fe   :  { %12099 = vmatpush3.xpose.msk.msra.mxu1 %vm1213_vm8, %v1856_v32  ;;  %12100 = vmatprep.mubr.msk.f32.mxu1 %vm13652_vm7, %v13651_v12 }
 0x4ff   :  { %12118 = vmatprep.subr.mxu1 %v13651_v12 }
 0x501   :  { %12101 = vmatmul.mubr.msk.f32.vlgmr.msra.gmra.mrb[14].mxu1 %vm1213_vm8, %v1702_v29 }
 0x502   :  { %12120 = vmatprep.mubr.msk.f32.mxu1 %vm13652_vm7, %v13651_v12 }
 0x559   :  { %v1286_v34 = vpop.f32.mrb[6].mxu1 }
 0x55a   :  { %v1290_v35 = vmul.f32 0.35355338, %v1286_v34  ;;  %v12062_v37 = vpop.f32.mrb[7].mxu1 }
 0x55c   :  { %v1439_v38 = vsel %vm1213_vm8, %v1290_v35, -inf }
 0x55d   :  { %1440 = vmax.xlane.f32.xlu0 %v1439_v38  ;;  %v1360_v39 = vpop.f32.mrb[8].mxu0 }
 0x55e   :  { %v1364_v40 = vmul.f32 0.35355338, %v1360_v39  ;;  %v12067_v41 = vpop.f32.mrb[9].mxu0 }
 0x560   :  { %v1442_v42 = vsel %vm1213_vm8, %v1364_v40, -inf }
 0x561   :  { %1443 = vmax.xlane.f32.xlu1 %v1442_v42  ;;  %v1434_v43 = vpop.f32.mrb[8].mxu1 }
 0x562   :  { %v1438_v46 = vmul.f32 0.35355338, %v1434_v43  ;;  %v12072_v47 = vpop.f32.mrb[9].mxu1 }
 0x564   :  { %v1446_v48 = vsel %vm1213_vm8, %v1438_v46, -inf }
 0x565   :  { %1447 = vmax.xlane.f32.xlu0 %v1446_v48 }
 0x572   :  { %1546 = vrot.lane.b32.xlu1 %v14140_v16, %s13653_s26 }
 0x576   :  { %1622 = vrot.lane.b32.xlu1 %v14164_v28, %s13653_s26 }
 0x5cc   :  { %v1775_v49 = vpop.f32.mrb[10].mxu1 }
 0x5cd   :  { %v1779_v50 = vmul.f32 0.35355338, %v1775_v49  ;;  %v12092_v51 = vpop.f32.mrb[11].mxu1 }
 0x5cf   :  { %v1930_v54 = vsel %vm1213_vm8, %v1779_v50, -inf }
 0x5d0   :  { %1931 = vmax.xlane.f32.xlu0 %v1930_v54  ;;  %v1850_v55 = vpop.f32.mrb[12].mxu1 }
 0x5d1   :  { %v1854_v56 = vmul.f32 0.35355338, %v1850_v55  ;;  %v12097_v57 = vpop.f32.mrb[13].mxu1 }
 0x5d3   :  { %v1933_v60 = vsel %vm1213_vm8, %v1854_v56, -inf }
 0x5d4   :  { %1934 = vmax.xlane.f32.xlu0 %v1933_v60  ;;  %v1925_v63 = vpop.f32.mrb[14].mxu1 }
 0x5d5   :  { %v1929_v0 = vmul.f32 0.35355338, %v1925_v63  ;;  %v12102_v1 = vpop.f32.mrb[15].mxu1 }
 0x5d7   :  { %v1937_v45 = vsel %vm1213_vm8, %v1929_v0, -inf }
 0x5d8   :  { %1938 = vmax.xlane.f32.xlu1 %v1937_v45 }
 0x5e9   :  { %1961 = vrot.lane.b32.xlu1 %v14150_v21, %s13654_s28 }
 0x5ea   :  { %1470 = vrot.lane.b32.xlu0 %v14150_v21, %s13653_s26  ;;  %v1441_v2 = vpop.xlane.xlu0 %1440 }
 0x5ed   :  { %2113 = vrot.lane.b32.xlu1 %v14164_v28, %s13654_s28 }
 0x5ee   :  { %v1444_v53 = vpop.xlane.xlu1 %1443  ;;  %2037 = vrot.lane.b32.xlu0 %v14140_v16, %s13654_s28 }
 0x5ef   :  { %v1445_v5 = vmax.f32 %v1441_v2, %v1444_v53 }
 0x5f2   :  { %v1448_v6 = vpop.xlane.xlu0 %1447  ;;  %v1547_v13 = vpop.permute.xlu1 %1546 }
 0x5f3   :  { %v1449_v7 = vmax.f32 %v1445_v5, %v1448_v6 }
 0x5f5   :  { %v1450_v8 = vsub.f32 %v1290_v35, %v1449_v7  ;;  %v1453_v11 = vsub.f32 %v1364_v40, %v1449_v7  ;;  %v1456_v20 = vsub.f32 %v1438_v46, %v1449_v7 }
 0x5f6   :  { %v1623_v17 = vpop.permute.xlu1 %1622 }
 0x5f7   :  { %v1451_v9 = vmul.f32 1.442695, %v1450_v8  ;;  %v1454_v61 = vmul.f32 1.442695, %v1453_v11  ;;  %v1457_v31 = vmul.f32 1.442695, %v1456_v20 }
 0x5f9   :  { %13022 = vpow2.f32 %v1451_v9 }
 0x5fa   :  { %13024 = vpow2.f32 %v1454_v61 }
 0x5fb   :  { %13026 = vpow2.f32 %v1457_v31 }
 0x603   :  { %v13023_v10 = vpop.eup %13022 }
 0x604   :  { %v1459_v62 = vsel %vm1213_vm8, %v13023_v10, 0.0  ;;  %v13025_v29 = vpop.eup %13024 }
 0x605   :  { %v13027_v40 = vpop.eup %13026  ;;  %v1462_v54 = vsel %vm1213_vm8, %v13025_v29, 0.0 }
 0x606   :  { %v1466_v51 = vsel %vm1213_vm8, %v13027_v40, 0.0 }
 0x60d   :  { %1460 = vadd.xlane.f32.xlu0 %v1459_v62 }
 0x65d   :  { %v1932_v15 = vpop.xlane.xlu0 %1931 }
 0x661   :  { %v1935_v18 = vpop.xlane.xlu0 %1934 }
 0x662   :  { %v1936_v22 = vmax.f32 %v1932_v15, %v1935_v18  ;;  %v14259_v15 = vld [vmem:[#allocation18] sm:$0xff] }
 0x665   :  { %v1939_v24 = vpop.xlane.xlu1 %1938  ;;  %v1471_v27 = vpop.permute.xlu0 %1470 }
 0x666   :  { %v1940_v30 = vmax.f32 %v1936_v22, %v1939_v24  ;;  %12074 = vmatpush3.msra.mxu0 %v1471_v27 }
 0x667   :  { %12076 = vmatmul.mubr.msk.f32.vlgmr.msra.gmra.mrb[10].mxu0 %vm1213_vm8, %v13025_v29  ;;  %12078 = vmatprep.subr.mxu0 %v13651_v12 }
 0x668   :  { %v1941_v32 = vsub.f32 %v1779_v50, %v1940_v30  ;;  %v1944_v34 = vsub.f32 %v1854_v56, %v1940_v30  ;;  %v1947_v35 = vsub.f32 %v1929_v0, %v1940_v30  ;;  %12079 = vmatpush3.msra.mxu0 %v1547_v13  ;;  %12080 = vmatprep.mubr.msk.f32.mxu0 %vm13652_vm7, %v13651_v12  ;;  %v14250_v56 = vld [vmem:[#allocation18 + $0x8] sm:$0xff] }
 0x669   :  { %12083 = vmatprep.subr.mxu0 %v13651_v12  ;;  %v1962_v43 = vpop.permute.xlu1 %1961  ;;  %v2038_v49 = vpop.permute.xlu0 %2037  ;;  %12119 = vmatpush3.msra.mxu1 %v14250_v56 }
 0x66a   :  { %v1942_v37 = vmul.f32 1.442695, %v1941_v32  ;;  %v1945_v38 = vmul.f32 1.442695, %v1944_v34  ;;  %v1948_v39 = vmul.f32 1.442695, %v1947_v35  ;;  %12123 = vmatprep.subr.mxu1 %v13651_v12 }
 0x66c   :  { %13028 = vpow2.f32 %v1942_v37 }
 0x66d   :  { %13030 = vpow2.f32 %v1945_v38  ;;  %v2114_v55 = vpop.permute.xlu1 %2113 }
 0x66e   :  { %13032 = vpow2.f32 %v1948_v39 }
 0x66f   :  { %12081 = vmatmul.mubr.msk.f32.vlgmr.msra.gmra.mrb[10].mxu0 %vm1213_vm8, %v13023_v10 }
 0x670   :  { %12084 = vmatpush3.msra.mxu0 %v1623_v17  ;;  %12085 = vmatprep.mubr.msk.f32.mxu0 %vm13652_vm7, %v13651_v12 }
 0x671   :  { %12103 = vmatprep.subr.mxu0 %v13651_v12 }
 0x676   :  { %v13029_v41 = vpop.eup %13028 }
 0x677   :  { %v13031_v42 = vpop.eup %13030  ;;  %12086 = vmatmul.mubr.msk.f32.vlgmr.msra.gmra.mrb[10].mxu0 %vm1213_vm8, %v13027_v40  ;;  %v1950_v46 = vsel %vm1213_vm8, %v13029_v41, 0.0 }
 0x678   :  { %v13033_v47 = vpop.eup %13032  ;;  %12104 = vmatpush3.msra.mxu0 %v1962_v43  ;;  %v1953_v48 = vsel %vm1213_vm8, %v13031_v42, 0.0  ;;  %1951 = vadd.xlane.f32.xlu0 %v1950_v46 }
 0x679   :  { %1954 = vadd.xlane.f32.xlu1 %v1953_v48  ;;  %12105 = vmatprep.mubr.msk.f32.mxu0 %vm13652_vm7, %v13651_v12  ;;  %v1957_v50 = vsel %vm1213_vm8, %v13033_v47, 0.0 }
 0x67a   :  { %12108 = vmatprep.subr.mxu0 %v13651_v12 }
 0x67b   :  { %12106 = vmatmul.mubr.msk.f32.vlgmr.msra.gmra.mrb[12].mxu0 %vm1213_vm8, %v13031_v42 }
 0x67c   :  { %12109 = vmatpush3.msra.mxu0 %v2038_v49  ;;  %1958 = vadd.xlane.f32.xlu0 %v1957_v50 }
 0x67d   :  { %1467 = vadd.xlane.f32.xlu1 %v1466_v51  ;;  %12110 = vmatprep.mubr.msk.f32.mxu0 %vm13652_vm7, %v13651_v12 }
 0x67e   :  { %12113 = vmatprep.subr.mxu0 %v13651_v12 }
 0x680   :  { %1463 = vadd.xlane.f32.xlu0 %v1462_v54 }
 0x683   :  { %12111 = vmatmul.mubr.msk.f32.vlgmr.msra.gmra.mrb[12].mxu0 %vm1213_vm8, %v13029_v41 }
 0x684   :  { %12114 = vmatpush3.msra.mxu0 %v2114_v55  ;;  %12115 = vmatprep.mubr.msk.f32.mxu0 %vm13652_vm7, %v13651_v12 }
 0x685   :  { %12133 = vmatprep.subr.mxu0 %v13651_v12 }
 0x68b   :  { %12116 = vmatmul.mubr.msk.f32.vlgmr.msra.gmra.mrb[12].mxu0 %vm1213_vm8, %v13033_v47 }
 0x68c   :  { %12135 = vmatprep.mubr.msk.f32.mxu0 %vm13652_vm7, %v13651_v12 }
 0x68e   :  { %2417 = vrot.lane.b32.xlu1 %v14150_v21, %s13655_s1 }
 0x692   :  { %2338 = vrot.lane.b32.xlu1 %v14095_v25, %s13655_s1 }
 0x696   :  { %2492 = vrot.lane.b32.xlu1 %v14164_v28, %s13655_s1  ;;  %2340 = vrot.lane.b32.xlu0 %v14140_v16, %s13655_s1 }
 0x69a   :  { %v1461_v1 = vpop.xlane.xlu0 %1460 }
 0x705   :  { %v1952_v45 = vpop.xlane.xlu0 %1951 }
 0x706   :  { %v1955_v57 = vpop.xlane.xlu1 %1954 }
 0x707   :  { %v1956_v7 = vadd.f32 %v1955_v57, %v1952_v45 }
 0x709   :  { %v1959_v2 = vpop.xlane.xlu0 %1958 }
 0x70a   :  { %v1468_v60 = vpop.xlane.xlu1 %1467  ;;  %v1960_v8 = vadd.f32 %v1959_v2, %v1956_v7 }
 0x70c   :  { %13034 = vrcp.f32 %v1960_v8 }
 0x70d   :  { %v1464_v6 = vpop.xlane.xlu0 %1463 }
 0x70e   :  { %v2418_v63 = vpop.permute.xlu1 %2417  ;;  %v1465_v9 = vadd.f32 %v1464_v6, %v1461_v1 }
 0x70f   :  { %12134 = vmatpush3.xpose.msk.msra.mxu0 %vm1213_vm8, %v2418_v63 }
 0x710   :  { %12143 = vmatprep.subr.mxu0 %v13651_v12  ;;  %v1469_v10 = vadd.f32 %v1468_v60, %v1465_v9 }
 0x711   :  { %v2341_v20 = vpop.permute.xlu0 %2340 }
 0x712   :  { %v2339_v0 = vpop.permute.xlu1 %2338  ;;  %13036 = vrcp.f32 %v1469_v10 }
 0x713   :  { %12136 = vmatmul.mubr.msk.f32.vlgmr.msra.gmra.mrb[14].mxu0 %vm1213_vm8, %v2339_v0 }
 0x714   :  { %12145 = vmatprep.mubr.msk.f32.mxu0 %vm13652_vm7, %v13651_v12 }
 0x716   :  { %v13035_v62 = vpop.eup %13034  ;;  %v2493_v22 = vpop.permute.xlu1 %2492 }
 0x71c   :  { %v13037_v17 = vpop.eup %13036 }
 0x74a   :  { %v1694_v53 = vpop.f32.mrb[10].mxu0 }
 0x74b   :  { %v12087_v5 = vpop.f32.mrb[11].mxu0  ;;  %v1700_v18 = vmul.f32 %v13037_v17, %v1694_v53 }
 0x75e   :  { %v2185_v11 = vpop.f32.mrb[12].mxu0 }
 0x75f   :  { %v2191_v61 = vmul.f32 %v13035_v62, %v2185_v11  ;;  %v12117_v13 = vpop.f32.mrb[13].mxu0  ;;  %v14311_v62 = vld [vmem:[#allocation18 + $0x10] sm:$0xff] }
 0x761   :  { %12121 = vmatmul.mubr.msk.f32.vlgmr.msra.gmra.mrb[16].mxu1 %vm1213_vm8, %v2191_v61 }
 0x762   :  { %12124 = vmatpush3.msra.mxu1 %v14259_v15  ;;  %12125 = vmatprep.mubr.msk.f32.mxu1 %vm13652_vm7, %v13651_v12 }
 0x763   :  { %12128 = vmatprep.subr.mxu1 %v13651_v12 }
 0x765   :  { %12126 = vmatmul.mubr.msk.f32.vlgmr.msra.gmra.mrb[18].mxu1 %vm1213_vm8, %v1700_v18 }
 0x766   :  { %12130 = vmatprep.mubr.msk.f32.mxu1 %vm13652_vm7, %v13651_v12 }
 0x769   :  { %12129 = vmatpush3.xpose.msk.msra.mxu1 %vm1213_vm8, %v2341_v20 }
 0x76a   :  { %12138 = vmatprep.subr.mxu1 %v13651_v12 }
 0x76c   :  { %12131 = vmatmul.mubr.msk.f32.vlgmr.msra.gmra.mrb[20].mxu1 %vm1213_vm8, %v2339_v0 }
 0x76d   :  { %12139 = vmatpush3.xpose.msk.msra.mxu1 %vm1213_vm8, %v2493_v22  ;;  %12140 = vmatprep.mubr.msk.f32.mxu1 %vm13652_vm7, %v13651_v12 }
 0x76e   :  { %12158 = vmatprep.subr.mxu1 %v13651_v12 }
 0x770   :  { %12141 = vmatmul.mubr.msk.f32.vlgmr.msra.gmra.mrb[22].mxu1 %vm1213_vm8, %v2339_v0 }
 0x771   :  { %12160 = vmatprep.mubr.msk.f32.mxu1 %vm13652_vm7, %v13651_v12  ;;  %12159 = vmatpush3.msra.mxu1 %v14311_v62 }
 0x772   :  { %12163 = vmatprep.subr.mxu1 %v13651_v12 }
 0x7e6   :  { %v2487_v24 = vpop.f32.mrb[14].mxu0 }
 0x7e7   :  { %v2491_v27 = vmul.f32 0.35355338, %v2487_v24  ;;  %v12137_v29 = vpop.f32.mrb[15].mxu0 }
 0x7e9   :  { %v2570_v30 = vsel %vm1213_vm8, %v2491_v27, -inf }
 0x7ea   :  { %2571 = vmax.xlane.f32.xlu1 %v2570_v30 }
 0x7fb   :  { %2674 = vrot.lane.b32.xlu1 %v14140_v16, %s13656_s19 }
 0x7ff   :  { %2750 = vrot.lane.b32.xlu1 %v14164_v28, %s13656_s19 }
 0x834   :  { %v2261_v31 = vpop.f32.mrb[16].mxu1 }
 0x835   :  { %v12122_v32 = vpop.f32.mrb[17].mxu1 }
 0x838   :  { %v2334_v34 = vpop.f32.mrb[18].mxu1 }
 0x839   :  { %v14284_v35 = vadd.f32 %v2334_v34, %v2261_v31  ;;  %v12127_v37 = vpop.f32.mrb[19].mxu1 }
 0x83f   :  { %v2412_v38 = vpop.f32.mrb[20].mxu1 }
 0x840   :  { %v2416_v39 = vmul.f32 0.35355338, %v2412_v38  ;;  %v12132_v40 = vpop.f32.mrb[21].mxu1 }
 0x842   :  { %v2567_v41 = vsel %vm1213_vm8, %v2416_v39, -inf }
 0x843   :  { %2568 = vmax.xlane.f32.xlu0 %v2567_v41  ;;  %v2562_v42 = vpop.f32.mrb[22].mxu1 }
 0x844   :  { %v2566_v43 = vmul.f32 0.35355338, %v2562_v42  ;;  %v12142_v46 = vpop.f32.mrb[23].mxu1 }
 0x846   :  { %v2574_v47 = vsel %vm1213_vm8, %v2566_v43, -inf }
 0x847   :  { %2575 = vmax.xlane.f32.xlu0 %v2574_v47 }
 0x85d   :  { %2598 = vrot.lane.b32.xlu0 %v14150_v21, %s13656_s19 }
 0x877   :  { %v2572_v49 = vpop.xlane.xlu1 %2571 }
 0x87b   :  { %v2675_v7 = vpop.permute.xlu1 %2674 }
 0x87f   :  { %v2751_v10 = vpop.permute.xlu1 %2750 }
 0x8d0   :  { %v2569_v48 = vpop.xlane.xlu0 %2568 }
 0x8d1   :  { %v2573_v50 = vmax.f32 %v2569_v48, %v2572_v49 }
 0x8d4   :  { %v2576_v51 = vpop.xlane.xlu0 %2575 }
 0x8d5   :  { %v2577_v54 = vmax.f32 %v2573_v50, %v2576_v51 }
 0x8d7   :  { %v2578_v55 = vsub.f32 %v2416_v39, %v2577_v54  ;;  %v2581_v57 = vsub.f32 %v2491_v27, %v2577_v54  ;;  %v2584_v60 = vsub.f32 %v2566_v43, %v2577_v54 }
 0x8d8   :  { %v2599_v63 = vpop.permute.xlu0 %2598 }
 0x8d9   :  { %v2579_v0 = vmul.f32 1.442695, %v2578_v55  ;;  %v2582_v1 = vmul.f32 1.442695, %v2581_v57  ;;  %v2585_v45 = vmul.f32 1.442695, %v2584_v60  ;;  %12144 = vmatpush3.msra.mxu0 %v2599_v63 }
 0x8da   :  { %12148 = vmatprep.subr.mxu0 %v13651_v12 }
 0x8db   :  { %13038 = vpow2.f32 %v2579_v0 }
 0x8dc   :  { %13040 = vpow2.f32 %v2582_v1 }
 0x8dd   :  { %13042 = vpow2.f32 %v2585_v45 }
 0x8e5   :  { %v13039_v2 = vpop.eup %13038 }
 0x8e6   :  { %v13041_v53 = vpop.eup %13040  ;;  %v2587_v5 = vsel %vm1213_vm8, %v13039_v2, 0.0 }
 0x8e7   :  { %v13043_v6 = vpop.eup %13042  ;;  %12146 = vmatmul.mubr.msk.f32.vlgmr.msra.gmra.mrb[16].mxu0 %vm1213_vm8, %v13041_v53  ;;  %v2590_v8 = vsel %vm1213_vm8, %v13041_v53, 0.0  ;;  %2588 = vadd.xlane.f32.xlu0 %v2587_v5 }
 0x8e8   :  { %12149 = vmatpush3.msra.mxu0 %v2675_v7  ;;  %2591 = vadd.xlane.f32.xlu1 %v2590_v8  ;;  %v2594_v9 = vsel %vm1213_vm8, %v13043_v6, 0.0 }
 0x8e9   :  { %12150 = vmatprep.mubr.msk.f32.mxu0 %vm13652_vm7, %v13651_v12  ;;  %12153 = vmatprep.subr.mxu0 %v13651_v12 }
 0x8eb   :  { %2595 = vadd.xlane.f32.xlu0 %v2594_v9 }
 0x8ef   :  { %12151 = vmatmul.mubr.msk.f32.vlgmr.msra.gmra.mrb[16].mxu0 %vm1213_vm8, %v13039_v2 }
 0x8f0   :  { %12154 = vmatpush3.msra.mxu0 %v2751_v10  ;;  %12155 = vmatprep.mubr.msk.f32.mxu0 %vm13652_vm7, %v13651_v12 }
 0x8f1   :  { %12173 = vmatprep.subr.mxu0 %v13651_v12 }
 0x8f7   :  { %12156 = vmatmul.mubr.msk.f32.vlgmr.msra.gmra.mrb[16].mxu0 %vm1213_vm8, %v13043_v6 }
 0x8f8   :  { %12175 = vmatprep.mubr.msk.f32.mxu0 %vm13652_vm7, %v13651_v12 }
 0x8f9   :  { %2903 = vrot.lane.b32.xlu1 %v14095_v25, %s13657_s29 }
 0x8fd   :  { %2982 = vrot.lane.b32.xlu1 %v14150_v21, %s13657_s29 }
 0x901   :  { %2905 = vrot.lane.b32.xlu0 %v14140_v16, %s13657_s29 }
 0x905   :  { %3057 = vrot.lane.b32.xlu0 %v14164_v28, %s13657_s29 }
 0x974   :  { %v2589_v11 = vpop.xlane.xlu0 %2588 }
 0x975   :  { %v2592_v17 = vpop.xlane.xlu1 %2591 }
 0x976   :  { %v2593_v20 = vadd.f32 %v2592_v17, %v2589_v11  ;;  %v14377_v11 = vld [vmem:[#allocation18 + $0x18] sm:$0xff] }
 0x978   :  { %v2596_v61 = vpop.xlane.xlu0 %2595 }
 0x979   :  { %v2904_v18 = vpop.permute.xlu1 %2903  ;;  %v2597_v22 = vadd.f32 %v2596_v61, %v2593_v20 }
 0x97b   :  { %13044 = vrcp.f32 %v2597_v22 }
 0x97c   :  { %v2906_v13 = vpop.permute.xlu0 %2905 }
 0x97d   :  { %v2983_v31 = vpop.permute.xlu1 %2982 }
 0x980   :  { %v3058_v25 = vpop.permute.xlu0 %3057 }
 0x981   :  { %12174 = vmatpush3.xpose.msk.msra.mxu0 %vm1213_vm8, %v3058_v25 }
 0x982   :  { %12193 = vmatprep.subr.mxu0 %v13651_v12 }
 0x984   :  { %12176 = vmatmul.mubr.msk.f32.vlgmr.msra.gmra.mrb[18].mxu0 %vm1213_vm8, %v2904_v18 }
 0x985   :  { %12195 = vmatprep.mubr.msk.f32.mxu0 %vm13652_vm7, %v13651_v12  ;;  %v13045_v24 = vpop.eup %13044  ;;  %12194 = vmatpush3.msra.mxu0 %v14377_v11 }
 0x986   :  { %12198 = vmatprep.subr.mxu0 %v13651_v12 }
 0x9ca   :  { %v2822_v27 = vpop.f32.mrb[16].mxu0 }
 0x9cb   :  { %v2828_v29 = vmul.f32 %v13045_v24, %v2822_v27  ;;  %v12157_v30 = vpop.f32.mrb[17].mxu0 }
 0x9cd   :  { %12161 = vmatmul.mubr.msk.f32.vlgmr.msra.gmra.mrb[24].mxu1 %vm1213_vm8, %v2828_v29 }
 0x9ce   :  { %12164 = vmatpush3.xpose.msk.msra.mxu1 %vm1213_vm8, %v2906_v13  ;;  %12165 = vmatprep.mubr.msk.f32.mxu1 %vm13652_vm7, %v13651_v12 }
 0x9cf   :  { %12168 = vmatprep.subr.mxu1 %v13651_v12 }
 0x9d1   :  { %12166 = vmatmul.mubr.msk.f32.vlgmr.msra.gmra.mrb[26].mxu1 %vm1213_vm8, %v2904_v18 }
 0x9d2   :  { %12169 = vmatpush3.xpose.msk.msra.mxu1 %vm1213_vm8, %v2983_v31  ;;  %12170 = vmatprep.mubr.msk.f32.mxu1 %vm13652_vm7, %v13651_v12 }
 0x9d3   :  { %12178 = vmatprep.subr.mxu1 %v13651_v12 }
 0x9d5   :  { %12171 = vmatmul.mubr.msk.f32.vlgmr.msra.gmra.mrb[28].mxu1 %vm1213_vm8, %v2904_v18 }
 0x9d6   :  { %12180 = vmatprep.mubr.msk.f32.mxu1 %vm13652_vm7, %v13651_v12 }
 0xa57   :  { %v3127_v32 = vpop.f32.mrb[18].mxu0 }
 0xa58   :  { %v12177_v34 = vpop.f32.mrb[19].mxu0  ;;  %v3131_v49 = vmul.f32 0.35355338, %v3127_v32 }
 0xa5a   :  { %v3139_v51 = vsel %vm1213_vm8, %v3131_v49, -inf }
 0xaa0   :  { %v2898_v37 = vpop.f32.mrb[24].mxu1 }
 0xaa1   :  { %v14336_v38 = vadd.f32 %v2898_v37, %v14284_v35  ;;  %v12162_v39 = vpop.f32.mrb[25].mxu1 }
 0xaa4   :  { %v2977_v40 = vpop.f32.mrb[26].mxu1 }
 0xaa5   :  { %v2981_v41 = vmul.f32 0.35355338, %v2977_v40  ;;  %v12167_v42 = vpop.f32.mrb[27].mxu1 }
 0xaa7   :  { %v3132_v43 = vsel %vm1213_vm8, %v2981_v41, -inf }
 0xaa8   :  { %3133 = vmax.xlane.f32.xlu1 %v3132_v43  ;;  %v3052_v46 = vpop.f32.mrb[28].mxu1 }
 0xaa9   :  { %v3056_v47 = vmul.f32 0.35355338, %v3052_v46  ;;  %v12172_v48 = vpop.f32.mrb[29].mxu1 }
 0xaab   :  { %v3135_v50 = vsel %vm1213_vm8, %v3056_v47, -inf }
 0xaac   :  { %3136 = vmax.xlane.f32.xlu0 %v3135_v50  ;;  %v14421_v50 = vld [vmem:[%s15212_s5] ss:$0 sm:$0xff] }
 0xab0   :  { %3140 = vmax.xlane.f32.xlu0 %v3139_v51 }
 0xab9   :  { %3239 = vrot.lane.b32.xlu1 %v14140_v16, %s13658_s2 }
 0xabd   :  { %3315 = vrot.lane.b32.xlu1 %v14164_v28, %s13658_s2 }
 0xac6   :  { %3163 = vrot.lane.b32.xlu0 %v14150_v21, %s13658_s2 }
 0xb35   :  { %v3134_v54 = vpop.xlane.xlu1 %3133 }
 0xb39   :  { %v3137_v35 = vpop.xlane.xlu0 %3136  ;;  %v3240_v6 = vpop.permute.xlu1 %3239 }
 0xb3a   :  { %v3138_v55 = vmax.f32 %v3134_v54, %v3137_v35 }
 0xb3d   :  { %v3141_v57 = vpop.xlane.xlu0 %3140  ;;  %v3316_v10 = vpop.permute.xlu1 %3315 }
 0xb3e   :  { %v3142_v60 = vmax.f32 %v3138_v55, %v3141_v57 }
 0xb40   :  { %v3143_v63 = vsub.f32 %v2981_v41, %v3142_v60  ;;  %v3146_v0 = vsub.f32 %v3056_v47, %v3142_v60  ;;  %v3149_v1 = vsub.f32 %v3131_v49, %v3142_v60 }
 0xb41   :  { %v3164_v45 = vpop.permute.xlu0 %3163 }
 0xb42   :  { %v3144_v2 = vmul.f32 1.442695, %v3143_v63  ;;  %v3147_v53 = vmul.f32 1.442695, %v3146_v0  ;;  %12179 = vmatpush3.msra.mxu1 %v3164_v45  ;;  %v3150_v5 = vmul.f32 1.442695, %v3149_v1 }
 0xb43   :  { %12183 = vmatprep.subr.mxu1 %v13651_v12 }
 0xb44   :  { %13046 = vpow2.f32 %v3144_v2 }
 0xb45   :  { %13048 = vpow2.f32 %v3147_v53 }
 0xb46   :  { %13050 = vpow2.f32 %v3150_v5 }
 0xb4e   :  { %v13047_v16 = vpop.eup %13046 }
 0xb4f   :  { %v13049_v21 = vpop.eup %13048  ;;  %v3152_v28 = vsel %vm1213_vm8, %v13047_v16, 0.0 }
 0xb50   :  { %12181 = vmatmul.mubr.msk.f32.vlgmr.msra.gmra.mrb[30].mxu1 %vm1213_vm8, %v13049_v21  ;;  %v3155_v7 = vsel %vm1213_vm8, %v13049_v21, 0.0  ;;  %3153 = vadd.xlane.f32.xlu1 %v3152_v28  ;;  %v13051_v8 = vpop.eup %13050 }
 0xb51   :  { %12184 = vmatpush3.msra.mxu1 %v3240_v6  ;;  %3156 = vadd.xlane.f32.xlu0 %v3155_v7  ;;  %v3159_v9 = vsel %vm1213_vm8, %v13051_v8, 0.0 }
 0xb52   :  { %12185 = vmatprep.mubr.msk.f32.mxu1 %vm13652_vm7, %v13651_v12  ;;  %12188 = vmatprep.subr.mxu1 %v13651_v12 }
 0xb55   :  { %3160 = vadd.xlane.f32.xlu0 %v3159_v9 }
 0xb58   :  { %12186 = vmatmul.mubr.msk.f32.vlgmr.msra.gmra.mrb[30].mxu1 %vm1213_vm8, %v13047_v16 }
 0xb59   :  { %12189 = vmatpush3.msra.mxu1 %v3316_v10  ;;  %12190 = vmatprep.mubr.msk.f32.mxu1 %vm13652_vm7, %v13651_v12 }
 0xb5a   :  { %12208 = vmatprep.subr.mxu1 %v13651_v12 }
 0xb60   :  { %12191 = vmatmul.mubr.msk.f32.vlgmr.msra.gmra.mrb[30].mxu1 %vm1213_vm8, %v13051_v8 }
 0xb61   :  { %12209 = vmatpush3.xpose.msk.msra.mxu1 %vm1213_vm8, %v14159_v26  ;;  %3963 = vrot.lane.b32.xlu1 %v14093_v23, %s13650_s22 }
 0xb62   :  { %12210 = vmatprep.mubr.msk.f32.mxu1 %vm13652_vm7, %v13651_v12  ;;  %12228 = vmatprep.subr.mxu1 %v13651_v12 }
 0xb64   :  { %12211 = vmatmul.mubr.msk.f32.vlgmr.msra.gmra.mrb[32].mxu1 %vm1213_vm8, %v14093_v23 }
 0xb65   :  { %4042 = vrot.lane.b32.xlu1 %v14147_v19, %s13650_s22  ;;  %12230 = vmatprep.mubr.msk.f32.mxu1 %vm13652_vm7, %v13651_v12 }
 0xb69   :  { %4117 = vrot.lane.b32.xlu1 %v14159_v26, %s13650_s22 }
 0xb6b   :  { %3965 = vrot.lane.b32.xlu0 %v14138_v14, %s13650_s22 }
 0xbdd   :  { %v3154_v61 = vpop.xlane.xlu1 %3153 }
 0xbde   :  { %v3157_v13 = vpop.xlane.xlu0 %3156 }
 0xbdf   :  { %v3158_v24 = vadd.f32 %v3157_v13, %v3154_v61 }
 0xbe1   :  { %v3964_v17 = vpop.permute.xlu1 %3963 }
 0xbe2   :  { %v3161_v25 = vpop.xlane.xlu0 %3160 }
 0xbe3   :  { %v3162_v27 = vadd.f32 %v3161_v25, %v3158_v24 }
 0xbe5   :  { %v4043_v20 = vpop.permute.xlu1 %4042  ;;  %13052 = vrcp.f32 %v3162_v27 }
 0xbe6   :  { %v3966_v18 = vpop.permute.xlu0 %3965 }
 0xbe7   :  { %12229 = vmatpush3.xpose.msk.msra.mxu1 %vm1213_vm8, %v3966_v18 }
 0xbe8   :  { %12233 = vmatprep.subr.mxu1 %v13651_v12 }
 0xbe9   :  { %v4118_v22 = vpop.permute.xlu1 %4117 }
 0xbea   :  { %12231 = vmatmul.mubr.msk.f32.vlgmr.msra.gmra.mrb[34].mxu1 %vm1213_vm8, %v3964_v17 }
 0xbeb   :  { %12234 = vmatpush3.xpose.msk.msra.mxu1 %vm1213_vm8, %v4043_v20  ;;  %12235 = vmatprep.mubr.msk.f32.mxu1 %vm13652_vm7, %v13651_v12 }
 0xbec   :  { %12238 = vmatprep.subr.mxu1 %v13651_v12 }
 0xbee   :  { %12236 = vmatmul.mubr.msk.f32.vlgmr.msra.gmra.mrb[36].mxu1 %vm1213_vm8, %v3964_v17 }
 0xbef   :  { %12239 = vmatpush3.xpose.msk.msra.mxu1 %vm1213_vm8, %v4118_v22  ;;  %12240 = vmatprep.mubr.msk.f32.mxu1 %vm13652_vm7, %v13651_v12  ;;  %v13053_v29 = vpop.eup %13052 }
 0xbf0   :  { %12258 = vmatprep.subr.mxu1 %v13651_v12 }
 0xbf2   :  { %12241 = vmatmul.mubr.msk.f32.vlgmr.msra.gmra.mrb[38].mxu1 %vm1213_vm8, %v3964_v17 }
 0xbf3   :  { %12259 = vmatpush3.msra.mxu1 %v14250_v56  ;;  %12260 = vmatprep.mubr.msk.f32.mxu1 %vm13652_vm7, %v13651_v12 }
 0xbf4   :  { %12263 = vmatprep.subr.mxu1 %v13651_v12 }
 0xc33   :  { %v3387_v30 = vpop.f32.mrb[30].mxu1 }
 0xc34   :  { %v3393_v31 = vmul.f32 %v13053_v29, %v3387_v30  ;;  %v12192_v32 = vpop.f32.mrb[31].mxu1 }
 0xc36   :  { %12196 = vmatmul.mubr.msk.f32.vlgmr.msra.gmra.mrb[20].mxu0 %vm1213_vm8, %v3393_v31 }
 0xc37   :  { %12199 = vmatpush3.xpose.msk.msra.mxu0 %vm1213_vm8, %v14138_v14  ;;  %v3696_v34 = vpop.f32.mrb[32].mxu1  ;;  %12200 = vmatprep.mubr.msk.f32.mxu0 %vm13652_vm7, %v13651_v12 }
 0xc38   :  { %v14403_v56 = vmul.f32 0.35355338, %v3696_v34  ;;  %v12212_v37 = vpop.f32.mrb[33].mxu1  ;;  %12203 = vmatprep.subr.mxu0 %v13651_v12 }
 0xc3a   :  { %12201 = vmatmul.mubr.msk.f32.vlgmr.msra.gmra.mrb[22].mxu0 %vm1213_vm8, %v14093_v23  ;;  %v3708_v39 = vsel %vm1213_vm8, %v14403_v56, -inf }
 0xc3b   :  { %12204 = vmatpush3.xpose.msk.msra.mxu0 %vm1213_vm8, %v14147_v19  ;;  %3709 = vmax.xlane.f32.xlu0 %v3708_v39 }
 0xc3c   :  { %12205 = vmatprep.mubr.msk.f32.mxu0 %vm13652_vm7, %v13651_v12  ;;  %12213 = vmatprep.subr.mxu0 %v13651_v12 }
 0xc3e   :  { %12206 = vmatmul.mubr.msk.f32.vlgmr.msra.gmra.mrb[24].mxu0 %vm1213_vm8, %v14093_v23 }
 0xc3f   :  { %12215 = vmatprep.mubr.msk.f32.mxu0 %vm13652_vm7, %v13651_v12 }
 0xcbd   :  { %v4037_v40 = vpop.f32.mrb[34].mxu1 }
 0xcbe   :  { %v4041_v41 = vmul.f32 0.35355338, %v4037_v40  ;;  %v12232_v42 = vpop.f32.mrb[35].mxu1 }
 0xcc0   :  { %v4192_v43 = vsel %vm1213_vm8, %v4041_v41, -inf }
 0xcc1   :  { %4193 = vmax.xlane.f32.xlu0 %v4192_v43  ;;  %v4112_v46 = vpop.f32.mrb[36].mxu1 }
 0xcc2   :  { %v12237_v47 = vpop.f32.mrb[37].mxu1  ;;  %v4116_v0 = vmul.f32 0.35355338, %v4112_v46 }
 0xcc5   :  { %v4187_v48 = vpop.f32.mrb[38].mxu1 }
 0xcc6   :  { %v12242_v49 = vpop.f32.mrb[39].mxu1  ;;  %v4191_v5 = vmul.f32 0.35355338, %v4187_v48 }
 0xcc8   :  { %v4199_v21 = vsel %vm1213_vm8, %v4191_v5, -inf  ;;  %v3710_v28 = vpop.xlane.xlu0 %3709 }
 0xd09   :  { %v3463_v51 = vpop.f32.mrb[20].mxu0 }
 0xd0a   :  { %v3467_v35 = vadd.f32 %v3463_v51, %v14336_v38  ;;  %v12197_v54 = vpop.f32.mrb[21].mxu0  ;;  %v4195_v38 = vsel %vm1213_vm8, %v4116_v0, -inf }
 0xd0c   :  { %v3474_v55 = vadd.f32 %v14421_v50, %v3467_v35 }
 0xd0d   :  { %v3548_v57 = vpop.f32.mrb[22].mxu0 }
 0xd0e   :  { %3475 = vst.msk [vmem:[#allocation2] sm:$0xff] %vm761_vm6, %v3474_v55  ;;  %v3552_v60 = vmul.f32 0.35355338, %v3548_v57  ;;  %v12202_v63 = vpop.f32.mrb[23].mxu0 }
 0xd10   :  { %v3701_v1 = vsel %vm1213_vm8, %v3552_v60, -inf }
 0xd11   :  { %v3622_v45 = vpop.f32.mrb[24].mxu0  ;;  %3702 = vmax.xlane.f32.xlu0 %v3701_v1 }
 0xd12   :  { %v3626_v2 = vmul.f32 0.35355338, %v3622_v45  ;;  %v12207_v53 = vpop.f32.mrb[25].mxu0 }
 0xd14   :  { %v3704_v16 = vsel %vm1213_vm8, %v3626_v2, -inf }
 0xd15   :  { %3705 = vmax.xlane.f32.xlu1 %v3704_v16  ;;  %4196 = vmax.xlane.f32.xlu0 %v4195_v38 }
 0xd19   :  { %4200 = vmax.xlane.f32.xlu1 %v4199_v21 }
 0xd2a   :  { %3808 = vrot.lane.b32.xlu1 %v14138_v14, %s13653_s26 }
 0xd2b   :  { %3732 = vrot.lane.b32.xlu0 %v14147_v19, %s13653_s26 }
 0xd2e   :  { %3884 = vrot.lane.b32.xlu1 %v14159_v26, %s13653_s26 }
 0xd2f   :  { %4299 = vrot.lane.b32.xlu0 %v14138_v14, %s13654_s28 }
 0xd32   :  { %4223 = vrot.lane.b32.xlu1 %v14147_v19, %s13654_s28 }
 0xd36   :  { %4375 = vrot.lane.b32.xlu1 %v14159_v26, %s13654_s28 }
 0xd4e   :  { %v4194_v6 = vpop.xlane.xlu0 %4193 }
 0xd9e   :  { %v3703_v7 = vpop.xlane.xlu0 %3702 }
 0xda2   :  { %v3706_v8 = vpop.xlane.xlu1 %3705  ;;  %v4197_v9 = vpop.xlane.xlu0 %4196 }
 0xda3   :  { %v3707_v10 = vmax.f32 %v3703_v7, %v3706_v8  ;;  %v4198_v13 = vmax.f32 %v4194_v6, %v4197_v9 }
 0xda5   :  { %v3711_v61 = vmax.f32 %v3707_v10, %v3710_v28 }
 0xda6   :  { %v3733_v17 = vpop.permute.xlu0 %3732  ;;  %v4201_v25 = vpop.xlane.xlu1 %4200 }
 0xda7   :  { %v3715_v18 = vsub.f32 %v3626_v2, %v3711_v61  ;;  %v4202_v20 = vmax.f32 %v4198_v13, %v4201_v25  ;;  %12214 = vmatpush3.msra.mxu0 %v3733_v17  ;;  %v3712_v31 = vsub.f32 %v3552_v60, %v3711_v61  ;;  %v3718_v39 = vsub.f32 %v14403_v56, %v3711_v61 }
 0xda8   :  { %12218 = vmatprep.subr.mxu0 %v13651_v12 }
 0xda9   :  { %v3716_v22 = vmul.f32 1.442695, %v3715_v18  ;;  %v4203_v24 = vsub.f32 %v4041_v41, %v4202_v20  ;;  %v4206_v27 = vsub.f32 %v4116_v0, %v4202_v20  ;;  %v4209_v29 = vsub.f32 %v4191_v5, %v4202_v20 }
 0xdaa   :  { %v3713_v37 = vmul.f32 1.442695, %v3712_v31  ;;  %v3809_v42 = vpop.permute.xlu1 %3808  ;;  %v3719_v41 = vmul.f32 1.442695, %v3718_v39  ;;  %v4300_v63 = vpop.permute.xlu0 %4299 }
 0xdab   :  { %v4204_v30 = vmul.f32 1.442695, %v4203_v24  ;;  %13054 = vpow2.f32 %v3716_v22  ;;  %v4207_v32 = vmul.f32 1.442695, %v4206_v27  ;;  %v4210_v34 = vmul.f32 1.442695, %v4209_v29 }
 0xdad   :  { %13056 = vpow2.f32 %v4204_v30 }
 0xdae   :  { %13058 = vpow2.f32 %v4207_v32  ;;  %v3885_v35 = vpop.permute.xlu1 %3884 }
 0xdaf   :  { %13060 = vpow2.f32 %v4210_v34 }
 0xdb0   :  { %13062 = vpow2.f32 %v3713_v37 }
 0xdb1   :  { %13064 = vpow2.f32 %v3719_v41 }
 0xdb2   :  { %v4224_v60 = vpop.permute.xlu1 %4223 }
 0xdb5   :  { %v13055_v40 = vpop.eup %13054 }
 0xdb6   :  { %12216 = vmatmul.mubr.msk.f32.vlgmr.msra.gmra.mrb[26].mxu0 %vm1213_vm8, %v13055_v40  ;;  %v3724_v55 = vsel %vm1213_vm8, %v13055_v40, 0.0  ;;  %v4376_v0 = vpop.permute.xlu1 %4375 }
 0xdb7   :  { %v13057_v43 = vpop.eup %13056  ;;  %12219 = vmatpush3.msra.mxu0 %v3809_v42  ;;  %12220 = vmatprep.mubr.msk.f32.mxu0 %vm13652_vm7, %v13651_v12 }
 0xdb8   :  { %v13059_v46 = vpop.eup %13058  ;;  %v4212_v47 = vsel %vm1213_vm8, %v13057_v43, 0.0  ;;  %12223 = vmatprep.subr.mxu0 %v13651_v12 }
 0xdb9   :  { %v13061_v48 = vpop.eup %13060  ;;  %v4215_v49 = vsel %vm1213_vm8, %v13059_v46, 0.0  ;;  %4213 = vadd.xlane.f32.xlu0 %v4212_v47 }
 0xdba   :  { %4216 = vadd.xlane.f32.xlu1 %v4215_v49  ;;  %v4219_v56 = vsel %vm1213_vm8, %v13061_v48, 0.0  ;;  %v13063_v51 = vpop.eup %13062 }
 0xdbb   :  { %v3721_v54 = vsel %vm1213_vm8, %v13063_v51, 0.0  ;;  %v13065_v57 = vpop.eup %13064 }
 0xdbc   :  { %v3728_v1 = vsel %vm1213_vm8, %v13065_v57, 0.0 }
 0xdbd   :  { %4220 = vadd.xlane.f32.xlu0 %v4219_v56 }
 0xdbe   :  { %12221 = vmatmul.mubr.msk.f32.vlgmr.msra.gmra.mrb[26].mxu0 %vm1213_vm8, %v13063_v51 }
 0xdbf   :  { %12224 = vmatpush3.msra.mxu0 %v3885_v35  ;;  %12225 = vmatprep.mubr.msk.f32.mxu0 %vm13652_vm7, %v13651_v12 }
 0xdc0   :  { %12243 = vmatprep.subr.mxu0 %v13651_v12 }
 0xdc1   :  { %3722 = vadd.xlane.f32.xlu0 %v3721_v54 }
 0xdc5   :  { %3725 = vadd.xlane.f32.xlu0 %v3724_v55 }
 0xdc6   :  { %12226 = vmatmul.mubr.msk.f32.vlgmr.msra.gmra.mrb[26].mxu0 %vm1213_vm8, %v13065_v57 }
 0xdc7   :  { %12244 = vmatpush3.msra.mxu0 %v4224_v60  ;;  %12245 = vmatprep.mubr.msk.f32.mxu0 %vm13652_vm7, %v13651_v12 }
 0xdc8   :  { %12248 = vmatprep.subr.mxu0 %v13651_v12 }
 0xdca   :  { %12246 = vmatmul.mubr.msk.f32.vlgmr.msra.gmra.mrb[28].mxu0 %vm1213_vm8, %v13059_v46 }
 0xdcb   :  { %4679 = vrot.lane.b32.xlu1 %v14147_v19, %s13655_s1  ;;  %12249 = vmatpush3.msra.mxu0 %v4300_v63 }
 0xdcc   :  { %12250 = vmatprep.mubr.msk.f32.mxu0 %vm13652_vm7, %v13651_v12  ;;  %12253 = vmatprep.subr.mxu0 %v13651_v12 }
 0xdcf   :  { %4600 = vrot.lane.b32.xlu1 %v14093_v23, %s13655_s1 }
 0xdd2   :  { %12251 = vmatmul.mubr.msk.f32.vlgmr.msra.gmra.mrb[28].mxu0 %vm1213_vm8, %v13057_v43 }
 0xdd3   :  { %12254 = vmatpush3.msra.mxu0 %v4376_v0  ;;  %12255 = vmatprep.mubr.msk.f32.mxu0 %vm13652_vm7, %v13651_v12 }
 0xdd4   :  { %12273 = vmatprep.subr.mxu0 %v13651_v12 }
 0xdda   :  { %12256 = vmatmul.mubr.msk.f32.vlgmr.msra.gmra.mrb[28].mxu0 %vm1213_vm8, %v13061_v48 }
 0xddb   :  { %4602 = vrot.lane.b32.xlu0 %v14138_v14, %s13655_s1  ;;  %12275 = vmatprep.mubr.msk.f32.mxu0 %vm13652_vm7, %v13651_v12 }
 0xdf3   :  { %3729 = vadd.xlane.f32.xlu1 %v3728_v1 }
 0xe04   :  { %4754 = vrot.lane.b32.xlu1 %v14159_v26, %s13655_s1 }
 0xe46   :  { %v4214_v5 = vpop.xlane.xlu0 %4213 }
 0xe47   :  { %v4217_v45 = vpop.xlane.xlu1 %4216 }
 0xe48   :  { %v4218_v6 = vadd.f32 %v4217_v45, %v4214_v5 }
 0xe4a   :  { %v4221_v16 = vpop.xlane.xlu0 %4220 }
 0xe4b   :  { %v4680_v2 = vpop.permute.xlu1 %4679  ;;  %v4222_v8 = vadd.f32 %v4221_v16, %v4218_v6 }
 0xe4c   :  { %12274 = vmatpush3.xpose.msk.msra.mxu0 %vm1213_vm8, %v4680_v2 }
 0xe4d   :  { %12283 = vmatprep.subr.mxu0 %v13651_v12  ;;  %13066 = vrcp.f32 %v4222_v8 }
 0xe4e   :  { %v3723_v38 = vpop.xlane.xlu0 %3722 }
 0xe4f   :  { %v4601_v53 = vpop.permute.xlu1 %4600 }
 0xe50   :  { %12276 = vmatmul.mubr.msk.f32.vlgmr.msra.gmra.mrb[30].mxu0 %vm1213_vm8, %v4601_v53 }
 0xe51   :  { %12285 = vmatprep.mubr.msk.f32.mxu0 %vm13652_vm7, %v13651_v12 }
 0xe52   :  { %v3726_v7 = vpop.xlane.xlu0 %3725 }
 0xe53   :  { %v3727_v10 = vadd.f32 %v3726_v7, %v3723_v38 }
 0xe56   :  { %v4603_v24 = vpop.permute.xlu0 %4602 }
 0xe57   :  { %v13067_v13 = vpop.eup %13066 }
 0xe80   :  { %v3730_v9 = vpop.xlane.xlu1 %3729 }
 0xe81   :  { %v3731_v61 = vadd.f32 %v3730_v9, %v3727_v10 }
 0xe83   :  { %13068 = vrcp.f32 %v3731_v61 }
 0xe84   :  { %v4755_v27 = vpop.permute.xlu1 %4754 }
 0xe8d   :  { %v13069_v20 = vpop.eup %13068 }
 0xe99   :  { %v3956_v21 = vpop.f32.mrb[26].mxu0 }
 0xe9a   :  { %v12227_v28 = vpop.f32.mrb[27].mxu0  ;;  %v3962_v22 = vmul.f32 %v13069_v20, %v3956_v21 }
 0xead   :  { %v4447_v17 = vpop.f32.mrb[28].mxu0 }
 0xeae   :  { %v4453_v25 = vmul.f32 %v13067_v13, %v4447_v17  ;;  %v12257_v18 = vpop.f32.mrb[29].mxu0 }
 0xeb0   :  { %12261 = vmatmul.mubr.msk.f32.vlgmr.msra.gmra.mrb[40].mxu1 %vm1213_vm8, %v4453_v25 }
 0xeb1   :  { %12264 = vmatpush3.msra.mxu1 %v14259_v15  ;;  %12265 = vmatprep.mubr.msk.f32.mxu1 %vm13652_vm7, %v13651_v12 }
 0xeb2   :  { %12268 = vmatprep.subr.mxu1 %v13651_v12 }
 0xeb4   :  { %12266 = vmatmul.mubr.msk.f32.vlgmr.msra.gmra.mrb[42].mxu1 %vm1213_vm8, %v3962_v22 }
 0xeb5   :  { %12270 = vmatprep.mubr.msk.f32.mxu1 %vm13652_vm7, %v13651_v12 }
 0xeb8   :  { %12269 = vmatpush3.xpose.msk.msra.mxu1 %vm1213_vm8, %v4603_v24 }
 0xeb9   :  { %12278 = vmatprep.subr.mxu1 %v13651_v12 }
 0xebb   :  { %12271 = vmatmul.mubr.msk.f32.vlgmr.msra.gmra.mrb[44].mxu1 %vm1213_vm8, %v4601_v53 }
 0xebc   :  { %12279 = vmatpush3.xpose.msk.msra.mxu1 %vm1213_vm8, %v4755_v27  ;;  %12280 = vmatprep.mubr.msk.f32.mxu1 %vm13652_vm7, %v13651_v12 }
 0xebd   :  { %12298 = vmatprep.subr.mxu1 %v13651_v12 }
 0xebf   :  { %12281 = vmatmul.mubr.msk.f32.vlgmr.msra.gmra.mrb[46].mxu1 %vm1213_vm8, %v4601_v53 }
 0xec0   :  { %12299 = vmatpush3.msra.mxu1 %v14311_v62  ;;  %12300 = vmatprep.mubr.msk.f32.mxu1 %vm13652_vm7, %v13651_v12 }
 0xec1   :  { %12303 = vmatprep.subr.mxu1 %v13651_v12 }
 0xf23   :  { %v4749_v15 = vpop.f32.mrb[30].mxu0 }
 0xf24   :  { %v4753_v29 = vmul.f32 0.35355338, %v4749_v15  ;;  %v12277_v30 = vpop.f32.mrb[31].mxu0 }
 0xf26   :  { %v4832_v31 = vsel %vm1213_vm8, %v4753_v29, -inf }
 0xf27   :  { %4833 = vmax.xlane.f32.xlu1 %v4832_v31 }
 0xf38   :  { %4936 = vrot.lane.b32.xlu1 %v14138_v14, %s13656_s19 }
 0xf3c   :  { %5012 = vrot.lane.b32.xlu1 %v14159_v26, %s13656_s19 }
 0xf83   :  { %v4523_v32 = vpop.f32.mrb[40].mxu1 }
 0xf84   :  { %v12262_v34 = vpop.f32.mrb[41].mxu1 }
 0xf87   :  { %v4596_v62 = vpop.f32.mrb[42].mxu1 }
 0xf88   :  { %v14511_v37 = vadd.f32 %v4596_v62, %v4523_v32  ;;  %v12267_v39 = vpop.f32.mrb[43].mxu1 }
 0xf8e   :  { %v4674_v40 = vpop.f32.mrb[44].mxu1 }
 0xf8f   :  { %v4678_v42 = vmul.f32 0.35355338, %v4674_v40  ;;  %v12272_v43 = vpop.f32.mrb[45].mxu1 }
 0xf91   :  { %v4829_v41 = vsel %vm1213_vm8, %v4678_v42, -inf }
 0xf92   :  { %4830 = vmax.xlane.f32.xlu0 %v4829_v41  ;;  %v4824_v46 = vpop.f32.mrb[46].mxu1 }
 0xf93   :  { %v4828_v47 = vmul.f32 0.35355338, %v4824_v46  ;;  %v12282_v48 = vpop.f32.mrb[47].mxu1 }
 0xf95   :  { %v4836_v49 = vsel %vm1213_vm8, %v4828_v47, -inf }
 0xf96   :  { %4837 = vmax.xlane.f32.xlu0 %v4836_v49 }
 0xfac   :  { %4860 = vrot.lane.b32.xlu0 %v14147_v19, %s13656_s19 }
 0xfb4   :  { %v4834_v51 = vpop.xlane.xlu1 %4833 }
 0xfb8   :  { %v4937_v21 = vpop.permute.xlu1 %4936 }
 0xfbc   :  { %v5013_v7 = vpop.permute.xlu1 %5012 }
0x101f   :  { %v4831_v56 = vpop.xlane.xlu0 %4830 }
0x1020   :  { %v4835_v35 = vmax.f32 %v4831_v56, %v4834_v51 }
0x1023   :  { %v4838_v54 = vpop.xlane.xlu0 %4837 }
0x1024   :  { %v4839_v55 = vmax.f32 %v4835_v35, %v4838_v54 }
0x1026   :  { %v4840_v57 = vsub.f32 %v4678_v42, %v4839_v55  ;;  %v4843_v60 = vsub.f32 %v4753_v29, %v4839_v55  ;;  %v4846_v63 = vsub.f32 %v4828_v47, %v4839_v55 }
0x1027   :  { %v4861_v0 = vpop.permute.xlu0 %4860 }
0x1028   :  { %v4841_v1 = vmul.f32 1.442695, %v4840_v57  ;;  %v4844_v45 = vmul.f32 1.442695, %v4843_v60  ;;  %v4847_v2 = vmul.f32 1.442695, %v4846_v63  ;;  %12284 = vmatpush3.msra.mxu0 %v4861_v0 }
0x1029   :  { %12288 = vmatprep.subr.mxu0 %v13651_v12 }
0x102a   :  { %13070 = vpow2.f32 %v4841_v1 }
0x102b   :  { %13072 = vpow2.f32 %v4844_v45 }
0x102c   :  { %13074 = vpow2.f32 %v4847_v2 }
0x1034   :  { %v13071_v53 = vpop.eup %13070 }
0x1035   :  { %v13073_v5 = vpop.eup %13072  ;;  %v4849_v16 = vsel %vm1213_vm8, %v13071_v53, 0.0 }
0x1036   :  { %v13075_v38 = vpop.eup %13074  ;;  %12286 = vmatmul.mubr.msk.f32.vlgmr.msra.gmra.mrb[32].mxu0 %vm1213_vm8, %v13073_v5  ;;  %v4852_v28 = vsel %vm1213_vm8, %v13073_v5, 0.0  ;;  %4850 = vadd.xlane.f32.xlu0 %v4849_v16 }
0x1037   :  { %12289 = vmatpush3.msra.mxu0 %v4937_v21  ;;  %4853 = vadd.xlane.f32.xlu1 %v4852_v28  ;;  %v4856_v6 = vsel %vm1213_vm8, %v13075_v38, 0.0 }
0x1038   :  { %12290 = vmatprep.mubr.msk.f32.mxu0 %vm13652_vm7, %v13651_v12  ;;  %12293 = vmatprep.subr.mxu0 %v13651_v12 }
0x103a   :  { %4857 = vadd.xlane.f32.xlu0 %v4856_v6 }
0x103e   :  { %12291 = vmatmul.mubr.msk.f32.vlgmr.msra.gmra.mrb[32].mxu0 %vm1213_vm8, %v13071_v53 }
0x103f   :  { %12294 = vmatpush3.msra.mxu0 %v5013_v7  ;;  %12295 = vmatprep.mubr.msk.f32.mxu0 %vm13652_vm7, %v13651_v12  ;;  %v5732_v7 = vld [vmem:[#allocation2] sm:$0xff] }
0x1040   :  { %12313 = vmatprep.subr.mxu0 %v13651_v12 }
0x1046   :  { %12296 = vmatmul.mubr.msk.f32.vlgmr.msra.gmra.mrb[32].mxu0 %vm1213_vm8, %v13075_v38 }
0x1047   :  { %12315 = vmatprep.mubr.msk.f32.mxu0 %vm13652_vm7, %v13651_v12 }
0x1048   :  { %5165 = vrot.lane.b32.xlu1 %v14093_v23, %s13657_s29 }
0x104c   :  { %5244 = vrot.lane.b32.xlu1 %v14147_v19, %s13657_s29 }
0x1050   :  { %5167 = vrot.lane.b32.xlu0 %v14138_v14, %s13657_s29 }
0x1054   :  { %5319 = vrot.lane.b32.xlu0 %v14159_v26, %s13657_s29 }
0x10c3   :  { %v4851_v8 = vpop.xlane.xlu0 %4850 }
0x10c4   :  { %v4854_v61 = vpop.xlane.xlu1 %4853 }
0x10c5   :  { %v4855_v23 = vadd.f32 %v4854_v61, %v4851_v8 }
0x10c7   :  { %v4858_v9 = vpop.xlane.xlu0 %4857 }
0x10c8   :  { %v5166_v17 = vpop.permute.xlu1 %5165  ;;  %v4859_v25 = vadd.f32 %v4858_v9, %v4855_v23  ;;  %v747_v23 = vld [vmem:[#allocation19 + $0x8] sm:$0xff] }
0x10ca   :  { %13076 = vrcp.f32 %v4859_v25  ;;  %v748_v25 = vld [vmem:[#allocation19 + $0x10] sm:$0xff] }
0x10cb   :  { %v5168_v10 = vpop.permute.xlu0 %5167 }
0x10cf   :  { %v5320_v13 = vpop.permute.xlu0 %5319 }
0x10d0   :  { %12314 = vmatpush3.xpose.msk.msra.mxu0 %vm1213_vm8, %v5320_v13  ;;  %v5734_v13 = vadd.f32 %v5732_v7, %v14103_v58  ;;  %v756_v7 = vld [vmem:[#allocation22] sm:$0xff] }
0x10d1   :  { %12333 = vmatprep.subr.mxu0 %v13651_v12 }
0x10d3   :  { %12316 = vmatmul.mubr.msk.f32.vlgmr.msra.gmra.mrb[34].mxu0 %vm1213_vm8, %v5166_v17 }
0x10d4   :  { %12334 = vmatpush3.msra.mxu0 %v14377_v11  ;;  %12335 = vmatprep.mubr.msk.f32.mxu0 %vm13652_vm7, %v13651_v12  ;;  %v13077_v18 = vpop.eup %13076  ;;  %v5245_v11 = vpop.permute.xlu1 %5244 }
0x1119   :  { %v5084_v20 = vpop.f32.mrb[32].mxu0 }
0x111a   :  { %v5090_v22 = vmul.f32 %v13077_v18, %v5084_v20  ;;  %v12297_v24 = vpop.f32.mrb[33].mxu0  ;;  %v749_v20 = vld [vmem:[#allocation19 + $0x18] sm:$0xff] }
0x111c   :  { %12301 = vmatmul.mubr.msk.f32.vlgmr.msra.gmra.mrb[48].mxu1 %vm1213_vm8, %v5090_v22  ;;  %v12781_v22 = vpack.c.bf16 %v749_v20, %v748_v25 }
0x111d   :  { %12304 = vmatpush3.xpose.msk.msra.mxu1 %vm1213_vm8, %v5168_v10  ;;  %12305 = vmatprep.mubr.msk.f32.mxu1 %vm13652_vm7, %v13651_v12 }
0x111e   :  { %12308 = vmatprep.subr.mxu1 %v13651_v12 }
0x1120   :  { %12306 = vmatmul.mubr.msk.f32.vlgmr.msra.gmra.mrb[50].mxu1 %vm1213_vm8, %v5166_v17 }
0x1121   :  { %12309 = vmatpush3.xpose.msk.msra.mxu1 %vm1213_vm8, %v5245_v11  ;;  %12310 = vmatprep.mubr.msk.f32.mxu1 %vm13652_vm7, %v13651_v12 }
0x1122   :  { %12318 = vmatprep.subr.mxu1 %v13651_v12 }
0x1124   :  { %12311 = vmatmul.mubr.msk.f32.vlgmr.msra.gmra.mrb[52].mxu1 %vm1213_vm8, %v5166_v17  ;;  %v746_v17 = vld [vmem:[#allocation19] sm:$0xff] }
0x1125   :  { %12320 = vmatprep.mubr.msk.f32.mxu1 %vm13652_vm7, %v13651_v12  ;;  %v12777_v18 = vpack.c.bf16 %v747_v23, %v746_v17 }
0x1127   :  { %12778 = vmatprep.subr.bf16.mxu0 %v12777_v18 }
0x11a6   :  { %v5389_v27 = vpop.f32.mrb[34].mxu0 }
0x11a7   :  { %v12317_v15 = vpop.f32.mrb[35].mxu0  ;;  %v5393_v41 = vmul.f32 0.35355338, %v5389_v27 }
0x11a9   :  { %v5401_v47 = vsel %vm1213_vm8, %v5393_v41, -inf }
0x11ef   :  { %v5160_v29 = vpop.f32.mrb[48].mxu1 }
0x11f0   :  { %v14560_v30 = vadd.f32 %v5160_v29, %v14511_v37  ;;  %v12302_v31 = vpop.f32.mrb[49].mxu1 }
0x11f1   :  { %v751_v31 = vld [vmem:[#allocation21] sm:$0xff] }
0x11f3   :  { %v5239_v32 = vpop.f32.mrb[50].mxu1 }
0x11f4   :  { %v5243_v34 = vmul.f32 0.35355338, %v5239_v32  ;;  %v12307_v62 = vpop.f32.mrb[51].mxu1  ;;  %v752_v32 = vld [vmem:[#allocation21 + $0x8] sm:$0xff] }
0x11f5   :  { %v753_v62 = vld [vmem:[#allocation21 + $0x10] sm:$0xff] }
0x11f6   :  { %v5394_v39 = vsel %vm1213_vm8, %v5243_v34, -inf }
0x11f7   :  { %5395 = vmax.xlane.f32.xlu1 %v5394_v39  ;;  %v5314_v40 = vpop.f32.mrb[52].mxu1  ;;  %v754_v39 = vld [vmem:[#allocation21 + $0x18] sm:$0xff] }
0x11f8   :  { %v5318_v42 = vmul.f32 0.35355338, %v5314_v40  ;;  %v12312_v43 = vpop.f32.mrb[53].mxu1  ;;  %v12789_v40 = vpack.c.bf16 %v754_v39, %v753_v62 }
0x11f9   :  { %v11557_v43 = vld [vmem:[%s15213_s30] ss:$0 sm:$0xff] }
0x11fa   :  { %v5397_v46 = vsel %vm1213_vm8, %v5318_v42, -inf }
0x11fb   :  { %5398 = vmax.xlane.f32.xlu0 %v5397_v46 }
0x11ff   :  { %5402 = vmax.xlane.f32.xlu0 %v5401_v47 }
0x1208   :  { %5501 = vrot.lane.b32.xlu1 %v14138_v14, %s13658_s2 }
0x120c   :  { %5577 = vrot.lane.b32.xlu1 %v14159_v26, %s13658_s2 }
0x1215   :  { %5425 = vrot.lane.b32.xlu0 %v14147_v19, %s13658_s2 }
0x1284   :  { %v5396_v48 = vpop.xlane.xlu1 %5395 }
0x1288   :  { %v5399_v37 = vpop.xlane.xlu0 %5398  ;;  %v5502_v1 = vpop.permute.xlu1 %5501 }
0x1289   :  { %v5400_v49 = vmax.f32 %v5396_v48, %v5399_v37 }
0x128c   :  { %v5403_v56 = vpop.xlane.xlu0 %5402  ;;  %v5578_v5 = vpop.permute.xlu1 %5577 }
0x128d   :  { %v5404_v51 = vmax.f32 %v5400_v49, %v5403_v56 }
0x128f   :  { %v5405_v35 = vsub.f32 %v5243_v34, %v5404_v51  ;;  %v5408_v54 = vsub.f32 %v5318_v42, %v5404_v51  ;;  %v5411_v55 = vsub.f32 %v5393_v41, %v5404_v51  ;;  %v12785_v34 = vpack.c.bf16 %v752_v32, %v751_v31 }
0x1290   :  { %v5426_v57 = vpop.permute.xlu0 %5425 }
0x1291   :  { %v5406_v60 = vmul.f32 1.442695, %v5405_v35  ;;  %v5409_v63 = vmul.f32 1.442695, %v5408_v54  ;;  %12319 = vmatpush3.msra.mxu1 %v5426_v57  ;;  %v5412_v0 = vmul.f32 1.442695, %v5411_v55 }
0x1292   :  { %12323 = vmatprep.subr.mxu1 %v13651_v12 }
0x1293   :  { %13078 = vpow2.f32 %v5406_v60  ;;  %v6025_v60 = vld [vmem:[#allocation24 + $0x10] sm:$0xff] }
0x1294   :  { %13080 = vpow2.f32 %v5409_v63  ;;  %v6026_v63 = vld [vmem:[#allocation24 + $0x18] sm:$0xff] }
0x1295   :  { %13082 = vpow2.f32 %v5412_v0 }
0x129d   :  { %v13079_v14 = vpop.eup %13078 }
0x129e   :  { %v13081_v19 = vpop.eup %13080  ;;  %v5414_v26 = vsel %vm1213_vm8, %v13079_v14, 0.0 }
0x129f   :  { %12321 = vmatmul.mubr.msk.f32.vlgmr.msra.gmra.mrb[54].mxu1 %vm1213_vm8, %v13081_v19  ;;  %v5417_v45 = vsel %vm1213_vm8, %v13081_v19, 0.0  ;;  %5415 = vadd.xlane.f32.xlu1 %v5414_v26  ;;  %v13083_v2 = vpop.eup %13082  ;;  %v12805_v26 = vpack.c.bf16 %v6026_v63, %v6025_v60 }
0x12a0   :  { %12324 = vmatpush3.msra.mxu1 %v5502_v1  ;;  %5418 = vadd.xlane.f32.xlu0 %v5417_v45  ;;  %v5421_v53 = vsel %vm1213_vm8, %v13083_v2, 0.0  ;;  %v6033_v1 = vld [vmem:[#allocation27] sm:$0xff]  ;;  %v6034_v45 = vld [vmem:[#allocation27 + $0x8] sm:$0xff] }
0x12a1   :  { %12325 = vmatprep.mubr.msk.f32.mxu1 %vm13652_vm7, %v13651_v12  ;;  %12328 = vmatprep.subr.mxu1 %v13651_v12 }
0x12a4   :  { %5422 = vadd.xlane.f32.xlu0 %v5421_v53  ;;  %v12817_v53 = vpack.c.bf16 %v6034_v45, %v6033_v1  ;;  %v6028_v45 = vld [vmem:[#allocation25] sm:$0xff] }
0x12a7   :  { %12326 = vmatmul.mubr.msk.f32.vlgmr.msra.gmra.mrb[54].mxu1 %vm1213_vm8, %v13079_v14 }
0x12a8   :  { %12329 = vmatpush3.msra.mxu1 %v5578_v5  ;;  %12330 = vmatprep.mubr.msk.f32.mxu1 %vm13652_vm7, %v13651_v12 }
0x12a9   :  { %12786 = vmatprep.subr.bf16.mxu1 %v12785_v34 }
0x12af   :  { %12331 = vmatmul.mubr.msk.f32.vlgmr.msra.gmra.mrb[54].mxu1 %vm1213_vm8, %v13083_v2  ;;  %v14595_v2 = vld [vmem:[%s15214_s0] ss:$0 sm:$0xff] }
0x12b0   :  { %12788 = vmatpush3.bf16.msra.mxu1 %v12785_v34  ;;  %v6110_v5 = vmul.f32 %v14595_v2, %v14106_v59 }
0x12b1   :  { %12790 = vmatprep.subr.bf16.mxu1 %v12789_v40 }
0x12b4   :  { %12792 = vmatpush3.bf16.msra.mxu1 %v12789_v40 }
0x132c   :  { %v5416_v38 = vpop.xlane.xlu1 %5415 }
0x132d   :  { %v5419_v16 = vpop.xlane.xlu0 %5418 }
0x132e   :  { %v5420_v28 = vadd.f32 %v5419_v16, %v5416_v38  ;;  %v6035_v16 = vld [vmem:[#allocation27 + $0x10] sm:$0xff]  ;;  %v6036_v38 = vld [vmem:[#allocation27 + $0x18] sm:$0xff] }
0x1331   :  { %v5423_v21 = vpop.xlane.xlu0 %5422 }
0x1332   :  { %v5424_v6 = vadd.f32 %v5423_v21, %v5420_v28  ;;  %v14602_v21 = vld [vmem:[%s15215_s6] ss:$0 sm:$0xff]  ;;  %v12821_v28 = vpack.c.bf16 %v6036_v38, %v6035_v16  ;;  %v6030_v16 = vld [vmem:[#allocation25 + $0x10] sm:$0xff]  ;;  %v6031_v38 = vld [vmem:[#allocation25 + $0x18] sm:$0xff] }
0x1334   :  { %13084 = vrcp.f32 %v5424_v6  ;;  %v6112_v6 = vadd.f32 %v14602_v21, %v6110_v5 }
0x133e   :  { %v13085_v8 = vpop.eup %13084 }
0x1382   :  { %v5649_v9 = vpop.f32.mrb[54].mxu1 }
0x1383   :  { %v5655_v10 = vmul.f32 %v13085_v8, %v5649_v9  ;;  %v12332_v61 = vpop.f32.mrb[55].mxu1  ;;  %v758_v9 = vld [vmem:[#allocation22 + $0x10] sm:$0xff] }
0x1384   :  { %v11560_v61 = vld [vmem:[%s15216_s27] ss:$0 sm:$0xff] }
0x1385   :  { %12336 = vmatmul.mubr.msk.f32.vlgmr.msra.gmra.mrb[36].mxu0 %vm1213_vm8, %v5655_v10  ;;  %v759_v10 = vld [vmem:[#allocation22 + $0x18] sm:$0xff] }
0x1386   :  { %12346 = vmatprep.mubr.msk.f32.mxu0 %vm761_vm6, %v5734_v13  ;;  %12780 = vmatpush3.bf16.msra.mxu0 %v12777_v18 }
0x1387   :  { %12782 = vmatprep.subr.bf16.mxu0 %v12781_v22 }
0x138a   :  { %12784 = vmatpush3.bf16.msra.mxu0 %v12781_v22 }
0x1458   :  { %v5725_v24 = vpop.f32.mrb[36].mxu0 }
0x1459   :  { %v5729_v11 = vadd.f32 %v5725_v24, %v14560_v30  ;;  %v12337_v27 = vpop.f32.mrb[37].mxu0  ;;  %v6023_v30 = vld [vmem:[#allocation24] sm:$0xff] }
0x145b   :  { %v5730_v58 = vadd.f32 %v14421_v50, %v5729_v11  ;;  %v6024_v50 = vld [vmem:[#allocation24 + $0x8] sm:$0xff]  ;;  %v11568_v11 = vld [vmem:[%s15217_s4] ss:$0 sm:$0xff] }
0x145c   :  { %v12801_v42 = vpack.c.bf16 %v6024_v50, %v6023_v30 }
0x145d   :  { %5731 = vst.msk [vmem:[#allocation2 + $0x8] sm:$0xff] %vm761_vm6, %v5730_v58 }
0x145e   :  { %12802 = vmatprep.subr.bf16.mxu1 %v12801_v42 }
0x1464   :  { %v5733_v15 = vld [vmem:[#allocation2 + $0x8] sm:$0xff] }
0x1465   :  { %v5735_v29 = vadd.f32 %v5733_v15, %v14114_v4 }
0x1467   :  { %12347 = vmatmul.mubr.msk.f32.vlgmr.msra.gmra.mrb[38].mxu0 %vm761_vm6, %v5735_v29  ;;  %v11574_v29 = vld [vmem:[%s15218_s7] ss:$0 sm:$0xff] }
0x153a   :  { %v12348_v41 = vpop.f32.mrb[38].mxu0 }
0x153b   :  { %v5820_v4 = vadd.f32 %v12348_v41, %v11557_v43  ;;  %v5814_v46 = vpop.f32.mrb[39].mxu0 }
0x153c   :  { %v5815_v47 = vadd.f32 %v11557_v43, %v5814_v46 }
0x153d   :  { %v5824_v37 = vsub.f32 0.0, %v5820_v4 }
0x153e   :  { %v5823_v48 = vsub.f32 0.0, %v5815_v47 }
0x153f   :  { %v5827_v49 = vmul.f32 1.442695, %v5824_v37 }
0x1540   :  { %v5825_v56 = vmul.f32 1.442695, %v5823_v48 }
0x1541   :  { %13086 = vpow2.f32 %v5827_v49 }
0x1542   :  { %13088 = vpow2.f32 %v5825_v56 }
0x154b   :  { %v13087_v51 = vpop.eup %13086 }
0x154c   :  { %v13089_v35 = vpop.eup %13088  ;;  %v5830_v54 = vadd.f32 1.0, %v13087_v51 }
0x154d   :  { %v5829_v55 = vadd.f32 1.0, %v13089_v35 }
0x154e   :  { %13090 = vrcp.f32 %v5830_v54 }
0x154f   :  { %13092 = vrcp.f32 %v5829_v55 }
0x1558   :  { %v13091_v57 = vpop.eup %13090 }
0x1559   :  { %v13093_v0 = vpop.eup %13092  ;;  %v5834_v19 = vmul.f32 %v13091_v57, %v5820_v4  ;;  %v11563_v4 = vld [vmem:[%s15219_s13] ss:$0 sm:$0xff] }
0x155a   :  { %v5833_v14 = vmul.f32 %v13093_v0, %v5815_v47 }
0x155c   :  { %12357 = vmatprep.mubr.msk.f32.mxu1 %vm761_vm6, %v5833_v14 }
0x155d   :  { %12358 = vmatmul.mubr.msk.f32.vlgmr.msra.gmra.mrb[56].mxu1 %vm761_vm6, %v5834_v19 }
0x155e   :  { %12804 = vmatpush3.bf16.msra.mxu1 %v12801_v42  ;;  %12379 = vmatprep.mubr.msk.f32.mxu1 %vm761_vm6, %v14049_v36  ;;  %v6111_v36 = vmul.f32 %v14595_v2, %v14112_v3  ;;  %v12797_v3 = vpack.c.bf16 %v759_v10, %v758_v9 }
0x155f   :  { %12806 = vmatprep.subr.bf16.mxu1 %v12805_v26 }
0x1560   :  { %v6113_v59 = vadd.f32 %v14602_v21, %v6111_v36  ;;  %v6039_v36 = vld [vmem:[#allocation28 + $0x8] sm:$0xff] }
0x1562   :  { %12808 = vmatpush3.bf16.msra.mxu1 %v12805_v26 }
0x1563   :  { %12818 = vmatprep.subr.bf16.mxu1 %v12817_v53 }
0x1565   :  { %12380 = vmatmul.mubr.msk.f32.vlgmr.msra.gmra.mrb[58].mxu1 %vm761_vm6, %v14046_v33  ;;  %v757_v33 = vld [vmem:[#allocation22 + $0x8] sm:$0xff] }
0x1566   :  { %12820 = vmatpush3.bf16.msra.mxu1 %v12817_v53  ;;  %12401 = vmatprep.mubr.msk.f32.mxu1 %vm761_vm6, %v6112_v6  ;;  %v12793_v8 = vpack.c.bf16 %v757_v33, %v756_v7  ;;  %v6029_v53 = vld [vmem:[#allocation25 + $0x8] sm:$0xff]  ;;  %v6038_v6 = vld [vmem:[#allocation28] sm:$0xff] }
0x1567   :  { %12822 = vmatprep.subr.bf16.mxu1 %v12821_v28  ;;  %v12809_v5 = vpack.c.bf16 %v6029_v53, %v6028_v45 }
0x1568   :  { %12794 = vmatprep.subr.bf16.mxu0 %v12793_v8 }
0x1569   :  { %12796 = vmatpush3.bf16.msra.mxu0 %v12793_v8 }
0x156a   :  { %12824 = vmatpush3.bf16.msra.mxu1 %v12821_v28  ;;  %12798 = vmatprep.subr.bf16.mxu0 %v12797_v3  ;;  %v12813_v28 = vpack.c.bf16 %v6031_v38, %v6030_v16 }
0x156b   :  { %12415 = vmatprep.subr.mxu1 %v13651_v12 }
0x156d   :  { %12402 = vmatmul.mubr.msk.f32.vlgmr.msra.gmra.mrb[60].mxu1 %vm761_vm6, %v6113_v59  ;;  %12800 = vmatpush3.bf16.msra.mxu0 %v12797_v3  ;;  %v12825_v59 = vpack.c.bf16 %v6039_v36, %v6038_v6 }
0x156e   :  { %12417 = vmatprep.mubr.msk.f32.mxu1 %vm13652_vm7, %v13651_v12  ;;  %12810 = vmatprep.subr.bf16.mxu0 %v12809_v5 }
0x1630   :  { %v12359_v13 = vpop.f32.mrb[56].mxu1 }
0x1631   :  { %v5919_v17 = vadd.f32 %v12359_v13, %v11560_v61  ;;  %v5913_v23 = vpop.f32.mrb[57].mxu1 }
0x1632   :  { %v5914_v25 = vadd.f32 %v11560_v61, %v5913_v23 }
0x1633   :  { %v5923_v18 = vsub.f32 0.0, %v5919_v17 }
0x1634   :  { %v5922_v20 = vsub.f32 0.0, %v5914_v25 }
0x1635   :  { %v5926_v22 = vmul.f32 1.442695, %v5923_v18 }
0x1636   :  { %v5924_v24 = vmul.f32 1.442695, %v5922_v20  ;;  %v6070_v20 = vmul.f32 %v14595_v2, %v14117_v44  ;;  %v6071_v44 = vmul.f32 %v14595_v2, %v14125_v52  ;;  %v11571_v52 = vld [vmem:[%s15220_s10] ss:$0 sm:$0xff] }
0x1637   :  { %13094 = vpow2.f32 %v5926_v22  ;;  %v6040_v22 = vld [vmem:[#allocation28 + $0x10] sm:$0xff] }
0x1638   :  { %13096 = vpow2.f32 %v5924_v24  ;;  %v12381_v27 = vpop.f32.mrb[58].mxu1  ;;  %v6041_v24 = vld [vmem:[#allocation28 + $0x18] sm:$0xff] }
0x1639   :  { %v14617_v58 = vadd.f32 %v12381_v27, %v11568_v11  ;;  %v6186_v15 = vpop.f32.mrb[59].mxu1 }
0x163a   :  { %v14637_v26 = vadd.f32 %v11568_v11, %v6186_v15  ;;  %v12829_v15 = vpack.c.bf16 %v6041_v24, %v6040_v22 }
0x1640   :  { %v12403_v31 = vpop.f32.mrb[60].mxu1 }
0x1641   :  { %v13095_v32 = vpop.eup %13094  ;;  %v14620_v34 = vadd.f32 %v12403_v31, %v11574_v29  ;;  %v6360_v62 = vpop.f32.mrb[61].mxu1  ;;  %v6079_v31 = vadd.f32 %v14602_v21, %v6071_v44 }
0x1642   :  { %v13097_v39 = vpop.eup %13096  ;;  %v5929_v40 = vadd.f32 1.0, %v13095_v32  ;;  %v14641_v1 = vadd.f32 %v11574_v29, %v6360_v62  ;;  %v6078_v29 = vadd.f32 %v14602_v21, %v6070_v20 }
0x1643   :  { %v5928_v30 = vadd.f32 1.0, %v13097_v39  ;;  %v11577_v39 = vld [vmem:[%s15221_s25] ss:$0 sm:$0xff] }
0x1644   :  { %13098 = vrcp.f32 %v5929_v40 }
0x1645   :  { %13100 = vrcp.f32 %v5928_v30 }
0x164e   :  { %v13099_v50 = vpop.eup %13098 }
0x164f   :  { %v13101_v42 = vpop.eup %13100  ;;  %v5933_v41 = vmul.f32 %v13099_v50, %v5919_v17 }
0x1650   :  { %v5932_v43 = vmul.f32 %v13101_v42, %v5914_v25 }
0x1652   :  { %12368 = vmatprep.mubr.msk.f32.mxu0 %vm761_vm6, %v5932_v43 }
0x1653   :  { %12369 = vmatmul.mubr.msk.f32.vlgmr.msra.gmra.mrb[40].mxu0 %vm761_vm6, %v5933_v41 }
0x1654   :  { %12812 = vmatpush3.bf16.msra.mxu0 %v12809_v5 }
0x1655   :  { %12814 = vmatprep.subr.bf16.mxu0 %v12813_v28 }
0x1658   :  { %12816 = vmatpush3.bf16.msra.mxu0 %v12813_v28 }
0x1659   :  { %12826 = vmatprep.subr.bf16.mxu0 %v12825_v59 }
0x1726   :  { %v12370_v46 = vpop.f32.mrb[40].mxu0 }
0x1727   :  { %v14625_v47 = vadd.f32 %v12370_v46, %v11563_v4  ;;  %v6012_v37 = vpop.f32.mrb[41].mxu0 }
0x1728   :  { %v14627_v48 = vadd.f32 %v11563_v4, %v6012_v37 }
0x1729   :  { %v6083_v49 = vsel %vm761_vm6, %v14625_v47, 0.0 }
0x172a   :  { %6084 = vadd.xlane.f32.xlu1 %v6083_v49  ;;  %v6080_v56 = vsel %vm761_vm6, %v14627_v48, 0.0 }
0x172b   :  { %6081 = vadd.xlane.f32.xlu0 %v6080_v56 }
0x17b7   :  { %v6085_v51 = vpop.xlane.xlu1 %6084 }
0x17b8   :  { %v6087_v35 = vmul.f32 0.03125, %v6085_v51  ;;  %v6082_v54 = vpop.xlane.xlu0 %6081 }
0x17b9   :  { %v6086_v55 = vmul.f32 0.03125, %v6082_v54 }
0x17ba   :  { %v6089_v57 = vsub.f32 %v14625_v47, %v6087_v35 }
0x17bb   :  { %v6088_v60 = vsub.f32 %v14627_v48, %v6086_v55 }
0x17bc   :  { %v6091_v63 = vmul.f32 %v6089_v57, %v6089_v57 }
0x17bd   :  { %v6090_v0 = vmul.f32 %v6088_v60, %v6088_v60 }
0x17be   :  { %v6095_v14 = vsel %vm761_vm6, %v6091_v63, 0.0 }
0x17bf   :  { %6096 = vadd.xlane.f32.xlu1 %v6095_v14  ;;  %v6092_v19 = vsel %vm761_vm6, %v6090_v0, 0.0 }
0x17c0   :  { %6093 = vadd.xlane.f32.xlu0 %v6092_v19 }
0x17d0   :  { %6943 = vrot.lane.b32.xlu1 %v14637_v26, %s13650_s22 }
0x17d4   :  { %7022 = vrot.lane.b32.xlu1 %v14641_v1, %s13650_s22 }
0x184c   :  { %v6097_v7 = vpop.xlane.xlu1 %6096 }
0x184d   :  { %v6099_v33 = vmul.f32 0.03125, %v6097_v7  ;;  %v6094_v8 = vpop.xlane.xlu0 %6093 }
0x184e   :  { %v6098_v9 = vmul.f32 0.03125, %v6094_v8 }
0x184f   :  { %v6101_v10 = vadd.f32 1e-05, %v6099_v33 }
0x1850   :  { %v6100_v3 = vadd.f32 1e-05, %v6098_v9  ;;  %v6944_v37 = vpop.permute.xlu1 %6943 }
0x1851   :  { %13102 = vrsqrt.f32 %v6101_v10 }
0x1852   :  { %13104 = vrsqrt.f32 %v6100_v3 }
0x1854   :  { %v7023_v56 = vpop.permute.xlu1 %7022 }
0x185b   :  { %v13103_v61 = vpop.eup %13102 }
0x185c   :  { %v13105_v13 = vpop.eup %13104  ;;  %v6105_v17 = vmul.f32 %v13103_v61, %v6089_v57 }
0x185d   :  { %v6104_v23 = vmul.f32 %v13105_v13, %v6088_v60 }
0x185e   :  { %v6107_v25 = vmul.f32 %v14595_v2, %v6105_v17 }
0x185f   :  { %v6106_v18 = vmul.f32 %v14595_v2, %v6104_v23 }
0x1860   :  { %v14653_v27 = vadd.f32 %v14602_v21, %v6107_v25 }
0x1861   :  { %v14650_v11 = vadd.f32 %v14602_v21, %v6106_v18 }
0x1863   :  { %12390 = vmatprep.mubr.msk.f32.mxu0 %vm761_vm6, %v14650_v11 }
0x1864   :  { %12391 = vmatmul.mubr.msk.f32.vlgmr.msra.gmra.mrb[42].mxu0 %vm761_vm6, %v14653_v27 }
0x1865   :  { %12828 = vmatpush3.bf16.msra.mxu0 %v12825_v59  ;;  %12412 = vmatprep.mubr.msk.f32.mxu0 %vm761_vm6, %v6078_v29 }
0x1866   :  { %12830 = vmatprep.subr.bf16.mxu0 %v12829_v15 }
0x1869   :  { %12832 = vmatpush3.bf16.msra.mxu0 %v12829_v15 }
0x186a   :  { %12420 = vmatprep.subr.mxu0 %v13651_v12 }
0x186c   :  { %12413 = vmatmul.mubr.msk.f32.vlgmr.msra.gmra.mrb[44].mxu0 %vm761_vm6, %v6079_v31 }
0x186d   :  { %12422 = vmatprep.mubr.msk.f32.mxu0 %vm13652_vm7, %v13651_v12 }
0x1872   :  { %12421 = vmatpush3.xpose.msk.msra.mxu0 %vm1213_vm8, %v14641_v1 }
0x1873   :  { %12430 = vmatprep.subr.mxu0 %v13651_v12 }
0x1875   :  { %12423 = vmatmul.mubr.msk.f32.vlgmr.msra.gmra.mrb[46].mxu0 %vm1213_vm8, %v14637_v26 }
0x1876   :  { %12432 = vmatprep.mubr.msk.f32.mxu0 %vm13652_vm7, %v13651_v12 }
0x1937   :  { %v12392_v2 = vpop.f32.mrb[42].mxu0 }
0x1938   :  { %v14676_v21 = vadd.f32 %v12392_v2, %v11571_v52  ;;  %v6273_v32 = vpop.f32.mrb[43].mxu0 }
0x1939   :  { %v14678_v62 = vadd.f32 %v11571_v52, %v6273_v32 }
0x193b   :  { %6945 = vrot.lane.b32.xlu0 %v14678_v62, %s13650_s22  ;;  %12416 = vmatpush3.xpose.msk.msra.mxu1 %vm1213_vm8, %v14678_v62 }
0x193c   :  { %12425 = vmatprep.subr.mxu1 %v13651_v12 }
0x193e   :  { %12418 = vmatmul.mubr.msk.f32.vlgmr.msra.gmra.mrb[62].mxu1 %vm1213_vm8, %v14637_v26 }
0x193f   :  { %v12414_v40 = vpop.f32.mrb[44].mxu0  ;;  %12427 = vmatprep.mubr.msk.f32.mxu1 %vm13652_vm7, %v13651_v12 }
0x1940   :  { %v14690_v30 = vadd.f32 %v12414_v40, %v11577_v39  ;;  %v6447_v50 = vpop.f32.mrb[45].mxu0 }
0x1941   :  { %v14692_v42 = vadd.f32 %v11577_v39, %v6447_v50 }
0x1943   :  { %7097 = vrot.lane.b32.xlu1 %v14692_v42, %s13650_s22  ;;  %12426 = vmatpush3.xpose.msk.msra.mxu1 %vm1213_vm8, %v14692_v42 }
0x1944   :  { %12445 = vmatprep.subr.mxu1 %v13651_v12 }
0x1946   :  { %12428 = vmatmul.mubr.msk.f32.vlgmr.msra.gmra.mrb[64].mxu1 %vm1213_vm8, %v14637_v26 }
0x1947   :  { %12447 = vmatprep.mubr.msk.f32.mxu1 %vm13652_vm7, %v13651_v12 }
0x1948   :  { %v6602_v43 = vpop.f32.mrb[46].mxu0 }
0x1949   :  { %v12424_v41 = vpop.f32.mrb[47].mxu0  ;;  %v6606_v4 = vmul.f32 0.35355338, %v6602_v43 }
0x194b   :  { %v6684_v46 = vsel %vm1213_vm8, %v6606_v4, -inf }
0x1967   :  { %6685 = vmax.xlane.f32.xlu1 %v6684_v46 }
0x1978   :  { %6788 = vrot.lane.b32.xlu1 %v14678_v62, %s13653_s26 }
0x197c   :  { %6864 = vrot.lane.b32.xlu1 %v14692_v42, %s13653_s26 }
0x19ad   :  { %v6946_v49 = vpop.permute.xlu0 %6945 }
0x19ae   :  { %12446 = vmatpush3.xpose.msk.msra.mxu1 %vm1213_vm8, %v6946_v49 }
0x19af   :  { %12450 = vmatprep.subr.mxu1 %v13651_v12 }
0x19b1   :  { %12448 = vmatmul.mubr.msk.f32.vlgmr.msra.gmra.mrb[66].mxu1 %vm1213_vm8, %v6944_v37 }
0x19b2   :  { %12451 = vmatpush3.xpose.msk.msra.mxu1 %vm1213_vm8, %v7023_v56  ;;  %12452 = vmatprep.mubr.msk.f32.mxu1 %vm13652_vm7, %v13651_v12 }
0x19b3   :  { %12455 = vmatprep.subr.mxu1 %v13651_v12 }
0x19b5   :  { %v7098_v51 = vpop.permute.xlu1 %7097  ;;  %12453 = vmatmul.mubr.msk.f32.vlgmr.msra.gmra.mrb[68].mxu1 %vm1213_vm8, %v6944_v37 }
0x19b6   :  { %12456 = vmatpush3.xpose.msk.msra.mxu1 %vm1213_vm8, %v7098_v51  ;;  %12457 = vmatprep.mubr.msk.f32.mxu1 %vm13652_vm7, %v13651_v12 }
0x19b7   :  { %12475 = vmatprep.subr.mxu1 %v13651_v12 }
0x19b9   :  { %12458 = vmatmul.mubr.msk.f32.vlgmr.msra.gmra.mrb[70].mxu1 %vm1213_vm8, %v6944_v37 }
0x19ba   :  { %12477 = vmatprep.mubr.msk.f32.mxu1 %vm13652_vm7, %v13651_v12 }
0x19f4   :  { %v6686_v9 = vpop.xlane.xlu1 %6685 }
0x19f8   :  { %v6789_v22 = vpop.permute.xlu1 %6788 }
0x19fc   :  { %v6865_v15 = vpop.permute.xlu1 %6864 }
0x1a11   :  { %v6528_v35 = vpop.f32.mrb[62].mxu1 }
0x1a12   :  { %v6532_v54 = vmul.f32 0.35355338, %v6528_v35  ;;  %v12419_v55 = vpop.f32.mrb[63].mxu1 }
0x1a14   :  { %v6681_v57 = vsel %vm1213_vm8, %v6532_v54, -inf }
0x1a15   :  { %6682 = vmax.xlane.f32.xlu0 %v6681_v57 }
0x1a19   :  { %v6676_v60 = vpop.f32.mrb[64].mxu1 }
0x1a1a   :  { %v6680_v63 = vmul.f32 0.35355338, %v6676_v60  ;;  %v12429_v0 = vpop.f32.mrb[65].mxu1 }
0x1a1c   :  { %v6688_v14 = vsel %vm1213_vm8, %v6680_v63, -inf }
0x1a1d   :  { %6689 = vmax.xlane.f32.xlu0 %v6688_v14 }
0x1a84   :  { %v7017_v19 = vpop.f32.mrb[66].mxu1 }
0x1a85   :  { %v7021_v45 = vmul.f32 0.35355338, %v7017_v19  ;;  %v12449_v53 = vpop.f32.mrb[67].mxu1 }
0x1a87   :  { %v7172_v5 = vsel %vm1213_vm8, %v7021_v45, -inf }
0x1a88   :  { %7173 = vmax.xlane.f32.xlu0 %v7172_v5  ;;  %v7092_v16 = vpop.f32.mrb[68].mxu1 }
0x1a89   :  { %v7096_v38 = vmul.f32 0.35355338, %v7092_v16  ;;  %v12454_v28 = vpop.f32.mrb[69].mxu1 }
0x1a8b   :  { %v7175_v6 = vsel %vm1213_vm8, %v7096_v38, -inf }
0x1a8c   :  { %7176 = vmax.xlane.f32.xlu0 %v7175_v6  ;;  %v7167_v36 = vpop.f32.mrb[70].mxu1 }
0x1a8d   :  { %v7171_v59 = vmul.f32 0.35355338, %v7167_v36  ;;  %v12459_v7 = vpop.f32.mrb[71].mxu1 }
0x1a8f   :  { %v7179_v33 = vsel %vm1213_vm8, %v7171_v59, -inf }
0x1a90   :  { %7180 = vmax.xlane.f32.xlu1 %v7179_v33 }
0x1aa1   :  { %7203 = vrot.lane.b32.xlu1 %v14641_v1, %s13654_s28 }
0x1aa2   :  { %6712 = vrot.lane.b32.xlu0 %v14641_v1, %s13653_s26  ;;  %v6683_v8 = vpop.xlane.xlu0 %6682 }
0x1aa3   :  { %v6687_v10 = vmax.f32 %v6683_v8, %v6686_v9 }
0x1aa5   :  { %7355 = vrot.lane.b32.xlu1 %v14692_v42, %s13654_s28 }
0x1aa6   :  { %7279 = vrot.lane.b32.xlu0 %v14678_v62, %s13654_s28 }
0x1aaa   :  { %v6690_v3 = vpop.xlane.xlu0 %6689 }
0x1aab   :  { %v6691_v61 = vmax.f32 %v6687_v10, %v6690_v3 }
0x1aad   :  { %v6692_v13 = vsub.f32 %v6532_v54, %v6691_v61  ;;  %v6695_v18 = vsub.f32 %v6606_v4, %v6691_v61  ;;  %v6698_v44 = vsub.f32 %v6680_v63, %v6691_v61 }
0x1aaf   :  { %v6693_v17 = vmul.f32 1.442695, %v6692_v13  ;;  %v6696_v20 = vmul.f32 1.442695, %v6695_v18  ;;  %v6699_v40 = vmul.f32 1.442695, %v6698_v44 }
0x1ab1   :  { %13106 = vpow2.f32 %v6693_v17 }
0x1ab2   :  { %13108 = vpow2.f32 %v6696_v20  ;;  %v14783_v20 = vld [vmem:[#allocation30] sm:$0xff] }
0x1ab3   :  { %13110 = vpow2.f32 %v6699_v40 }
0x1abb   :  { %v13107_v23 = vpop.eup %13106 }
0x1abc   :  { %v6701_v25 = vsel %vm1213_vm8, %v13107_v23, 0.0  ;;  %v13109_v32 = vpop.eup %13108 }
0x1abd   :  { %v13111_v49 = vpop.eup %13110  ;;  %v6704_v14 = vsel %vm1213_vm8, %v13109_v32, 0.0 }
0x1abe   :  { %v6708_v0 = vsel %vm1213_vm8, %v13111_v49, 0.0 }
0x1ac5   :  { %6702 = vadd.xlane.f32.xlu0 %v6701_v25 }
0x1b15   :  { %v7174_v24 = vpop.xlane.xlu0 %7173 }
0x1b19   :  { %v7177_v29 = vpop.xlane.xlu0 %7176 }
0x1b1a   :  { %v7178_v31 = vmax.f32 %v7174_v24, %v7177_v29 }
0x1b1d   :  { %v6713_v52 = vpop.permute.xlu0 %6712  ;;  %v7181_v2 = vpop.xlane.xlu1 %7180 }
0x1b1e   :  { %v7182_v39 = vmax.f32 %v7178_v31, %v7181_v2  ;;  %12431 = vmatpush3.msra.mxu0 %v6713_v52 }
0x1b1f   :  { %12433 = vmatmul.mubr.msk.f32.vlgmr.msra.gmra.mrb[48].mxu0 %vm1213_vm8, %v13109_v32  ;;  %12435 = vmatprep.subr.mxu0 %v13651_v12 }
0x1b20   :  { %v7183_v50 = vsub.f32 %v7021_v45, %v7182_v39  ;;  %v7186_v43 = vsub.f32 %v7096_v38, %v7182_v39  ;;  %v7189_v41 = vsub.f32 %v7171_v59, %v7182_v39  ;;  %12436 = vmatpush3.msra.mxu0 %v6789_v22  ;;  %12437 = vmatprep.mubr.msk.f32.mxu0 %vm13652_vm7, %v13651_v12  ;;  %v14774_v45 = vld [vmem:[#allocation30 + $0x8] sm:$0xff] }
0x1b21   :  { %12440 = vmatprep.subr.mxu0 %v13651_v12  ;;  %v7204_v35 = vpop.permute.xlu1 %7203  ;;  %v7280_v60 = vpop.permute.xlu0 %7279  ;;  %12476 = vmatpush3.msra.mxu1 %v14774_v45 }
0x1b22   :  { %v7184_v4 = vmul.f32 1.442695, %v7183_v50  ;;  %v7187_v46 = vmul.f32 1.442695, %v7186_v43  ;;  %v7190_v37 = vmul.f32 1.442695, %v7189_v41  ;;  %12480 = vmatprep.subr.mxu1 %v13651_v12 }
0x1b24   :  { %13112 = vpow2.f32 %v7184_v4 }
0x1b25   :  { %13114 = vpow2.f32 %v7187_v46  ;;  %v7356_v19 = vpop.permute.xlu1 %7355 }
0x1b26   :  { %13116 = vpow2.f32 %v7190_v37 }
0x1b27   :  { %12438 = vmatmul.mubr.msk.f32.vlgmr.msra.gmra.mrb[48].mxu0 %vm1213_vm8, %v13107_v23 }
0x1b28   :  { %12441 = vmatpush3.msra.mxu0 %v6865_v15  ;;  %12442 = vmatprep.mubr.msk.f32.mxu0 %vm13652_vm7, %v13651_v12 }
0x1b29   :  { %12460 = vmatprep.subr.mxu0 %v13651_v12 }
0x1b2e   :  { %v13113_v56 = vpop.eup %13112 }
0x1b2f   :  { %v13115_v51 = vpop.eup %13114  ;;  %12443 = vmatmul.mubr.msk.f32.vlgmr.msra.gmra.mrb[48].mxu0 %vm1213_vm8, %v13111_v49  ;;  %v7192_v54 = vsel %vm1213_vm8, %v13113_v56, 0.0 }
0x1b30   :  { %v13117_v55 = vpop.eup %13116  ;;  %12461 = vmatpush3.msra.mxu0 %v7204_v35  ;;  %v7195_v57 = vsel %vm1213_vm8, %v13115_v51, 0.0  ;;  %7193 = vadd.xlane.f32.xlu0 %v7192_v54 }
0x1b31   :  { %7196 = vadd.xlane.f32.xlu1 %v7195_v57  ;;  %12462 = vmatprep.mubr.msk.f32.mxu0 %vm13652_vm7, %v13651_v12  ;;  %v7199_v63 = vsel %vm1213_vm8, %v13117_v55, 0.0 }
0x1b32   :  { %12465 = vmatprep.subr.mxu0 %v13651_v12 }
0x1b33   :  { %12463 = vmatmul.mubr.msk.f32.vlgmr.msra.gmra.mrb[50].mxu0 %vm1213_vm8, %v13115_v51 }
0x1b34   :  { %12466 = vmatpush3.msra.mxu0 %v7280_v60  ;;  %7200 = vadd.xlane.f32.xlu0 %v7199_v63 }
0x1b35   :  { %6709 = vadd.xlane.f32.xlu1 %v6708_v0  ;;  %12467 = vmatprep.mubr.msk.f32.mxu0 %vm13652_vm7, %v13651_v12 }
0x1b36   :  { %12470 = vmatprep.subr.mxu0 %v13651_v12 }
0x1b38   :  { %6705 = vadd.xlane.f32.xlu0 %v6704_v14 }
0x1b3b   :  { %12468 = vmatmul.mubr.msk.f32.vlgmr.msra.gmra.mrb[50].mxu0 %vm1213_vm8, %v13113_v56 }
0x1b3c   :  { %12471 = vmatpush3.msra.mxu0 %v7356_v19  ;;  %12472 = vmatprep.mubr.msk.f32.mxu0 %vm13652_vm7, %v13651_v12 }
0x1b3d   :  { %12490 = vmatprep.subr.mxu0 %v13651_v12 }
0x1b43   :  { %12473 = vmatmul.mubr.msk.f32.vlgmr.msra.gmra.mrb[50].mxu0 %vm1213_vm8, %v13117_v55 }
0x1b44   :  { %12492 = vmatprep.mubr.msk.f32.mxu0 %vm13652_vm7, %v13651_v12 }
0x1b46   :  { %7659 = vrot.lane.b32.xlu1 %v14641_v1, %s13655_s1 }
0x1b4a   :  { %7580 = vrot.lane.b32.xlu1 %v14637_v26, %s13655_s1 }
0x1b4e   :  { %7734 = vrot.lane.b32.xlu1 %v14692_v42, %s13655_s1  ;;  %7582 = vrot.lane.b32.xlu0 %v14678_v62, %s13655_s1 }
0x1b52   :  { %v6703_v28 = vpop.xlane.xlu0 %6702 }
0x1bbd   :  { %v7194_v6 = vpop.xlane.xlu0 %7193 }
0x1bbe   :  { %v7197_v53 = vpop.xlane.xlu1 %7196 }
0x1bbf   :  { %v7198_v61 = vadd.f32 %v7197_v53, %v7194_v6 }
0x1bc1   :  { %v7201_v36 = vpop.xlane.xlu0 %7200 }
0x1bc2   :  { %v6710_v5 = vpop.xlane.xlu1 %6709  ;;  %v7202_v13 = vadd.f32 %v7201_v36, %v7198_v61 }
0x1bc5   :  { %v6706_v59 = vpop.xlane.xlu0 %6705 }
0x1bc6   :  { %v7660_v16 = vpop.permute.xlu1 %7659  ;;  %v6707_v7 = vadd.f32 %v6706_v59, %v6703_v28 }
0x1bc7   :  { %12491 = vmatpush3.xpose.msk.msra.mxu0 %vm1213_vm8, %v7660_v16 }
0x1bc8   :  { %12500 = vmatprep.subr.mxu0 %v13651_v12  ;;  %v6711_v33 = vadd.f32 %v6710_v5, %v6707_v7 }
0x1bc9   :  { %v7583_v22 = vpop.permute.xlu0 %7582 }
0x1bca   :  { %v7581_v38 = vpop.permute.xlu1 %7580  ;;  %13118 = vrcp.f32 %v6711_v33 }
0x1bcb   :  { %12493 = vmatmul.mubr.msk.f32.vlgmr.msra.gmra.mrb[52].mxu0 %vm1213_vm8, %v7581_v38  ;;  %13120 = vrcp.f32 %v7202_v13 }
0x1bcc   :  { %12502 = vmatprep.mubr.msk.f32.mxu0 %vm13652_vm7, %v13651_v12 }
0x1bce   :  { %v7735_v24 = vpop.permute.xlu1 %7734 }
0x1bd4   :  { %v13119_v8 = vpop.eup %13118 }
0x1bd5   :  { %v13121_v17 = vpop.eup %13120 }
0x1c02   :  { %v6936_v9 = vpop.f32.mrb[48].mxu0 }
0x1c03   :  { %v6942_v10 = vmul.f32 %v13119_v8, %v6936_v9  ;;  %v12444_v3 = vpop.f32.mrb[49].mxu0  ;;  %v14835_v8 = vld [vmem:[#allocation30 + $0x10] sm:$0xff] }
0x1c16   :  { %v7427_v23 = vpop.f32.mrb[50].mxu0 }
0x1c17   :  { %v7433_v25 = vmul.f32 %v13121_v17, %v7427_v23  ;;  %v12474_v18 = vpop.f32.mrb[51].mxu0 }
0x1c19   :  { %12478 = vmatmul.mubr.msk.f32.vlgmr.msra.gmra.mrb[72].mxu1 %vm1213_vm8, %v7433_v25 }
0x1c1a   :  { %12481 = vmatpush3.msra.mxu1 %v14783_v20  ;;  %12482 = vmatprep.mubr.msk.f32.mxu1 %vm13652_vm7, %v13651_v12 }
0x1c1b   :  { %12485 = vmatprep.subr.mxu1 %v13651_v12 }
0x1c1d   :  { %12483 = vmatmul.mubr.msk.f32.vlgmr.msra.gmra.mrb[74].mxu1 %vm1213_vm8, %v6942_v10 }
0x1c1e   :  { %12487 = vmatprep.mubr.msk.f32.mxu1 %vm13652_vm7, %v13651_v12 }
0x1c21   :  { %12486 = vmatpush3.xpose.msk.msra.mxu1 %vm1213_vm8, %v7583_v22 }
0x1c22   :  { %12495 = vmatprep.subr.mxu1 %v13651_v12 }
0x1c24   :  { %12488 = vmatmul.mubr.msk.f32.vlgmr.msra.gmra.mrb[76].mxu1 %vm1213_vm8, %v7581_v38 }
0x1c25   :  { %12496 = vmatpush3.xpose.msk.msra.mxu1 %vm1213_vm8, %v7735_v24  ;;  %12497 = vmatprep.mubr.msk.f32.mxu1 %vm13652_vm7, %v13651_v12 }
0x1c26   :  { %12515 = vmatprep.subr.mxu1 %v13651_v12 }
0x1c28   :  { %12498 = vmatmul.mubr.msk.f32.vlgmr.msra.gmra.mrb[78].mxu1 %vm1213_vm8, %v7581_v38 }
0x1c29   :  { %12517 = vmatprep.mubr.msk.f32.mxu1 %vm13652_vm7, %v13651_v12  ;;  %12516 = vmatpush3.msra.mxu1 %v14835_v8 }
0x1c2a   :  { %12520 = vmatprep.subr.mxu1 %v13651_v12 }
0x1c9e   :  { %v7729_v15 = vpop.f32.mrb[52].mxu0 }
0x1c9f   :  { %v7733_v29 = vmul.f32 0.35355338, %v7729_v15  ;;  %v12494_v44 = vpop.f32.mrb[53].mxu0 }
0x1ca1   :  { %v7812_v31 = vsel %vm1213_vm8, %v7733_v29, -inf }
0x1ca2   :  { %7813 = vmax.xlane.f32.xlu1 %v7812_v31 }
0x1cb3   :  { %7916 = vrot.lane.b32.xlu1 %v14678_v62, %s13656_s19 }
0x1cb7   :  { %7992 = vrot.lane.b32.xlu1 %v14692_v42, %s13656_s19 }
0x1cec   :  { %v7503_v52 = vpop.f32.mrb[72].mxu1 }
0x1ced   :  { %v12479_v2 = vpop.f32.mrb[73].mxu1 }
0x1cf0   :  { %v7576_v32 = vpop.f32.mrb[74].mxu1 }
0x1cf1   :  { %v14808_v39 = vadd.f32 %v7576_v32, %v7503_v52  ;;  %v12484_v40 = vpop.f32.mrb[75].mxu1 }
0x1cf7   :  { %v7654_v50 = vpop.f32.mrb[76].mxu1 }
0x1cf8   :  { %v7658_v43 = vmul.f32 0.35355338, %v7654_v50  ;;  %v12489_v41 = vpop.f32.mrb[77].mxu1 }
0x1cfa   :  { %v7809_v4 = vsel %vm1213_vm8, %v7658_v43, -inf }
0x1cfb   :  { %7810 = vmax.xlane.f32.xlu0 %v7809_v4  ;;  %v7804_v46 = vpop.f32.mrb[78].mxu1 }
0x1cfc   :  { %v7808_v37 = vmul.f32 0.35355338, %v7804_v46  ;;  %v12499_v49 = vpop.f32.mrb[79].mxu1 }
0x1cfe   :  { %v7816_v56 = vsel %vm1213_vm8, %v7808_v37, -inf }
0x1cff   :  { %7817 = vmax.xlane.f32.xlu0 %v7816_v56 }
0x1d15   :  { %7840 = vrot.lane.b32.xlu0 %v14641_v1, %s13656_s19 }
0x1d2f   :  { %v7814_v35 = vpop.xlane.xlu1 %7813 }
0x1d33   :  { %v7917_v36 = vpop.permute.xlu1 %7916 }
0x1d37   :  { %v7993_v33 = vpop.permute.xlu1 %7992 }
0x1d88   :  { %v7811_v51 = vpop.xlane.xlu0 %7810 }
0x1d89   :  { %v7815_v54 = vmax.f32 %v7811_v51, %v7814_v35 }
0x1d8c   :  { %v7818_v55 = vpop.xlane.xlu0 %7817 }
0x1d8d   :  { %v7819_v57 = vmax.f32 %v7815_v54, %v7818_v55 }
0x1d8f   :  { %v7820_v60 = vsub.f32 %v7658_v43, %v7819_v57  ;;  %v7823_v63 = vsub.f32 %v7733_v29, %v7819_v57  ;;  %v7826_v0 = vsub.f32 %v7808_v37, %v7819_v57 }
0x1d90   :  { %v7841_v14 = vpop.permute.xlu0 %7840 }
0x1d91   :  { %v7821_v19 = vmul.f32 1.442695, %v7820_v60  ;;  %v7824_v53 = vmul.f32 1.442695, %v7823_v63  ;;  %v7827_v5 = vmul.f32 1.442695, %v7826_v0  ;;  %12501 = vmatpush3.msra.mxu0 %v7841_v14 }
0x1d92   :  { %12505 = vmatprep.subr.mxu0 %v13651_v12 }
0x1d93   :  { %13122 = vpow2.f32 %v7821_v19 }
0x1d94   :  { %13124 = vpow2.f32 %v7824_v53 }
0x1d95   :  { %13126 = vpow2.f32 %v7827_v5 }
0x1d9d   :  { %v13123_v16 = vpop.eup %13122 }
0x1d9e   :  { %v13125_v38 = vpop.eup %13124  ;;  %v7829_v28 = vsel %vm1213_vm8, %v13123_v16, 0.0 }
0x1d9f   :  { %v13127_v6 = vpop.eup %13126  ;;  %12503 = vmatmul.mubr.msk.f32.vlgmr.msra.gmra.mrb[54].mxu0 %vm1213_vm8, %v13125_v38  ;;  %v7832_v59 = vsel %vm1213_vm8, %v13125_v38, 0.0  ;;  %7830 = vadd.xlane.f32.xlu0 %v7829_v28 }
0x1da0   :  { %12506 = vmatpush3.msra.mxu0 %v7917_v36  ;;  %7833 = vadd.xlane.f32.xlu1 %v7832_v59  ;;  %v7836_v7 = vsel %vm1213_vm8, %v13127_v6, 0.0  ;;  %v14901_v36 = vld [vmem:[#allocation30 + $0x18] sm:$0xff] }
0x1da1   :  { %12507 = vmatprep.mubr.msk.f32.mxu0 %vm13652_vm7, %v13651_v12  ;;  %12510 = vmatprep.subr.mxu0 %v13651_v12 }
0x1da3   :  { %7837 = vadd.xlane.f32.xlu0 %v7836_v7 }
0x1da7   :  { %12508 = vmatmul.mubr.msk.f32.vlgmr.msra.gmra.mrb[54].mxu0 %vm1213_vm8, %v13123_v16 }
0x1da8   :  { %12511 = vmatpush3.msra.mxu0 %v7993_v33  ;;  %12512 = vmatprep.mubr.msk.f32.mxu0 %vm13652_vm7, %v13651_v12 }
0x1da9   :  { %12530 = vmatprep.subr.mxu0 %v13651_v12 }
0x1daf   :  { %12513 = vmatmul.mubr.msk.f32.vlgmr.msra.gmra.mrb[54].mxu0 %vm1213_vm8, %v13127_v6 }
0x1db0   :  { %12532 = vmatprep.mubr.msk.f32.mxu0 %vm13652_vm7, %v13651_v12 }
0x1db1   :  { %8145 = vrot.lane.b32.xlu1 %v14637_v26, %s13657_s29 }
0x1db5   :  { %8224 = vrot.lane.b32.xlu1 %v14641_v1, %s13657_s29 }
0x1db9   :  { %8147 = vrot.lane.b32.xlu0 %v14678_v62, %s13657_s29 }
0x1dbd   :  { %8299 = vrot.lane.b32.xlu0 %v14692_v42, %s13657_s29 }
0x1e2c   :  { %v7831_v9 = vpop.xlane.xlu0 %7830 }
0x1e2d   :  { %v7834_v10 = vpop.xlane.xlu1 %7833 }
0x1e2e   :  { %v7835_v3 = vadd.f32 %v7834_v10, %v7831_v9 }
0x1e30   :  { %v7838_v61 = vpop.xlane.xlu0 %7837 }
0x1e31   :  { %v7839_v26 = vadd.f32 %v7838_v61, %v7835_v3  ;;  %v8146_v23 = vpop.permute.xlu1 %8145 }
0x1e33   :  { %13128 = vrcp.f32 %v7839_v26 }
0x1e34   :  { %v8148_v13 = vpop.permute.xlu0 %8147 }
0x1e35   :  { %v8225_v15 = vpop.permute.xlu1 %8224 }
0x1e38   :  { %v8300_v17 = vpop.permute.xlu0 %8299 }
0x1e39   :  { %12531 = vmatpush3.xpose.msk.msra.mxu0 %vm1213_vm8, %v8300_v17 }
0x1e3a   :  { %12550 = vmatprep.subr.mxu0 %v13651_v12 }
0x1e3c   :  { %12533 = vmatmul.mubr.msk.f32.vlgmr.msra.gmra.mrb[56].mxu0 %vm1213_vm8, %v8146_v23 }
0x1e3d   :  { %12552 = vmatprep.mubr.msk.f32.mxu0 %vm13652_vm7, %v13651_v12  ;;  %v13129_v25 = vpop.eup %13128  ;;  %12551 = vmatpush3.msra.mxu0 %v14901_v36 }
0x1e3e   :  { %12555 = vmatprep.subr.mxu0 %v13651_v12 }
0x1e82   :  { %v8064_v18 = vpop.f32.mrb[54].mxu0 }
0x1e83   :  { %v8070_v22 = vmul.f32 %v13129_v25, %v8064_v18  ;;  %v12514_v24 = vpop.f32.mrb[55].mxu0 }
0x1e85   :  { %12518 = vmatmul.mubr.msk.f32.vlgmr.msra.gmra.mrb[80].mxu1 %vm1213_vm8, %v8070_v22 }
0x1e86   :  { %12521 = vmatpush3.xpose.msk.msra.mxu1 %vm1213_vm8, %v8148_v13  ;;  %12522 = vmatprep.mubr.msk.f32.mxu1 %vm13652_vm7, %v13651_v12 }
0x1e87   :  { %12525 = vmatprep.subr.mxu1 %v13651_v12 }
0x1e89   :  { %12523 = vmatmul.mubr.msk.f32.vlgmr.msra.gmra.mrb[82].mxu1 %vm1213_vm8, %v8146_v23 }
0x1e8a   :  { %12526 = vmatpush3.xpose.msk.msra.mxu1 %vm1213_vm8, %v8225_v15  ;;  %12527 = vmatprep.mubr.msk.f32.mxu1 %vm13652_vm7, %v13651_v12 }
0x1e8b   :  { %12535 = vmatprep.subr.mxu1 %v13651_v12 }
0x1e8d   :  { %12528 = vmatmul.mubr.msk.f32.vlgmr.msra.gmra.mrb[84].mxu1 %vm1213_vm8, %v8146_v23 }
0x1e8e   :  { %12537 = vmatprep.mubr.msk.f32.mxu1 %vm13652_vm7, %v13651_v12 }
0x1f0f   :  { %v8369_v29 = vpop.f32.mrb[56].mxu0 }
0x1f10   :  { %v12534_v44 = vpop.f32.mrb[57].mxu0  ;;  %v8373_v37 = vmul.f32 0.35355338, %v8369_v29 }
0x1f12   :  { %v8381_v56 = vsel %vm1213_vm8, %v8373_v37, -inf }
0x1f58   :  { %v8140_v31 = vpop.f32.mrb[80].mxu1 }
0x1f59   :  { %v14860_v52 = vadd.f32 %v8140_v31, %v14808_v39  ;;  %v12519_v2 = vpop.f32.mrb[81].mxu1 }
0x1f5c   :  { %v8219_v32 = vpop.f32.mrb[82].mxu1 }
0x1f5d   :  { %v8223_v40 = vmul.f32 0.35355338, %v8219_v32  ;;  %v12524_v50 = vpop.f32.mrb[83].mxu1 }
0x1f5f   :  { %v8374_v43 = vsel %vm1213_vm8, %v8223_v40, -inf }
0x1f60   :  { %8375 = vmax.xlane.f32.xlu1 %v8374_v43  ;;  %v8294_v41 = vpop.f32.mrb[84].mxu1 }
0x1f61   :  { %v8298_v4 = vmul.f32 0.35355338, %v8294_v41  ;;  %v12529_v46 = vpop.f32.mrb[85].mxu1  ;;  %v14945_v41 = vld [vmem:[%s15222_s11] ss:$0 sm:$0xff] }
0x1f63   :  { %v8377_v49 = vsel %vm1213_vm8, %v8298_v4, -inf }
0x1f64   :  { %8378 = vmax.xlane.f32.xlu0 %v8377_v49 }
0x1f68   :  { %8382 = vmax.xlane.f32.xlu0 %v8381_v56 }
0x1f71   :  { %8481 = vrot.lane.b32.xlu1 %v14678_v62, %s13658_s2 }
0x1f75   :  { %8557 = vrot.lane.b32.xlu1 %v14692_v42, %s13658_s2 }
0x1f7e   :  { %8405 = vrot.lane.b32.xlu0 %v14641_v1, %s13658_s2 }
0x1fed   :  { %v8376_v51 = vpop.xlane.xlu1 %8375 }
0x1ff1   :  { %v8379_v39 = vpop.xlane.xlu0 %8378  ;;  %v8482_v5 = vpop.permute.xlu1 %8481 }
0x1ff2   :  { %v8380_v35 = vmax.f32 %v8376_v51, %v8379_v39 }
0x1ff5   :  { %v8383_v54 = vpop.xlane.xlu0 %8382  ;;  %v8558_v6 = vpop.permute.xlu1 %8557 }
0x1ff6   :  { %v8384_v55 = vmax.f32 %v8380_v35, %v8383_v54 }
0x1ff8   :  { %v8385_v57 = vsub.f32 %v8223_v40, %v8384_v55  ;;  %v8388_v60 = vsub.f32 %v8298_v4, %v8384_v55  ;;  %v8391_v63 = vsub.f32 %v8373_v37, %v8384_v55 }
0x1ff9   :  { %v8406_v0 = vpop.permute.xlu0 %8405 }
0x1ffa   :  { %v8386_v14 = vmul.f32 1.442695, %v8385_v57  ;;  %v8389_v19 = vmul.f32 1.442695, %v8388_v60  ;;  %12536 = vmatpush3.msra.mxu1 %v8406_v0  ;;  %v8392_v53 = vmul.f32 1.442695, %v8391_v63 }
0x1ffb   :  { %12540 = vmatprep.subr.mxu1 %v13651_v12 }
0x1ffc   :  { %13130 = vpow2.f32 %v8386_v14 }
0x1ffd   :  { %13132 = vpow2.f32 %v8389_v19 }
0x1ffe   :  { %13134 = vpow2.f32 %v8392_v53 }
0x2006   :  { %v13131_v62 = vpop.eup %13130 }
0x2007   :  { %v13133_v1 = vpop.eup %13132  ;;  %v8394_v42 = vsel %vm1213_vm8, %v13131_v62, 0.0 }
0x2008   :  { %12538 = vmatmul.mubr.msk.f32.vlgmr.msra.gmra.mrb[86].mxu1 %vm1213_vm8, %v13133_v1  ;;  %v8397_v16 = vsel %vm1213_vm8, %v13133_v1, 0.0  ;;  %8395 = vadd.xlane.f32.xlu1 %v8394_v42  ;;  %v13135_v38 = vpop.eup %13134 }
0x2009   :  { %12541 = vmatpush3.msra.mxu1 %v8482_v5  ;;  %8398 = vadd.xlane.f32.xlu0 %v8397_v16  ;;  %v8401_v28 = vsel %vm1213_vm8, %v13135_v38, 0.0 }
0x200a   :  { %12542 = vmatprep.mubr.msk.f32.mxu1 %vm13652_vm7, %v13651_v12  ;;  %12545 = vmatprep.subr.mxu1 %v13651_v12 }
0x200d   :  { %8402 = vadd.xlane.f32.xlu0 %v8401_v28 }
0x2010   :  { %12543 = vmatmul.mubr.msk.f32.vlgmr.msra.gmra.mrb[86].mxu1 %vm1213_vm8, %v13131_v62 }
0x2011   :  { %12546 = vmatpush3.msra.mxu1 %v8558_v6  ;;  %12547 = vmatprep.mubr.msk.f32.mxu1 %vm13652_vm7, %v13651_v12 }
0x2012   :  { %12565 = vmatprep.subr.mxu1 %v13651_v12 }
0x2018   :  { %12548 = vmatmul.mubr.msk.f32.vlgmr.msra.gmra.mrb[86].mxu1 %vm1213_vm8, %v13135_v38 }
0x2019   :  { %12566 = vmatpush3.xpose.msk.msra.mxu1 %vm1213_vm8, %v14690_v30  ;;  %9205 = vrot.lane.b32.xlu1 %v14617_v58, %s13650_s22 }
0x201a   :  { %12567 = vmatprep.mubr.msk.f32.mxu1 %vm13652_vm7, %v13651_v12  ;;  %12585 = vmatprep.subr.mxu1 %v13651_v12 }
0x201c   :  { %12568 = vmatmul.mubr.msk.f32.vlgmr.msra.gmra.mrb[88].mxu1 %vm1213_vm8, %v14617_v58 }
0x201d   :  { %9284 = vrot.lane.b32.xlu1 %v14620_v34, %s13650_s22  ;;  %12587 = vmatprep.mubr.msk.f32.mxu1 %vm13652_vm7, %v13651_v12 }
0x2021   :  { %9359 = vrot.lane.b32.xlu1 %v14690_v30, %s13650_s22 }
0x2023   :  { %9207 = vrot.lane.b32.xlu0 %v14676_v21, %s13650_s22  ;;  %s15228_s22 = sld [smem:[#allocation70_spill]] }
0x2095   :  { %v8396_v59 = vpop.xlane.xlu1 %8395 }
0x2096   :  { %v8399_v7 = vpop.xlane.xlu0 %8398 }
0x2097   :  { %v8400_v33 = vadd.f32 %v8399_v7, %v8396_v59 }
0x2099   :  { %v9206_v9 = vpop.permute.xlu1 %9205 }
0x209a   :  { %v8403_v10 = vpop.xlane.xlu0 %8402 }
0x209b   :  { %v8404_v3 = vadd.f32 %v8403_v10, %v8400_v33 }
0x209d   :  { %v9285_v26 = vpop.permute.xlu1 %9284  ;;  %13136 = vrcp.f32 %v8404_v3 }
0x209e   :  { %v9208_v61 = vpop.permute.xlu0 %9207 }
0x209f   :  { %12586 = vmatpush3.xpose.msk.msra.mxu1 %vm1213_vm8, %v9208_v61 }
0x20a0   :  { %12590 = vmatprep.subr.mxu1 %v13651_v12 }
0x20a1   :  { %v9360_v13 = vpop.permute.xlu1 %9359 }
0x20a2   :  { %12588 = vmatmul.mubr.msk.f32.vlgmr.msra.gmra.mrb[90].mxu1 %vm1213_vm8, %v9206_v9 }
0x20a3   :  { %12591 = vmatpush3.xpose.msk.msra.mxu1 %vm1213_vm8, %v9285_v26  ;;  %12592 = vmatprep.mubr.msk.f32.mxu1 %vm13652_vm7, %v13651_v12 }
0x20a4   :  { %12595 = vmatprep.subr.mxu1 %v13651_v12 }
0x20a6   :  { %12593 = vmatmul.mubr.msk.f32.vlgmr.msra.gmra.mrb[92].mxu1 %vm1213_vm8, %v9206_v9 }
0x20a7   :  { %12596 = vmatpush3.xpose.msk.msra.mxu1 %vm1213_vm8, %v9360_v13  ;;  %12597 = vmatprep.mubr.msk.f32.mxu1 %vm13652_vm7, %v13651_v12  ;;  %v13137_v17 = vpop.eup %13136 }
0x20a8   :  { %12615 = vmatprep.subr.mxu1 %v13651_v12 }
0x20aa   :  { %12598 = vmatmul.mubr.msk.f32.vlgmr.msra.gmra.mrb[94].mxu1 %vm1213_vm8, %v9206_v9 }
0x20ab   :  { %12616 = vmatpush3.msra.mxu1 %v14774_v45  ;;  %12617 = vmatprep.mubr.msk.f32.mxu1 %vm13652_vm7, %v13651_v12 }
0x20ac   :  { %12620 = vmatprep.subr.mxu1 %v13651_v12 }
0x20eb   :  { %v8629_v23 = vpop.f32.mrb[86].mxu1 }
0x20ec   :  { %v8635_v25 = vmul.f32 %v13137_v17, %v8629_v23  ;;  %v12549_v18 = vpop.f32.mrb[87].mxu1 }
0x20ee   :  { %12553 = vmatmul.mubr.msk.f32.vlgmr.msra.gmra.mrb[58].mxu0 %vm1213_vm8, %v8635_v25 }
0x20ef   :  { %12556 = vmatpush3.xpose.msk.msra.mxu0 %vm1213_vm8, %v14676_v21  ;;  %v8938_v22 = vpop.f32.mrb[88].mxu1  ;;  %12557 = vmatprep.mubr.msk.f32.mxu0 %vm13652_vm7, %v13651_v12 }
0x20f0   :  { %v14927_v45 = vmul.f32 0.35355338, %v8938_v22  ;;  %v12569_v24 = vpop.f32.mrb[89].mxu1  ;;  %12560 = vmatprep.subr.mxu0 %v13651_v12 }
0x20f2   :  { %12558 = vmatmul.mubr.msk.f32.vlgmr.msra.gmra.mrb[60].mxu0 %vm1213_vm8, %v14617_v58  ;;  %v8950_v15 = vsel %vm1213_vm8, %v14927_v45, -inf }
0x20f3   :  { %12561 = vmatpush3.xpose.msk.msra.mxu0 %vm1213_vm8, %v14620_v34  ;;  %8951 = vmax.xlane.f32.xlu0 %v8950_v15 }
0x20f4   :  { %12562 = vmatprep.mubr.msk.f32.mxu0 %vm13652_vm7, %v13651_v12  ;;  %12570 = vmatprep.subr.mxu0 %v13651_v12 }
0x20f6   :  { %12563 = vmatmul.mubr.msk.f32.vlgmr.msra.gmra.mrb[62].mxu0 %vm1213_vm8, %v14617_v58 }
0x20f7   :  { %12572 = vmatprep.mubr.msk.f32.mxu0 %vm13652_vm7, %v13651_v12 }
0x2175   :  { %v9279_v29 = vpop.f32.mrb[90].mxu1 }
0x2176   :  { %v9283_v44 = vmul.f32 0.35355338, %v9279_v29  ;;  %v12589_v31 = vpop.f32.mrb[91].mxu1 }
0x2178   :  { %v9434_v2 = vsel %vm1213_vm8, %v9283_v44, -inf }
0x2179   :  { %9435 = vmax.xlane.f32.xlu0 %v9434_v2  ;;  %v9354_v32 = vpop.f32.mrb[92].mxu1 }
0x217a   :  { %v12594_v40 = vpop.f32.mrb[93].mxu1  ;;  %v9358_v35 = vmul.f32 0.35355338, %v9354_v32 }
0x217d   :  { %v9429_v50 = vpop.f32.mrb[94].mxu1 }
0x217e   :  { %v12599_v43 = vpop.f32.mrb[95].mxu1  ;;  %v9433_v63 = vmul.f32 0.35355338, %v9429_v50 }
0x2180   :  { %v9441_v14 = vsel %vm1213_vm8, %v9433_v63, -inf  ;;  %v8952_v19 = vpop.xlane.xlu0 %8951 }
0x21c1   :  { %v8705_v4 = vpop.f32.mrb[58].mxu0 }
0x21c2   :  { %v8709_v46 = vadd.f32 %v8705_v4, %v14860_v52  ;;  %v12554_v37 = vpop.f32.mrb[59].mxu0  ;;  %v9437_v52 = vsel %vm1213_vm8, %v9358_v35, -inf }
0x21c4   :  { %v8716_v49 = vadd.f32 %v14945_v41, %v8709_v46 }
0x21c5   :  { %v8790_v56 = vpop.f32.mrb[60].mxu0 }
0x21c6   :  { %8717 = vst.msk [vmem:[#allocation2] sm:$0xff] %vm761_vm6, %v8716_v49  ;;  %v8794_v39 = vmul.f32 0.35355338, %v8790_v56  ;;  %v12559_v51 = vpop.f32.mrb[61].mxu0 }
0x21c8   :  { %v8943_v54 = vsel %vm1213_vm8, %v8794_v39, -inf }
0x21c9   :  { %v8864_v55 = vpop.f32.mrb[62].mxu0  ;;  %8944 = vmax.xlane.f32.xlu0 %v8943_v54 }
0x21ca   :  { %v8868_v57 = vmul.f32 0.35355338, %v8864_v55  ;;  %v12564_v60 = vpop.f32.mrb[63].mxu0 }
0x21cc   :  { %v8946_v0 = vsel %vm1213_vm8, %v8868_v57, -inf }
0x21cd   :  { %8947 = vmax.xlane.f32.xlu1 %v8946_v0  ;;  %9438 = vmax.xlane.f32.xlu0 %v9437_v52 }
0x21d1   :  { %9442 = vmax.xlane.f32.xlu1 %v9441_v14 }
0x21e2   :  { %9050 = vrot.lane.b32.xlu1 %v14676_v21, %s13653_s26 }
0x21e3   :  { %8974 = vrot.lane.b32.xlu0 %v14620_v34, %s13653_s26 }
0x21e6   :  { %9126 = vrot.lane.b32.xlu1 %v14690_v30, %s13653_s26 }
0x21e7   :  { %9541 = vrot.lane.b32.xlu0 %v14676_v21, %s13654_s28 }
0x21ea   :  { %9465 = vrot.lane.b32.xlu1 %v14620_v34, %s13654_s28 }
0x21ee   :  { %9617 = vrot.lane.b32.xlu1 %v14690_v30, %s13654_s28 }
0x2206   :  { %v9436_v53 = vpop.xlane.xlu0 %9435 }
0x2256   :  { %v8945_v62 = vpop.xlane.xlu0 %8944 }
0x225a   :  { %v8948_v1 = vpop.xlane.xlu1 %8947  ;;  %v9439_v42 = vpop.xlane.xlu0 %9438 }
0x225b   :  { %v8949_v5 = vmax.f32 %v8945_v62, %v8948_v1  ;;  %v9440_v38 = vmax.f32 %v9436_v53, %v9439_v42 }
0x225d   :  { %v8953_v16 = vmax.f32 %v8949_v5, %v8952_v19 }
0x225e   :  { %v8975_v28 = vpop.permute.xlu0 %8974  ;;  %v9443_v6 = vpop.xlane.xlu1 %9442 }
0x225f   :  { %v8957_v59 = vsub.f32 %v8868_v57, %v8953_v16  ;;  %v9444_v7 = vmax.f32 %v9440_v38, %v9443_v6  ;;  %12571 = vmatpush3.msra.mxu0 %v8975_v28  ;;  %v8954_v26 = vsub.f32 %v8794_v39, %v8953_v16  ;;  %v8960_v25 = vsub.f32 %v14927_v45, %v8953_v16 }
0x2260   :  { %12575 = vmatprep.subr.mxu0 %v13651_v12 }
0x2261   :  { %v8958_v33 = vmul.f32 1.442695, %v8957_v59  ;;  %v9445_v9 = vsub.f32 %v9283_v44, %v9444_v7  ;;  %v9448_v10 = vsub.f32 %v9358_v35, %v9444_v7  ;;  %v9451_v3 = vsub.f32 %v9433_v63, %v9444_v7 }
0x2262   :  { %v8955_v23 = vmul.f32 1.442695, %v8954_v26  ;;  %v9051_v22 = vpop.permute.xlu1 %9050  ;;  %v8961_v15 = vmul.f32 1.442695, %v8960_v25  ;;  %v9542_v37 = vpop.permute.xlu0 %9541 }
0x2263   :  { %v9446_v61 = vmul.f32 1.442695, %v9445_v9  ;;  %13138 = vpow2.f32 %v8958_v33  ;;  %v9449_v13 = vmul.f32 1.442695, %v9448_v10  ;;  %v9452_v17 = vmul.f32 1.442695, %v9451_v3 }
0x2265   :  { %13140 = vpow2.f32 %v9446_v61 }
0x2266   :  { %13142 = vpow2.f32 %v9449_v13  ;;  %v9127_v40 = vpop.permute.xlu1 %9126 }
0x2267   :  { %13144 = vpow2.f32 %v9452_v17 }
0x2268   :  { %13146 = vpow2.f32 %v8955_v23 }
0x2269   :  { %13148 = vpow2.f32 %v8961_v15 }
0x226a   :  { %v9466_v46 = vpop.permute.xlu1 %9465 }
0x226d   :  { %v13139_v18 = vpop.eup %13138 }
0x226e   :  { %12573 = vmatmul.mubr.msk.f32.vlgmr.msra.gmra.mrb[64].mxu0 %vm1213_vm8, %v13139_v18  ;;  %v8966_v43 = vsel %vm1213_vm8, %v13139_v18, 0.0  ;;  %v9618_v49 = vpop.permute.xlu1 %9617 }
0x226f   :  { %v13141_v24 = vpop.eup %13140  ;;  %12576 = vmatpush3.msra.mxu0 %v9051_v22  ;;  %12577 = vmatprep.mubr.msk.f32.mxu0 %vm13652_vm7, %v13651_v12 }
0x2270   :  { %v13143_v29 = vpop.eup %13142  ;;  %v9454_v44 = vsel %vm1213_vm8, %v13141_v24, 0.0  ;;  %12580 = vmatprep.subr.mxu0 %v13651_v12 }
0x2271   :  { %v13145_v31 = vpop.eup %13144  ;;  %v9457_v2 = vsel %vm1213_vm8, %v13143_v29, 0.0  ;;  %9455 = vadd.xlane.f32.xlu0 %v9454_v44 }
0x2272   :  { %9458 = vadd.xlane.f32.xlu1 %v9457_v2  ;;  %v9461_v45 = vsel %vm1213_vm8, %v13145_v31, 0.0  ;;  %v13147_v32 = vpop.eup %13146 }
0x2273   :  { %v8963_v50 = vsel %vm1213_vm8, %v13147_v32, 0.0  ;;  %v13149_v4 = vpop.eup %13148 }
0x2274   :  { %v8970_v56 = vsel %vm1213_vm8, %v13149_v4, 0.0 }
0x2275   :  { %9462 = vadd.xlane.f32.xlu0 %v9461_v45 }
0x2276   :  { %12578 = vmatmul.mubr.msk.f32.vlgmr.msra.gmra.mrb[64].mxu0 %vm1213_vm8, %v13147_v32 }
0x2277   :  { %12581 = vmatpush3.msra.mxu0 %v9127_v40  ;;  %12582 = vmatprep.mubr.msk.f32.mxu0 %vm13652_vm7, %v13651_v12 }
0x2278   :  { %12600 = vmatprep.subr.mxu0 %v13651_v12 }
0x2279   :  { %8964 = vadd.xlane.f32.xlu0 %v8963_v50 }
0x227d   :  { %8967 = vadd.xlane.f32.xlu0 %v8966_v43 }
0x227e   :  { %12583 = vmatmul.mubr.msk.f32.vlgmr.msra.gmra.mrb[64].mxu0 %vm1213_vm8, %v13149_v4 }
0x227f   :  { %12601 = vmatpush3.msra.mxu0 %v9466_v46  ;;  %12602 = vmatprep.mubr.msk.f32.mxu0 %vm13652_vm7, %v13651_v12 }
0x2280   :  { %12605 = vmatprep.subr.mxu0 %v13651_v12 }
0x2282   :  { %12603 = vmatmul.mubr.msk.f32.vlgmr.msra.gmra.mrb[66].mxu0 %vm1213_vm8, %v13143_v29 }
0x2283   :  { %9921 = vrot.lane.b32.xlu1 %v14620_v34, %s13655_s1  ;;  %12606 = vmatpush3.msra.mxu0 %v9542_v37 }
0x2284   :  { %12607 = vmatprep.mubr.msk.f32.mxu0 %vm13652_vm7, %v13651_v12  ;;  %12610 = vmatprep.subr.mxu0 %v13651_v12 }
0x2287   :  { %9842 = vrot.lane.b32.xlu1 %v14617_v58, %s13655_s1 }
0x228a   :  { %12608 = vmatmul.mubr.msk.f32.vlgmr.msra.gmra.mrb[66].mxu0 %vm1213_vm8, %v13141_v24 }
0x228b   :  { %12611 = vmatpush3.msra.mxu0 %v9618_v49  ;;  %12612 = vmatprep.mubr.msk.f32.mxu0 %vm13652_vm7, %v13651_v12 }
0x228c   :  { %12630 = vmatprep.subr.mxu0 %v13651_v12 }
0x2292   :  { %12613 = vmatmul.mubr.msk.f32.vlgmr.msra.gmra.mrb[66].mxu0 %vm1213_vm8, %v13145_v31 }
0x2293   :  { %9844 = vrot.lane.b32.xlu0 %v14676_v21, %s13655_s1  ;;  %12632 = vmatprep.mubr.msk.f32.mxu0 %vm13652_vm7, %v13651_v12 }
0x22ab   :  { %8971 = vadd.xlane.f32.xlu1 %v8970_v56 }
0x22bc   :  { %9996 = vrot.lane.b32.xlu1 %v14690_v30, %s13655_s1 }
0x22fe   :  { %v9456_v54 = vpop.xlane.xlu0 %9455 }
0x22ff   :  { %v9459_v39 = vpop.xlane.xlu1 %9458 }
0x2300   :  { %v9460_v0 = vadd.f32 %v9459_v39, %v9456_v54 }
0x2302   :  { %v9463_v55 = vpop.xlane.xlu0 %9462 }
0x2303   :  { %v9922_v51 = vpop.permute.xlu1 %9921  ;;  %v9464_v14 = vadd.f32 %v9463_v55, %v9460_v0 }
0x2304   :  { %12631 = vmatpush3.xpose.msk.msra.mxu0 %vm1213_vm8, %v9922_v51 }
0x2305   :  { %12640 = vmatprep.subr.mxu0 %v13651_v12  ;;  %13150 = vrcp.f32 %v9464_v14 }
0x2306   :  { %v8965_v57 = vpop.xlane.xlu0 %8964 }
0x2307   :  { %v9843_v35 = vpop.permute.xlu1 %9842 }
0x2308   :  { %12633 = vmatmul.mubr.msk.f32.vlgmr.msra.gmra.mrb[68].mxu0 %vm1213_vm8, %v9843_v35 }
0x2309   :  { %12642 = vmatprep.mubr.msk.f32.mxu0 %vm13652_vm7, %v13651_v12 }
0x230a   :  { %v8968_v52 = vpop.xlane.xlu0 %8967 }
0x230b   :  { %v8969_v53 = vadd.f32 %v8968_v52, %v8965_v57 }
0x230e   :  { %v9845_v6 = vpop.permute.xlu0 %9844 }
0x230f   :  { %v13151_v1 = vpop.eup %13150 }
0x2338   :  { %v8972_v19 = vpop.xlane.xlu1 %8971 }
0x2339   :  { %v8973_v62 = vadd.f32 %v8972_v19, %v8969_v53 }
0x233b   :  { %13152 = vrcp.f32 %v8973_v62 }
0x233c   :  { %v9997_v59 = vpop.permute.xlu1 %9996 }
0x2345   :  { %v13153_v38 = vpop.eup %13152 }
0x2351   :  { %v9198_v60 = vpop.f32.mrb[64].mxu0 }
0x2352   :  { %v12584_v63 = vpop.f32.mrb[65].mxu0  ;;  %v9204_v28 = vmul.f32 %v13153_v38, %v9198_v60 }
0x2365   :  { %v9689_v42 = vpop.f32.mrb[66].mxu0 }
0x2366   :  { %v9695_v5 = vmul.f32 %v13151_v1, %v9689_v42  ;;  %v12614_v16 = vpop.f32.mrb[67].mxu0 }
0x2368   :  { %12618 = vmatmul.mubr.msk.f32.vlgmr.msra.gmra.mrb[96].mxu1 %vm1213_vm8, %v9695_v5 }
0x2369   :  { %12621 = vmatpush3.msra.mxu1 %v14783_v20  ;;  %12622 = vmatprep.mubr.msk.f32.mxu1 %vm13652_vm7, %v13651_v12 }
0x236a   :  { %12625 = vmatprep.subr.mxu1 %v13651_v12 }
0x236c   :  { %12623 = vmatmul.mubr.msk.f32.vlgmr.msra.gmra.mrb[98].mxu1 %vm1213_vm8, %v9204_v28 }
0x236d   :  { %12627 = vmatprep.mubr.msk.f32.mxu1 %vm13652_vm7, %v13651_v12 }
0x2370   :  { %12626 = vmatpush3.xpose.msk.msra.mxu1 %vm1213_vm8, %v9845_v6 }
0x2371   :  { %12635 = vmatprep.subr.mxu1 %v13651_v12 }
0x2373   :  { %12628 = vmatmul.mubr.msk.f32.vlgmr.msra.gmra.mrb[100].mxu1 %vm1213_vm8, %v9843_v35 }
0x2374   :  { %12636 = vmatpush3.xpose.msk.msra.mxu1 %vm1213_vm8, %v9997_v59  ;;  %12637 = vmatprep.mubr.msk.f32.mxu1 %vm13652_vm7, %v13651_v12 }
0x2375   :  { %12655 = vmatprep.subr.mxu1 %v13651_v12 }
0x2377   :  { %12638 = vmatmul.mubr.msk.f32.vlgmr.msra.gmra.mrb[102].mxu1 %vm1213_vm8, %v9843_v35 }
0x2378   :  { %12656 = vmatpush3.msra.mxu1 %v14835_v8  ;;  %12657 = vmatprep.mubr.msk.f32.mxu1 %vm13652_vm7, %v13651_v12 }
0x2379   :  { %12660 = vmatprep.subr.mxu1 %v13651_v12 }
0x23db   :  { %v9991_v20 = vpop.f32.mrb[68].mxu0 }
0x23dc   :  { %v9995_v7 = vmul.f32 0.35355338, %v9991_v20  ;;  %v12634_v33 = vpop.f32.mrb[69].mxu0 }
0x23de   :  { %v10074_v9 = vsel %vm1213_vm8, %v9995_v7, -inf }
0x23df   :  { %10075 = vmax.xlane.f32.xlu1 %v10074_v9 }
0x23f0   :  { %10178 = vrot.lane.b32.xlu1 %v14676_v21, %s13656_s19 }
0x23f4   :  { %10254 = vrot.lane.b32.xlu1 %v14690_v30, %s13656_s19 }
0x243b   :  { %v9765_v10 = vpop.f32.mrb[96].mxu1 }
0x243c   :  { %v12619_v3 = vpop.f32.mrb[97].mxu1 }
0x243f   :  { %v9838_v8 = vpop.f32.mrb[98].mxu1 }
0x2440   :  { %v15035_v61 = vadd.f32 %v9838_v8, %v9765_v10  ;;  %v12624_v26 = vpop.f32.mrb[99].mxu1 }
0x2446   :  { %v9916_v13 = vpop.f32.mrb[100].mxu1 }
0x2447   :  { %v9920_v17 = vmul.f32 0.35355338, %v9916_v13  ;;  %v12629_v23 = vpop.f32.mrb[101].mxu1 }
0x2448   :  { %v6063_v23 = vld [vmem:[#allocation4] sm:$0x1] }
0x2449   :  { %v10071_v25 = vsel %vm1213_vm8, %v9920_v17, -inf }
0x244a   :  { %10072 = vmax.xlane.f32.xlu0 %v10071_v25  ;;  %v10066_v18 = vpop.f32.mrb[102].mxu1  ;;  %v11263_v25 = vsub.f32 0.0, %v6063_v23 }
0x244b   :  { %v10070_v22 = vmul.f32 0.35355338, %v10066_v18  ;;  %v12639_v24 = vpop.f32.mrb[103].mxu1 }
0x244c   :  { %v11264_v18 = vmul.f32 1.442695, %v11263_v25 }
0x244d   :  { %v10078_v15 = vsel %vm1213_vm8, %v10070_v22, -inf }
0x244e   :  { %10079 = vmax.xlane.f32.xlu0 %v10078_v15 }
0x2464   :  { %10102 = vrot.lane.b32.xlu0 %v14620_v34, %s13656_s19 }
0x246c   :  { %v10076_v44 = vpop.xlane.xlu1 %10075 }
0x2470   :  { %v10179_v35 = vpop.permute.xlu1 %10178 }
0x2474   :  { %v10255_v57 = vpop.permute.xlu1 %10254 }
0x24d7   :  { %v10073_v29 = vpop.xlane.xlu0 %10072 }
0x24d8   :  { %v10077_v31 = vmax.f32 %v10073_v29, %v10076_v44 }
0x24db   :  { %v10080_v2 = vpop.xlane.xlu0 %10079 }
0x24dc   :  { %v10081_v45 = vmax.f32 %v10077_v31, %v10080_v2 }
0x24de   :  { %v10082_v32 = vsub.f32 %v9920_v17, %v10081_v45  ;;  %v10085_v40 = vsub.f32 %v9995_v7, %v10081_v45  ;;  %v10088_v50 = vsub.f32 %v10070_v22, %v10081_v45 }
0x24df   :  { %v10103_v43 = vpop.permute.xlu0 %10102 }
0x24e0   :  { %v10083_v4 = vmul.f32 1.442695, %v10082_v32  ;;  %v10086_v46 = vmul.f32 1.442695, %v10085_v40  ;;  %v10089_v37 = vmul.f32 1.442695, %v10088_v50  ;;  %12641 = vmatpush3.msra.mxu0 %v10103_v43 }
0x24e1   :  { %12645 = vmatprep.subr.mxu0 %v13651_v12 }
0x24e2   :  { %13154 = vpow2.f32 %v10083_v4 }
0x24e3   :  { %13156 = vpow2.f32 %v10086_v46 }
0x24e4   :  { %13158 = vpow2.f32 %v10089_v37 }
0x24ec   :  { %v13155_v49 = vpop.eup %13154 }
0x24ed   :  { %v13157_v56 = vpop.eup %13156  ;;  %v10091_v39 = vsel %vm1213_vm8, %v13155_v49, 0.0 }
0x24ee   :  { %v13159_v51 = vpop.eup %13158  ;;  %12643 = vmatmul.mubr.msk.f32.vlgmr.msra.gmra.mrb[70].mxu0 %vm1213_vm8, %v13157_v56  ;;  %v10094_v54 = vsel %vm1213_vm8, %v13157_v56, 0.0  ;;  %10092 = vadd.xlane.f32.xlu0 %v10091_v39  ;;  %v11269_v39 = vlaneseq }
0x24ef   :  { %12646 = vmatpush3.msra.mxu0 %v10179_v35  ;;  %10095 = vadd.xlane.f32.xlu1 %v10094_v54  ;;  %v10098_v55 = vsel %vm1213_vm8, %v13159_v51, 0.0 }
0x24f0   :  { %12647 = vmatprep.mubr.msk.f32.mxu0 %vm13652_vm7, %v13651_v12  ;;  %12650 = vmatprep.subr.mxu0 %v13651_v12  ;;  %v15103_v35 = vshrl.u32 %v11269_v39, 7 }
0x24f2   :  { %10099 = vadd.xlane.f32.xlu0 %v10098_v55 }
0x24f6   :  { %12648 = vmatmul.mubr.msk.f32.vlgmr.msra.gmra.mrb[70].mxu0 %vm1213_vm8, %v13155_v49 }
0x24f7   :  { %12651 = vmatpush3.msra.mxu0 %v10255_v57  ;;  %12652 = vmatprep.mubr.msk.f32.mxu0 %vm13652_vm7, %v13651_v12  ;;  %v11271_v57 = vsub.s32 0, %v15103_v35 }
0x24f8   :  { %12670 = vmatprep.subr.mxu0 %v13651_v12 }
0x24fe   :  { %12653 = vmatmul.mubr.msk.f32.vlgmr.msra.gmra.mrb[70].mxu0 %vm1213_vm8, %v13159_v51 }
0x24ff   :  { %12672 = vmatprep.mubr.msk.f32.mxu0 %vm13652_vm7, %v13651_v12 }
0x2500   :  { %10407 = vrot.lane.b32.xlu1 %v14617_v58, %s13657_s29 }
0x2504   :  { %10486 = vrot.lane.b32.xlu1 %v14620_v34, %s13657_s29 }
0x2508   :  { %10409 = vrot.lane.b32.xlu0 %v14676_v21, %s13657_s29 }
0x250c   :  { %10561 = vrot.lane.b32.xlu0 %v14690_v30, %s13657_s29 }
0x257b   :  { %v10093_v60 = vpop.xlane.xlu0 %10092 }
0x257c   :  { %v10096_v63 = vpop.xlane.xlu1 %10095 }
0x257d   :  { %v10097_v0 = vadd.f32 %v10096_v63, %v10093_v60 }
0x257f   :  { %v10100_v52 = vpop.xlane.xlu0 %10099 }
0x2580   :  { %v10101_v14 = vadd.f32 %v10100_v52, %v10097_v0  ;;  %v10408_v58 = vpop.permute.xlu1 %10407 }
0x2582   :  { %13160 = vrcp.f32 %v10101_v14 }
0x2583   :  { %v10410_v19 = vpop.permute.xlu0 %10409  ;;  %13162 = vpow2.f32 %v11264_v18 }
0x2584   :  { %v10487_v16 = vpop.permute.xlu1 %10486 }
0x2587   :  { %v10562_v53 = vpop.permute.xlu0 %10561 }
0x2588   :  { %12671 = vmatpush3.xpose.msk.msra.mxu0 %vm1213_vm8, %v10562_v53 }
0x2589   :  { %12690 = vmatprep.subr.mxu0 %v13651_v12 }
0x258b   :  { %12673 = vmatmul.mubr.msk.f32.vlgmr.msra.gmra.mrb[72].mxu0 %vm1213_vm8, %v10408_v58 }
0x258c   :  { %12691 = vmatpush3.msra.mxu0 %v14901_v36  ;;  %12692 = vmatprep.mubr.msk.f32.mxu0 %vm13652_vm7, %v13651_v12  ;;  %v13161_v62 = vpop.eup %13160 }
0x258d   :  { %v13163_v40 = vpop.eup %13162 }
0x258e   :  { %v11266_v50 = vadd.f32 1.0, %v13163_v40  ;;  %v6058_v40 = vld [vmem:[%s15226_s16] sm:$0xff] }
0x25d1   :  { %v10326_v1 = vpop.f32.mrb[70].mxu0 }
0x25d2   :  { %v10332_v42 = vmul.f32 %v13161_v62, %v10326_v1  ;;  %v12654_v5 = vpop.f32.mrb[71].mxu0 }
0x25d4   :  { %12658 = vmatmul.mubr.msk.f32.vlgmr.msra.gmra.mrb[104].mxu1 %vm1213_vm8, %v10332_v42 }
0x25d5   :  { %12661 = vmatpush3.xpose.msk.msra.mxu1 %vm1213_vm8, %v10410_v19  ;;  %12662 = vmatprep.mubr.msk.f32.mxu1 %vm13652_vm7, %v13651_v12 }
0x25d6   :  { %12665 = vmatprep.subr.mxu1 %v13651_v12 }
0x25d8   :  { %12663 = vmatmul.mubr.msk.f32.vlgmr.msra.gmra.mrb[106].mxu1 %vm1213_vm8, %v10408_v58 }
0x25d9   :  { %12666 = vmatpush3.xpose.msk.msra.mxu1 %vm1213_vm8, %v10487_v16  ;;  %12667 = vmatprep.mubr.msk.f32.mxu1 %vm13652_vm7, %v13651_v12  ;;  %v6048_v16 = vld [vmem:[%s15223_s18] sm:$0xff] }
0x25da   :  { %12675 = vmatprep.subr.mxu1 %v13651_v12 }
0x25dc   :  { %12668 = vmatmul.mubr.msk.f32.vlgmr.msra.gmra.mrb[108].mxu1 %vm1213_vm8, %v10408_v58 }
0x25dd   :  { %12677 = vmatprep.mubr.msk.f32.mxu1 %vm13652_vm7, %v13651_v12 }
0x265e   :  { %v10631_v36 = vpop.f32.mrb[72].mxu0 }
0x265f   :  { %v12674_v38 = vpop.f32.mrb[73].mxu0  ;;  %v10635_v26 = vmul.f32 0.35355338, %v10631_v36  ;;  %v6049_v36 = vld [vmem:[%s15223_s18 + $0x8] sm:$0xff] }
0x2660   :  { %v6050_v38 = vld [vmem:[%s15223_s18 + $0x10] sm:$0xff] }
0x2661   :  { %v10643_v17 = vsel %vm1213_vm8, %v10635_v26, -inf }
0x26a7   :  { %v10402_v28 = vpop.f32.mrb[104].mxu1 }
0x26a8   :  { %v15084_v6 = vadd.f32 %v10402_v28, %v15035_v61  ;;  %v12659_v59 = vpop.f32.mrb[105].mxu1  ;;  %v13659_v61 = vmov 0   ;;  %v12833_v28 = vpack.c.bf16 %v6049_v36, %v6048_v16  ;;  %v11295_v16 = vld [vmem:[%s13893_s9 + $0x10] sm:$0xff]  ;;  %v11296_v36 = vld [vmem:[%s13893_s9 + $0x18] sm:$0xff] }
0x26a9   :  { %13009 = vset.pattern.permute.xlu1 %v13659_v61  ;;  %13008 = vset.pattern.permute.xlu0 %v13659_v61  ;;  %v6051_v59 = vld [vmem:[%s15223_s18 + $0x18] sm:$0xff] }
0x26aa   :  { %12834 = vmatprep.subr.bf16.mxu0 %v12833_v28  ;;  %v6056_v61 = vld [vmem:[%s15224_s17 + $0x18] sm:$0xff] }
0x26ab   :  { %v10481_v20 = vpop.f32.mrb[106].mxu1 }
0x26ac   :  { %v10485_v7 = vmul.f32 0.35355338, %v10481_v20  ;;  %v12664_v33 = vpop.f32.mrb[107].mxu1  ;;  %v12837_v20 = vpack.c.bf16 %v6051_v59, %v6050_v38  ;;  %v12861_v38 = vpack.c.bf16 %v11296_v36, %v11295_v16 }
0x26ae   :  { %v10636_v9 = vsel %vm1213_vm8, %v10485_v7, -inf }
0x26af   :  { %10637 = vmax.xlane.f32.xlu1 %v10636_v9  ;;  %v10556_v10 = vpop.f32.mrb[108].mxu1 }
0x26b0   :  { %v10560_v3 = vmul.f32 0.35355338, %v10556_v10  ;;  %v12669_v8 = vpop.f32.mrb[109].mxu1 }
0x26b1   :  { %v6053_v8 = vld [vmem:[%s15224_s17] sm:$0xff] }
0x26b2   :  { %v10639_v13 = vsel %vm1213_vm8, %v10560_v3, -inf }
0x26b3   :  { %10640 = vmax.xlane.f32.xlu0 %v10639_v13 }
0x26b7   :  { %10644 = vmax.xlane.f32.xlu0 %v10643_v17  ;;  %v6055_v17 = vld [vmem:[%s15224_s17 + $0x10] sm:$0xff] }
0x26b8   :  { %v12845_v23 = vpack.c.bf16 %v6056_v61, %v6055_v17  ;;  %v11670_v61 = vld [vmem:[%s13898_s12] ss:$0 sm:$0xff] }
0x26c0   :  { %10743 = vrot.lane.b32.xlu1 %v14676_v21, %s13658_s2 }
0x26c4   :  { %10819 = vrot.lane.b32.xlu1 %v14690_v30, %s13658_s2 }
0x26cd   :  { %10667 = vrot.lane.b32.xlu0 %v14620_v34, %s13658_s2 }
0x273c   :  { %v10638_v24 = vpop.xlane.xlu1 %10637 }
0x2740   :  { %v10641_v22 = vpop.xlane.xlu0 %10640  ;;  %v10744_v37 = vpop.permute.xlu1 %10743 }
0x2741   :  { %v10642_v15 = vmax.f32 %v10638_v24, %v10641_v22 }
0x2744   :  { %v10645_v29 = vpop.xlane.xlu0 %10644  ;;  %v10820_v55 = vpop.permute.xlu1 %10819 }
0x2745   :  { %v10646_v44 = vmax.f32 %v10642_v15, %v10645_v29 }
0x2747   :  { %v10647_v31 = vsub.f32 %v10485_v7, %v10646_v44  ;;  %v10650_v21 = vsub.f32 %v10560_v3, %v10646_v44  ;;  %v10653_v2 = vsub.f32 %v10635_v26, %v10646_v44  ;;  %v6054_v26 = vld [vmem:[%s15224_s17 + $0x8] sm:$0xff] }
0x2748   :  { %v10668_v45 = vpop.permute.xlu0 %10667  ;;  %v12841_v13 = vpack.c.bf16 %v6054_v26, %v6053_v8 }
0x2749   :  { %v10648_v30 = vmul.f32 1.442695, %v10647_v31  ;;  %v10651_v32 = vmul.f32 1.442695, %v10650_v21  ;;  %12676 = vmatpush3.msra.mxu1 %v10668_v45  ;;  %v10654_v34 = vmul.f32 1.442695, %v10653_v2 }
0x274a   :  { %12680 = vmatprep.subr.mxu1 %v13651_v12 }
0x274b   :  { %13164 = vpow2.f32 %v10648_v30 }
0x274c   :  { %13166 = vpow2.f32 %v10651_v32 }
0x274d   :  { %13168 = vpow2.f32 %v10654_v34 }
0x274e   :  { %13170 = vrcp.f32 %v11266_v50  ;;  %v6059_v50 = vld [vmem:[%s15226_s16 + $0x8] sm:$0xff] }
0x2755   :  { %v13165_v43 = vpop.eup %13164 }
0x2756   :  { %v13167_v4 = vpop.eup %13166  ;;  %v10656_v46 = vsel %vm1213_vm8, %v13165_v43, 0.0 }
0x2757   :  { %12678 = vmatmul.mubr.msk.f32.vlgmr.msra.gmra.mrb[110].mxu1 %vm1213_vm8, %v13167_v4  ;;  %v10659_v49 = vsel %vm1213_vm8, %v13167_v4, 0.0  ;;  %10657 = vadd.xlane.f32.xlu1 %v10656_v46  ;;  %v13169_v56 = vpop.eup %13168  ;;  %v6060_v4 = vld [vmem:[%s15226_s16 + $0x10] sm:$0xff]  ;;  %v6061_v46 = vld [vmem:[%s15226_s16 + $0x18] sm:$0xff] }
0x2758   :  { %12681 = vmatpush3.msra.mxu1 %v10744_v37  ;;  %10660 = vadd.xlane.f32.xlu0 %v10659_v49  ;;  %v10663_v51 = vsel %vm1213_vm8, %v13169_v56, 0.0  ;;  %v15105_v54 = vpop.eup %13170  ;;  %v12853_v37 = vpack.c.bf16 %v6061_v46, %v6060_v4 }
0x2759   :  { %12682 = vmatprep.mubr.msk.f32.mxu1 %vm13652_vm7, %v13651_v12  ;;  %12685 = vmatprep.subr.mxu1 %v13651_v12  ;;  %v11279_v60 = vsub.f32 1.0, %v15105_v54  ;;  %v11272_v49 = vrot.slane %v15105_v54, %v11271_v57 }
0x275b   :  { %v11284_v63 = vrot.slane %v11279_v60, %v11271_v57 }
0x275c   :  { %10664 = vadd.xlane.f32.xlu0 %v10663_v51 }
0x275f   :  { %12683 = vmatmul.mubr.msk.f32.vlgmr.msra.gmra.mrb[110].mxu1 %vm1213_vm8, %v13165_v43  ;;  %v12849_v43 = vpack.c.bf16 %v6059_v50, %v6058_v40 }
0x2760   :  { %12686 = vmatpush3.msra.mxu1 %v10820_v55  ;;  %12687 = vmatprep.mubr.msk.f32.mxu1 %vm13652_vm7, %v13651_v12  ;;  %v10974_v12 = vld [vmem:[#allocation2] sm:$0xff] }
0x2761   :  { %v10976_v5 = vadd.f32 %v10974_v12, %v14650_v11  ;;  %12842 = vmatprep.subr.bf16.mxu1 %v12841_v13 }
0x2767   :  { %12688 = vmatmul.mubr.msk.f32.vlgmr.msra.gmra.mrb[110].mxu1 %vm1213_vm8, %v13169_v56  ;;  %v11664_v56 = vld [vmem:[%s15227_s14] ss:$0 sm:$0xff] }
0x2768   :  { %11286 = vperm.xlu1 %13009, %v11284_v63   ;;  %12844 = vmatpush3.bf16.msra.mxu1 %v12841_v13 }
0x2769   :  { %12846 = vmatprep.subr.bf16.mxu1 %v12845_v23 }
0x276c   :  { %12848 = vmatpush3.bf16.msra.mxu1 %v12845_v23 }
0x2772   :  { %11274 = vperm.xlu0 %13008, %v11272_v49  }
0x27e4   :  { %v10658_v52 = vpop.xlane.xlu1 %10657 }
0x27e5   :  { %v10661_v0 = vpop.xlane.xlu0 %10660 }
0x27e6   :  { %v10662_v19 = vadd.f32 %v10661_v0, %v10658_v52 }
0x27e9   :  { %v10665_v14 = vpop.xlane.xlu0 %10664 }
0x27ea   :  { %v10666_v53 = vadd.f32 %v10665_v14, %v10662_v19 }
0x27ec   :  { %13172 = vrcp.f32 %v10666_v53 }
0x27f6   :  { %v13173_v58 = vpop.eup %13172 }
0x283a   :  { %v10891_v62 = vpop.f32.mrb[110].mxu1 }
0x283b   :  { %v10897_v1 = vmul.f32 %v13173_v58, %v10891_v62  ;;  %v12689_v42 = vpop.f32.mrb[111].mxu1 }
0x283c   :  { %v11294_v42 = vld [vmem:[%s13893_s9 + $0x8] sm:$0xff] }
0x283d   :  { %12693 = vmatmul.mubr.msk.f32.vlgmr.msra.gmra.mrb[74].mxu0 %vm1213_vm8, %v10897_v1  ;;  %v11293_v1 = vld [vmem:[%s13893_s9] sm:$0xff] }
0x283e   :  { %12703 = vmatprep.mubr.msk.f32.mxu0 %vm761_vm6, %v10976_v5  ;;  %12836 = vmatpush3.bf16.msra.mxu0 %v12833_v28  ;;  %v12857_v5 = vpack.c.bf16 %v11294_v42, %v11293_v1  ;;  %v11667_v28 = vld [vmem:[%s15228_s22] ss:$0 sm:$0xff] }
0x283f   :  { %12838 = vmatprep.subr.bf16.mxu0 %v12837_v20 }
0x2840   :  { %12858 = vmatprep.subr.bf16.mxu1 %v12857_v5 }
0x2842   :  { %12840 = vmatpush3.bf16.msra.mxu0 %v12837_v20  ;;  %v11275_v20 = vpop.permute.xlu0 %11274 }
0x2843   :  { %12850 = vmatprep.subr.bf16.mxu0 %v12849_v43 }
0x2910   :  { %v10967_v7 = vpop.f32.mrb[74].mxu0 }
0x2911   :  { %v10971_v11 = vadd.f32 %v10967_v7, %v15084_v6  ;;  %v12694_v33 = vpop.f32.mrb[75].mxu0  ;;  %v11661_v6 = vld [vmem:[%s15225_s15] ss:$0 sm:$0xff]  ;;  %v11287_v7 = vpop.permute.xlu1 %11286 }
0x2912   :  { %v11290_v26 = vmul.f32 %v11287_v7, %v14625_v47 }
0x2913   :  { %v10972_v9 = vadd.f32 %v14945_v41, %v10971_v11 }
0x2915   :  { %10973 = vst.msk [vmem:[#allocation2 + $0x8] sm:$0xff] %vm761_vm6, %v10972_v9 }
0x291c   :  { %v10975_v10 = vld [vmem:[#allocation2 + $0x8] sm:$0xff] }
0x291d   :  { %v10977_v3 = vadd.f32 %v10975_v10, %v14653_v27 }
0x291f   :  { %12704 = vmatmul.mubr.msk.f32.vlgmr.msra.gmra.mrb[76].mxu0 %vm761_vm6, %v10977_v3  ;;  %v11289_v3 = vmul.f32 %v11287_v7, %v14627_v48 }
0x2920   :  { %12852 = vmatpush3.bf16.msra.mxu0 %v12849_v43 }
0x2921   :  { %12854 = vmatprep.subr.bf16.mxu0 %v12853_v37 }
0x2924   :  { %12856 = vmatpush3.bf16.msra.mxu0 %v12853_v37 }
0x29f2   :  { %v12705_v25 = vpop.f32.mrb[76].mxu0 }
0x29f3   :  { %v11062_v41 = vadd.f32 %v12705_v25, %v11661_v6  ;;  %v11056_v18 = vpop.f32.mrb[77].mxu0 }
0x29f4   :  { %v11057_v22 = vadd.f32 %v11661_v6, %v11056_v18 }
0x29f5   :  { %v11066_v24 = vsub.f32 0.0, %v11062_v41 }
0x29f6   :  { %v11065_v15 = vsub.f32 0.0, %v11057_v22 }
0x29f7   :  { %v11069_v27 = vmul.f32 1.442695, %v11066_v24 }
0x29f8   :  { %v11067_v29 = vmul.f32 1.442695, %v11065_v15 }
0x29f9   :  { %13174 = vpow2.f32 %v11069_v27 }
0x29fa   :  { %13176 = vpow2.f32 %v11067_v29 }
0x2a03   :  { %v13175_v44 = vpop.eup %13174 }
0x2a04   :  { %v13177_v31 = vpop.eup %13176  ;;  %v11072_v21 = vadd.f32 1.0, %v13175_v44 }
0x2a05   :  { %v11071_v2 = vadd.f32 1.0, %v13177_v31 }
0x2a06   :  { %13178 = vrcp.f32 %v11072_v21 }
0x2a07   :  { %13180 = vrcp.f32 %v11071_v2 }
0x2a10   :  { %v13179_v45 = vpop.eup %13178 }
0x2a11   :  { %v13181_v30 = vpop.eup %13180  ;;  %v11076_v34 = vmul.f32 %v13179_v45, %v11062_v41 }
0x2a12   :  { %v11075_v32 = vmul.f32 %v13181_v30, %v11057_v22 }
0x2a14   :  { %12714 = vmatprep.mubr.msk.f32.mxu1 %vm761_vm6, %v11075_v32 }
0x2a15   :  { %12715 = vmatmul.mubr.msk.f32.vlgmr.msra.gmra.mrb[112].mxu1 %vm761_vm6, %v11076_v34 }
0x2a16   :  { %12860 = vmatpush3.bf16.msra.mxu1 %v12857_v5 }
0x2a17   :  { %12862 = vmatprep.subr.bf16.mxu1 %v12861_v38 }
0x2a1a   :  { %12864 = vmatpush3.bf16.msra.mxu1 %v12861_v38 }
0x2ae8   :  { %v12716_v39 = vpop.f32.mrb[112].mxu1 }
0x2ae9   :  { %v11161_v51 = vadd.f32 %v12716_v39, %v11664_v56  ;;  %v11155_v55 = vpop.f32.mrb[113].mxu1 }
0x2aea   :  { %v11156_v60 = vadd.f32 %v11664_v56, %v11155_v55 }
0x2aeb   :  { %v11165_v63 = vsub.f32 0.0, %v11161_v51 }
0x2aec   :  { %v11164_v0 = vsub.f32 0.0, %v11156_v60 }
0x2aed   :  { %v11168_v52 = vmul.f32 1.442695, %v11165_v63 }
0x2aee   :  { %v11166_v14 = vmul.f32 1.442695, %v11164_v0 }
0x2aef   :  { %13182 = vpow2.f32 %v11168_v52 }
0x2af0   :  { %13184 = vpow2.f32 %v11166_v14 }
0x2af9   :  { %v13183_v19 = vpop.eup %13182 }
0x2afa   :  { %v13185_v53 = vpop.eup %13184  ;;  %v11171_v35 = vadd.f32 1.0, %v13183_v19 }
0x2afb   :  { %v11170_v54 = vadd.f32 1.0, %v13185_v53 }
0x2afc   :  { %13186 = vrcp.f32 %v11171_v35 }
0x2afd   :  { %13188 = vrcp.f32 %v11170_v54 }
0x2b06   :  { %v13187_v57 = vpop.eup %13186 }
0x2b07   :  { %v13189_v12 = vpop.eup %13188  ;;  %v11175_v62 = vmul.f32 %v13187_v57, %v11161_v51 }
0x2b08   :  { %v11174_v58 = vmul.f32 %v13189_v12, %v11156_v60 }
0x2b0a   :  { %12725 = vmatprep.mubr.msk.f32.mxu0 %vm761_vm6, %v11174_v58 }
0x2b0b   :  { %12726 = vmatmul.mubr.msk.f32.vlgmr.msra.gmra.mrb[78].mxu0 %vm761_vm6, %v11175_v62 }
0x2bde   :  { %v12727_v59 = vpop.f32.mrb[78].mxu0 }
0x2bdf   :  { %v11260_v11 = vadd.f32 %v12727_v59, %v11667_v28  ;;  %v11254_v33 = vpop.f32.mrb[79].mxu0 }
0x2be0   :  { %v11255_v9 = vadd.f32 %v11667_v28, %v11254_v33 }
0x2be1   :  { %v11278_v10 = vmul.f32 %v11275_v20, %v11260_v11 }
0x2be2   :  { %v11277_v8 = vmul.f32 %v11275_v20, %v11255_v9 }
0x2be3   :  { %v11292_v17 = vadd.f32 %v11290_v26, %v11278_v10 }
0x2be4   :  { %v11291_v13 = vadd.f32 %v11289_v3, %v11277_v8 }
0x2be6   :  { %12736 = vmatprep.mubr.msk.f32.mxu1 %vm761_vm6, %v11291_v13 }
0x2be7   :  { %12737 = vmatmul.mubr.msk.f32.vlgmr.msra.gmra.mrb[114].mxu1 %vm761_vm6, %v11292_v17 }
0x2cba   :  { %v12738_v23 = vpop.f32.mrb[114].mxu1 }
0x2cbb   :  { %v11382_v6 = vadd.f32 %v12738_v23, %v11670_v61  ;;  %v11376_v25 = vpop.f32.mrb[115].mxu1 }
0x2cbc   :  { %v11377_v41 = vadd.f32 %v11670_v61, %v11376_v25 }
0x2cbd   :  { %11387 = vst.msk [vmem:[%s13903_s21 + $0x8] sm:$0xff] %vm11385_vm9, %v11382_v6 }
0x2cbe   :  { %11386 = vst.msk [vmem:[%s13903_s21] sm:$0xff] %vm11385_vm9, %v11377_v41 }
0x2cbf   :  { %11392 = vsyncpa [#allocation6], 1 }
0x2cc0   :  { %11393 = vsyncpa [#allocation8], 1 }
0x2cc1   :  { %11394 = vsyncpa [#allocation11], 1 }
0x2cc2   :  { %11395 = vsyncpa [#allocation14], 1 }
0x2cc3   :  { %11396 = vsyncpa [#allocation17], 1 }
0x2cc4   :  { %11397 = vsyncpa [#allocation20], 1 }
0x2cc5   :  { %11398 = vsyncpa [#allocation23], 1 }
0x2cc6   :  { %11399 = vsyncpa [#allocation26], 1 }
0x2cc7   :  { %11400 = vsyncpa [#allocation29], 1 }

</bundles_post_ra>
